<compile_context>
chip_gen: v5e
topology: v5e:2x2
jax: 0.10.0
libtpu: 0.0.40
codegen_flags: <defaults>
</compile_context>

<pallas_src>
import math
import functools
import numpy as np

import jax
import jax.numpy as jnp
from jax import lax
from jax.experimental import pallas as pl
from jax.experimental.pallas import tpu as pltpu


# ------------------------------------------------------------------ kernel

def _win_attn_kernel(*refs, num_heads, seq_len, has_mask):
    """One grid step = `tb` windows (M = tb * N token rows, lane-dense C)."""
    if has_mask:
        (x_ref, wqkv_ref, bqkv_ref, hsum_ref, qscale_ref, bias_ref, mask_ref,
         wproj_ref, bproj_ref, o_ref, acc_ref) = refs
    else:
        (x_ref, wqkv_ref, bqkv_ref, hsum_ref, qscale_ref, bias_ref,
         wproj_ref, bproj_ref, o_ref, acc_ref) = refs
        mask_ref = None

    M, C = x_ref.shape
    N = seq_len
    tb = M // N
    nh = num_heads
    hd = C // nh

    # ---- fused qkv projection (bf16 operands -> MXU, f32 accumulation) ----
    xb = x_ref[...].astype(jnp.bfloat16)
    qkv = jnp.dot(xb, wqkv_ref[...], preferred_element_type=jnp.float32)
    qkv = qkv + bqkv_ref[...]                       # (M, 3C) f32; k-bias is 0
    q = qkv[:, :C]
    k = qkv[:, C:2 * C]
    v = qkv[:, 2 * C:]

    # ---- head-batched cosine normalization; logit scale folded into q ----
    # hsum is the (C, C) block-diagonal matrix of ones: one MXU matmul gives
    # each head's ||.||^2 replicated across that head's lanes, so the whole
    # normalization (and the scale) runs at full lane width, outside the
    # per-head loop.
    ssq = jnp.dot(q * q, hsum_ref[...], preferred_element_type=jnp.float32)
    ssk = jnp.dot(k * k, hsum_ref[...], preferred_element_type=jnp.float32)
    # F.normalize(eps=1e-12)  ==  x * rsqrt(max(||x||^2, 1e-24))
    qn = (q * (qscale_ref[...] * lax.rsqrt(jnp.maximum(ssq, 1e-24)))
          ).astype(jnp.bfloat16)
    kn = (k * lax.rsqrt(jnp.maximum(ssk, 1e-24))).astype(jnp.bfloat16)
    vb = v.astype(jnp.bfloat16)

    mask = mask_ref[...] if has_mask else None      # (tb, N, N) bf16

    acc_ref[...] = jnp.zeros_like(acc_ref)
    for h in range(nh):                             # static unroll, nh small
        lo = h * hd
        qh = qn[:, lo:lo + hd].reshape(tb, N, hd)
        kh = kn[:, lo:lo + hd].reshape(tb, N, hd)
        vh = vb[:, lo:lo + hd].reshape(tb, N, hd)

        s = jnp.einsum('bnd,bmd->bnm', qh, kh,
                       preferred_element_type=jnp.float32)      # (tb, N, N)
        s = s + bias_ref[h][None, :, :]
        if has_mask:
            s = s + mask
        s = s - jnp.max(s, axis=-1, keepdims=True)
        e = jnp.exp(s)
        l = jnp.sum(e, axis=-1, keepdims=True)
        ctx = jnp.einsum('bnm,bmd->bnd', e.astype(jnp.bfloat16), vh,
                         preferred_element_type=jnp.float32)
        ctx = ctx * pl.reciprocal(l, approx=True)   # softmax denom on EUP
        # fold this head's context straight into the output projection:
        # no lane-axis concat, single f32 accumulator in VMEM scratch.
        acc_ref[...] += jnp.dot(ctx.reshape(M, hd).astype(jnp.bfloat16),
                                wproj_ref[h],
                                preferred_element_type=jnp.float32)

    o_ref[...] = (acc_ref[...] + bproj_ref[...]).astype(o_ref.dtype)


# -------------------------------------------------------------- pallas wrap

def _pick_tb(B_, nW, N, C, has_mask):
    """Largest windows-per-step tile that (a) never mixes mask slices,
    (b) keeps the pipelined x/out/mask buffers inside a VMEM budget and
    (c) yields a single grid step or an even number of steps (even split for
    v7x's two TensorCores; one big step on single-TC v5e/v6e)."""
    budget = 24 * 1024 * 1024

    def buffers_bytes(t):
        b = 2 * 2 * (t * N * C * 4)                 # x + out tiles, 2x buffered
        if has_mask:
            b += 2 * (t * N * N * 2)                # bf16 mask tile, 2x buffered
        return b

    cands = [t for t in range(B_, 0, -1)
             if B_ % t == 0
             and (not has_mask or nW % t == 0)
             and ((t * N) % 8 == 0 or t == B_)]
    for require_even in (True, False):
        for t in cands:
            steps = B_ // t
            if require_even and not (steps == 1 or steps % 2 == 0):
                continue
            if buffers_bytes(t) <= budget:
                return t
    return cands[-1] if cands else 1


def _vmem_limit(tb, N, C, nh, has_mask):
    f32, bf16 = 4, 2
    b = 2 * 2 * (tb * N * C * f32)                  # x + out tiles
    if has_mask:
        b += 2 * (tb * N * N * bf16)                # mask tile
    b += C * 3 * C * bf16 + 3 * C * f32             # qkv weight + bias
    b += C * C * f32 + C * f32                      # head-sum ones + q scale
    b += nh * N * N * bf16                          # relative position bias
    b += C * C * bf16 + C * f32                     # proj weight + bias
    b += tb * N * C * f32                           # f32 accumulator scratch
    limit = int(1.5 * b) + 8 * 1024 * 1024          # headroom for temporaries
    return max(16 * 1024 * 1024, min(limit, 64 * 1024 * 1024))


def _inv_spec(shape, single_buffer):
    zero = (lambda i: (0, 0)) if len(shape) == 2 else (lambda i: (0, 0, 0))
    if single_buffer:
        # grid-invariant operand: one VMEM copy is enough (halves its footprint)
        return pl.BlockSpec(shape, zero, pipeline_mode=pl.Buffered(1))
    return pl.BlockSpec(shape, zero)


def window_attention_3d(x, p, mask=None):
    """x: (num_windows*B, N, C); mask: (num_windows, N, N) of 0/-100 or None.

    Rows of x must be ordered batch-major with the window index fastest
    (row = b * nW + w), i.e. the torch window_partition order; the mask
    index_map relies on this.
    """
    B_, N, C = x.shape
    nh = p['num_heads']
    assert C % nh == 0
    hd = C // nh

    has_mask = mask is not None
    nW = mask.shape[0] if has_mask else 1
    if has_mask:
        assert B_ % nW == 0

    tb = _pick_tb(B_, nW, N, C, has_mask)
    steps = B_ // tb
    nwb = nW // tb if has_mask else 1

    # ---- tiny host-side parameter massaging (cache per layer in a real model)
    f32 = jnp.float32
    qkv_bias = jnp.concatenate(
        [p['q_bias'], jnp.zeros((C,), f32), p['v_bias']]).reshape(1, 3 * C)
    scale = jnp.exp(jnp.minimum(p['logit_scale'].reshape(nh),
                                math.log(1.0 / 0.01))).astype(f32)
    qscale = jnp.repeat(scale, hd).reshape(1, C)          # folded into q-hat
    head_sum = jnp.asarray(np.kron(np.eye(nh), np.ones((hd, hd))), f32)
    wqkv = p['qkv_w'].astype(jnp.bfloat16)
    wproj = p['proj_w'].reshape(nh, hd, C).astype(jnp.bfloat16)
    bproj = p['proj_b'].reshape(1, C).astype(f32)
    rel_bias = p['rel_bias'].astype(jnp.bfloat16)

    # lane-dense 2-D I/O (minor dim = C); reshape back at the end.
    x2d = x.reshape(B_ * N, C)

    def build(single_buffer):
        in_specs = [
            pl.BlockSpec((tb * N, C), lambda i: (i, 0)),           # x (pipelined)
            _inv_spec((C, 3 * C), single_buffer),                  # qkv weight
            _inv_spec((1, 3 * C), single_buffer),                  # qkv bias
            _inv_spec((C, C), single_buffer),                      # head-sum ones
            _inv_spec((1, C), single_buffer),                      # q scale
            _inv_spec((nh, N, N), single_buffer),                  # rel-pos bias
        ]
        args = [x2d, wqkv, qkv_bias, head_sum, qscale, rel_bias]
        if has_mask:
            in_specs.append(pl.BlockSpec((tb, N, N),
                                         lambda i: (i % nwb, 0, 0)))
            args.append(mask.astype(jnp.bfloat16))
        in_specs += [_inv_spec((nh, hd, C), single_buffer),        # proj weight
                     _inv_spec((1, C), single_buffer)]             # proj bias
        args += [wproj, bproj]

        call = pl.pallas_call(
            functools.partial(_win_attn_kernel, num_heads=nh, seq_len=N,
                              has_mask=has_mask),
            out_shape=jax.ShapeDtypeStruct((B_ * N, C), x.dtype),
            grid=(steps,),
            in_specs=in_specs,
            out_specs=pl.BlockSpec((tb * N, C), lambda i: (i, 0)),
            scratch_shapes=[pltpu.VMEM((tb * N, C), jnp.float32)],
            compiler_params=pltpu.CompilerParams(
                dimension_semantics=("parallel",),
                vmem_limit_bytes=_vmem_limit(tb, N, C, nh, has_mask)),
        )
        return call(*args)

    try:
        out2d = build(single_buffer=True)
    except Exception:
        # pipeline_mode / pl.Buffered(1) unavailable on this jax version:
        # fall back to default (double-buffered) invariant operands.
        out2d = build(single_buffer=False)
    return out2d.reshape(B_, N, C)


# ------------------------------------------ host-side (input independent) glue

def relative_position_bias(window_size, num_heads, cpb_w1, cpb_b1, cpb_w2,
                           pretrained_window_size=(0, 0, 0)):
    wd, wh, ww = window_size
    rcd = np.arange(-(wd - 1), wd, dtype=np.float32)
    rch = np.arange(-(wh - 1), wh, dtype=np.float32)
    rcw = np.arange(-(ww - 1), ww, dtype=np.float32)
    table = np.stack(np.meshgrid(rcd, rch, rcw, indexing='ij'))
    table = table.transpose(1, 2, 3, 0)[None].copy()
    eps = 1e-6
    if pretrained_window_size[0] > 0:
        denom = [pretrained_window_size[i] - (1 - eps) for i in range(3)]
    else:
        denom = [window_size[i] - (1 - eps) for i in range(3)]
    for i in range(3):
        table[..., i] /= denom[i]
    table *= 8.0
    table = np.sign(table) * np.log2(np.abs(table) + 1.0) / np.log2(8)

    coords = np.stack(np.meshgrid(np.arange(wd), np.arange(wh), np.arange(ww),
                                  indexing='ij'))
    cf = coords.reshape(3, -1)
    rel = (cf[:, :, None] - cf[:, None, :]).transpose(1, 2, 0).copy()
    rel[..., 0] += wd - 1
    rel[..., 1] += wh - 1
    rel[..., 2] += ww - 1
    rel[..., 0] *= (2 * wh - 1) * (2 * ww - 1)
    rel[..., 1] *= (2 * ww - 1)
    idx = rel.sum(-1)                                     # (A, A)

    feat = jnp.asarray(table.reshape(-1, 3))              # cpb_mlp: tiny, plain JAX
    hid = jax.nn.relu(feat @ cpb_w1 + cpb_b1)
    tbl = hid @ cpb_w2                                    # (num_entries, nh)
    A = wd * wh * ww
    bias = tbl[idx.reshape(-1)].reshape(A, A, num_heads)
    bias = jnp.transpose(bias, (2, 0, 1))                 # (nh, A, A)
    return 16.0 * jax.nn.sigmoid(bias)


def build_shift_attn_mask(input_resolution, window_size, shift_size):
    """Standard shifted-window 0/-100 mask of shape (num_windows, N, N)."""
    D, H, W = input_resolution
    ws, ss = window_size, shift_size
    img = np.zeros((1, D, H, W, 1), dtype=np.float32)
    cnt = 0
    for d in ((0, -ws[0]), (-ws[0], -ss[0]), (-ss[0], None)):
        for h in ((0, -ws[1]), (-ws[1], -ss[1]), (-ss[1], None)):
            for w in ((0, -ws[2]), (-ws[2], -ss[2]), (-ss[2], None)):
                img[:, d[0]:d[1], h[0]:h[1], w[0]:w[1], :] = cnt
                cnt += 1
    x = img.reshape(1, D // ws[0], ws[0], H // ws[1], ws[1], W // ws[2], ws[2], 1)
    x = x.transpose(0, 1, 3, 5, 2, 4, 6, 7)
    mw = x.reshape(-1, ws[0] * ws[1] * ws[2])
    am = mw[:, None, :] - mw[:, :, None]
    am = np.where(am != 0, -100.0, 0.0).astype(np.float32)
    return jnp.asarray(am)


# --------------------------------------------------- pure-JAX f32 reference

def _reference(x, p, rel_bias_f32, mask):
    B_, N, C = x.shape
    nh = p['num_heads']
    hd = C // nh
    qkv_b = jnp.concatenate([p['q_bias'], jnp.zeros((C,), x.dtype), p['v_bias']])
    qkv = x @ p['qkv_w'] + qkv_b
    qkv = qkv.reshape(B_, N, 3, nh, hd).transpose(2, 0, 3, 1, 4)
    q, k, v = qkv[0], qkv[1], qkv[2]                     # (B_, nh, N, hd)
    qn = q / jnp.maximum(jnp.linalg.norm(q, axis=-1, keepdims=True), 1e-12)
    kn = k / jnp.maximum(jnp.linalg.norm(k, axis=-1, keepdims=True), 1e-12)
    attn = jnp.einsum('bhnd,bhmd->bhnm', qn, kn)
    scale = jnp.exp(jnp.minimum(p['logit_scale'].reshape(nh, 1, 1),
                                math.log(1.0 / 0.01)))
    attn = attn * scale[None]
    attn = attn + rel_bias_f32[None]
    if mask is not None:
        nW = mask.shape[0]
        attn = attn.reshape(B_ // nW, nW, nh, N, N) + mask[None, :, None]
        attn = attn.reshape(B_, nh, N, N)
    attn = jax.nn.softmax(attn, axis=-1)
    out = jnp.einsum('bhnm,bhmd->bhnd', attn, v)
    out = out.transpose(0, 2, 1, 3).reshape(B_, N, C)
    return out @ p['proj_w'] + p['proj_b']


# ------------------------------------------------------------------- main

if __name__ == "__main__":
    key = jax.random.PRNGKey(0)
    dim, num_heads = 128, 4                       # lane-dense C, head_dim = 32
    window_size = (1, 4, 4)
    input_resolution = (2, 8, 8)
    shift_size = (0, 2, 2)
    B = 2
    N = window_size[0] * window_size[1] * window_size[2]          # 16
    nW = ((input_resolution[0] // window_size[0])
          * (input_resolution[1] // window_size[1])
          * (input_resolution[2] // window_size[2]))               # 8
    B_ = B * nW                                                    # 16

    ks = jax.random.split(key, 10)

    def nrm(k, shape, scale=0.05):
        return scale * jax.random.normal(k, shape, dtype=jnp.float32)

    params = dict(
        num_heads=num_heads,
        qkv_w=nrm(ks[0], (dim, 3 * dim)),
        q_bias=nrm(ks[1], (dim,)),
        v_bias=nrm(ks[2], (dim,)),
        proj_w=nrm(ks[3], (dim, dim)),
        proj_b=nrm(ks[4], (dim,)),
        logit_scale=jnp.log(10.0 * jnp.ones((num_heads, 1, 1), jnp.float32)),
    )
    cpb_w1 = nrm(ks[5], (3, 512))
    cpb_b1 = nrm(ks[6], (512,))
    cpb_w2 = nrm(ks[7], (512, num_heads))
    params['rel_bias'] = relative_position_bias(window_size, num_heads,
                                                cpb_w1, cpb_b1, cpb_w2)

    x = jax.random.normal(ks[8], (B_, N, dim), dtype=jnp.float32)
    mask = build_shift_attn_mask(input_resolution, window_size, shift_size)

    # TODO(synk): attn_drop / proj_drop are p=0.0 (inference) -> identity.
    out_masked = window_attention_3d(x, params, mask)
    out_plain = window_attention_3d(x, params, None)
    out_masked, out_plain = jax.block_until_ready((out_masked, out_plain))

    assert out_masked.shape == (B_, N, dim), out_masked.shape
    assert out_plain.shape == (B_, N, dim), out_plain.shape

    ref_masked = _reference(x, params, params['rel_bias'], mask)
    ref_plain = _reference(x, params, params['rel_bias'], None)
    # bf16 MXU operands + approx reciprocal are deliberate trade-offs; check
    # against the exact f32 reference with a correspondingly loose tolerance.
    np.testing.assert_allclose(np.asarray(out_masked), np.asarray(ref_masked),
                               rtol=5e-2, atol=2e-2)
    np.testing.assert_allclose(np.asarray(out_plain), np.asarray(ref_plain),
                               rtol=5e-2, atol=2e-2)
    print("KERNEL_OK")
</pallas_src>

<mosaic_0001>
module attributes {stable_mosaic.version = 11 : i64} {
  func.func @_win_attn_kernel(%arg0: i32, %arg1: memref<128x128xf32, #tpu.memory_space<vmem>>, %arg2: memref<128x384xbf16, #tpu.memory_space<vmem>>, %arg3: memref<1x384xf32, #tpu.memory_space<vmem>>, %arg4: memref<128x128xf32, #tpu.memory_space<vmem>>, %arg5: memref<1x128xf32, #tpu.memory_space<vmem>>, %arg6: memref<4x16x16xbf16, #tpu.memory_space<vmem>>, %arg7: memref<8x16x16xbf16, #tpu.memory_space<vmem>>, %arg8: memref<4x32x128xbf16, #tpu.memory_space<vmem>>, %arg9: memref<1x128xf32, #tpu.memory_space<vmem>>, %arg10: memref<128x128xf32, #tpu.memory_space<vmem>>, %arg11: memref<128x128xf32, #tpu.memory_space<vmem>>) attributes {dimension_semantics = [#tpu.dimension_semantics<parallel>], iteration_bounds = array<i64: 2>, scalar_prefetch = 0 : i64, scratch_operands = 1 : i64, tpu.core_type = #tpu.core_type<tc>, window_params = [{transform_indices = @transform_0, window_bounds = array<i64: 128, 128>}, {pipeline_mode = #tpu.pipeline_mode<synchronous>, transform_indices = @transform_1, window_bounds = array<i64: 128, 384>}, {pipeline_mode = #tpu.pipeline_mode<synchronous>, transform_indices = @transform_2, window_bounds = array<i64: 1, 384>}, {pipeline_mode = #tpu.pipeline_mode<synchronous>, transform_indices = @transform_3, window_bounds = array<i64: 128, 128>}, {pipeline_mode = #tpu.pipeline_mode<synchronous>, transform_indices = @transform_4, window_bounds = array<i64: 1, 128>}, {pipeline_mode = #tpu.pipeline_mode<synchronous>, transform_indices = @transform_5, window_bounds = array<i64: 4, 16, 16>}, {transform_indices = @transform_6, window_bounds = array<i64: 8, 16, 16>}, {pipeline_mode = #tpu.pipeline_mode<synchronous>, transform_indices = @transform_7, window_bounds = array<i64: 4, 32, 128>}, {pipeline_mode = #tpu.pipeline_mode<synchronous>, transform_indices = @transform_8, window_bounds = array<i64: 1, 128>}, {transform_indices = @transform_9, window_bounds = array<i64: 128, 128>}]} {
    %c0 = arith.constant 0 : index
    %c0_0 = arith.constant 0 : index
    %0 = vector.load %arg1[%c0, %c0_0] : memref<128x128xf32, #tpu.memory_space<vmem>>, vector<128x128xf32>
    %1 = arith.truncf %0 : vector<128x128xf32> to vector<128x128xbf16>
    %c0_1 = arith.constant 0 : index
    %c0_2 = arith.constant 0 : index
    %2 = vector.load %arg2[%c0_1, %c0_2] : memref<128x384xbf16, #tpu.memory_space<vmem>>, vector<128x384xbf16>
    %cst = arith.constant dense<0.000000e+00> : vector<128x384xf32>
    %3 = tpu.matmul %1, %2, %cst {dimension_numbers = #tpu.dot_dimension_numbers<[1], [0], [0], [1], [0, 0, 1, 1], [], []>} : vector<128x128xbf16>, vector<128x384xbf16>, vector<128x384xf32> -> vector<128x384xf32>
    %c0_3 = arith.constant 0 : index
    %c0_4 = arith.constant 0 : index
    %4 = vector.load %arg3[%c0_3, %c0_4] : memref<1x384xf32, #tpu.memory_space<vmem>>, vector<1x384xf32>
    %5 = vector.broadcast %4 : vector<1x384xf32> to vector<128x384xf32>
    %6 = arith.addf %3, %5 : vector<128x384xf32>
    %7 = vector.extract_strided_slice %6 {offsets = [0, 0], sizes = [128, 128], strides = [1, 1]} : vector<128x384xf32> to vector<128x128xf32>
    %8 = vector.extract_strided_slice %6 {offsets = [0, 128], sizes = [128, 128], strides = [1, 1]} : vector<128x384xf32> to vector<128x128xf32>
    %9 = vector.extract_strided_slice %6 {offsets = [0, 256], sizes = [128, 128], strides = [1, 1]} : vector<128x384xf32> to vector<128x128xf32>
    %10 = arith.mulf %7, %7 : vector<128x128xf32>
    %c0_5 = arith.constant 0 : index
    %c0_6 = arith.constant 0 : index
    %11 = vector.load %arg4[%c0_5, %c0_6] : memref<128x128xf32, #tpu.memory_space<vmem>>, vector<128x128xf32>
    %cst_7 = arith.constant dense<0.000000e+00> : vector<128x128xf32>
    %12 = tpu.matmul %10, %11, %cst_7 {dimension_numbers = #tpu.dot_dimension_numbers<[1], [0], [0], [1], [0, 0, 1, 1], [], []>} : vector<128x128xf32>, vector<128x128xf32>, vector<128x128xf32> -> vector<128x128xf32>
    %13 = arith.mulf %8, %8 : vector<128x128xf32>
    %c0_8 = arith.constant 0 : index
    %c0_9 = arith.constant 0 : index
    %14 = vector.load %arg4[%c0_8, %c0_9] : memref<128x128xf32, #tpu.memory_space<vmem>>, vector<128x128xf32>
    %cst_10 = arith.constant dense<0.000000e+00> : vector<128x128xf32>
    %15 = tpu.matmul %13, %14, %cst_10 {dimension_numbers = #tpu.dot_dimension_numbers<[1], [0], [0], [1], [0, 0, 1, 1], [], []>} : vector<128x128xf32>, vector<128x128xf32>, vector<128x128xf32> -> vector<128x128xf32>
    %c0_11 = arith.constant 0 : index
    %c0_12 = arith.constant 0 : index
    %16 = vector.load %arg5[%c0_11, %c0_12] : memref<1x128xf32, #tpu.memory_space<vmem>>, vector<1x128xf32>
    %cst_13 = arith.constant 1.000000e-24 : f32
    %17 = vector.broadcast %cst_13 : f32 to vector<128x128xf32>
    %18 = arith.maximumf %12, %17 : vector<128x128xf32>
    %19 = math.rsqrt %18 : vector<128x128xf32>
    %20 = vector.broadcast %16 : vector<1x128xf32> to vector<128x128xf32>
    %21 = arith.mulf %20, %19 : vector<128x128xf32>
    %22 = arith.mulf %7, %21 : vector<128x128xf32>
    %23 = arith.truncf %22 : vector<128x128xf32> to vector<128x128xbf16>
    %cst_14 = arith.constant 1.000000e-24 : f32
    %24 = vector.broadcast %cst_14 : f32 to vector<128x128xf32>
    %25 = arith.maximumf %15, %24 : vector<128x128xf32>
    %26 = math.rsqrt %25 : vector<128x128xf32>
    %27 = arith.mulf %8, %26 : vector<128x128xf32>
    %28 = arith.truncf %27 : vector<128x128xf32> to vector<128x128xbf16>
    %29 = arith.truncf %9 : vector<128x128xf32> to vector<128x128xbf16>
    %c0_15 = arith.constant 0 : index
    %c0_16 = arith.constant 0 : index
    %c0_17 = arith.constant 0 : index
    %30 = vector.load %arg7[%c0_15, %c0_16, %c0_17] : memref<8x16x16xbf16, #tpu.memory_space<vmem>>, vector<8x16x16xbf16>
    %cst_18 = arith.constant 0.000000e+00 : f32
    %31 = vector.broadcast %cst_18 : f32 to vector<128x128xf32>
    %c0_19 = arith.constant 0 : index
    %c0_20 = arith.constant 0 : index
    %32 = vector.load %arg11[%c0_19, %c0_20] : memref<128x128xf32, #tpu.memory_space<vmem>>, vector<128x128xf32>
    tpu.vector_store %arg11[%c0_19, %c0_20], %31 {strides = array<i32>} : memref<128x128xf32, #tpu.memory_space<vmem>>, vector<128x128xf32>,
    %33 = vector.extract_strided_slice %23 {offsets = [0, 0], sizes = [128, 32], strides = [1, 1]} : vector<128x128xbf16> to vector<128x32xbf16>
    %34 = vector.shape_cast %33 : vector<128x32xbf16> to vector<8x16x32xbf16>
    %35 = vector.extract_strided_slice %28 {offsets = [0, 0], sizes = [128, 32], strides = [1, 1]} : vector<128x128xbf16> to vector<128x32xbf16>
    %36 = vector.shape_cast %35 : vector<128x32xbf16> to vector<8x16x32xbf16>
    %37 = vector.extract_strided_slice %29 {offsets = [0, 0], sizes = [128, 32], strides = [1, 1]} : vector<128x128xbf16> to vector<128x32xbf16>
    %38 = vector.shape_cast %37 : vector<128x32xbf16> to vector<8x16x32xbf16>
    "tpu.trace_start"() <{level = 10 : i32, message = "bnd,bmd->bnm"}> : () -> ()
    %cst_21 = arith.constant dense<0.000000e+00> : vector<8x16x16xf32>
    %39 = tpu.matmul %34, %36, %cst_21 {dimension_numbers = #tpu.dot_dimension_numbers<[2], [2], [1], [1], [0, 0, 0, 1, 1, 1], [0], [0]>} : vector<8x16x32xbf16>, vector<8x16x32xbf16>, vector<8x16x16xf32> -> vector<8x16x16xf32>
    "tpu.trace_stop"() : () -> ()
    %c0_22 = arith.constant 0 : index
    %c0_23 = arith.constant 0 : index
    %c0_24 = arith.constant 0 : index
    %40 = vector.load %arg6[%c0_22, %c0_23, %c0_24] : memref<4x16x16xbf16, #tpu.memory_space<vmem>>, vector<1x16x16xbf16>
    %41 = vector.shape_cast %40 : vector<1x16x16xbf16> to vector<16x16xbf16>
    %42 = vector.shape_cast %41 : vector<16x16xbf16> to vector<1x16x16xbf16>
    %43 = arith.extf %42 : vector<1x16x16xbf16> to vector<1x16x16xf32>
    %44 = vector.broadcast %43 : vector<1x16x16xf32> to vector<8x16x16xf32>
    %45 = arith.addf %39, %44 : vector<8x16x16xf32>
    %46 = arith.extf %30 : vector<8x16x16xbf16> to vector<8x16x16xf32>
    %47 = arith.addf %45, %46 : vector<8x16x16xf32>
    %cst_25 = arith.constant dense<0xFF800000> : vector<8x16xf32>
    %48 = vector.multi_reduction <maximumf>, %47, %cst_25 [2] : vector<8x16x16xf32> to vector<8x16xf32>
    %49 = vector.shape_cast %48 : vector<8x16xf32> to vector<8x16x1xf32>
    %50 = vector.broadcast %49 : vector<8x16x1xf32> to vector<8x16x16xf32>
    %51 = arith.subf %47, %50 : vector<8x16x16xf32>
    %52 = math.exp %51 : vector<8x16x16xf32>
    %cst_26 = arith.constant dense<0.000000e+00> : vector<8x16xf32>
    %53 = vector.multi_reduction <add>, %52, %cst_26 [2] : vector<8x16x16xf32> to vector<8x16xf32>
    %54 = vector.shape_cast %53 : vector<8x16xf32> to vector<8x16x1xf32>
    %55 = arith.truncf %52 : vector<8x16x16xf32> to vector<8x16x16xbf16>
    "tpu.trace_start"() <{level = 10 : i32, message = "bnm,bmd->bnd"}> : () -> ()
    %cst_27 = arith.constant dense<0.000000e+00> : vector<8x16x32xf32>
    %56 = tpu.matmul %55, %38, %cst_27 {dimension_numbers = #tpu.dot_dimension_numbers<[2], [1], [1], [2], [0, 0, 0, 1, 1, 2], [0], [0]>} : vector<8x16x16xbf16>, vector<8x16x32xbf16>, vector<8x16x32xf32> -> vector<8x16x32xf32>
    "tpu.trace_stop"() : () -> ()
    %57 = tpu.reciprocal %54 {approx = true} : vector<8x16x1xf32> -> vector<8x16x1xf32>
    %58 = vector.broadcast %57 : vector<8x16x1xf32> to vector<8x16x32xf32>
    %59 = arith.mulf %56, %58 : vector<8x16x32xf32>
    %c0_28 = arith.constant 0 : index
    %c0_29 = arith.constant 0 : index
    %60 = vector.load %arg11[%c0_28, %c0_29] : memref<128x128xf32, #tpu.memory_space<vmem>>, vector<128x128xf32>
    %61 = vector.shape_cast %59 : vector<8x16x32xf32> to vector<128x32xf32>
    %62 = arith.truncf %61 : vector<128x32xf32> to vector<128x32xbf16>
    %c0_30 = arith.constant 0 : index
    %c0_31 = arith.constant 0 : index
    %c0_32 = arith.constant 0 : index
    %63 = vector.load %arg8[%c0_30, %c0_31, %c0_32] : memref<4x32x128xbf16, #tpu.memory_space<vmem>>, vector<1x32x128xbf16>
    %64 = vector.shape_cast %63 : vector<1x32x128xbf16> to vector<32x128xbf16>
    %cst_33 = arith.constant dense<0.000000e+00> : vector<128x128xf32>
    %65 = tpu.matmul %62, %64, %cst_33 {dimension_numbers = #tpu.dot_dimension_numbers<[1], [0], [0], [1], [0, 0, 1, 1], [], []>} : vector<128x32xbf16>, vector<32x128xbf16>, vector<128x128xf32> -> vector<128x128xf32>
    %66 = arith.addf %60, %65 : vector<128x128xf32>
    %c0_34 = arith.constant 0 : index
    %c0_35 = arith.constant 0 : index
    %67 = vector.load %arg11[%c0_34, %c0_35] : memref<128x128xf32, #tpu.memory_space<vmem>>, vector<128x128xf32>
    tpu.vector_store %arg11[%c0_34, %c0_35], %66 {strides = array<i32>} : memref<128x128xf32, #tpu.memory_space<vmem>>, vector<128x128xf32>,
    %68 = vector.extract_strided_slice %23 {offsets = [0, 32], sizes = [128, 32], strides = [1, 1]} : vector<128x128xbf16> to vector<128x32xbf16>
    %69 = vector.shape_cast %68 : vector<128x32xbf16> to vector<8x16x32xbf16>
    %70 = vector.extract_strided_slice %28 {offsets = [0, 32], sizes = [128, 32], strides = [1, 1]} : vector<128x128xbf16> to vector<128x32xbf16>
    %71 = vector.shape_cast %70 : vector<128x32xbf16> to vector<8x16x32xbf16>
    %72 = vector.extract_strided_slice %29 {offsets = [0, 32], sizes = [128, 32], strides = [1, 1]} : vector<128x128xbf16> to vector<128x32xbf16>
    %73 = vector.shape_cast %72 : vector<128x32xbf16> to vector<8x16x32xbf16>
    "tpu.trace_start"() <{level = 10 : i32, message = "bnd,bmd->bnm"}> : () -> ()
    %cst_36 = arith.constant dense<0.000000e+00> : vector<8x16x16xf32>
    %74 = tpu.matmul %69, %71, %cst_36 {dimension_numbers = #tpu.dot_dimension_numbers<[2], [2], [1], [1], [0, 0, 0, 1, 1, 1], [0], [0]>} : vector<8x16x32xbf16>, vector<8x16x32xbf16>, vector<8x16x16xf32> -> vector<8x16x16xf32>
    "tpu.trace_stop"() : () -> ()
    %c1 = arith.constant 1 : index
    %c0_37 = arith.constant 0 : index
    %c0_38 = arith.constant 0 : index
    %75 = vector.load %arg6[%c1, %c0_37, %c0_38] : memref<4x16x16xbf16, #tpu.memory_space<vmem>>, vector<1x16x16xbf16>
    %76 = vector.shape_cast %75 : vector<1x16x16xbf16> to vector<16x16xbf16>
    %77 = vector.shape_cast %76 : vector<16x16xbf16> to vector<1x16x16xbf16>
    %78 = arith.extf %77 : vector<1x16x16xbf16> to vector<1x16x16xf32>
    %79 = vector.broadcast %78 : vector<1x16x16xf32> to vector<8x16x16xf32>
    %80 = arith.addf %74, %79 : vector<8x16x16xf32>
    %81 = arith.extf %30 : vector<8x16x16xbf16> to vector<8x16x16xf32>
    %82 = arith.addf %80, %81 : vector<8x16x16xf32>
    %cst_39 = arith.constant dense<0xFF800000> : vector<8x16xf32>
    %83 = vector.multi_reduction <maximumf>, %82, %cst_39 [2] : vector<8x16x16xf32> to vector<8x16xf32>
    %84 = vector.shape_cast %83 : vector<8x16xf32> to vector<8x16x1xf32>
    %85 = vector.broadcast %84 : vector<8x16x1xf32> to vector<8x16x16xf32>
    %86 = arith.subf %82, %85 : vector<8x16x16xf32>
    %87 = math.exp %86 : vector<8x16x16xf32>
    %cst_40 = arith.constant dense<0.000000e+00> : vector<8x16xf32>
    %88 = vector.multi_reduction <add>, %87, %cst_40 [2] : vector<8x16x16xf32> to vector<8x16xf32>
    %89 = vector.shape_cast %88 : vector<8x16xf32> to vector<8x16x1xf32>
    %90 = arith.truncf %87 : vector<8x16x16xf32> to vector<8x16x16xbf16>
    "tpu.trace_start"() <{level = 10 : i32, message = "bnm,bmd->bnd"}> : () -> ()
    %cst_41 = arith.constant dense<0.000000e+00> : vector<8x16x32xf32>
    %91 = tpu.matmul %90, %73, %cst_41 {dimension_numbers = #tpu.dot_dimension_numbers<[2], [1], [1], [2], [0, 0, 0, 1, 1, 2], [0], [0]>} : vector<8x16x16xbf16>, vector<8x16x32xbf16>, vector<8x16x32xf32> -> vector<8x16x32xf32>
    "tpu.trace_stop"() : () -> ()
    %92 = tpu.reciprocal %89 {approx = true} : vector<8x16x1xf32> -> vector<8x16x1xf32>
    %93 = vector.broadcast %92 : vector<8x16x1xf32> to vector<8x16x32xf32>
    %94 = arith.mulf %91, %93 : vector<8x16x32xf32>
    %c0_42 = arith.constant 0 : index
    %c0_43 = arith.constant 0 : index
    %95 = vector.load %arg11[%c0_42, %c0_43] : memref<128x128xf32, #tpu.memory_space<vmem>>, vector<128x128xf32>
    %96 = vector.shape_cast %94 : vector<8x16x32xf32> to vector<128x32xf32>
    %97 = arith.truncf %96 : vector<128x32xf32> to vector<128x32xbf16>
    %c1_44 = arith.constant 1 : index
    %c0_45 = arith.constant 0 : index
    %c0_46 = arith.constant 0 : index
    %98 = vector.load %arg8[%c1_44, %c0_45, %c0_46] : memref<4x32x128xbf16, #tpu.memory_space<vmem>>, vector<1x32x128xbf16>
    %99 = vector.shape_cast %98 : vector<1x32x128xbf16> to vector<32x128xbf16>
    %cst_47 = arith.constant dense<0.000000e+00> : vector<128x128xf32>
    %100 = tpu.matmul %97, %99, %cst_47 {dimension_numbers = #tpu.dot_dimension_numbers<[1], [0], [0], [1], [0, 0, 1, 1], [], []>} : vector<128x32xbf16>, vector<32x128xbf16>, vector<128x128xf32> -> vector<128x128xf32>
    %101 = arith.addf %95, %100 : vector<128x128xf32>
    %c0_48 = arith.constant 0 : index
    %c0_49 = arith.constant 0 : index
    %102 = vector.load %arg11[%c0_48, %c0_49] : memref<128x128xf32, #tpu.memory_space<vmem>>, vector<128x128xf32>
    tpu.vector_store %arg11[%c0_48, %c0_49], %101 {strides = array<i32>} : memref<128x128xf32, #tpu.memory_space<vmem>>, vector<128x128xf32>,
    %103 = vector.extract_strided_slice %23 {offsets = [0, 64], sizes = [128, 32], strides = [1, 1]} : vector<128x128xbf16> to vector<128x32xbf16>
    %104 = vector.shape_cast %103 : vector<128x32xbf16> to vector<8x16x32xbf16>
    %105 = vector.extract_strided_slice %28 {offsets = [0, 64], sizes = [128, 32], strides = [1, 1]} : vector<128x128xbf16> to vector<128x32xbf16>
    %106 = vector.shape_cast %105 : vector<128x32xbf16> to vector<8x16x32xbf16>
    %107 = vector.extract_strided_slice %29 {offsets = [0, 64], sizes = [128, 32], strides = [1, 1]} : vector<128x128xbf16> to vector<128x32xbf16>
    %108 = vector.shape_cast %107 : vector<128x32xbf16> to vector<8x16x32xbf16>
    "tpu.trace_start"() <{level = 10 : i32, message = "bnd,bmd->bnm"}> : () -> ()
    %cst_50 = arith.constant dense<0.000000e+00> : vector<8x16x16xf32>
    %109 = tpu.matmul %104, %106, %cst_50 {dimension_numbers = #tpu.dot_dimension_numbers<[2], [2], [1], [1], [0, 0, 0, 1, 1, 1], [0], [0]>} : vector<8x16x32xbf16>, vector<8x16x32xbf16>, vector<8x16x16xf32> -> vector<8x16x16xf32>
    "tpu.trace_stop"() : () -> ()
    %c2 = arith.constant 2 : index
    %c0_51 = arith.constant 0 : index
    %c0_52 = arith.constant 0 : index
    %110 = vector.load %arg6[%c2, %c0_51, %c0_52] : memref<4x16x16xbf16, #tpu.memory_space<vmem>>, vector<1x16x16xbf16>
    %111 = vector.shape_cast %110 : vector<1x16x16xbf16> to vector<16x16xbf16>
    %112 = vector.shape_cast %111 : vector<16x16xbf16> to vector<1x16x16xbf16>
    %113 = arith.extf %112 : vector<1x16x16xbf16> to vector<1x16x16xf32>
    %114 = vector.broadcast %113 : vector<1x16x16xf32> to vector<8x16x16xf32>
    %115 = arith.addf %109, %114 : vector<8x16x16xf32>
    %116 = arith.extf %30 : vector<8x16x16xbf16> to vector<8x16x16xf32>
    %117 = arith.addf %115, %116 : vector<8x16x16xf32>
    %cst_53 = arith.constant dense<0xFF800000> : vector<8x16xf32>
    %118 = vector.multi_reduction <maximumf>, %117, %cst_53 [2] : vector<8x16x16xf32> to vector<8x16xf32>
    %119 = vector.shape_cast %118 : vector<8x16xf32> to vector<8x16x1xf32>
    %120 = vector.broadcast %119 : vector<8x16x1xf32> to vector<8x16x16xf32>
    %121 = arith.subf %117, %120 : vector<8x16x16xf32>
    %122 = math.exp %121 : vector<8x16x16xf32>
    %cst_54 = arith.constant dense<0.000000e+00> : vector<8x16xf32>
    %123 = vector.multi_reduction <add>, %122, %cst_54 [2] : vector<8x16x16xf32> to vector<8x16xf32>
    %124 = vector.shape_cast %123 : vector<8x16xf32> to vector<8x16x1xf32>
    %125 = arith.truncf %122 : vector<8x16x16xf32> to vector<8x16x16xbf16>
    "tpu.trace_start"() <{level = 10 : i32, message = "bnm,bmd->bnd"}> : () -> ()
    %cst_55 = arith.constant dense<0.000000e+00> : vector<8x16x32xf32>
    %126 = tpu.matmul %125, %108, %cst_55 {dimension_numbers = #tpu.dot_dimension_numbers<[2], [1], [1], [2], [0, 0, 0, 1, 1, 2], [0], [0]>} : vector<8x16x16xbf16>, vector<8x16x32xbf16>, vector<8x16x32xf32> -> vector<8x16x32xf32>
    "tpu.trace_stop"() : () -> ()
    %127 = tpu.reciprocal %124 {approx = true} : vector<8x16x1xf32> -> vector<8x16x1xf32>
    %128 = vector.broadcast %127 : vector<8x16x1xf32> to vector<8x16x32xf32>
    %129 = arith.mulf %126, %128 : vector<8x16x32xf32>
    %c0_56 = arith.constant 0 : index
    %c0_57 = arith.constant 0 : index
    %130 = vector.load %arg11[%c0_56, %c0_57] : memref<128x128xf32, #tpu.memory_space<vmem>>, vector<128x128xf32>
    %131 = vector.shape_cast %129 : vector<8x16x32xf32> to vector<128x32xf32>
    %132 = arith.truncf %131 : vector<128x32xf32> to vector<128x32xbf16>
    %c2_58 = arith.constant 2 : index
    %c0_59 = arith.constant 0 : index
    %c0_60 = arith.constant 0 : index
    %133 = vector.load %arg8[%c2_58, %c0_59, %c0_60] : memref<4x32x128xbf16, #tpu.memory_space<vmem>>, vector<1x32x128xbf16>
    %134 = vector.shape_cast %133 : vector<1x32x128xbf16> to vector<32x128xbf16>
    %cst_61 = arith.constant dense<0.000000e+00> : vector<128x128xf32>
    %135 = tpu.matmul %132, %134, %cst_61 {dimension_numbers = #tpu.dot_dimension_numbers<[1], [0], [0], [1], [0, 0, 1, 1], [], []>} : vector<128x32xbf16>, vector<32x128xbf16>, vector<128x128xf32> -> vector<128x128xf32>
    %136 = arith.addf %130, %135 : vector<128x128xf32>
    %c0_62 = arith.constant 0 : index
    %c0_63 = arith.constant 0 : index
    %137 = vector.load %arg11[%c0_62, %c0_63] : memref<128x128xf32, #tpu.memory_space<vmem>>, vector<128x128xf32>
    tpu.vector_store %arg11[%c0_62, %c0_63], %136 {strides = array<i32>} : memref<128x128xf32, #tpu.memory_space<vmem>>, vector<128x128xf32>,
    %138 = vector.extract_strided_slice %23 {offsets = [0, 96], sizes = [128, 32], strides = [1, 1]} : vector<128x128xbf16> to vector<128x32xbf16>
    %139 = vector.shape_cast %138 : vector<128x32xbf16> to vector<8x16x32xbf16>
    %140 = vector.extract_strided_slice %28 {offsets = [0, 96], sizes = [128, 32], strides = [1, 1]} : vector<128x128xbf16> to vector<128x32xbf16>
    %141 = vector.shape_cast %140 : vector<128x32xbf16> to vector<8x16x32xbf16>
    %142 = vector.extract_strided_slice %29 {offsets = [0, 96], sizes = [128, 32], strides = [1, 1]} : vector<128x128xbf16> to vector<128x32xbf16>
    %143 = vector.shape_cast %142 : vector<128x32xbf16> to vector<8x16x32xbf16>
    "tpu.trace_start"() <{level = 10 : i32, message = "bnd,bmd->bnm"}> : () -> ()
    %cst_64 = arith.constant dense<0.000000e+00> : vector<8x16x16xf32>
    %144 = tpu.matmul %139, %141, %cst_64 {dimension_numbers = #tpu.dot_dimension_numbers<[2], [2], [1], [1], [0, 0, 0, 1, 1, 1], [0], [0]>} : vector<8x16x32xbf16>, vector<8x16x32xbf16>, vector<8x16x16xf32> -> vector<8x16x16xf32>
    "tpu.trace_stop"() : () -> ()
    %c3 = arith.constant 3 : index
    %c0_65 = arith.constant 0 : index
    %c0_66 = arith.constant 0 : index
    %145 = vector.load %arg6[%c3, %c0_65, %c0_66] : memref<4x16x16xbf16, #tpu.memory_space<vmem>>, vector<1x16x16xbf16>
    %146 = vector.shape_cast %145 : vector<1x16x16xbf16> to vector<16x16xbf16>
    %147 = vector.shape_cast %146 : vector<16x16xbf16> to vector<1x16x16xbf16>
    %148 = arith.extf %147 : vector<1x16x16xbf16> to vector<1x16x16xf32>
    %149 = vector.broadcast %148 : vector<1x16x16xf32> to vector<8x16x16xf32>
    %150 = arith.addf %144, %149 : vector<8x16x16xf32>
    %151 = arith.extf %30 : vector<8x16x16xbf16> to vector<8x16x16xf32>
    %152 = arith.addf %150, %151 : vector<8x16x16xf32>
    %cst_67 = arith.constant dense<0xFF800000> : vector<8x16xf32>
    %153 = vector.multi_reduction <maximumf>, %152, %cst_67 [2] : vector<8x16x16xf32> to vector<8x16xf32>
    %154 = vector.shape_cast %153 : vector<8x16xf32> to vector<8x16x1xf32>
    %155 = vector.broadcast %154 : vector<8x16x1xf32> to vector<8x16x16xf32>
    %156 = arith.subf %152, %155 : vector<8x16x16xf32>
    %157 = math.exp %156 : vector<8x16x16xf32>
    %cst_68 = arith.constant dense<0.000000e+00> : vector<8x16xf32>
    %158 = vector.multi_reduction <add>, %157, %cst_68 [2] : vector<8x16x16xf32> to vector<8x16xf32>
    %159 = vector.shape_cast %158 : vector<8x16xf32> to vector<8x16x1xf32>
    %160 = arith.truncf %157 : vector<8x16x16xf32> to vector<8x16x16xbf16>
    "tpu.trace_start"() <{level = 10 : i32, message = "bnm,bmd->bnd"}> : () -> ()
    %cst_69 = arith.constant dense<0.000000e+00> : vector<8x16x32xf32>
    %161 = tpu.matmul %160, %143, %cst_69 {dimension_numbers = #tpu.dot_dimension_numbers<[2], [1], [1], [2], [0, 0, 0, 1, 1, 2], [0], [0]>} : vector<8x16x16xbf16>, vector<8x16x32xbf16>, vector<8x16x32xf32> -> vector<8x16x32xf32>
    "tpu.trace_stop"() : () -> ()
    %162 = tpu.reciprocal %159 {approx = true} : vector<8x16x1xf32> -> vector<8x16x1xf32>
    %163 = vector.broadcast %162 : vector<8x16x1xf32> to vector<8x16x32xf32>
    %164 = arith.mulf %161, %163 : vector<8x16x32xf32>
    %c0_70 = arith.constant 0 : index
    %c0_71 = arith.constant 0 : index
    %165 = vector.load %arg11[%c0_70, %c0_71] : memref<128x128xf32, #tpu.memory_space<vmem>>, vector<128x128xf32>
    %166 = vector.shape_cast %164 : vector<8x16x32xf32> to vector<128x32xf32>
    %167 = arith.truncf %166 : vector<128x32xf32> to vector<128x32xbf16>
    %c3_72 = arith.constant 3 : index
    %c0_73 = arith.constant 0 : index
    %c0_74 = arith.constant 0 : index
    %168 = vector.load %arg8[%c3_72, %c0_73, %c0_74] : memref<4x32x128xbf16, #tpu.memory_space<vmem>>, vector<1x32x128xbf16>
    %169 = vector.shape_cast %168 : vector<1x32x128xbf16> to vector<32x128xbf16>
    %cst_75 = arith.constant dense<0.000000e+00> : vector<128x128xf32>
    %170 = tpu.matmul %167, %169, %cst_75 {dimension_numbers = #tpu.dot_dimension_numbers<[1], [0], [0], [1], [0, 0, 1, 1], [], []>} : vector<128x32xbf16>, vector<32x128xbf16>, vector<128x128xf32> -> vector<128x128xf32>
    %171 = arith.addf %165, %170 : vector<128x128xf32>
    %c0_76 = arith.constant 0 : index
    %c0_77 = arith.constant 0 : index
    %172 = vector.load %arg11[%c0_76, %c0_77] : memref<128x128xf32, #tpu.memory_space<vmem>>, vector<128x128xf32>
    tpu.vector_store %arg11[%c0_76, %c0_77], %171 {strides = array<i32>} : memref<128x128xf32, #tpu.memory_space<vmem>>, vector<128x128xf32>,
    %c0_78 = arith.constant 0 : index
    %c0_79 = arith.constant 0 : index
    %173 = vector.load %arg11[%c0_78, %c0_79] : memref<128x128xf32, #tpu.memory_space<vmem>>, vector<128x128xf32>
    %c0_80 = arith.constant 0 : index
    %c0_81 = arith.constant 0 : index
    %174 = vector.load %arg9[%c0_80, %c0_81] : memref<1x128xf32, #tpu.memory_space<vmem>>, vector<1x128xf32>
    %175 = vector.broadcast %174 : vector<1x128xf32> to vector<128x128xf32>
    %176 = arith.addf %173, %175 : vector<128x128xf32>
    %c0_82 = arith.constant 0 : index
    %c0_83 = arith.constant 0 : index
    %177 = vector.load %arg10[%c0_82, %c0_83] : memref<128x128xf32, #tpu.memory_space<vmem>>, vector<128x128xf32>
    tpu.vector_store %arg10[%c0_82, %c0_83], %176 {strides = array<i32>} : memref<128x128xf32, #tpu.memory_space<vmem>>, vector<128x128xf32>,
    return
  }
  func.func @transform_0(%arg0: i32) -> (i32, i32) {
    %c0_i32 = arith.constant 0 : i32
    %c0_i32_0 = arith.constant 0 : i32
    return %arg0, %c0_i32 : i32, i32
  }
  func.func @transform_1(%arg0: i32) -> (i32, i32) {
    %c0_i32 = arith.constant 0 : i32
    %c0_i32_0 = arith.constant 0 : i32
    %c0_i32_1 = arith.constant 0 : i32
    return %c0_i32, %c0_i32_0 : i32, i32
  }
  func.func @transform_2(%arg0: i32) -> (i32, i32) {
    %c0_i32 = arith.constant 0 : i32
    %c0_i32_0 = arith.constant 0 : i32
    %c0_i32_1 = arith.constant 0 : i32
    return %c0_i32, %c0_i32_0 : i32, i32
  }
  func.func @transform_3(%arg0: i32) -> (i32, i32) {
    %c0_i32 = arith.constant 0 : i32
    %c0_i32_0 = arith.constant 0 : i32
    %c0_i32_1 = arith.constant 0 : i32
    return %c0_i32, %c0_i32_0 : i32, i32
  }
  func.func @transform_4(%arg0: i32) -> (i32, i32) {
    %c0_i32 = arith.constant 0 : i32
    %c0_i32_0 = arith.constant 0 : i32
    %c0_i32_1 = arith.constant 0 : i32
    return %c0_i32, %c0_i32_0 : i32, i32
  }
  func.func @transform_5(%arg0: i32) -> (i32, i32, i32) {
    %c0_i32 = arith.constant 0 : i32
    %c0_i32_0 = arith.constant 0 : i32
    %c0_i32_1 = arith.constant 0 : i32
    %c0_i32_2 = arith.constant 0 : i32
    return %c0_i32, %c0_i32_0, %c0_i32_1 : i32, i32, i32
  }
  func.func @transform_6(%arg0: i32) -> (i32, i32, i32) {
    %c1_i32 = arith.constant 1 : i32
    %c0_i32 = arith.constant 0 : i32
    %0 = arith.cmpi eq, %c1_i32, %c0_i32 : i32
    %c1_i32_0 = arith.constant 1 : i32
    %1 = arith.select %0, %c1_i32_0, %c1_i32 : i32
    %2 = arith.remsi %arg0, %1 : i32
    %c0_i32_1 = arith.constant 0 : i32
    %3 = arith.cmpi ne, %2, %c0_i32_1 : i32
    %c0_i32_2 = arith.constant 0 : i32
    %4 = arith.cmpi slt, %2, %c0_i32_2 : i32
    %c0_i32_3 = arith.constant 0 : i32
    %5 = arith.cmpi slt, %1, %c0_i32_3 : i32
    %6 = arith.xori %4, %5 : i1
    %7 = arith.andi %6, %3 : i1
    %8 = arith.addi %2, %1 : i32
    %9 = arith.select %7, %8, %2 : i32
    %c0_i32_4 = arith.constant 0 : i32
    %c0_i32_5 = arith.constant 0 : i32
    %c0_i32_6 = arith.constant 0 : i32
    return %9, %c0_i32_4, %c0_i32_5 : i32, i32, i32
  }
  func.func @transform_7(%arg0: i32) -> (i32, i32, i32) {
    %c0_i32 = arith.constant 0 : i32
    %c0_i32_0 = arith.constant 0 : i32
    %c0_i32_1 = arith.constant 0 : i32
    %c0_i32_2 = arith.constant 0 : i32
    return %c0_i32, %c0_i32_0, %c0_i32_1 : i32, i32, i32
  }
  func.func @transform_8(%arg0: i32) -> (i32, i32) {
    %c0_i32 = arith.constant 0 : i32
    %c0_i32_0 = arith.constant 0 : i32
    %c0_i32_1 = arith.constant 0 : i32
    return %c0_i32, %c0_i32_0 : i32, i32
  }
  func.func @transform_9(%arg0: i32) -> (i32, i32) {
    %c0_i32 = arith.constant 0 : i32
    %c0_i32_0 = arith.constant 0 : i32
    return %arg0, %c0_i32 : i32, i32
  }
}

module attributes {stable_mosaic.version = 11 : i64} {
  func.func @_win_attn_kernel(%arg0: i32, %arg1: memref<128x128xf32, #tpu.memory_space<vmem>>, %arg2: memref<128x384xbf16, #tpu.memory_space<vmem>>, %arg3: memref<1x384xf32, #tpu.memory_space<vmem>>, %arg4: memref<128x128xf32, #tpu.memory_space<vmem>>, %arg5: memref<1x128xf32, #tpu.memory_space<vmem>>, %arg6: memref<4x16x16xbf16, #tpu.memory_space<vmem>>, %arg7: memref<8x16x16xbf16, #tpu.memory_space<vmem>>, %arg8: memref<4x32x128xbf16, #tpu.memory_space<vmem>>, %arg9: memref<1x128xf32, #tpu.memory_space<vmem>>, %arg10: memref<128x128xf32, #tpu.memory_space<vmem>>, %arg11: memref<128x128xf32, #tpu.memory_space<vmem>>) attributes {dimension_semantics = [#tpu.dimension_semantics<parallel>], iteration_bounds = array<i64: 2>, scalar_prefetch = 0 : i64, scratch_operands = 1 : i64, tpu.core_type = #tpu.core_type<tc>, window_params = [{transform_indices = @transform_0, window_bounds = array<i64: 128, 128>}, {pipeline_mode = #tpu.pipeline_mode<synchronous>, transform_indices = @transform_1, window_bounds = array<i64: 128, 384>}, {pipeline_mode = #tpu.pipeline_mode<synchronous>, transform_indices = @transform_2, window_bounds = array<i64: 1, 384>}, {pipeline_mode = #tpu.pipeline_mode<synchronous>, transform_indices = @transform_3, window_bounds = array<i64: 128, 128>}, {pipeline_mode = #tpu.pipeline_mode<synchronous>, transform_indices = @transform_4, window_bounds = array<i64: 1, 128>}, {pipeline_mode = #tpu.pipeline_mode<synchronous>, transform_indices = @transform_5, window_bounds = array<i64: 4, 16, 16>}, {transform_indices = @transform_6, window_bounds = array<i64: 8, 16, 16>}, {pipeline_mode = #tpu.pipeline_mode<synchronous>, transform_indices = @transform_7, window_bounds = array<i64: 4, 32, 128>}, {pipeline_mode = #tpu.pipeline_mode<synchronous>, transform_indices = @transform_8, window_bounds = array<i64: 1, 128>}, {transform_indices = @transform_9, window_bounds = array<i64: 128, 128>}]} {
    %c0 = arith.constant 0 : index
    %c0_0 = arith.constant 0 : index
    %0 = vector.load %arg1[%c0, %c0_0] : memref<128x128xf32, #tpu.memory_space<vmem>>, vector<128x128xf32>
    %1 = arith.truncf %0 : vector<128x128xf32> to vector<128x128xbf16>
    %c0_1 = arith.constant 0 : index
    %c0_2 = arith.constant 0 : index
    %2 = vector.load %arg2[%c0_1, %c0_2] : memref<128x384xbf16, #tpu.memory_space<vmem>>, vector<128x384xbf16>
    %cst = arith.constant dense<0.000000e+00> : vector<128x384xf32>
    %3 = tpu.matmul %1, %2, %cst {dimension_numbers = #tpu.dot_dimension_numbers<[1], [0], [0], [1], [0, 0, 1, 1], [], []>} : vector<128x128xbf16>, vector<128x384xbf16>, vector<128x384xf32> -> vector<128x384xf32>
    %c0_3 = arith.constant 0 : index
    %c0_4 = arith.constant 0 : index
    %4 = vector.load %arg3[%c0_3, %c0_4] : memref<1x384xf32, #tpu.memory_space<vmem>>, vector<1x384xf32>
    %5 = vector.broadcast %4 : vector<1x384xf32> to vector<128x384xf32>
    %6 = arith.addf %3, %5 : vector<128x384xf32>
    %7 = vector.extract_strided_slice %6 {offsets = [0, 0], sizes = [128, 128], strides = [1, 1]} : vector<128x384xf32> to vector<128x128xf32>
    %8 = vector.extract_strided_slice %6 {offsets = [0, 128], sizes = [128, 128], strides = [1, 1]} : vector<128x384xf32> to vector<128x128xf32>
    %9 = vector.extract_strided_slice %6 {offsets = [0, 256], sizes = [128, 128], strides = [1, 1]} : vector<128x384xf32> to vector<128x128xf32>
    %10 = arith.mulf %7, %7 : vector<128x128xf32>
    %c0_5 = arith.constant 0 : index
    %c0_6 = arith.constant 0 : index
    %11 = vector.load %arg4[%c0_5, %c0_6] : memref<128x128xf32, #tpu.memory_space<vmem>>, vector<128x128xf32>
    %cst_7 = arith.constant dense<0.000000e+00> : vector<128x128xf32>
    %12 = tpu.matmul %10, %11, %cst_7 {dimension_numbers = #tpu.dot_dimension_numbers<[1], [0], [0], [1], [0, 0, 1, 1], [], []>} : vector<128x128xf32>, vector<128x128xf32>, vector<128x128xf32> -> vector<128x128xf32>
    %13 = arith.mulf %8, %8 : vector<128x128xf32>
    %c0_8 = arith.constant 0 : index
    %c0_9 = arith.constant 0 : index
    %14 = vector.load %arg4[%c0_8, %c0_9] : memref<128x128xf32, #tpu.memory_space<vmem>>, vector<128x128xf32>
    %cst_10 = arith.constant dense<0.000000e+00> : vector<128x128xf32>
    %15 = tpu.matmul %13, %14, %cst_10 {dimension_numbers = #tpu.dot_dimension_numbers<[1], [0], [0], [1], [0, 0, 1, 1], [], []>} : vector<128x128xf32>, vector<128x128xf32>, vector<128x128xf32> -> vector<128x128xf32>
    %c0_11 = arith.constant 0 : index
    %c0_12 = arith.constant 0 : index
    %16 = vector.load %arg5[%c0_11, %c0_12] : memref<1x128xf32, #tpu.memory_space<vmem>>, vector<1x128xf32>
    %cst_13 = arith.constant 1.000000e-24 : f32
    %17 = vector.broadcast %cst_13 : f32 to vector<128x128xf32>
    %18 = arith.maximumf %12, %17 : vector<128x128xf32>
    %19 = math.rsqrt %18 : vector<128x128xf32>
    %20 = vector.broadcast %16 : vector<1x128xf32> to vector<128x128xf32>
    %21 = arith.mulf %20, %19 : vector<128x128xf32>
    %22 = arith.mulf %7, %21 : vector<128x128xf32>
    %23 = arith.truncf %22 : vector<128x128xf32> to vector<128x128xbf16>
    %cst_14 = arith.constant 1.000000e-24 : f32
    %24 = vector.broadcast %cst_14 : f32 to vector<128x128xf32>
    %25 = arith.maximumf %15, %24 : vector<128x128xf32>
    %26 = math.rsqrt %25 : vector<128x128xf32>
    %27 = arith.mulf %8, %26 : vector<128x128xf32>
    %28 = arith.truncf %27 : vector<128x128xf32> to vector<128x128xbf16>
    %29 = arith.truncf %9 : vector<128x128xf32> to vector<128x128xbf16>
    %c0_15 = arith.constant 0 : index
    %c0_16 = arith.constant 0 : index
    %c0_17 = arith.constant 0 : index
    %30 = vector.load %arg7[%c0_15, %c0_16, %c0_17] : memref<8x16x16xbf16, #tpu.memory_space<vmem>>, vector<8x16x16xbf16>
    %cst_18 = arith.constant 0.000000e+00 : f32
    %31 = vector.broadcast %cst_18 : f32 to vector<128x128xf32>
    %c0_19 = arith.constant 0 : index
    %c0_20 = arith.constant 0 : index
    %32 = vector.load %arg11[%c0_19, %c0_20] : memref<128x128xf32, #tpu.memory_space<vmem>>, vector<128x128xf32>
    tpu.vector_store %arg11[%c0_19, %c0_20], %31 {strides = array<i32>} : memref<128x128xf32, #tpu.memory_space<vmem>>, vector<128x128xf32>,
    %33 = vector.extract_strided_slice %23 {offsets = [0, 0], sizes = [128, 32], strides = [1, 1]} : vector<128x128xbf16> to vector<128x32xbf16>
    %34 = vector.shape_cast %33 : vector<128x32xbf16> to vector<8x16x32xbf16>
    %35 = vector.extract_strided_slice %28 {offsets = [0, 0], sizes = [128, 32], strides = [1, 1]} : vector<128x128xbf16> to vector<128x32xbf16>
    %36 = vector.shape_cast %35 : vector<128x32xbf16> to vector<8x16x32xbf16>
    %37 = vector.extract_strided_slice %29 {offsets = [0, 0], sizes = [128, 32], strides = [1, 1]} : vector<128x128xbf16> to vector<128x32xbf16>
    %38 = vector.shape_cast %37 : vector<128x32xbf16> to vector<8x16x32xbf16>
    "tpu.trace_start"() <{level = 10 : i32, message = "bnd,bmd->bnm"}> : () -> ()
    %cst_21 = arith.constant dense<0.000000e+00> : vector<8x16x16xf32>
    %39 = tpu.matmul %34, %36, %cst_21 {dimension_numbers = #tpu.dot_dimension_numbers<[2], [2], [1], [1], [0, 0, 0, 1, 1, 1], [0], [0]>} : vector<8x16x32xbf16>, vector<8x16x32xbf16>, vector<8x16x16xf32> -> vector<8x16x16xf32>
    "tpu.trace_stop"() : () -> ()
    %c0_22 = arith.constant 0 : index
    %c0_23 = arith.constant 0 : index
    %c0_24 = arith.constant 0 : index
    %40 = vector.load %arg6[%c0_22, %c0_23, %c0_24] : memref<4x16x16xbf16, #tpu.memory_space<vmem>>, vector<1x16x16xbf16>
    %41 = vector.shape_cast %40 : vector<1x16x16xbf16> to vector<16x16xbf16>
    %42 = vector.shape_cast %41 : vector<16x16xbf16> to vector<1x16x16xbf16>
    %43 = arith.extf %42 : vector<1x16x16xbf16> to vector<1x16x16xf32>
    %44 = vector.broadcast %43 : vector<1x16x16xf32> to vector<8x16x16xf32>
    %45 = arith.addf %39, %44 : vector<8x16x16xf32>
    %46 = arith.extf %30 : vector<8x16x16xbf16> to vector<8x16x16xf32>
    %47 = arith.addf %45, %46 : vector<8x16x16xf32>
    %cst_25 = arith.constant dense<0xFF800000> : vector<8x16xf32>
    %48 = vector.multi_reduction <maximumf>, %47, %cst_25 [2] : vector<8x16x16xf32> to vector<8x16xf32>
    %49 = vector.shape_cast %48 : vector<8x16xf32> to vector<8x16x1xf32>
    %50 = vector.broadcast %49 : vector<8x16x1xf32> to vector<8x16x16xf32>
    %51 = arith.subf %47, %50 : vector<8x16x16xf32>
    %52 = math.exp %51 : vector<8x16x16xf32>
    %cst_26 = arith.constant dense<0.000000e+00> : vector<8x16xf32>
    %53 = vector.multi_reduction <add>, %52, %cst_26 [2] : vector<8x16x16xf32> to vector<8x16xf32>
    %54 = vector.shape_cast %53 : vector<8x16xf32> to vector<8x16x1xf32>
    %55 = arith.truncf %52 : vector<8x16x16xf32> to vector<8x16x16xbf16>
    "tpu.trace_start"() <{level = 10 : i32, message = "bnm,bmd->bnd"}> : () -> ()
    %cst_27 = arith.constant dense<0.000000e+00> : vector<8x16x32xf32>
    %56 = tpu.matmul %55, %38, %cst_27 {dimension_numbers = #tpu.dot_dimension_numbers<[2], [1], [1], [2], [0, 0, 0, 1, 1, 2], [0], [0]>} : vector<8x16x16xbf16>, vector<8x16x32xbf16>, vector<8x16x32xf32> -> vector<8x16x32xf32>
    "tpu.trace_stop"() : () -> ()
    %57 = tpu.reciprocal %54 {approx = true} : vector<8x16x1xf32> -> vector<8x16x1xf32>
    %58 = vector.broadcast %57 : vector<8x16x1xf32> to vector<8x16x32xf32>
    %59 = arith.mulf %56, %58 : vector<8x16x32xf32>
    %c0_28 = arith.constant 0 : index
    %c0_29 = arith.constant 0 : index
    %60 = vector.load %arg11[%c0_28, %c0_29] : memref<128x128xf32, #tpu.memory_space<vmem>>, vector<128x128xf32>
    %61 = vector.shape_cast %59 : vector<8x16x32xf32> to vector<128x32xf32>
    %62 = arith.truncf %61 : vector<128x32xf32> to vector<128x32xbf16>
    %c0_30 = arith.constant 0 : index
    %c0_31 = arith.constant 0 : index
    %c0_32 = arith.constant 0 : index
    %63 = vector.load %arg8[%c0_30, %c0_31, %c0_32] : memref<4x32x128xbf16, #tpu.memory_space<vmem>>, vector<1x32x128xbf16>
    %64 = vector.shape_cast %63 : vector<1x32x128xbf16> to vector<32x128xbf16>
    %cst_33 = arith.constant dense<0.000000e+00> : vector<128x128xf32>
    %65 = tpu.matmul %62, %64, %cst_33 {dimension_numbers = #tpu.dot_dimension_numbers<[1], [0], [0], [1], [0, 0, 1, 1], [], []>} : vector<128x32xbf16>, vector<32x128xbf16>, vector<128x128xf32> -> vector<128x128xf32>
    %66 = arith.addf %60, %65 : vector<128x128xf32>
    %c0_34 = arith.constant 0 : index
    %c0_35 = arith.constant 0 : index
    %67 = vector.load %arg11[%c0_34, %c0_35] : memref<128x128xf32, #tpu.memory_space<vmem>>, vector<128x128xf32>
    tpu.vector_store %arg11[%c0_34, %c0_35], %66 {strides = array<i32>} : memref<128x128xf32, #tpu.memory_space<vmem>>, vector<128x128xf32>,
    %68 = vector.extract_strided_slice %23 {offsets = [0, 32], sizes = [128, 32], strides = [1, 1]} : vector<128x128xbf16> to vector<128x32xbf16>
    %69 = vector.shape_cast %68 : vector<128x32xbf16> to vector<8x16x32xbf16>
    %70 = vector.extract_strided_slice %28 {offsets = [0, 32], sizes = [128, 32], strides = [1, 1]} : vector<128x128xbf16> to vector<128x32xbf16>
    %71 = vector.shape_cast %70 : vector<128x32xbf16> to vector<8x16x32xbf16>
    %72 = vector.extract_strided_slice %29 {offsets = [0, 32], sizes = [128, 32], strides = [1, 1]} : vector<128x128xbf16> to vector<128x32xbf16>
    %73 = vector.shape_cast %72 : vector<128x32xbf16> to vector<8x16x32xbf16>
    "tpu.trace_start"() <{level = 10 : i32, message = "bnd,bmd->bnm"}> : () -> ()
    %cst_36 = arith.constant dense<0.000000e+00> : vector<8x16x16xf32>
    %74 = tpu.matmul %69, %71, %cst_36 {dimension_numbers = #tpu.dot_dimension_numbers<[2], [2], [1], [1], [0, 0, 0, 1, 1, 1], [0], [0]>} : vector<8x16x32xbf16>, vector<8x16x32xbf16>, vector<8x16x16xf32> -> vector<8x16x16xf32>
    "tpu.trace_stop"() : () -> ()
    %c1 = arith.constant 1 : index
    %c0_37 = arith.constant 0 : index
    %c0_38 = arith.constant 0 : index
    %75 = vector.load %arg6[%c1, %c0_37, %c0_38] : memref<4x16x16xbf16, #tpu.memory_space<vmem>>, vector<1x16x16xbf16>
    %76 = vector.shape_cast %75 : vector<1x16x16xbf16> to vector<16x16xbf16>
    %77 = vector.shape_cast %76 : vector<16x16xbf16> to vector<1x16x16xbf16>
    %78 = arith.extf %77 : vector<1x16x16xbf16> to vector<1x16x16xf32>
    %79 = vector.broadcast %78 : vector<1x16x16xf32> to vector<8x16x16xf32>
    %80 = arith.addf %74, %79 : vector<8x16x16xf32>
    %81 = arith.extf %30 : vector<8x16x16xbf16> to vector<8x16x16xf32>
    %82 = arith.addf %80, %81 : vector<8x16x16xf32>
    %cst_39 = arith.constant dense<0xFF800000> : vector<8x16xf32>
    %83 = vector.multi_reduction <maximumf>, %82, %cst_39 [2] : vector<8x16x16xf32> to vector<8x16xf32>
    %84 = vector.shape_cast %83 : vector<8x16xf32> to vector<8x16x1xf32>
    %85 = vector.broadcast %84 : vector<8x16x1xf32> to vector<8x16x16xf32>
    %86 = arith.subf %82, %85 : vector<8x16x16xf32>
    %87 = math.exp %86 : vector<8x16x16xf32>
    %cst_40 = arith.constant dense<0.000000e+00> : vector<8x16xf32>
    %88 = vector.multi_reduction <add>, %87, %cst_40 [2] : vector<8x16x16xf32> to vector<8x16xf32>
    %89 = vector.shape_cast %88 : vector<8x16xf32> to vector<8x16x1xf32>
    %90 = arith.truncf %87 : vector<8x16x16xf32> to vector<8x16x16xbf16>
    "tpu.trace_start"() <{level = 10 : i32, message = "bnm,bmd->bnd"}> : () -> ()
    %cst_41 = arith.constant dense<0.000000e+00> : vector<8x16x32xf32>
    %91 = tpu.matmul %90, %73, %cst_41 {dimension_numbers = #tpu.dot_dimension_numbers<[2], [1], [1], [2], [0, 0, 0, 1, 1, 2], [0], [0]>} : vector<8x16x16xbf16>, vector<8x16x32xbf16>, vector<8x16x32xf32> -> vector<8x16x32xf32>
    "tpu.trace_stop"() : () -> ()
    %92 = tpu.reciprocal %89 {approx = true} : vector<8x16x1xf32> -> vector<8x16x1xf32>
    %93 = vector.broadcast %92 : vector<8x16x1xf32> to vector<8x16x32xf32>
    %94 = arith.mulf %91, %93 : vector<8x16x32xf32>
    %c0_42 = arith.constant 0 : index
    %c0_43 = arith.constant 0 : index
    %95 = vector.load %arg11[%c0_42, %c0_43] : memref<128x128xf32, #tpu.memory_space<vmem>>, vector<128x128xf32>
    %96 = vector.shape_cast %94 : vector<8x16x32xf32> to vector<128x32xf32>
    %97 = arith.truncf %96 : vector<128x32xf32> to vector<128x32xbf16>
    %c1_44 = arith.constant 1 : index
    %c0_45 = arith.constant 0 : index
    %c0_46 = arith.constant 0 : index
    %98 = vector.load %arg8[%c1_44, %c0_45, %c0_46] : memref<4x32x128xbf16, #tpu.memory_space<vmem>>, vector<1x32x128xbf16>
    %99 = vector.shape_cast %98 : vector<1x32x128xbf16> to vector<32x128xbf16>
    %cst_47 = arith.constant dense<0.000000e+00> : vector<128x128xf32>
    %100 = tpu.matmul %97, %99, %cst_47 {dimension_numbers = #tpu.dot_dimension_numbers<[1], [0], [0], [1], [0, 0, 1, 1], [], []>} : vector<128x32xbf16>, vector<32x128xbf16>, vector<128x128xf32> -> vector<128x128xf32>
    %101 = arith.addf %95, %100 : vector<128x128xf32>
    %c0_48 = arith.constant 0 : index
    %c0_49 = arith.constant 0 : index
    %102 = vector.load %arg11[%c0_48, %c0_49] : memref<128x128xf32, #tpu.memory_space<vmem>>, vector<128x128xf32>
    tpu.vector_store %arg11[%c0_48, %c0_49], %101 {strides = array<i32>} : memref<128x128xf32, #tpu.memory_space<vmem>>, vector<128x128xf32>,
    %103 = vector.extract_strided_slice %23 {offsets = [0, 64], sizes = [128, 32], strides = [1, 1]} : vector<128x128xbf16> to vector<128x32xbf16>
    %104 = vector.shape_cast %103 : vector<128x32xbf16> to vector<8x16x32xbf16>
    %105 = vector.extract_strided_slice %28 {offsets = [0, 64], sizes = [128, 32], strides = [1, 1]} : vector<128x128xbf16> to vector<128x32xbf16>
    %106 = vector.shape_cast %105 : vector<128x32xbf16> to vector<8x16x32xbf16>
    %107 = vector.extract_strided_slice %29 {offsets = [0, 64], sizes = [128, 32], strides = [1, 1]} : vector<128x128xbf16> to vector<128x32xbf16>
    %108 = vector.shape_cast %107 : vector<128x32xbf16> to vector<8x16x32xbf16>
    "tpu.trace_start"() <{level = 10 : i32, message = "bnd,bmd->bnm"}> : () -> ()
    %cst_50 = arith.constant dense<0.000000e+00> : vector<8x16x16xf32>
    %109 = tpu.matmul %104, %106, %cst_50 {dimension_numbers = #tpu.dot_dimension_numbers<[2], [2], [1], [1], [0, 0, 0, 1, 1, 1], [0], [0]>} : vector<8x16x32xbf16>, vector<8x16x32xbf16>, vector<8x16x16xf32> -> vector<8x16x16xf32>
    "tpu.trace_stop"() : () -> ()
    %c2 = arith.constant 2 : index
    %c0_51 = arith.constant 0 : index
    %c0_52 = arith.constant 0 : index
    %110 = vector.load %arg6[%c2, %c0_51, %c0_52] : memref<4x16x16xbf16, #tpu.memory_space<vmem>>, vector<1x16x16xbf16>
    %111 = vector.shape_cast %110 : vector<1x16x16xbf16> to vector<16x16xbf16>
    %112 = vector.shape_cast %111 : vector<16x16xbf16> to vector<1x16x16xbf16>
    %113 = arith.extf %112 : vector<1x16x16xbf16> to vector<1x16x16xf32>
    %114 = vector.broadcast %113 : vector<1x16x16xf32> to vector<8x16x16xf32>
    %115 = arith.addf %109, %114 : vector<8x16x16xf32>
    %116 = arith.extf %30 : vector<8x16x16xbf16> to vector<8x16x16xf32>
    %117 = arith.addf %115, %116 : vector<8x16x16xf32>
    %cst_53 = arith.constant dense<0xFF800000> : vector<8x16xf32>
    %118 = vector.multi_reduction <maximumf>, %117, %cst_53 [2] : vector<8x16x16xf32> to vector<8x16xf32>
    %119 = vector.shape_cast %118 : vector<8x16xf32> to vector<8x16x1xf32>
    %120 = vector.broadcast %119 : vector<8x16x1xf32> to vector<8x16x16xf32>
    %121 = arith.subf %117, %120 : vector<8x16x16xf32>
    %122 = math.exp %121 : vector<8x16x16xf32>
    %cst_54 = arith.constant dense<0.000000e+00> : vector<8x16xf32>
    %123 = vector.multi_reduction <add>, %122, %cst_54 [2] : vector<8x16x16xf32> to vector<8x16xf32>
    %124 = vector.shape_cast %123 : vector<8x16xf32> to vector<8x16x1xf32>
    %125 = arith.truncf %122 : vector<8x16x16xf32> to vector<8x16x16xbf16>
    "tpu.trace_start"() <{level = 10 : i32, message = "bnm,bmd->bnd"}> : () -> ()
    %cst_55 = arith.constant dense<0.000000e+00> : vector<8x16x32xf32>
    %126 = tpu.matmul %125, %108, %cst_55 {dimension_numbers = #tpu.dot_dimension_numbers<[2], [1], [1], [2], [0, 0, 0, 1, 1, 2], [0], [0]>} : vector<8x16x16xbf16>, vector<8x16x32xbf16>, vector<8x16x32xf32> -> vector<8x16x32xf32>
    "tpu.trace_stop"() : () -> ()
    %127 = tpu.reciprocal %124 {approx = true} : vector<8x16x1xf32> -> vector<8x16x1xf32>
    %128 = vector.broadcast %127 : vector<8x16x1xf32> to vector<8x16x32xf32>
    %129 = arith.mulf %126, %128 : vector<8x16x32xf32>
    %c0_56 = arith.constant 0 : index
    %c0_57 = arith.constant 0 : index
    %130 = vector.load %arg11[%c0_56, %c0_57] : memref<128x128xf32, #tpu.memory_space<vmem>>, vector<128x128xf32>
    %131 = vector.shape_cast %129 : vector<8x16x32xf32> to vector<128x32xf32>
    %132 = arith.truncf %131 : vector<128x32xf32> to vector<128x32xbf16>
    %c2_58 = arith.constant 2 : index
    %c0_59 = arith.constant 0 : index
    %c0_60 = arith.constant 0 : index
    %133 = vector.load %arg8[%c2_58, %c0_59, %c0_60] : memref<4x32x128xbf16, #tpu.memory_space<vmem>>, vector<1x32x128xbf16>
    %134 = vector.shape_cast %133 : vector<1x32x128xbf16> to vector<32x128xbf16>
    %cst_61 = arith.constant dense<0.000000e+00> : vector<128x128xf32>
    %135 = tpu.matmul %132, %134, %cst_61 {dimension_numbers = #tpu.dot_dimension_numbers<[1], [0], [0], [1], [0, 0, 1, 1], [], []>} : vector<128x32xbf16>, vector<32x128xbf16>, vector<128x128xf32> -> vector<128x128xf32>
    %136 = arith.addf %130, %135 : vector<128x128xf32>
    %c0_62 = arith.constant 0 : index
    %c0_63 = arith.constant 0 : index
    %137 = vector.load %arg11[%c0_62, %c0_63] : memref<128x128xf32, #tpu.memory_space<vmem>>, vector<128x128xf32>
    tpu.vector_store %arg11[%c0_62, %c0_63], %136 {strides = array<i32>} : memref<128x128xf32, #tpu.memory_space<vmem>>, vector<128x128xf32>,
    %138 = vector.extract_strided_slice %23 {offsets = [0, 96], sizes = [128, 32], strides = [1, 1]} : vector<128x128xbf16> to vector<128x32xbf16>
    %139 = vector.shape_cast %138 : vector<128x32xbf16> to vector<8x16x32xbf16>
    %140 = vector.extract_strided_slice %28 {offsets = [0, 96], sizes = [128, 32], strides = [1, 1]} : vector<128x128xbf16> to vector<128x32xbf16>
    %141 = vector.shape_cast %140 : vector<128x32xbf16> to vector<8x16x32xbf16>
    %142 = vector.extract_strided_slice %29 {offsets = [0, 96], sizes = [128, 32], strides = [1, 1]} : vector<128x128xbf16> to vector<128x32xbf16>
    %143 = vector.shape_cast %142 : vector<128x32xbf16> to vector<8x16x32xbf16>
    "tpu.trace_start"() <{level = 10 : i32, message = "bnd,bmd->bnm"}> : () -> ()
    %cst_64 = arith.constant dense<0.000000e+00> : vector<8x16x16xf32>
    %144 = tpu.matmul %139, %141, %cst_64 {dimension_numbers = #tpu.dot_dimension_numbers<[2], [2], [1], [1], [0, 0, 0, 1, 1, 1], [0], [0]>} : vector<8x16x32xbf16>, vector<8x16x32xbf16>, vector<8x16x16xf32> -> vector<8x16x16xf32>
    "tpu.trace_stop"() : () -> ()
    %c3 = arith.constant 3 : index
    %c0_65 = arith.constant 0 : index
    %c0_66 = arith.constant 0 : index
    %145 = vector.load %arg6[%c3, %c0_65, %c0_66] : memref<4x16x16xbf16, #tpu.memory_space<vmem>>, vector<1x16x16xbf16>
    %146 = vector.shape_cast %145 : vector<1x16x16xbf16> to vector<16x16xbf16>
    %147 = vector.shape_cast %146 : vector<16x16xbf16> to vector<1x16x16xbf16>
    %148 = arith.extf %147 : vector<1x16x16xbf16> to vector<1x16x16xf32>
    %149 = vector.broadcast %148 : vector<1x16x16xf32> to vector<8x16x16xf32>
    %150 = arith.addf %144, %149 : vector<8x16x16xf32>
    %151 = arith.extf %30 : vector<8x16x16xbf16> to vector<8x16x16xf32>
    %152 = arith.addf %150, %151 : vector<8x16x16xf32>
    %cst_67 = arith.constant dense<0xFF800000> : vector<8x16xf32>
    %153 = vector.multi_reduction <maximumf>, %152, %cst_67 [2] : vector<8x16x16xf32> to vector<8x16xf32>
    %154 = vector.shape_cast %153 : vector<8x16xf32> to vector<8x16x1xf32>
    %155 = vector.broadcast %154 : vector<8x16x1xf32> to vector<8x16x16xf32>
    %156 = arith.subf %152, %155 : vector<8x16x16xf32>
    %157 = math.exp %156 : vector<8x16x16xf32>
    %cst_68 = arith.constant dense<0.000000e+00> : vector<8x16xf32>
    %158 = vector.multi_reduction <add>, %157, %cst_68 [2] : vector<8x16x16xf32> to vector<8x16xf32>
    %159 = vector.shape_cast %158 : vector<8x16xf32> to vector<8x16x1xf32>
    %160 = arith.truncf %157 : vector<8x16x16xf32> to vector<8x16x16xbf16>
    "tpu.trace_start"() <{level = 10 : i32, message = "bnm,bmd->bnd"}> : () -> ()
    %cst_69 = arith.constant dense<0.000000e+00> : vector<8x16x32xf32>
    %161 = tpu.matmul %160, %143, %cst_69 {dimension_numbers = #tpu.dot_dimension_numbers<[2], [1], [1], [2], [0, 0, 0, 1, 1, 2], [0], [0]>} : vector<8x16x16xbf16>, vector<8x16x32xbf16>, vector<8x16x32xf32> -> vector<8x16x32xf32>
    "tpu.trace_stop"() : () -> ()
    %162 = tpu.reciprocal %159 {approx = true} : vector<8x16x1xf32> -> vector<8x16x1xf32>
    %163 = vector.broadcast %162 : vector<8x16x1xf32> to vector<8x16x32xf32>
    %164 = arith.mulf %161, %163 : vector<8x16x32xf32>
    %c0_70 = arith.constant 0 : index
    %c0_71 = arith.constant 0 : index
    %165 = vector.load %arg11[%c0_70, %c0_71] : memref<128x128xf32, #tpu.memory_space<vmem>>, vector<128x128xf32>
    %166 = vector.shape_cast %164 : vector<8x16x32xf32> to vector<128x32xf32>
    %167 = arith.truncf %166 : vector<128x32xf32> to vector<128x32xbf16>
    %c3_72 = arith.constant 3 : index
    %c0_73 = arith.constant 0 : index
    %c0_74 = arith.constant 0 : index
    %168 = vector.load %arg8[%c3_72, %c0_73, %c0_74] : memref<4x32x128xbf16, #tpu.memory_space<vmem>>, vector<1x32x128xbf16>
    %169 = vector.shape_cast %168 : vector<1x32x128xbf16> to vector<32x128xbf16>
    %cst_75 = arith.constant dense<0.000000e+00> : vector<128x128xf32>
    %170 = tpu.matmul %167, %169, %cst_75 {dimension_numbers = #tpu.dot_dimension_numbers<[1], [0], [0], [1], [0, 0, 1, 1], [], []>} : vector<128x32xbf16>, vector<32x128xbf16>, vector<128x128xf32> -> vector<128x128xf32>
    %171 = arith.addf %165, %170 : vector<128x128xf32>
    %c0_76 = arith.constant 0 : index
    %c0_77 = arith.constant 0 : index
    %172 = vector.load %arg11[%c0_76, %c0_77] : memref<128x128xf32, #tpu.memory_space<vmem>>, vector<128x128xf32>
    tpu.vector_store %arg11[%c0_76, %c0_77], %171 {strides = array<i32>} : memref<128x128xf32, #tpu.memory_space<vmem>>, vector<128x128xf32>,
    %c0_78 = arith.constant 0 : index
    %c0_79 = arith.constant 0 : index
    %173 = vector.load %arg11[%c0_78, %c0_79] : memref<128x128xf32, #tpu.memory_space<vmem>>, vector<128x128xf32>
    %c0_80 = arith.constant 0 : index
    %c0_81 = arith.constant 0 : index
    %174 = vector.load %arg9[%c0_80, %c0_81] : memref<1x128xf32, #tpu.memory_space<vmem>>, vector<1x128xf32>
    %175 = vector.broadcast %174 : vector<1x128xf32> to vector<128x128xf32>
    %176 = arith.addf %173, %175 : vector<128x128xf32>
    %c0_82 = arith.constant 0 : index
    %c0_83 = arith.constant 0 : index
    %177 = vector.load %arg10[%c0_82, %c0_83] : memref<128x128xf32, #tpu.memory_space<vmem>>, vector<128x128xf32>
    tpu.vector_store %arg10[%c0_82, %c0_83], %176 {strides = array<i32>} : memref<128x128xf32, #tpu.memory_space<vmem>>, vector<128x128xf32>,
    return
  }
  func.func @transform_0(%arg0: i32) -> (i32, i32) {
    %c0_i32 = arith.constant 0 : i32
    %c0_i32_0 = arith.constant 0 : i32
    return %arg0, %c0_i32 : i32, i32
  }
  func.func @transform_1(%arg0: i32) -> (i32, i32) {
    %c0_i32 = arith.constant 0 : i32
    %c0_i32_0 = arith.constant 0 : i32
    %c0_i32_1 = arith.constant 0 : i32
    return %c0_i32, %c0_i32_0 : i32, i32
  }
  func.func @transform_2(%arg0: i32) -> (i32, i32) {
    %c0_i32 = arith.constant 0 : i32
    %c0_i32_0 = arith.constant 0 : i32
    %c0_i32_1 = arith.constant 0 : i32
    return %c0_i32, %c0_i32_0 : i32, i32
  }
  func.func @transform_3(%arg0: i32) -> (i32, i32) {
    %c0_i32 = arith.constant 0 : i32
    %c0_i32_0 = arith.constant 0 : i32
    %c0_i32_1 = arith.constant 0 : i32
    return %c0_i32, %c0_i32_0 : i32, i32
  }
  func.func @transform_4(%arg0: i32) -> (i32, i32) {
    %c0_i32 = arith.constant 0 : i32
    %c0_i32_0 = arith.constant 0 : i32
    %c0_i32_1 = arith.constant 0 : i32
    return %c0_i32, %c0_i32_0 : i32, i32
  }
  func.func @transform_5(%arg0: i32) -> (i32, i32, i32) {
    %c0_i32 = arith.constant 0 : i32
    %c0_i32_0 = arith.constant 0 : i32
    %c0_i32_1 = arith.constant 0 : i32
    %c0_i32_2 = arith.constant 0 : i32
    return %c0_i32, %c0_i32_0, %c0_i32_1 : i32, i32, i32
  }
  func.func @transform_6(%arg0: i32) -> (i32, i32, i32) {
    %c1_i32 = arith.constant 1 : i32
    %c0_i32 = arith.constant 0 : i32
    %0 = arith.cmpi eq, %c1_i32, %c0_i32 : i32
    %c1_i32_0 = arith.constant 1 : i32
    %1 = arith.select %0, %c1_i32_0, %c1_i32 : i32
    %2 = arith.remsi %arg0, %1 : i32
    %c0_i32_1 = arith.constant 0 : i32
    %3 = arith.cmpi ne, %2, %c0_i32_1 : i32
    %c0_i32_2 = arith.constant 0 : i32
    %4 = arith.cmpi slt, %2, %c0_i32_2 : i32
    %c0_i32_3 = arith.constant 0 : i32
    %5 = arith.cmpi slt, %1, %c0_i32_3 : i32
    %6 = arith.xori %4, %5 : i1
    %7 = arith.andi %6, %3 : i1
    %8 = arith.addi %2, %1 : i32
    %9 = arith.select %7, %8, %2 : i32
    %c0_i32_4 = arith.constant 0 : i32
    %c0_i32_5 = arith.constant 0 : i32
    %c0_i32_6 = arith.constant 0 : i32
    return %9, %c0_i32_4, %c0_i32_5 : i32, i32, i32
  }
  func.func @transform_7(%arg0: i32) -> (i32, i32, i32) {
    %c0_i32 = arith.constant 0 : i32
    %c0_i32_0 = arith.constant 0 : i32
    %c0_i32_1 = arith.constant 0 : i32
    %c0_i32_2 = arith.constant 0 : i32
    return %c0_i32, %c0_i32_0, %c0_i32_1 : i32, i32, i32
  }
  func.func @transform_8(%arg0: i32) -> (i32, i32) {
    %c0_i32 = arith.constant 0 : i32
    %c0_i32_0 = arith.constant 0 : i32
    %c0_i32_1 = arith.constant 0 : i32
    return %c0_i32, %c0_i32_0 : i32, i32
  }
  func.func @transform_9(%arg0: i32) -> (i32, i32) {
    %c0_i32 = arith.constant 0 : i32
    %c0_i32_0 = arith.constant 0 : i32
    return %arg0, %c0_i32 : i32, i32
  }
}

</mosaic_0001>

<bundles_post_ra>
// kernel: tpu_custom_call.1
= control target key start
LH: loop header
LB: loop body
LE: loop exit
PB: predicated region body
PF: predicated region fallthrough
CT: control target
= control target key end

     0   :  { %s8427_s0 = inlined_call_operand.hbm [shape: f32[256,128], index: 0, kind: input, shape index: {}]   ;;  %s8428_s1 = inlined_call_operand.hbm [shape: bf16[128,384], index: 1, kind: input, shape index: {}]   ;;  %s8429_s2 = inlined_call_operand.hbm [shape: f32[1,384], index: 2, kind: input, shape index: {}]   ;;  %s8430_s3 = inlined_call_operand.hbm [shape: f32[128,128], index: 3, kind: input, shape index: {}]   ;;  %s8431_s4 = inlined_call_operand.vmem [shape: f32[1,128], index: 4, kind: input, shape index: {}]   ;;  %s8432_s5 = inlined_call_operand.hbm [shape: bf16[4,16,16], index: 5, kind: input, shape index: {}]   ;;  %s8433_s6 = inlined_call_operand.hbm [shape: bf16[8,16,16], index: 6, kind: input, shape index: {}]   ;;  %s8434_s7 = inlined_call_operand.hbm [shape: bf16[4,32,128], index: 7, kind: input, shape index: {}]   ;;  %s8435_s8 = inlined_call_operand.vmem [shape: f32[1,128], index: 8, kind: input, shape index: {}]   ;;  %s8436_s9 = inlined_call_operand.hbm [shape: f32[256,128], index: 9, kind: output, shape index: {}]  }
   0x1   :  { %8475 = sst [smem:[#allocation61_spill]] %s8428_s1 }
   0x2   :  { %8476 = sst [smem:[#allocation62_spill]] %s8429_s2 }
   0x3   :  { %8477 = sst [smem:[#allocation63_spill]] %s8430_s3 }
   0x4   :  { %8478 = sst [smem:[#allocation64_spill]] %s8432_s5 }
   0x5   :  { %14 = vsyncpa [#allocation4], 0 }
   0x6   :  { %16 = vsyncpa [#allocation4 + $0x1], 0 }
   0x7   :  { %17 = vsyncpa [#allocation7], 0 }
   0x8   :  { %18 = vsyncpa [#allocation10], 0 }
   0x9   :  { %19 = vsyncpa [#allocation13], 0 }
   0xa   :  { %20 = vsyncpa [#allocation5], 0 }
   0xb   :  { %22 = vsyncpa [#allocation5 + $0x1], 0  ;;  %s5906_s30 = smov 0   ;;  %s5908_s10 = smov 0  }
   0xc   :  { %s5910_s11 = smov 0   ;;  %s5912_s12 = smov 0  }
   0xd LB: > { %s8479_s1 = sld [smem:[#allocation61_spill]]  ;;  %s5930_s16 = sadd.s32 4294967295, %s5837_s12   ;;  %s5837_s12 = sphi %s5912_s12, %s8651_s12   ;;  %s5833_s11 = sphi %s5910_s11, %s8650_s11   ;;  %s5829_s10 = sphi %s5908_s10, %s8649_s10   ;;  %s5825_s30 = sphi %s5906_s30, %s8648_s30  }
   0xe   : > { %p4745_p0 = scmp.ge.s32.totalorder %s5837_s12, 1  ;;  %p49_p1 = scmp.eq.s32.totalorder %s5930_s16, 0 }
   0xf   : > { %p253_p2 = scmp.lt.s32.totalorder %s5837_s12, 3  ;;  %s5839_s18 = smov [#allocation6]  }
  0x10   : > { %s266_s19 = sshll.u32 %s5839_s18, 4  ;;  %s8481_s3 = sld [smem:[#allocation63_spill]]  ;;  %s267_s19 = int_to_ptr.vmem [resolvable:$true] %s266_s19 }
  0x11   : > { %p5935_p3 = pnand %p4745_p0, %p253_p2  ;;  %s5840_s24 = smov [#allocation9]  }
  0x12   : > { %s292_s25 = sshll.u32 %s5840_s24, 4  ;;  %s5841_s26 = smov 192   ;;  %s293_s25 = int_to_ptr.vmem [resolvable:$true] %s292_s25 }
  0x13   : > { %s264_s15 = sshll.u32 %s8479_s1, 4  ;;  %p5135_p4 = pneg %p5935_p3  ;;  %s265_s15 = int_to_ptr.hbm [resolvable:$true] %s264_s15 }
  0x14   : > { %s5842_s27 = smov 12   ;;  %s8437_s28 = smov 128  }
  0x15   : > { %p5947_p6 = pnand %p5135_p4, %p49_p1  ;;  %s8438_s29 = smov 8  }
  0x16   : > { %s290_s22 = sshll.u32 %s8481_s3, 4  ;;  %s321_s18 = sshll.u32 %s8433_s6, 4  ;;  %s291_s22 = int_to_ptr.hbm [resolvable:$true] %s290_s22  ;;  %s322_s18 = int_to_ptr.hbm [resolvable:$true] %s321_s18 }
  0x17   : > { %5138 = dma.hbm_to_vmem [thread:$0]  (!%p5947_p6), %s265_s15, 3072, %s267_s19, [#allocation7], %s5841_s26, %s5841_s26, %s5842_s27  }
  0x18   : > { %5144 = dma.hbm_to_vmem [thread:$0]  (!%p5947_p6), %s291_s22, 2048, %s293_s25, [#allocation10], %s8437_s28, %s8437_s28, %s8438_s29  }
  0x19   : > { %s5845_s20 = smov [#allocation12]   ;;  %s8483_s2 = sld [smem:[#allocation62_spill]] }
  0x1a   : > { %s323_s21 = sshll.u32 %s5845_s20, 4  ;;  %s5846_s19 = smov 64   ;;  %s324_s21 = int_to_ptr.vmem [resolvable:$true] %s323_s21 }
  0x1b   : > { %s5847_s26 = smov 4   ;;  %s5848_s22 = smov [#allocation8]  }
  0x1c   : > { %5150 = dma.hbm_to_vmem [thread:$0]  (!%p5947_p6), %s322_s18, 1024, %s324_s21, [#allocation13], %s5846_s19, %s5846_s19, %s5847_s26  }
  0x1d   : > { %s281_s25 = sshll.u32 %s5848_s22, 4  ;;  %s8484_s5 = sld [smem:[#allocation64_spill]]  ;;  %s282_s25 = int_to_ptr.vmem [resolvable:$true] %s281_s25 }
  0x1e   : > { %s335_s18 = sshll.u32 %s8434_s7, 4  ;;  %s5849_s21 = smov [#allocation11]   ;;  %s336_s18 = int_to_ptr.hbm [resolvable:$true] %s335_s18 }
  0x1f   : > { %s279_s15 = sshll.u32 %s8483_s2, 4  ;;  %s309_s24 = sshll.u32 %s5849_s21, 4  ;;  %s280_s15 = int_to_ptr.hbm [resolvable:$true] %s279_s15  ;;  %s310_s24 = int_to_ptr.vmem [resolvable:$true] %s309_s24 }
  0x20   : > { %5141 = dma.hbm_to_vmem [thread:$0]  (!%p5947_p6), %s280_s15, 48, %s282_s25, [#allocation7]  }
  0x21   : > { %s5850_s22 = smov [#allocation14]   ;;  %s4744_s25 = sadd.s32 4294967294, %s5837_s12  }
  0x22   : > { %s337_s15 = sshll.u32 %s5850_s22, 4  ;;  %s5980_s27 = sadd.s32 1, %s5837_s12   ;;  %s338_s15 = int_to_ptr.vmem [resolvable:$true] %s337_s15 }
  0x23   : > { %s307_s14 = sshll.u32 %s8484_s5, 4  ;;  %s32_s13 = ssub.s32 %s5837_s12, %s5980_s27  ;;  %s308_s14 = int_to_ptr.hbm [resolvable:$true] %s307_s14 }
  0x24   : > { %5147 = dma.hbm_to_vmem [thread:$0]  (!%p5947_p6), %s308_s14, 512, %s310_s24, [#allocation10], %s5846_s19, %s5846_s19, %s5847_s26  }
  0x25   : > { %5153 = dma.hbm_to_vmem [thread:$0]  (!%p5947_p6), %s336_s18, 1024, %s338_s15, [#allocation13], %s5846_s19, %s5846_s19, %s5847_s26  }
  0x26   : > { %s35_s1 = sadd.s32 1, %s5833_s11  ;;  %p33_p7 = scmp.eq.s32.totalorder %s32_s13, 0 }
  0x27   : > { %p42_p8 = scmp.ne.s32.totalorder %s5833_s11, %s5829_s10  ;;  %p43_p9 = scmp.eq.s32.totalorder %s5837_s12, 0 }
  0x28   : > { %p48_p10 = scmp.ne.s32.totalorder %s5829_s10, %s5825_s30  ;;  %p240_p13 = scmp.eq.s32.totalorder %s5930_s16, 1 }
  0x29   : > { %s5991_s14 = scalar_select %p33_p7, %s5833_s11, %s35_s1  }
  0x2a   : > { %p5993_p11 = por %p43_p9, %p42_p8  ;;  %p5999_p12 = por %p49_p1, %p48_p10 }
  0x2b   : > { %p246_p0 = scmp.eq.s32.totalorder %s4744_s25, 1  ;;  %p5168_p2 = scmp.lt.s32.totalorder %s5837_s12, 2 }
  0x2c   : > { %s354_s19 = sand.u32 1, %s5833_s11   ;;  %p6006_p4 = por %p240_p13, %p42_p8 }
  0x2d   : > { %p6010_p6 = por %p246_p0, %p48_p10  ;;  %s4753_s21 = sshll.u32 %s354_s19, 7 }
  0x2e   : > { %s4994_s24 = sshll.u32 %s5837_s12, 7  ;;  %s358_s1 = scalar_lea.vmem [#allocation3], %s4753_s21 }
  0x2f   : > { %s363_s13 = scalar_lea.hbm %s8427_s0, %s4994_s24  ;;  %s366_s28 = sshll.u32 %s358_s1, 4  ;;  %s367_s28 = int_to_ptr.vmem [resolvable:$true] %s366_s28 }
  0x30   : > { %s364_s29 = sshll.u32 %s363_s13, 4  ;;  %p6020_p7 = pnand %p5168_p2, %p5993_p11  ;;  %s365_s29 = int_to_ptr.hbm [resolvable:$true] %s364_s29 }
  0x31   : > { %s355_s2 = scalar_lea.sflag [#allocation4], %s354_s19  ;;  %s5729_s3 = sshra.s32 %s365_s29, 4  ;;  %s5730_s3 = int_to_ptr.hbm [resolvable:$true] %s5729_s3 }
  0x32   : > { %s5731_s5 = scalar_lea.hbm %s5730_s3, 128  ;;  %p5733_p9 = pneg %p6020_p7 }
  0x33   : > { %p5732_p8 = scmp.ne.s32.totalorder %s5730_s3, %s5731_s5  ;;  %s5736_s22 = scalar_lea.hbm %s8427_s0, 256 }
  0x34   : > { %p5737_p11 = scmp.lt.s32.totalorder %s5730_s3, %s8427_s0  ;;  %p5738_p0 = scmp.lt.s32.totalorder %s5736_s22, %s5731_s5 }
  0x35   : > { %p5734_p10 = pnand %p5733_p9, %p5732_p8 }
  0x36   : > { %p5739_p2 = por %p5738_p0, %p5737_p11 }
  0x37   : > { %p5735_p13 = pneg %p5734_p10 }
  0x39   : > { %p5740_p5 = pnand %p5739_p2, %p5735_p13 }
  0x3b   : > { %5743 = shalt.err (!%p5740_p5)
}
  0x3c   : > { %s8490_s19 = smov 8   ;;  %s8491_s13 = smov 128  }
  0x3d   : > { %5157 = dma.hbm_to_vmem [thread:$0]  (!%p6020_p7), %s365_s29, 2048, %s367_s28, %s355_s2, %s8491_s13, %s8491_s13, %s8490_s19  }
  0x3e   : > { %378 = sbr.rel (%p5935_p3) target bundleno = 2490 (0x9ba), region = 56 }
  0x43   : > { %s6040_s1 = sand.u32 1, %s5829_s10  }
  0x44   : > { %s4757_s3 = sshll.u32 %s6040_s1, 7  ;;  %s381_s5 = scalar_lea.sflag [#allocation4], %s6040_s1 }
  0x45   : > { %s6046_s21 = scalar_lea.vmem [#allocation3], %s4757_s3 }
  0x46   : > { %5804 = dma.done.wait (%p5999_p12), %s381_s5, 2048  }
  0x47   : > { %5806 = vsyncadd (%p5999_p12), %s381_s5, 4294965248 }
  0x48   : > { %5808 = dma.done.wait (%p49_p1), [#allocation7], 3120  }
  0x49   : > { %5810 = vsyncadd (%p49_p1), [#allocation7], 4294964176 }
  0x4a   : > { %5812 = dma.done.wait (%p49_p1), [#allocation10], 2560  }
  0x4b   : > { %5814 = vsyncadd (%p49_p1), [#allocation10], 4294964736 }
  0x4c   : > { %5816 = dma.done.wait (%p49_p1), [#allocation13], 2048  }
  0x4d   : > { %5818 = vsyncadd (%p49_p1), [#allocation13], 4294965248  ;;  %v4851_v0 = vld [vmem:[#allocation6 + $0xa8] sm:$0xf]  ;;  %v5017_v1 = vld [vmem:[#allocation6 + $0xb0] sm:$0xf0] }
  0x4e   : > { %v4839_v2 = vld [vmem:[#allocation6 + $0x90] sm:$0xf]  ;;  %v4852_v3 = vor.u32 %v5017_v1, %v4851_v0  ;;  %v5014_v4 = vld [vmem:[#allocation6 + $0x98] sm:$0xf0]  ;;  %v4827_v6 = vld [vmem:[#allocation6 + $0x78] sm:$0xf] }
  0x4f   : > { %v4840_v5 = vor.u32 %v5014_v4, %v4839_v2  ;;  %v5011_v7 = vld [vmem:[#allocation6 + $0x80] sm:$0xf0]  ;;  %v4815_v9 = vld [vmem:[#allocation6 + $0x60] sm:$0xf]  ;;  %v5008_v10 = vld [vmem:[#allocation6 + $0x68] sm:$0xf0] }
  0x50   : > { %645 = vmatpush.bf16.msra.mxu0 %v4852_v3  ;;  %5083 = vmatpush.bf16.msra.mxu1 %v4852_v3  ;;  %v4828_v8 = vor.u32 %v5011_v7, %v4827_v6  ;;  %v4816_v11 = vor.u32 %v5008_v10, %v4815_v9  ;;  %v4803_v12 = vld [vmem:[#allocation6 + $0x48] sm:$0xf]  ;;  %v5005_v13 = vld [vmem:[#allocation6 + $0x50] sm:$0xf0]  ;;  %v4791_v15 = vld [vmem:[#allocation6 + $0x30] sm:$0xf] }
  0x51   : > { %v4804_v14 = vor.u32 %v5005_v13, %v4803_v12  ;;  %v5002_v16 = vld [vmem:[#allocation6 + $0x38] sm:$0xf0]  ;;  %v4779_v18 = vld [vmem:[#allocation6 + $0x18] sm:$0xf]  ;;  %v4999_v19 = vld [vmem:[#allocation6 + $0x20] sm:$0xf0] }
  0x52   : > { %v4792_v17 = vor.u32 %v5002_v16, %v4791_v15  ;;  %v4780_v20 = vor.u32 %v4999_v19, %v4779_v18  ;;  %v4767_v21 = vld [vmem:[#allocation6] sm:$0xf]  ;;  %v4996_v22 = vld [vmem:[#allocation6 + $0x8] sm:$0xf0]  ;;  %v463_v26 = vld [vmem:[%s6046_s21 + $0x50] sm:$0xff]  ;;  %s5851_s28 = smov 96  }
  0x53   : > { %v453_v23 = vld [vmem:[%s6046_s21] sm:$0xff]  ;;  %v4768_v24 = vor.u32 %v4996_v22, %v4767_v21  ;;  %v454_v25 = vld [vmem:[%s6046_s21 + $0x8] sm:$0xff]  ;;  %v464_v27 = vld [vmem:[%s6046_s21 + $0x58] sm:$0xff]  ;;  %s5852_s25 = smov 64   ;;  %s5853_s24 = smov 32  }
  0x54   : > { %646 = vmatpush.bf16.msra.mxu0 %v4840_v5  ;;  %5084 = vmatpush.bf16.msra.mxu1 %v4840_v5  ;;  %v6068_v28 = vpack.c.bf16 %v454_v25, %v453_v23  ;;  %v6070_v29 = vpack.c.bf16 %v464_v27, %v463_v26  ;;  %v5016_v30 = vld [vmem:[#allocation6 + $0xac] sm:$0xf]  ;;  %v4853_v31 = vld [vmem:[#allocation6 + $0xb4] sm:$0xf0]  ;;  %v5013_v32 = vld [vmem:[#allocation6 + $0x94] sm:$0xf] }
  0x55   : > { %v4856_v33 = vor.u32 %v5016_v30, %v4853_v31  ;;  %v4841_v34 = vld [vmem:[#allocation6 + $0x9c] sm:$0xf0]  ;;  %v455_v36 = vld [vmem:[%s6046_s21 + $0x10] sm:$0xff]  ;;  %v456_v37 = vld [vmem:[%s6046_s21 + $0x18] sm:$0xff]  ;;  %s8332_s20 = scalar_lea.vmem [#allocation15], %s4757_s3  ;;  %s5027_s19 = sshll.u32 %s5930_s16, 7 }
  0x56   : > { %v4844_v35 = vor.u32 %v5013_v32, %v4841_v34  ;;  %v465_v38 = vld [vmem:[%s6046_s21 + $0x60] sm:$0xff]  ;;  %v466_v39 = vld [vmem:[%s6046_s21 + $0x68] sm:$0xff]  ;;  %v6078_v40 = vpack.c.bf16 %v456_v37, %v455_v36  ;;  %v5010_v42 = vld [vmem:[#allocation6 + $0x7c] sm:$0xf]  ;;  %s4610_s5 = scalar_lea.hbm %s8436_s9, %s5027_s19  ;;  %s4599_s16 = scalar_lea.sflag [#allocation5], %s6040_s1 }
  0x57   : > { %v6080_v41 = vpack.c.bf16 %v466_v39, %v465_v38  ;;  %v4829_v43 = vld [vmem:[#allocation6 + $0x84] sm:$0xf0]  ;;  %v5007_v45 = vld [vmem:[#allocation6 + $0x64] sm:$0xf]  ;;  %v4817_v46 = vld [vmem:[#allocation6 + $0x6c] sm:$0xf0] }
  0x58   : > { %647 = vmatpush.bf16.msra.mxu0 %v4828_v8  ;;  %5085 = vmatpush.bf16.msra.mxu1 %v4828_v8  ;;  %v4832_v44 = vor.u32 %v5010_v42, %v4829_v43  ;;  %v4820_v47 = vor.u32 %v5007_v45, %v4817_v46  ;;  %v5004_v48 = vld [vmem:[#allocation6 + $0x4c] sm:$0xf]  ;;  %v4805_v49 = vld [vmem:[#allocation6 + $0x54] sm:$0xf0]  ;;  %v5001_v51 = vld [vmem:[#allocation6 + $0x34] sm:$0xf] }
  0x59   : > { %v4808_v50 = vor.u32 %v5004_v48, %v4805_v49  ;;  %v4793_v52 = vld [vmem:[#allocation6 + $0x3c] sm:$0xf0]  ;;  %v458_v54 = vld [vmem:[%s6046_s21 + $0x28] sm:$0xff]  ;;  %v467_v55 = vld [vmem:[%s6046_s21 + $0x70] sm:$0xff]  ;;  %s4613_s2 = sshll.u32 %s4610_s5, 4  ;;  %s4614_s2 = int_to_ptr.hbm [resolvable:$true] %s4613_s2 }
  0x5a   : > { %v457_v53 = vld [vmem:[%s6046_s21 + $0x20] sm:$0xff]  ;;  %v468_v56 = vld [vmem:[%s6046_s21 + $0x78] sm:$0xff]  ;;  %v4796_v57 = vor.u32 %v5001_v51, %v4793_v52  ;;  %v4781_v61 = vld [vmem:[#allocation6 + $0x24] sm:$0xf0]  ;;  %s5773_s17 = sshra.s32 %s4614_s2, 4  ;;  %s5774_s17 = int_to_ptr.hbm [resolvable:$true] %s5773_s17 }
  0x5b   : > { %v6088_v58 = vpack.c.bf16 %v458_v54, %v457_v53  ;;  %v6090_v59 = vpack.c.bf16 %v468_v56, %v467_v55  ;;  %v4998_v60 = vld [vmem:[#allocation6 + $0x1c] sm:$0xf]  ;;  %v4995_v63 = vld [vmem:[#allocation6 + $0x4] sm:$0xf]  ;;  %v4769_v0 = vld [vmem:[#allocation6 + $0xc] sm:$0xf0]  ;;  %p5780_p12 = scmp.lt.s32.totalorder %s5774_s17, %s8436_s9 }
  0x5c   : > { %648 = vmatpush.bf16.msra.mxu0 %v4816_v11  ;;  %5086 = vmatpush.bf16.msra.mxu1 %v4816_v11  ;;  %v4784_v62 = vor.u32 %v4998_v60, %v4781_v61  ;;  %v823_v1 = vld [vmem:[#allocation9 + $0x78] sm:$0xff]  ;;  %v4772_v2 = vor.u32 %v4995_v63, %v4769_v0  ;;  %v822_v3 = vld [vmem:[#allocation9 + $0x70] sm:$0xff]  ;;  %v821_v4 = vld [vmem:[#allocation9 + $0x68] sm:$0xff] }
  0x5d   : > { %5091 = vmatpush.msra.mxu3 %v823_v1  ;;  %v459_v5 = vld [vmem:[%s6046_s21 + $0x30] sm:$0xff]  ;;  %v460_v6 = vld [vmem:[%s6046_s21 + $0x38] sm:$0xff]  ;;  %v820_v8 = vld [vmem:[#allocation9 + $0x60] sm:$0xff] }
  0x5e   : > { %v6096_v7 = vpack.c.bf16 %v460_v6, %v459_v5  ;;  %v819_v9 = vld [vmem:[#allocation9 + $0x58] sm:$0xff]  ;;  %v818_v10 = vld [vmem:[#allocation9 + $0x50] sm:$0xff]  ;;  %v817_v11 = vld [vmem:[#allocation9 + $0x48] sm:$0xff] }
  0x5f   : > { %5092 = vmatpush.msra.mxu3 %v822_v3  ;;  %v816_v12 = vld [vmem:[#allocation9 + $0x40] sm:$0xff]  ;;  %v815_v13 = vld [vmem:[#allocation9 + $0x38] sm:$0xff]  ;;  %v814_v16 = vld [vmem:[#allocation9 + $0x30] sm:$0xff] }
  0x60   : > { %649 = vmatpush.bf16.msra.mxu0 %v4804_v14  ;;  %5087 = vmatpush.bf16.msra.mxu1 %v4804_v14  ;;  %v461_v14 = vld [vmem:[%s6046_s21 + $0x40] sm:$0xff]  ;;  %v462_v15 = vld [vmem:[%s6046_s21 + $0x48] sm:$0xff]  ;;  %v810_v21 = vld [vmem:[#allocation9 + $0x10] sm:$0xff]  ;;  %s4611_s21 = sshll.u32 %s8332_s20, 4  ;;  %s4612_s21 = int_to_ptr.vmem [resolvable:$true] %s4611_s21 }
  0x61   : > { %5093 = vmatpush.msra.mxu3 %v821_v4  ;;  %v813_v18 = vld [vmem:[#allocation9 + $0x28] sm:$0xff]  ;;  %v812_v19 = vld [vmem:[#allocation9 + $0x20] sm:$0xff] }
  0x62   : > { %v809_v22 = vld [vmem:[#allocation9 + $0x8] sm:$0xff]  ;;  %v808_v23 = vld [vmem:[#allocation9] sm:$0xff] }
  0x63   : > { %5094 = vmatpush.msra.mxu3 %v820_v8 }
  0x64   : > { %650 = vmatpush.bf16.msra.mxu0 %v4792_v17  ;;  %5088 = vmatpush.bf16.msra.mxu1 %v4792_v17  ;;  %v6102_v17 = vpack.c.bf16 %v462_v15, %v461_v14  ;;  %v5018_v14 = vld [vmem:[#allocation6 + $0xb8] sm:$0xf0]  ;;  %v4847_v15 = vld [vmem:[#allocation6 + $0x98] sm:$0xf] }
  0x65   : > { %5095 = vmatpush.msra.mxu3 %v819_v9 }
  0x67   : > { %5096 = vmatpush.msra.mxu3 %v818_v10 }
  0x68   : > { %651 = vmatpush.bf16.msra.mxu0 %v4780_v20  ;;  %5089 = vmatpush.bf16.msra.mxu1 %v4780_v20  ;;  %v811_v20 = vld [vmem:[#allocation9 + $0x18] sm:$0xff] }
  0x69   : > { %5097 = vmatpush.msra.mxu3 %v817_v11 }
  0x6b   : > { %5098 = vmatpush.msra.mxu3 %v816_v12 }
  0x6c   : > { %652 = vmatpush.bf16.msra.mxu0 %v4768_v24  ;;  %5090 = vmatpush.bf16.msra.mxu1 %v4768_v24  ;;  %v6109_v24 = vld [vmem:[#allocation8] sm:$0x7] }
  0x6d   : > { %5099 = vmatpush.msra.mxu3 %v815_v13  ;;  %v6112_v25 = vperm.slane %v6109_v24, 0 }
  0x6f   : > { %653 = vmatmul.bf16.vlgmr.msra.gmra.mxu0 %v6068_v28  ;;  %678 = vmatmul.bf16.vlgmr.msra.gmra.mxu1 %v6070_v29 }
  0x70   : > { %694 = vmatpush.bf16.msrb.mxu1 %v4856_v33  ;;  %824 = vmatpush.msrb.mxu0 %v823_v1 }
  0x71   : > { %5100 = vmatpush.msra.mxu3 %v814_v16 }
  0x72   : > { %825 = vmatpush.msrb.mxu0 %v822_v3 }
  0x73   : > { %5101 = vmatpush.msra.mxu3 %v813_v18 }
  0x74   : > { %695 = vmatpush.bf16.msrb.mxu1 %v4844_v35  ;;  %826 = vmatpush.msrb.mxu0 %v821_v4 }
  0x75   : > { %5102 = vmatpush.msra.mxu3 %v812_v19 }
  0x76   : > { %827 = vmatpush.msrb.mxu0 %v820_v8 }
  0x77   : > { %5103 = vmatpush.msra.mxu3 %v811_v20 }
  0x78   : > { %696 = vmatpush.bf16.msrb.mxu1 %v4832_v44  ;;  %828 = vmatpush.msrb.mxu0 %v819_v9 }
  0x79   : > { %5104 = vmatpush.msra.mxu3 %v810_v21 }
  0x7a   : > { %829 = vmatpush.msrb.mxu0 %v818_v10 }
  0x7b   : > { %5105 = vmatpush.msra.mxu3 %v809_v22 }
  0x7c   : > { %697 = vmatpush.bf16.msrb.mxu1 %v4820_v47  ;;  %830 = vmatpush.msrb.mxu0 %v817_v11 }
  0x7d   : > { %5106 = vmatpush.msra.mxu3 %v808_v23 }
  0x7e   : > { %831 = vmatpush.msrb.mxu0 %v816_v12 }
  0x7f   : > { %658 = vmatmul.bf16.gmra.mxu0 %v6078_v40  ;;  %683 = vmatmul.bf16.gmra.mxu1 %v6080_v41 }
  0x80   : > { %698 = vmatpush.bf16.msrb.mxu1 %v4808_v50  ;;  %832 = vmatpush.msrb.mxu0 %v815_v13 }
  0x82   : > { %833 = vmatpush.msrb.mxu0 %v814_v16 }
  0x84   : > { %699 = vmatpush.bf16.msrb.mxu1 %v4796_v57  ;;  %834 = vmatpush.msrb.mxu0 %v813_v18 }
  0x86   : > { %835 = vmatpush.msrb.mxu0 %v812_v19 }
  0x88   : > { %700 = vmatpush.bf16.msrb.mxu1 %v4784_v62  ;;  %836 = vmatpush.msrb.mxu0 %v811_v20 }
  0x8a   : > { %837 = vmatpush.msrb.mxu0 %v810_v21 }
  0x8c   : > { %701 = vmatpush.bf16.msrb.mxu1 %v4772_v2  ;;  %838 = vmatpush.msrb.mxu0 %v809_v22 }
  0x8e   : > { %839 = vmatpush.msrb.mxu0 %v808_v23 }
  0x8f   : > { %663 = vmatmul.bf16.gmra.mxu0 %v6088_v58  ;;  %688 = vmatmul.bf16.gmra.mxu1 %v6090_v59 }
  0x90   : > { %905 = vmatpush.msra.mxu0 %v823_v1 }
  0x92   : > { %906 = vmatpush.msra.mxu0 %v822_v3 }
  0x94   : > { %907 = vmatpush.msra.mxu0 %v821_v4 }
  0x96   : > { %908 = vmatpush.msra.mxu0 %v820_v8 }
  0x98   : > { %909 = vmatpush.msra.mxu0 %v819_v9 }
  0x9a   : > { %910 = vmatpush.msra.mxu0 %v818_v10 }
  0x9c   : > { %911 = vmatpush.msra.mxu0 %v817_v11 }
  0x9e   : > { %912 = vmatpush.msra.mxu0 %v816_v12 }
  0x9f   : > { %668 = vmatmul.bf16.gmra.mxu0 %v6096_v7  ;;  %702 = vmatmul.bf16.vlgmr.msrb.gmra.mxu1 %v6068_v28 }
  0xa0   : > { %913 = vmatpush.msra.mxu0 %v815_v13  ;;  %v4859_v13 = vld [vmem:[#allocation6 + $0xb0] sm:$0xf] }
  0xa2   : > { %914 = vmatpush.msra.mxu0 %v814_v16  ;;  %v4860_v16 = vor.u32 %v5018_v14, %v4859_v13 }
  0xa4   : > { %915 = vmatpush.msra.mxu0 %v813_v18  ;;  %v5015_v18 = vld [vmem:[#allocation6 + $0xa0] sm:$0xf0]  ;;  %743 = vmatpush.bf16.msra.mxu2 %v4860_v16 }
  0xa6   : > { %916 = vmatpush.msra.mxu0 %v812_v19 }
  0xa8   : > { %917 = vmatpush.msra.mxu0 %v811_v20  ;;  %v4848_v20 = vor.u32 %v5015_v18, %v4847_v15 }
  0xaa   : > { %918 = vmatpush.msra.mxu0 %v810_v21  ;;  %744 = vmatpush.bf16.msra.mxu2 %v4848_v20 }
  0xac   : > { %919 = vmatpush.msra.mxu0 %v809_v22 }
  0xae   : > { %920 = vmatpush.msra.mxu0 %v808_v23 }
  0xaf   : > { %673 = vmatmul.bf16.gmra.mxu0 %v6102_v17  ;;  %707 = vmatmul.bf16.gmra.mxu1 %v6078_v40 }
  0xbf   : > { %712 = vmatmul.bf16.gmra.mxu1 %v6088_v58 }
  0xcf   : > { %717 = vmatmul.bf16.gmra.mxu1 %v6096_v7 }
  0xdf   : > { %722 = vmatmul.bf16.gmra.mxu1 %v6102_v17 }
  0xec   : > { %v654_v26 = vpop.f32.mrf.mxu0  ;;  %v679_v27 = vpop.f32.mrf.mxu1 }
  0xed   : > { %v6115_v30 = vadd.f32 %v654_v26, %v6112_v25  ;;  %v6118_v31 = vadd.f32 %v679_v27, %v6112_v25  ;;  %v4835_v26 = vld [vmem:[#allocation6 + $0x80] sm:$0xf]  ;;  %v5012_v27 = vld [vmem:[#allocation6 + $0x88] sm:$0xf0] }
  0xef   : > { %v792_v32 = vmul.f32 %v6115_v30, %v6115_v30  ;;  %v802_v33 = vmul.f32 %v6118_v31, %v6118_v31  ;;  %727 = vmatmul.bf16.gmra.mxu1 %v6070_v29 }
  0xf1   : > { %840 = vmatmul.f32.vlgmr.msrb.gmra.mxu0 %v792_v32  ;;  %870 = vmatmul.f32.vlgmr.msra.gmra.mxu3 %v802_v33  ;;  %v4823_v32 = vld [vmem:[#allocation6 + $0x68] sm:$0xf]  ;;  %v4836_v33 = vor.u32 %v5012_v27, %v4835_v26 }
  0xf3   : > { %745 = vmatpush.bf16.msra.mxu2 %v4836_v33 }
  0xf4   : > { %v656_v34 = vpop.f32.mrf.mxu0  ;;  %v681_v35 = vpop.f32.mrf.mxu1 }
  0xf5   : > { %v6126_v36 = vadd.f32 %v656_v34, %v6112_v25  ;;  %v6129_v37 = vadd.f32 %v681_v35, %v6112_v25  ;;  %v5009_v34 = vld [vmem:[#allocation6 + $0x70] sm:$0xf0] }
  0xf7   : > { %v793_v38 = vmul.f32 %v6126_v36, %v6126_v36  ;;  %v803_v39 = vmul.f32 %v6129_v37, %v6129_v37 }
  0xf9   : > { %843 = vmatmul.f32.gmra.mxu0 %v793_v38  ;;  %873 = vmatmul.f32.gmra.mxu3 %v803_v39  ;;  %v4824_v38 = vor.u32 %v5009_v34, %v4823_v32 }
  0xfb   : > { %746 = vmatpush.bf16.msra.mxu2 %v4824_v38 }
  0xfc   : > { %v659_v42 = vpop.f32.mrf.mxu0  ;;  %v684_v43 = vpop.f32.mrf.mxu1 }
  0xfd   : > { %v6136_v44 = vadd.f32 %v659_v42, %v6112_v25  ;;  %v6139_v45 = vadd.f32 %v684_v43, %v6112_v25  ;;  %v6196_v42 = vperm.slane %v6109_v24, 1 }
  0xff   : > { %v794_v46 = vmul.f32 %v6136_v44, %v6136_v44  ;;  %v804_v47 = vmul.f32 %v6139_v45, %v6139_v45  ;;  %732 = vmatmul.bf16.gmra.mxu1 %v6080_v41 }
 0x101   : > { %846 = vmatmul.f32.gmra.mxu0 %v794_v46  ;;  %876 = vmatmul.f32.gmra.mxu3 %v804_v47 }
 0x104   : > { %v661_v48 = vpop.f32.mrf.mxu0  ;;  %v686_v49 = vpop.f32.mrf.mxu1 }
 0x105   : > { %v6147_v50 = vadd.f32 %v661_v48, %v6112_v25  ;;  %v6150_v51 = vadd.f32 %v686_v49, %v6112_v25  ;;  %v4811_v48 = vld [vmem:[#allocation6 + $0x50] sm:$0xf]  ;;  %v5006_v49 = vld [vmem:[#allocation6 + $0x58] sm:$0xf0] }
 0x107   : > { %v795_v52 = vmul.f32 %v6147_v50, %v6147_v50  ;;  %v805_v53 = vmul.f32 %v6150_v51, %v6150_v51 }
 0x109   : > { %849 = vmatmul.f32.gmra.mxu0 %v795_v52  ;;  %879 = vmatmul.f32.gmra.mxu3 %v805_v53  ;;  %v4799_v52 = vld [vmem:[#allocation6 + $0x38] sm:$0xf]  ;;  %v4812_v53 = vor.u32 %v5006_v49, %v4811_v48 }
 0x10b   : > { %747 = vmatpush.bf16.msra.mxu2 %v4812_v53 }
 0x10c   : > { %v664_v54 = vpop.f32.mrf.mxu0  ;;  %v689_v55 = vpop.f32.mrf.mxu1 }
 0x10d   : > { %v6157_v56 = vadd.f32 %v664_v54, %v6112_v25  ;;  %v6160_v57 = vadd.f32 %v689_v55, %v6112_v25  ;;  %v5003_v54 = vld [vmem:[#allocation6 + $0x40] sm:$0xf0]  ;;  %v4787_v55 = vld [vmem:[#allocation6 + $0x20] sm:$0xf] }
 0x10f   : > { %v796_v60 = vmul.f32 %v6157_v56, %v6157_v56  ;;  %v806_v61 = vmul.f32 %v6160_v57, %v6160_v57  ;;  %737 = vmatmul.bf16.gmra.mxu1 %v6090_v59 }
 0x111   : > { %852 = vmatmul.f32.gmra.mxu0 %v796_v60  ;;  %882 = vmatmul.f32.gmra.mxu3 %v806_v61  ;;  %v5000_v60 = vld [vmem:[#allocation6 + $0x28] sm:$0xf0]  ;;  %v4775_v61 = vld [vmem:[#allocation6 + $0x8] sm:$0xf] }
 0x114   : > { %v666_v62 = vpop.f32.mrf.mxu0  ;;  %v691_v63 = vpop.f32.mrf.mxu1 }
 0x115   : > { %v6168_v0 = vadd.f32 %v666_v62, %v6112_v25  ;;  %v6171_v1 = vadd.f32 %v691_v63, %v6112_v25  ;;  %v4788_v63 = vor.u32 %v5000_v60, %v4787_v55 }
 0x117   : > { %v797_v2 = vmul.f32 %v6168_v0, %v6168_v0  ;;  %v807_v3 = vmul.f32 %v6171_v1, %v6171_v1 }
 0x119   : > { %855 = vmatmul.f32.gmra.mxu0 %v797_v2  ;;  %885 = vmatmul.f32.gmra.mxu3 %v807_v3  ;;  %v4997_v2 = vld [vmem:[#allocation6 + $0x10] sm:$0xf0] }
 0x11c   : > { %v669_v4 = vpop.f32.mrf.mxu0  ;;  %v703_v5 = vpop.f32.mrf.mxu1 }
 0x11d   : > { %v6178_v6 = vadd.f32 %v669_v4, %v6112_v25  ;;  %v6201_v47 = vadd.f32 %v703_v5, %v6196_v42  ;;  %v4776_v4 = vor.u32 %v4997_v2, %v4775_v61 }
 0x11f   : > { %v798_v8 = vmul.f32 %v6178_v6, %v6178_v6  ;;  %v889_v24 = vmul.f32 %v6201_v47, %v6201_v47 }
 0x121   : > { %858 = vmatmul.f32.gmra.mxu0 %v798_v8 }
 0x124   : > { %v671_v9 = vpop.f32.mrf.mxu0  ;;  %v705_v10 = vpop.f32.mrf.mxu1 }
 0x125   : > { %v6183_v11 = vadd.f32 %v671_v9, %v6112_v25  ;;  %v6206_v3 = vadd.f32 %v705_v10, %v6196_v42 }
 0x127   : > { %v799_v12 = vmul.f32 %v6183_v11, %v6183_v11  ;;  %v890_v5 = vmul.f32 %v6206_v3, %v6206_v3 }
 0x129   : > { %861 = vmatmul.f32.gmra.mxu0 %v799_v12 }
 0x12c   : > { %v674_v19 = vpop.f32.mrf.mxu0  ;;  %v708_v22 = vpop.f32.mrf.mxu1 }
 0x12d   : > { %v6188_v21 = vadd.f32 %v674_v19, %v6112_v25  ;;  %v6211_v8 = vadd.f32 %v708_v22, %v6196_v42 }
 0x12f   : > { %v800_v23 = vmul.f32 %v6188_v21, %v6188_v21  ;;  %v891_v12 = vmul.f32 %v6211_v8, %v6211_v8 }
 0x131   : > { %864 = vmatmul.f32.gmra.mxu0 %v800_v23 }
 0x134   : > { %v676_v35 = vpop.f32.mrf.mxu0  ;;  %v710_v46 = vpop.f32.mrf.mxu1 }
 0x135   : > { %v6193_v39 = vadd.f32 %v676_v35, %v6112_v25  ;;  %v4800_v25 = vor.u32 %v5003_v54, %v4799_v52  ;;  %v6217_v10 = vadd.f32 %v710_v46, %v6196_v42 }
 0x137   : > { %v801_v43 = vmul.f32 %v6193_v39, %v6193_v39  ;;  %748 = vmatpush.bf16.msra.mxu2 %v4800_v25  ;;  %v892_v14 = vmul.f32 %v6217_v10, %v6217_v10 }
 0x139   : > { %867 = vmatmul.f32.gmra.mxu0 %v801_v43 }
 0x13b   : > { %749 = vmatpush.bf16.msra.mxu2 %v4788_v63 }
 0x13c   : > { %v713_v62 = vpop.f32.mrf.mxu1 }
 0x13d   : > { %v6222_v15 = vadd.f32 %v713_v62, %v6196_v42 }
 0x13f   : > { %750 = vmatpush.bf16.msra.mxu2 %v4776_v4 }
 0x141   : > { %921 = vmatmul.f32.vlgmr.msra.gmra.mxu0 %v889_v24 }
 0x142   : > { %751 = vmatmul.bf16.vlgmr.msra.gmra.mxu2 %v6068_v28  ;;  %v893_v28 = vmul.f32 %v6222_v15, %v6222_v15 }
 0x144   : > { %v715_v9 = vpop.f32.mrf.mxu1 }
 0x145   : > { %v6228_v18 = vadd.f32 %v715_v9, %v6196_v42 }
 0x147   : > { %v894_v19 = vmul.f32 %v6228_v18, %v6228_v18 }
 0x149   : > { %924 = vmatmul.f32.gmra.mxu0 %v890_v5  ;;  %v6259_v5 = vld [vmem:[%s8431_s4] ss:$0 sm:$0xff] }
 0x14c   : > { %v718_v13 = vpop.f32.mrf.mxu1 }
 0x14d   : > { %v6233_v22 = vadd.f32 %v718_v13, %v6196_v42 }
 0x151   : > { %927 = vmatmul.f32.gmra.mxu0 %v891_v12 }
 0x152   : > { %756 = vmatmul.bf16.gmra.mxu2 %v6078_v40  ;;  %v895_v40 = vmul.f32 %v6233_v22, %v6233_v22 }
 0x154   : > { %v720_v16 = vpop.f32.mrf.mxu1 }
 0x155   : > { %v6239_v32 = vadd.f32 %v720_v16, %v6196_v42 }
 0x157   : > { %v896_v35 = vmul.f32 %v6239_v32, %v6239_v32 }
 0x159   : > { %930 = vmatmul.f32.gmra.mxu0 %v892_v14 }
 0x15c   : > { %v723_v20 = vpop.f32.mrf.mxu1 }
 0x161   : > { %933 = vmatmul.f32.gmra.mxu0 %v893_v28 }
 0x162   : > { %761 = vmatmul.bf16.gmra.mxu2 %v6088_v58  ;;  %v6244_v58 = vadd.f32 %v723_v20, %v6196_v42 }
 0x164   : > { %v725_v27 = vpop.f32.mrf.mxu1  ;;  %v897_v52 = vmul.f32 %v6244_v58, %v6244_v58 }
 0x165   : > { %v6252_v55 = vadd.f32 %v725_v27, %v6196_v42 }
 0x169   : > { %936 = vmatmul.f32.gmra.mxu0 %v894_v19 }
 0x16c   : > { %v728_v49 = vpop.f32.mrf.mxu1 }
 0x16d   : > { %v6262_v13 = vadd.f32 %v728_v49, %v6196_v42 }
 0x16e   : > { %v841_v23 = vpop.f32.mrf.mxu0 }
 0x16f   : > { %v971_v26 = vmax.f32 %v841_v23, 1e-24  ;;  %v899_v19 = vmul.f32 %v6262_v13, %v6262_v13 }
 0x171   : > { %5227 = vrsqrt.f32 %v971_v26  ;;  %939 = vmatmul.f32.gmra.mxu0 %v895_v40  ;;  %vm993_vm1 = vweird.f32 %v971_v26 }
 0x172   : > { %766 = vmatmul.bf16.gmra.mxu2 %v6096_v7  ;;  %v898_v7 = vmul.f32 %v6252_v55, %v6252_v55 }
 0x174   : > { %v730_v4 = vpop.f32.mrf.mxu1 }
 0x175   : > { %v6274_v27 = vadd.f32 %v730_v4, %v6196_v42 }
 0x176   : > { %v844_v33 = vpop.f32.mrf.mxu0 }
 0x177   : > { %v5228_v34 = vpop.eup %5227  ;;  %v972_v38 = vmax.f32 %v844_v33, 1e-24 }
 0x178   : > { %v988_v43 = vmul.f32 %v5228_v34, %v971_v26  ;;  %vm994_vm0 = vweird.f32 %v5228_v34 }
 0x179   : > { %5229 = vrsqrt.f32 %v972_v38  ;;  %942 = vmatmul.f32.gmra.mxu0 %v896_v35  ;;  %vm995_vm3 = vmor %vm993_vm1, %vm994_vm0  ;;  %vm1003_vm4 = vweird.f32 %v972_v38  ;;  %v900_v35 = vmul.f32 %v6274_v27, %v6274_v27  ;;  %vm1468_vm0 = vcmask 261120  }
 0x17a   : > { %v989_v46 = vmul.f32 %v5228_v34, %v988_v43 }
 0x17c   : > { %v990_v48 = vmul.f32 0.5, %v989_v46  ;;  %v733_v26 = vpop.f32.mrf.mxu1 }
 0x17e   : > { %v6249_v53 = vpop.f32.mrf.mxu0  ;;  %v991_v25 = vsub.f32 1.5, %v990_v48 }
 0x17f   : > { %v5230_v54 = vpop.eup %5229 }
 0x180   : > { %v998_v24 = vmul.f32 %v5230_v54, %v972_v38  ;;  %v992_v61 = vmul.f32 %v5228_v34, %v991_v25  ;;  %vm1004_vm2 = vweird.f32 %v5230_v54 }
 0x181   : > { %945 = vmatmul.f32.gmra.mxu0 %v897_v52  ;;  %vm1005_vm5 = vmor %vm1003_vm4, %vm1004_vm2 }
 0x182   : > { %v999_v60 = vmul.f32 %v5230_v54, %v998_v24  ;;  %v996_v9 = vsel %vm995_vm3, %v5228_v34, %v992_v61  ;;  %771 = vmatmul.bf16.gmra.mxu2 %v6102_v17 }
 0x183   : > { %v1150_v28 = vmul.f32 %v6259_v5, %v996_v9 }
 0x184   : > { %v1000_v62 = vmul.f32 0.5, %v999_v60 }
 0x185   : > { %v1166_v23 = vmul.f32 %v1150_v28, %v6115_v30  ;;  %v735_v30 = vpop.f32.mrf.mxu1 }
 0x186   : > { %v1001_v63 = vsub.f32 1.5, %v1000_v62  ;;  %v850_v2 = vpop.f32.mrf.mxu0  ;;  %v6291_v52 = vadd.f32 %v735_v30, %v6196_v42 }
 0x187   : > { %v1182_v34 = vpack.c.bf16 %v1166_v23, %v1166_v23 }
 0x188   : > { %v1002_v12 = vmul.f32 %v5230_v54, %v1001_v63  ;;  %v902_v25 = vmul.f32 %v6291_v52, %v6291_v52 }
 0x189   : > { %948 = vmatmul.f32.gmra.mxu0 %v898_v7  ;;  %v1460_v43 = vunpack.c.l.b16 %v1182_v34 }
 0x18a   : > { %v1006_v14 = vsel %vm1005_vm5, %v5230_v54, %v1002_v12  ;;  %v6314_v12 = vmax.f32 %v6249_v53, 1e-24 }
 0x18b   : > { %v1151_v16 = vmul.f32 %v6259_v5, %v1006_v14  ;;  %v6316_v14 = vmax.f32 %v850_v2, 1e-24 }
 0x18c   : > { %vm1013_vm12 = vweird.f32 %v6314_v12 }
 0x18d   : > { %v1167_v40 = vmul.f32 %v1151_v16, %v6126_v36  ;;  %v6281_v36 = vadd.f32 %v733_v26, %v6196_v42  ;;  %v738_v54 = vpop.f32.mrf.mxu1  ;;  %vm1023_vm2 = vweird.f32 %v6316_v14 }
 0x18e   : > { %v6269_v20 = vpop.f32.mrf.mxu0  ;;  %v6298_v60 = vadd.f32 %v738_v54, %v6196_v42 }
 0x18f   : > { %v1183_v33 = vpack.c.bf16 %v1167_v40, %v1167_v40  ;;  %v901_v48 = vmul.f32 %v6281_v36, %v6281_v36 }
 0x191   : > { %951 = vmatmul.f32.gmra.mxu0 %v899_v19  ;;  %v1461_v17 = vunpack.c.l.b16 %v1183_v33 }
 0x192   : > { %776 = vmatmul.bf16.gmra.mxu2 %v6070_v29  ;;  %v903_v29 = vmul.f32 %v6298_v60, %v6298_v60 }
 0x193   : > { %v6278_v46 = vpack.c.b16 %v1461_v17, %v1460_v43 }
 0x195   : > { %8492 = vst [vmem:[#allocation21_spill] sm:$0xff] %v6278_v46  ;;  %2298 = vrot.lane.b32.xlu1 %v6278_v46, %s5851_s28  ;;  %v740_v62 = vpop.f32.mrf.mxu1 }
 0x196   : > { %v856_v38 = vpop.f32.mrf.mxu0  ;;  %v6306_v7 = vadd.f32 %v740_v62, %v6196_v42 }
 0x197   : > { %v6336_v62 = vmax.f32 %v856_v38, 1e-24 }
 0x198   : > { %v904_v63 = vmul.f32 %v6306_v7, %v6306_v7 }
 0x199   : > { %954 = vmatmul.f32.gmra.mxu0 %v900_v35 }
 0x19e   : > { %v6288_v49 = vpop.f32.mrf.mxu0 }
 0x1a1   : > { %957 = vmatmul.f32.gmra.mxu0 %v901_v48 }
 0x1a2   : > { %781 = vmatmul.bf16.gmra.mxu2 %v6080_v41 }
 0x1a6   : > { %v6295_v24 = vpop.f32.mrf.mxu0 }
 0x1a9   : > { %960 = vmatmul.f32.gmra.mxu0 %v902_v25 }
 0x1ae   : > { %v6303_v61 = vpop.f32.mrf.mxu0 }
 0x1b1   : > { %963 = vmatmul.f32.gmra.mxu0 %v903_v29  ;;  %v6334_v29 = vmax.f32 %v6269_v20, 1e-24 }
 0x1b2   : > { %786 = vmatmul.bf16.gmra.mxu2 %v6090_v59 }
 0x1b6   : > { %v6310_v4 = vpop.f32.mrf.mxu0 }
 0x1b9   : > { %966 = vmatmul.f32.gmra.mxu0 %v904_v63 }
 0x1be   : > { %v922_v9 = vpop.f32.mrf.mxu0 }
 0x1bf   : > { %v1198_v41 = vmax.f32 %v922_v9, 1e-24 }
 0x1c1   : > { %5231 = vrsqrt.f32 %v1198_v41  ;;  %vm1220_vm7 = vweird.f32 %v1198_v41 }
 0x1c2   : > { %5233 = vrsqrt.f32 %v6314_v12 }
 0x1c3   : > { %5235 = vrsqrt.f32 %v6316_v14 }
 0x1c6   : > { %v925_v42 = vpop.f32.mrf.mxu0 }
 0x1c7   : > { %v5232_v28 = vpop.eup %5231  ;;  %v1199_v16 = vmax.f32 %v925_v42, 1e-24  ;;  %v6338_v42 = vpop.f32.mrf.mxu2 }
 0x1c8   : > { %v1215_v19 = vmul.f32 %v5232_v28, %v1198_v41  ;;  %v6320_v23 = vpop.eup %5233  ;;  %vm1221_vm6 = vweird.f32 %v5232_v28 }
 0x1c9   : > { %5237 = vrsqrt.f32 %v1199_v16  ;;  %v6322_v59 = vpop.eup %5235  ;;  %v1008_v53 = vmul.f32 %v6320_v23, %v6314_v12  ;;  %vm1222_vm8 = vmor %vm1220_vm7, %vm1221_vm6  ;;  %vm1230_vm10 = vweird.f32 %v1199_v16  ;;  %vm1014_vm13 = vweird.f32 %v6320_v23 }
 0x1ca   : > { %v1216_v40 = vmul.f32 %v5232_v28, %v1215_v19  ;;  %v1018_v35 = vmul.f32 %v6322_v59, %v6316_v14  ;;  %vm1024_vm14 = vweird.f32 %v6322_v59  ;;  %vm6370_vm1 = vmor %vm1013_vm12, %vm1014_vm13  ;;  %vm1033_vm13 = vweird.f32 %v6334_v29 }
 0x1cb   : > { %v1009_v48 = vmul.f32 %v6320_v23, %v1008_v53  ;;  %vm6385_vm3 = vmor %vm1023_vm2, %vm1024_vm14 }
 0x1cc   : > { %v1217_v26 = vmul.f32 0.5, %v1216_v40  ;;  %v1019_v25 = vmul.f32 %v6322_v59, %v1018_v35 }
 0x1cd   : > { %v1010_v19 = vmul.f32 0.5, %v1009_v48 }
 0x1ce   : > { %v1218_v2 = vsub.f32 1.5, %v1217_v26  ;;  %v928_v33 = vpop.f32.mrf.mxu0  ;;  %v1020_v41 = vmul.f32 0.5, %v1019_v25 }
 0x1cf   : > { %v5238_v34 = vpop.eup %5237  ;;  %v6328_v17 = vmax.f32 %v928_v33, 1e-24  ;;  %v1011_v33 = vsub.f32 1.5, %v1010_v19  ;;  %v6352_v25 = vpop.f32.mrf.mxu2 }
 0x1d0   : > { %v1219_v43 = vmul.f32 %v5232_v28, %v1218_v2  ;;  %v1225_v30 = vmul.f32 %v5238_v34, %v1199_v16  ;;  %vm1231_vm9 = vweird.f32 %v5238_v34 }
 0x1d1   : > { %5239 = vrsqrt.f32 %v6328_v17  ;;  %vm1232_vm11 = vmor %vm1230_vm10, %vm1231_vm9  ;;  %vm1240_vm4 = vweird.f32 %v6328_v17 }
 0x1d2   : > { %v1226_v54 = vmul.f32 %v5238_v34, %v1225_v30  ;;  %v1223_v63 = vsel %vm1222_vm8, %v5232_v28, %v1219_v43  ;;  %5241 = vrsqrt.f32 %v6334_v29  ;;  %v1021_v30 = vsub.f32 1.5, %v1020_v41 }
 0x1d3   : > { %v1374_v53 = vmul.f32 %v1223_v63, %v6201_v47  ;;  %5243 = vrsqrt.f32 %v6336_v62 }
 0x1d4   : > { %v1227_v9 = vmul.f32 0.5, %v1226_v54 }
 0x1d5   : > { %v1390_v48 = vpack.c.bf16 %v1374_v53, %v1374_v53 }
 0x1d6   : > { %v1228_v40 = vsub.f32 1.5, %v1227_v9  ;;  %v931_v26 = vpop.f32.mrf.mxu0 }
 0x1d7   : > { %v6340_v2 = vpop.eup %5239  ;;  %v6344_v20 = vmax.f32 %v931_v26, 1e-24  ;;  %v1465_v41 = vunpack.c.l.b16 %v1390_v48 }
 0x1d8   : > { %v1229_v38 = vmul.f32 %v5238_v34, %v1228_v40  ;;  %v1235_v28 = vmul.f32 %v6340_v2, %v6328_v17  ;;  %v6354_v63 = vpop.eup %5241  ;;  %v1012_v40 = vmul.f32 %v6320_v23, %v1011_v33  ;;  %vm1241_vm15 = vweird.f32 %v6340_v2 }
 0x1d9   : > { %5245 = vrsqrt.f32 %v6344_v20  ;;  %v6357_v9 = vpop.eup %5243  ;;  %vm6392_vm5 = vmor %vm1240_vm4, %vm1241_vm15  ;;  %v6413_v33 = vmax.f32 %v6288_v49, 1e-24  ;;  %vm1250_vm7 = vweird.f32 %v6344_v20  ;;  %vm1034_vm9 = vweird.f32 %v6354_v63 }
 0x1da   : > { %v1233_v35 = vsel %vm1232_vm11, %v5238_v34, %v1229_v38  ;;  %v1236_v43 = vmul.f32 %v6340_v2, %v1235_v28  ;;  %v1016_v48 = vsel %vm6370_vm1, %v6320_v23, %v1012_v40  ;;  %v1038_v14 = vmul.f32 %v6357_v9, %v6336_v62  ;;  %vm6472_vm15 = vmor %vm1033_vm13, %vm1034_vm9 }
 0x1db   : > { %v1375_v47 = vmul.f32 %v1233_v35, %v6206_v3  ;;  %v1022_v3 = vmul.f32 %v6322_v59, %v1021_v30  ;;  %v6402_v40 = vmax.f32 %v6295_v24, 1e-24  ;;  %vm1044_vm11 = vweird.f32 %v6357_v9 }
 0x1dc   : > { %v1237_v54 = vmul.f32 0.5, %v1236_v43  ;;  %v1028_v43 = vmul.f32 %v6354_v63, %v6334_v29  ;;  %vm1043_vm1 = vweird.f32 %v6336_v62  ;;  %v6478_v29 = vmax.f32 %v6310_v4, 1e-24 }
 0x1dd   : > { %v1391_v16 = vpack.c.bf16 %v1375_v47, %v1375_v47  ;;  %v1026_v23 = vsel %vm6385_vm3, %v6322_v59, %v1022_v3  ;;  %vm6490_vm2 = vmor %vm1043_vm1, %vm1044_vm11  ;;  %vm1063_vm11 = vweird.f32 %v6402_v40 }
 0x1de   : > { %v1238_v34 = vsub.f32 1.5, %v1237_v54  ;;  %v934_v19 = vpop.f32.mrf.mxu0 }
 0x1df   : > { %v5246_v26 = vpop.eup %5245  ;;  %v6363_v53 = vmax.f32 %v934_v19, 1e-24  ;;  %v1466_v38 = vunpack.c.l.b16 %v1391_v16  ;;  %v6407_v19 = vpop.f32.mrf.mxu2 }
 0x1e0   : > { %v1239_v28 = vmul.f32 %v6340_v2, %v1238_v34  ;;  %v1245_v35 = vmul.f32 %v5246_v26, %v6344_v20  ;;  %vm1251_vm6 = vweird.f32 %v5246_v26 }
 0x1e1   : > { %5247 = vrsqrt.f32 %v6363_v53  ;;  %v6378_v30 = vpack.c.b16 %v1466_v38, %v1465_v41  ;;  %v1152_v41 = vmul.f32 %v6259_v5, %v1016_v48  ;;  %v1029_v38 = vmul.f32 %v6354_v63, %v1028_v43  ;;  %vm1252_vm8 = vmor %vm1250_vm7, %vm1251_vm6 }
 0x1e2   : > { %v1246_v47 = vmul.f32 %v5246_v26, %v1245_v35  ;;  %v1243_v34 = vsel %vm6392_vm5, %v6340_v2, %v1239_v28  ;;  %v1039_v35 = vmul.f32 %v6357_v9, %v1038_v14  ;;  %v1153_v2 = vmul.f32 %v6259_v5, %v1026_v23 }
 0x1e3   : > { %8495 = vst [vmem:[#allocation22_spill] sm:$0xff] %v6378_v30  ;;  %v1473_v16 = vsel %vm1468_vm0, %v6378_v30, 0  ;;  %v1376_v28 = vmul.f32 %v1243_v34, %v6211_v8  ;;  %5249 = vrsqrt.f32 %v6402_v40  ;;  %v1168_v48 = vmul.f32 %v1152_v41, %v6136_v44 }
 0x1e4   : > { %v1247_v17 = vmul.f32 0.5, %v1246_v47  ;;  %1482 = vmatpush.bf16.xpose.msrb.mxu2 %v1473_v16  ;;  %v871_v47 = vpop.f32.mrf.mxu3  ;;  %v1030_v14 = vmul.f32 0.5, %v1029_v38  ;;  %v1040_v54 = vmul.f32 0.5, %v1039_v35  ;;  %v1169_v20 = vmul.f32 %v1153_v2, %v6147_v50 }
 0x1e5   : > { %v1392_v23 = vpack.c.bf16 %v1376_v28, %v1376_v28  ;;  %v6437_v35 = vmax.f32 %v871_v47, 1e-24  ;;  %vm1260_vm12 = vweird.f32 %v6363_v53 }
 0x1e6   : > { %v1248_v59 = vsub.f32 1.5, %v1247_v17  ;;  %v937_v24 = vpop.f32.mrf.mxu0  ;;  %v1031_v41 = vsub.f32 1.5, %v1030_v14  ;;  %v1185_v14 = vpack.c.bf16 %v1169_v20, %v1169_v20 }
 0x1e7   : > { %v6415_v3 = vpop.eup %5247  ;;  %v6419_v12 = vmax.f32 %v937_v24, 1e-24  ;;  %v6433_v44 = vpop.f32.mrf.mxu2  ;;  %v1041_v24 = vsub.f32 1.5, %v1040_v54 }
 0x1e8   : > { %v1249_v43 = vmul.f32 %v5246_v26, %v1248_v59  ;;  %v1255_v49 = vmul.f32 %v6415_v3, %v6363_v53  ;;  %vm1261_vm10 = vweird.f32 %v6415_v3 }
 0x1e9   : > { %5251 = vrsqrt.f32 %v6419_v12  ;;  %v6435_v59 = vpop.eup %5249  ;;  %vm6464_vm14 = vmor %vm1260_vm12, %vm1261_vm10  ;;  %vm1270_vm4 = vweird.f32 %v6419_v12  ;;  %vm1053_vm12 = vweird.f32 %v6413_v33 }
 0x1ea   : > { %5253 = vrsqrt.f32 %v6413_v33  ;;  %v1253_v8 = vsel %vm1252_vm8, %v5246_v26, %v1249_v43  ;;  %v1256_v16 = vmul.f32 %v6415_v3, %v1255_v49  ;;  %v1184_v26 = vpack.c.bf16 %v1168_v48, %v1168_v48 }
 0x1eb   : > { %v1377_v34 = vmul.f32 %v1253_v8, %v6217_v10  ;;  %4861 = vmatmul.msk.bf16.vlgmr.msrb.gmra.mxu2 %vm1468_vm0, %v6278_v46  ;;  %v1496_v10 = vunpack.c.l.b16 %v1392_v23  ;;  %v1032_v48 = vmul.f32 %v6354_v63, %v1031_v41  ;;  %v1058_v20 = vmul.f32 %v6435_v59, %v6402_v40 }
 0x1ec   : > { %v1257_v17 = vmul.f32 0.5, %v1256_v16  ;;  %v874_v23 = vpop.f32.mrf.mxu3  ;;  %vm1064_vm7 = vweird.f32 %v6435_v59 }
 0x1ed   : > { %v1393_v38 = vpack.c.bf16 %v1377_v34, %v1377_v34  ;;  %v1042_v34 = vmul.f32 %v6357_v9, %v1041_v24  ;;  %v1036_v46 = vsel %vm6472_vm15, %v6354_v63, %v1032_v48  ;;  %v6505_v48 = vmax.f32 %v6303_v61, 1e-24  ;;  %vm6584_vm13 = vmor %vm1063_vm11, %vm1064_vm7 }
 0x1ee   : > { %v1258_v43 = vsub.f32 1.5, %v1257_v17  ;;  %v940_v28 = vpop.f32.mrf.mxu0 }
 0x1ef   : > { %v6439_v49 = vpop.eup %5251  ;;  %v1497_v8 = vunpack.c.l.b16 %v1393_v38  ;;  %v6442_v50 = vmax.f32 %v940_v28, 1e-24  ;;  %v1046_v4 = vsel %vm6490_vm2, %v6357_v9, %v1042_v34 }
 0x1f0   : > { %v6444_v2 = vpop.eup %5253  ;;  %v1259_v16 = vmul.f32 %v6415_v3, %v1258_v43  ;;  %v1265_v47 = vmul.f32 %v6439_v49, %v6419_v12  ;;  %vm1271_vm3 = vweird.f32 %v6439_v49 }
 0x1f1   : > { %5255 = vrsqrt.f32 %v6442_v50  ;;  %v6453_v54 = vpack.c.b16 %v1497_v8, %v1496_v10  ;;  %v1048_v41 = vmul.f32 %v6444_v2, %v6413_v33  ;;  %v6483_v10 = vmax.f32 %v874_v23, 1e-24  ;;  %vm1272_vm5 = vmor %vm1270_vm4, %vm1271_vm3 }
 0x1f2   : > { %v1266_v17 = vmul.f32 %v6439_v49, %v1265_v47  ;;  %5257 = vrsqrt.f32 %v6437_v35  ;;  %v1263_v43 = vsel %vm6464_vm14, %v6415_v3, %v1259_v16  ;;  %v1491_v8 = vunpack.c.l.b16 %v1184_v26 }
 0x1f3   : > { %8500 = vst [vmem:[#allocation23_spill] sm:$0xff] %v6453_v54  ;;  %v1503_v24 = vsel %vm1468_vm0, %v6453_v54, 0  ;;  %v1492_v47 = vunpack.c.l.b16 %v1185_v14  ;;  %v1059_v3 = vmul.f32 %v6435_v59, %v1058_v20  ;;  %v6499_v14 = vpop.f32.mrf.mxu2  ;;  %v1049_v63 = vmul.f32 %v6444_v2, %v1048_v41 }
 0x1f4   : > { %v1267_v28 = vmul.f32 0.5, %v1266_v17  ;;  %1512 = vmatpush.bf16.xpose.msra.mxu2 %v1503_v24  ;;  %v1378_v17 = vmul.f32 %v1263_v43, %v6222_v15  ;;  %5259 = vrsqrt.f32 %v6478_v29  ;;  %v1155_v41 = vmul.f32 %v6259_v5, %v1046_v4 }
 0x1f5   : > { %v6519_v61 = vpack.c.b16 %v1492_v47, %v1491_v8  ;;  %v1154_v15 = vmul.f32 %v6259_v5, %v1036_v46  ;;  %v1060_v24 = vmul.f32 0.5, %v1059_v3  ;;  %v1050_v12 = vmul.f32 0.5, %v1049_v63 }
 0x1f6   : > { %v1268_v16 = vsub.f32 1.5, %v1267_v28  ;;  %v943_v26 = vpop.f32.mrf.mxu0  ;;  %v1394_v28 = vpack.c.bf16 %v1378_v17, %v1378_v17  ;;  %vm1280_vm8 = vweird.f32 %v6442_v50  ;;  %vm1054_vm9 = vweird.f32 %v6444_v2 }
 0x1f7   : > { %v6501_v23 = vpop.eup %5255  ;;  %v6508_v38 = vmax.f32 %v943_v26, 1e-24  ;;  %v1061_v3 = vsub.f32 1.5, %v1060_v24  ;;  %v1170_v63 = vmul.f32 %v1154_v15, %v6157_v56  ;;  %vm6590_vm14 = vmor %vm1053_vm12, %vm1054_vm9  ;;  %vm1093_vm3 = vweird.f32 %v6437_v35 }
 0x1f8   : > { %v1269_v9 = vmul.f32 %v6439_v49, %v1268_v16  ;;  %v1275_v34 = vmul.f32 %v6501_v23, %v6442_v50  ;;  %v6515_v20 = vpop.eup %5257  ;;  %vm1281_vm6 = vweird.f32 %v6501_v23  ;;  %vm1103_vm11 = vweird.f32 %v6483_v10 }
 0x1f9   : > { %5261 = vrsqrt.f32 %v6508_v38  ;;  %v1088_v8 = vmul.f32 %v6515_v20, %v6437_v35  ;;  %vm6563_vm10 = vmor %vm1280_vm8, %vm1281_vm6  ;;  %vm1290_vm1 = vweird.f32 %v6508_v38  ;;  %vm1094_vm7 = vweird.f32 %v6515_v20 }
 0x1fa   : > { %v1273_v53 = vsel %vm1272_vm5, %v6439_v49, %v1269_v9  ;;  %v1276_v43 = vmul.f32 %v6501_v23, %v1275_v34  ;;  %5263 = vrsqrt.f32 %v6505_v48  ;;  %v1171_v49 = vmul.f32 %v1155_v41, %v6168_v0  ;;  %v6532_v4 = vpop.eup %5259  ;;  %v877_v9 = vpop.f32.mrf.mxu3 }
 0x1fb   : > { %4862 = vmatmul.msk.bf16.vlgmr.msra.gmra.mxu2 %vm1468_vm0, %v6519_v61  ;;  %v1379_v62 = vmul.f32 %v1273_v53, %v6228_v18  ;;  %5265 = vrsqrt.f32 %v6483_v10  ;;  %v1051_v18 = vsub.f32 1.5, %v1050_v12  ;;  %v1526_v53 = vunpack.c.l.b16 %v1394_v28  ;;  %v6544_v41 = vpop.f32.mrf.mxu2 }
 0x1fc   : > { %v1277_v46 = vmul.f32 0.5, %v1276_v43  ;;  %v1089_v43 = vmul.f32 %v6515_v20, %v1088_v8  ;;  %v1187_v24 = vpack.c.bf16 %v1171_v49, %v1171_v49  ;;  %v1062_v28 = vmul.f32 %v6435_v59, %v1061_v3 }
 0x1fd   : > { %v1395_v47 = vpack.c.bf16 %v1379_v62, %v1379_v62  ;;  %v1078_v8 = vmul.f32 %v6532_v4, %v6478_v29  ;;  %v1186_v3 = vpack.c.bf16 %v1170_v63, %v1170_v63  ;;  %vm1084_vm8 = vweird.f32 %v6532_v4 }
 0x1fe   : > { %v1278_v16 = vsub.f32 1.5, %v1277_v46  ;;  %v946_v26 = vpop.f32.mrf.mxu0  ;;  %v1522_v63 = vunpack.c.l.b16 %v1187_v24  ;;  %vm1073_vm12 = vweird.f32 %v6505_v48 }
 0x1ff   : > { %v6535_v17 = vpop.eup %5261  ;;  %v6537_v34 = vmax.f32 %v946_v26, 1e-24  ;;  %v1527_v54 = vunpack.c.l.b16 %v1395_v47  ;;  %v1052_v47 = vmul.f32 %v6444_v2, %v1051_v18 }
 0x200   : > { %v1279_v62 = vmul.f32 %v6501_v23, %v1278_v16  ;;  %v1285_v0 = vmul.f32 %v6535_v17, %v6508_v38  ;;  %v6546_v56 = vpop.eup %5263  ;;  %vm1291_vm15 = vweird.f32 %v6535_v17 }
 0x201   : > { %5267 = vrsqrt.f32 %v6537_v34  ;;  %v6550_v15 = vpack.c.b16 %v1527_v54, %v1526_v53  ;;  %v6552_v12 = vpop.eup %5265  ;;  %v1068_v50 = vmul.f32 %v6546_v56, %v6505_v48  ;;  %v6579_v53 = vmax.f32 %v877_v9, 1e-24  ;;  %vm1292_vm2 = vmor %vm1290_vm1, %vm1291_vm15 }
 0x202   : > { %v1286_v46 = vmul.f32 %v6535_v17, %v1285_v0  ;;  %v1283_v16 = vsel %vm6563_vm10, %v6501_v23, %v1279_v62  ;;  %v1098_v18 = vmul.f32 %v6552_v12, %v6483_v10  ;;  %v1066_v9 = vsel %vm6584_vm13, %v6435_v59, %v1062_v28 }
 0x203   : > { %8507 = vst [vmem:[#allocation24_spill] sm:$0xff] %v6550_v15  ;;  %2348 = vrot.lane.b32.xlu2 %v6550_v15, %s5851_s28  ;;  %v1533_v49 = vsel %vm1468_vm0, %v6550_v15, 0  ;;  %v1079_v62 = vmul.f32 %v6532_v4, %v1078_v8  ;;  %v1056_v24 = vsel %vm6590_vm14, %v6444_v2, %v1052_v47  ;;  %v1380_v54 = vmul.f32 %v1283_v16, %v6233_v22 }
 0x204   : > { %v1287_v26 = vmul.f32 0.5, %v1286_v46  ;;  %1542 = vmatpush.bf16.xpose.msrb.mxu3 %v1533_v49  ;;  %v1521_v15 = vunpack.c.l.b16 %v1186_v3  ;;  %v1069_v40 = vmul.f32 %v6546_v56, %v1068_v50  ;;  %v1099_v8 = vmul.f32 %v6552_v12, %v1098_v18  ;;  %v6619_v50 = vpop.f32.mrf.mxu2 }
 0x205   : > { %v1157_v23 = vmul.f32 %v6259_v5, %v1066_v9  ;;  %v1080_v2 = vmul.f32 0.5, %v1079_v62  ;;  %v1156_v38 = vmul.f32 %v6259_v5, %v1056_v24  ;;  %v1396_v16 = vpack.c.bf16 %v1380_v54, %v1380_v54 }
 0x206   : > { %v1288_v33 = vsub.f32 1.5, %v1287_v26  ;;  %v949_v0 = vpop.f32.mrf.mxu0  ;;  %v880_v26 = vpop.f32.mrf.mxu3  ;;  %v6615_v22 = vpack.c.b16 %v1522_v63, %v1521_v15  ;;  %v1090_v9 = vmul.f32 0.5, %v1089_v43  ;;  %v1070_v15 = vmul.f32 0.5, %v1069_v40 }
 0x207   : > { %v6599_v46 = vpop.eup %5267  ;;  %v6605_v49 = vmax.f32 %v949_v0, 1e-24  ;;  %v1173_v62 = vmul.f32 %v1157_v23, %v6183_v11  ;;  %v1081_v24 = vsub.f32 1.5, %v1080_v2  ;;  %vm1300_vm4 = vweird.f32 %v6537_v34 }
 0x208   : > { %v1289_v59 = vmul.f32 %v6535_v17, %v1288_v33  ;;  %v1295_v28 = vmul.f32 %v6599_v46, %v6537_v34  ;;  %8514 = vst [vmem:[#allocation25_spill] sm:$0xff] %v6615_v22  ;;  %v6625_v33 = vmax.f32 %v880_v26, 1e-24  ;;  %vm1301_vm5 = vweird.f32 %v6599_v46 }
 0x209   : > { %5269 = vrsqrt.f32 %v6605_v49  ;;  %v1172_v40 = vmul.f32 %v1156_v38, %v6178_v6  ;;  %v1091_v34 = vsub.f32 1.5, %v1090_v9  ;;  %v1189_v2 = vpack.c.bf16 %v1173_v62, %v1173_v62  ;;  %vm6641_vm6 = vmor %vm1300_vm4, %vm1301_vm5 }
 0x20a   : > { %v1293_v47 = vsel %vm1292_vm2, %v6535_v17, %v1289_v59  ;;  %v1296_v3 = vmul.f32 %v6599_v46, %v1295_v28  ;;  %v1100_v17 = vmul.f32 0.5, %v1099_v8  ;;  %5271 = vrsqrt.f32 %v6579_v53  ;;  %vm6696_vm4 = vmor %vm1093_vm3, %vm1094_vm7 }
 0x20b   : > { %v1381_v18 = vmul.f32 %v1293_v47, %v6239_v32  ;;  %4863 = vmatmul.msk.bf16.vlgmr.msrb.gmra.mxu3 %vm1468_vm0, %v6615_v22  ;;  %v1556_v59 = vunpack.c.l.b16 %v1396_v16  ;;  %5273 = vrsqrt.f32 %v6625_v33  ;;  %v1071_v8 = vsub.f32 1.5, %v1070_v15 }
 0x20c   : > { %v1297_v63 = vmul.f32 0.5, %v1296_v3  ;;  %v1082_v3 = vmul.f32 %v6532_v4, %v1081_v24  ;;  %v1188_v9 = vpack.c.bf16 %v1172_v40, %v1172_v40  ;;  %vm1074_vm9 = vweird.f32 %v6546_v56  ;;  %v6662_v24 = vpop.f32.mrf.mxu2 }
 0x20d   : > { %v1397_v0 = vpack.c.bf16 %v1381_v18, %v1381_v18  ;;  %v1101_v18 = vsub.f32 1.5, %v1100_v17  ;;  %vm1083_vm10 = vweird.f32 %v6478_v29  ;;  %v1092_v17 = vmul.f32 %v6515_v20, %v1091_v34  ;;  %vm6685_vm2 = vmor %vm1073_vm12, %vm1074_vm9 }
 0x20e   : > { %v1298_v54 = vsub.f32 1.5, %v1297_v63  ;;  %v952_v32 = vpop.f32.mrf.mxu0  ;;  %v1072_v63 = vmul.f32 %v6546_v56, %v1071_v8  ;;  %vm6669_vm13 = vmor %vm1083_vm10, %vm1084_vm8  ;;  %vm1310_vm14 = vweird.f32 %v6605_v49  ;;  %vm1104_vm1 = vweird.f32 %v6552_v12 }
 0x20f   : > { %v6632_v43 = vpop.eup %5269  ;;  %v1557_v28 = vunpack.c.l.b16 %v1397_v0  ;;  %v6635_v26 = vmax.f32 %v952_v32, 1e-24  ;;  %v1086_v40 = vsel %vm6669_vm13, %v6532_v4, %v1082_v3  ;;  %v1551_v8 = vunpack.c.l.b16 %v1188_v9  ;;  %vm6721_vm5 = vmor %vm1103_vm11, %vm1104_vm1 }
 0x210   : > { %v1299_v11 = vmul.f32 %v6599_v46, %v1298_v54  ;;  %v1305_v23 = vmul.f32 %v6632_v43, %v6605_v49  ;;  %v6652_v16 = vpop.eup %5271  ;;  %v1552_v54 = vunpack.c.l.b16 %v1189_v2  ;;  %vm1311_vm15 = vweird.f32 %v6632_v43 }
 0x211   : > { %5275 = vrsqrt.f32 %v6635_v26  ;;  %v6646_v6 = vpack.c.b16 %v1557_v28, %v1556_v59  ;;  %v6673_v29 = vpop.eup %5273  ;;  %v1102_v2 = vmul.f32 %v6552_v12, %v1101_v18  ;;  %v1076_v47 = vsel %vm6685_vm2, %v6546_v56, %v1072_v63  ;;  %vm1312_vm3 = vmor %vm1310_vm14, %vm1311_vm15 }
 0x212   : > { %v1306_v38 = vmul.f32 %v6632_v43, %v1305_v23  ;;  %v1303_v62 = vsel %vm6641_vm6, %v6599_v46, %v1299_v11  ;;  %v883_v46 = vpop.f32.mrf.mxu3  ;;  %v1159_v35 = vmul.f32 %v6259_v5, %v1086_v40  ;;  %v6715_v18 = vpack.c.b16 %v1552_v54, %v1551_v8 }
 0x213   : > { %v1563_v15 = vsel %vm1468_vm0, %v6646_v6, 0  ;;  %v1382_v23 = vmul.f32 %v1303_v62, %v6244_v58  ;;  %v1118_v9 = vmul.f32 %v6673_v29, %v6625_v33  ;;  %v1158_v63 = vmul.f32 %v6259_v5, %v1076_v47 }
 0x214   : > { %v1307_v0 = vmul.f32 0.5, %v1306_v38  ;;  %1572 = vmatpush.bf16.xpose.msra.mxu1 %v1563_v15  ;;  %v1108_v38 = vmul.f32 %v6652_v16, %v6579_v53  ;;  %v1096_v10 = vsel %vm6696_vm4, %v6515_v20, %v1092_v17  ;;  %v1106_v32 = vsel %vm6721_vm5, %v6552_v12, %v1102_v2  ;;  %v6744_v11 = vpop.f32.mrf.mxu2 }
 0x215   : > { %v1398_v62 = vpack.c.bf16 %v1382_v23, %v1382_v23  ;;  %v1175_v40 = vmul.f32 %v1159_v35, %v6193_v39  ;;  %vm1320_vm6 = vweird.f32 %v6635_v26  ;;  %v1174_v17 = vmul.f32 %v1158_v63, %v6188_v21 }
 0x216   : > { %v1308_v59 = vsub.f32 1.5, %v1307_v0  ;;  %v955_v28 = vpop.f32.mrf.mxu0  ;;  %v1160_v39 = vmul.f32 %v6259_v5, %v1096_v10  ;;  %vm1113_vm11 = vweird.f32 %v6579_v53  ;;  %vm1114_vm13 = vweird.f32 %v6652_v16 }
 0x217   : > { %v6680_v48 = vpop.eup %5275  ;;  %v6690_v4 = vmax.f32 %v955_v28, 1e-24  ;;  %v1119_v28 = vmul.f32 %v6673_v29, %v1118_v9  ;;  %v1586_v23 = vunpack.c.l.b16 %v1398_v62  ;;  %v1161_v9 = vmul.f32 %v6259_v5, %v1106_v32  ;;  %vm6829_vm1 = vmor %vm1113_vm11, %vm1114_vm13 }
 0x218   : > { %v1309_v3 = vmul.f32 %v6632_v43, %v1308_v59  ;;  %v1315_v58 = vmul.f32 %v6680_v48, %v6635_v26  ;;  %vm1321_vm7 = vweird.f32 %v6680_v48  ;;  %v1190_v10 = vpack.c.bf16 %v1174_v17, %v1174_v17 }
 0x219   : > { %5277 = vrsqrt.f32 %v6690_v4  ;;  %vm6758_vm8 = vmor %vm1320_vm6, %vm1321_vm7  ;;  %v1120_v62 = vmul.f32 0.5, %v1119_v28  ;;  %vm1330_vm9 = vweird.f32 %v6690_v4  ;;  %vm1123_vm14 = vweird.f32 %v6625_v33 }
 0x21a   : > { %v1313_v15 = vsel %vm1312_vm3, %v6632_v43, %v1309_v3  ;;  %v1316_v49 = vmul.f32 %v6680_v48, %v1315_v58  ;;  %v1109_v43 = vmul.f32 %v6652_v16, %v1108_v38  ;;  %v886_v2 = vpop.f32.mrf.mxu3  ;;  %v1191_v58 = vpack.c.bf16 %v1175_v40, %v1175_v40  ;;  %v5547_v38 = vld [vmem:[#allocation8] sm:$0x7] }
 0x21b   : > { %v1383_v0 = vmul.f32 %v1313_v15, %v6252_v55  ;;  %4864 = vmatmul.msk.bf16.vlgmr.msra.gmra.mxu1 %vm1468_vm0, %v6715_v18  ;;  %v6752_v35 = vperm.slane %v5547_v38, 2  ;;  %v1581_v17 = vunpack.c.l.b16 %v1190_v10  ;;  %vm1124_vm15 = vweird.f32 %v6673_v29 }
 0x21c   : > { %v1317_v54 = vmul.f32 0.5, %v1316_v49  ;;  %v1110_v15 = vmul.f32 0.5, %v1109_v43  ;;  %v6766_v49 = vmax.f32 %v883_v46, 1e-24  ;;  %v1582_v5 = vunpack.c.l.b16 %v1191_v58  ;;  %vm6839_vm3 = vmor %vm1123_vm14, %vm1124_vm15 }
 0x21d   : > { %v1399_v59 = vpack.c.bf16 %v1383_v0, %v1383_v0  ;;  %v6768_v0 = vmax.f32 %v886_v2, 1e-24  ;;  %v753_v46 = vadd.f32 %v6338_v42, %v6752_v35  ;;  %v755_v32 = vadd.f32 %v6352_v25, %v6752_v35 }
 0x21e   : > { %v1318_v55 = vsub.f32 1.5, %v1317_v54  ;;  %v958_v8 = vpop.f32.mrf.mxu0  ;;  %v6782_v43 = vmul.f32 %v1160_v39, %v6118_v31  ;;  %v6801_v39 = vpop.f32.mrf.mxu2  ;;  %vm1133_vm13 = vweird.f32 %v6766_v49 }
 0x21f   : > { %v5278_v20 = vpop.eup %5277  ;;  %v1587_v12 = vunpack.c.l.b16 %v1399_v59  ;;  %v6747_v34 = vmax.f32 %v958_v8, 1e-24  ;;  %v1177_v59 = vmul.f32 %v1161_v9, %v6129_v37  ;;  %v1121_v37 = vsub.f32 1.5, %v1120_v62 }
 0x220   : > { %v1319_v47 = vmul.f32 %v6680_v48, %v1318_v55  ;;  %v1325_v3 = vmul.f32 %v5278_v20, %v6690_v4  ;;  %vm1331_vm10 = vweird.f32 %v5278_v20  ;;  %v1406_v2 = vpack.c.bf16 %v753_v46, %v753_v46 }
 0x221   : > { %5279 = vrsqrt.f32 %v6747_v34  ;;  %v6763_v56 = vpack.c.b16 %v1587_v12, %v1586_v23  ;;  %vm6792_vm12 = vmor %vm1330_vm9, %vm1331_vm10  ;;  %v6804_v4 = vpack.c.b16 %v1582_v5, %v1581_v17  ;;  %v770_v9 = vadd.f32 %v6662_v24, %v6752_v35 }
 0x222   : > { %v1326_v63 = vmul.f32 %v5278_v20, %v1325_v3  ;;  %v1323_v54 = vsel %vm6758_vm8, %v6680_v48, %v1319_v47  ;;  %v1111_v48 = vsub.f32 1.5, %v1110_v15  ;;  %5281 = vrsqrt.f32 %v6766_v49 }
 0x223   : > { %v1593_v26 = vsel %vm1468_vm0, %v6763_v56, 0  ;;  %v1384_v23 = vmul.f32 %v1323_v54, %v6262_v13  ;;  %5283 = vrsqrt.f32 %v6768_v0  ;;  %v1407_v13 = vpack.c.bf16 %v755_v32, %v755_v32 }
 0x224   : > { %v1327_v40 = vmul.f32 0.5, %v1326_v63  ;;  %1602 = vmatpush.bf16.xpose.msrb.mxu2 %v1593_v26  ;;  %v768_v3 = vadd.f32 %v6619_v50, %v6752_v35  ;;  %v1193_v15 = vpack.c.bf16 %v1177_v59, %v1177_v59  ;;  %v1112_v63 = vmul.f32 %v6652_v16, %v1111_v48 }
 0x225   : > { %v1400_v38 = vpack.c.bf16 %v1384_v23, %v1384_v23  ;;  %v1122_v62 = vmul.f32 %v6673_v29, %v1121_v37  ;;  %v1899_v10 = vunpack.c.l.b16 %v1406_v2  ;;  %v1900_v26 = vunpack.c.l.b16 %v1407_v13 }
 0x226   : > { %v1328_v28 = vsub.f32 1.5, %v1327_v40  ;;  %v961_v55 = vpop.f32.mrf.mxu0  ;;  %v1412_v40 = vpack.c.bf16 %v768_v3, %v768_v3  ;;  %vm1340_vm2 = vweird.f32 %v6747_v34  ;;  %v775_v37 = vadd.f32 %v6801_v39, %v6752_v35 }
 0x227   : > { %v6785_v8 = vpop.eup %5279  ;;  %v6796_v31 = vmax.f32 %v961_v55, 1e-24  ;;  %v1616_v53 = vunpack.c.l.b16 %v1400_v38  ;;  %v1126_v2 = vsel %vm6839_vm3, %v6673_v29, %v1122_v62  ;;  %v6868_v3 = vpack.c.b16 %v1900_v26, %v1899_v10 }
 0x228   : > { %v1329_v25 = vmul.f32 %v5278_v20, %v1328_v28  ;;  %v1335_v12 = vmul.f32 %v6785_v8, %v6747_v34  ;;  %v6820_v50 = vpop.eup %5281  ;;  %vm1341_vm4 = vweird.f32 %v6785_v8  ;;  %v1413_v28 = vpack.c.bf16 %v770_v9, %v770_v9 }
 0x229   : > { %5285 = vrsqrt.f32 %v6796_v31  ;;  %v1192_v34 = vpack.c.bf16 %v6782_v43, %v6782_v43  ;;  %v1128_v42 = vmul.f32 %v6820_v50, %v6766_v49  ;;  %vm6853_vm5 = vmor %vm1340_vm2, %vm1341_vm4  ;;  %v1116_v43 = vsel %vm6829_vm1, %v6652_v16, %v1112_v63  ;;  %8536 = vst [vmem:[#allocation27_spill] sm:$0xff] %v6868_v3 }
 0x22a   : > { %v1333_v47 = vsel %vm6792_vm12, %v5278_v20, %v1329_v25  ;;  %v1336_v58 = vmul.f32 %v6785_v8, %v1335_v12  ;;  %v1612_v12 = vunpack.c.l.b16 %v1193_v15  ;;  %v1984_v38 = vunpack.c.l.b16 %v1413_v28 }
 0x22b   : > { %v1385_v21 = vmul.f32 %v1333_v47, %v6274_v27  ;;  %4865 = vmatmul.msk.bf16.vlgmr.msrb.gmra.mxu2 %vm1468_vm0, %v6804_v4  ;;  %v6823_v27 = vpop.eup %5283  ;;  %v6866_v47 = vpop.f32.mrf.mxu2  ;;  %vm1350_vm6 = vweird.f32 %v6796_v31  ;;  %v1129_v16 = vmul.f32 %v6820_v50, %v1128_v42  ;;  %v758_v63 = vadd.f32 %v6407_v19, %v6752_v35 }
 0x22c   : > { %v1337_v20 = vmul.f32 0.5, %v1336_v58  ;;  %v1138_v33 = vmul.f32 %v6823_v27, %v6768_v0  ;;  %v1983_v58 = vunpack.c.l.b16 %v1412_v40  ;;  %v760_v62 = vadd.f32 %v6433_v44, %v6752_v35 }
 0x22d   : > { %v1401_v54 = vpack.c.bf16 %v1385_v21, %v1385_v21  ;;  %vm1143_vm11 = vweird.f32 %v6768_v0  ;;  %vm1144_vm12 = vweird.f32 %v6823_v27  ;;  %vm1134_vm14 = vweird.f32 %v6820_v50 }
 0x22e   : > { %v1338_v5 = vsub.f32 1.5, %v1337_v20  ;;  %v964_v46 = vpop.f32.mrf.mxu0  ;;  %v1139_v29 = vmul.f32 %v6823_v27, %v1138_v33  ;;  %v1611_v20 = vunpack.c.l.b16 %v1192_v34  ;;  %v1408_v34 = vpack.c.bf16 %v758_v63, %v758_v63  ;;  %vm6932_vm1 = vmor %vm1143_vm11, %vm1144_vm12 }
 0x22f   : > { %v5286_v32 = vpop.eup %5285  ;;  %v1617_v48 = vunpack.c.l.b16 %v1401_v54  ;;  %v6843_v55 = vmax.f32 %v964_v46, 1e-24  ;;  %v6888_v54 = vld [vmem:[%s8431_s4] ss:$0 sm:$0xff]  ;;  %v773_v33 = vadd.f32 %v6744_v11, %v6752_v35  ;;  %vm6940_vm2 = vmor %vm1133_vm13, %vm1134_vm14 }
 0x230   : > { %v1339_v17 = vmul.f32 %v6785_v8, %v1338_v5  ;;  %v1345_v23 = vmul.f32 %v5286_v32, %v6796_v31  ;;  %vm1351_vm7 = vweird.f32 %v5286_v32  ;;  %v1162_v24 = vmul.f32 %v6888_v54, %v1116_v43 }
 0x231   : > { %5287 = vrsqrt.f32 %v6843_v55  ;;  %v6858_v25 = vpack.c.b16 %v1617_v48, %v1616_v53  ;;  %v1163_v40 = vmul.f32 %v6888_v54, %v1126_v2  ;;  %vm1352_vm8 = vmor %vm1350_vm6, %vm1351_vm7  ;;  %v6898_v5 = vpack.c.b16 %v1984_v38, %v1983_v58 }
 0x232   : > { %v1346_v13 = vmul.f32 %v5286_v32, %v1345_v23  ;;  %v1343_v9 = vsel %vm6853_vm5, %v6785_v8, %v1339_v17  ;;  %v6902_v53 = vpack.c.b16 %v1612_v12, %v1611_v20  ;;  %v1130_v48 = vmul.f32 0.5, %v1129_v16 }
 0x233   : > { %8535 = vst [vmem:[#allocation26_spill] sm:$0xff] %v6858_v25  ;;  %v1623_v21 = vsel %vm1468_vm0, %v6858_v25, 0  ;;  %v1386_v19 = vmul.f32 %v1343_v9, %v6281_v36  ;;  %v1140_v28 = vmul.f32 0.5, %v1139_v29  ;;  %v1409_v36 = vpack.c.bf16 %v760_v62, %v760_v62 }
 0x234   : > { %v1347_v15 = vmul.f32 0.5, %v1346_v13  ;;  %1632 = vmatpush.bf16.xpose.msra.mxu3 %v1623_v21  ;;  %8537 = vst [vmem:[#allocation28_spill] sm:$0xff] %v6898_v5  ;;  %v1178_v12 = vmul.f32 %v1162_v24, %v6139_v45  ;;  %v1179_v43 = vmul.f32 %v1163_v40, %v6150_v51  ;;  %v1131_v13 = vsub.f32 1.5, %v1130_v48 }
 0x235   : > { %8538 = vst [vmem:[#allocation29_spill] sm:$0xff] %v6902_v53  ;;  %v1402_v23 = vpack.c.bf16 %v1386_v19, %v1386_v19  ;;  %v1141_v58 = vsub.f32 1.5, %v1140_v28  ;;  %v1928_v21 = vunpack.c.l.b16 %v1409_v36  ;;  %vm1360_vm9 = vweird.f32 %v6843_v55 }
 0x236   : > { %v1348_v10 = vsub.f32 1.5, %v1347_v15  ;;  %v967_v8 = vpop.f32.mrf.mxu0  ;;  %v1414_v45 = vpack.c.bf16 %v773_v33, %v773_v33  ;;  %v1415_v16 = vpack.c.bf16 %v775_v37, %v775_v37  ;;  %v1195_v63 = vpack.c.bf16 %v1179_v43, %v1179_v43 }
 0x237   : > { %v6883_v26 = vpop.eup %5287  ;;  %v6896_v44 = vmax.f32 %v967_v8, 1e-24  ;;  %v1646_v9 = vunpack.c.l.b16 %v1402_v23  ;;  %v1194_v62 = vpack.c.bf16 %v1178_v12, %v1178_v12  ;;  %v1132_v0 = vmul.f32 %v6820_v50, %v1131_v13 }
 0x238   : > { %v1349_v46 = vmul.f32 %v5286_v32, %v1348_v10  ;;  %v1355_v59 = vmul.f32 %v6883_v26, %v6843_v55  ;;  %vm1361_vm10 = vweird.f32 %v6883_v26  ;;  %v1142_v10 = vmul.f32 %v6823_v27, %v1141_v58 }
 0x239   : > { %5289 = vrsqrt.f32 %v6896_v44  ;;  %vm6924_vm15 = vmor %vm1360_vm9, %vm1361_vm10  ;;  %v2011_v49 = vunpack.c.l.b16 %v1414_v45  ;;  %v2012_v19 = vunpack.c.l.b16 %v1415_v16  ;;  %vm1370_vm4 = vweird.f32 %v6896_v44 }
 0x23a   : > { %v1353_v17 = vsel %vm1352_vm8, %v5286_v32, %v1349_v46  ;;  %v1356_v31 = vmul.f32 %v6883_v26, %v1355_v59  ;;  %v779_v32 = vpop.f32.mrf.mxu2  ;;  %v1641_v36 = vunpack.c.l.b16 %v1194_v62  ;;  %vm1731_vm6 = vcmask 130048  }
 0x23b   : > { %v1387_v42 = vmul.f32 %v1353_v17, %v6291_v52  ;;  %4866 = vmatmul.msk.bf16.vlgmr.msra.gmra.mxu3 %vm1468_vm0, %v6902_v53  ;;  %v1927_v52 = vunpack.c.l.b16 %v1408_v34  ;;  %v1642_v34 = vunpack.c.l.b16 %v1195_v63  ;;  %v1146_v17 = vsel %vm6932_vm1, %v6823_v27, %v1142_v10 }
 0x23c   : > { %1913 = vmatpush.bf16.msrb.mxu3 %v6868_v3  ;;  %v1357_v2 = vmul.f32 0.5, %v1356_v31  ;;  %v6962_v37 = vpack.c.b16 %v2012_v19, %v2011_v49  ;;  %v1165_v43 = vmul.f32 %v6888_v54, %v1146_v17  ;;  %v5061_v49 = vld [vmem:[#allocation11] sm:$0xff]  }
 0x23d   : > { %v1403_v38 = vpack.c.bf16 %v1387_v42, %v1387_v42  ;;  %v6936_v40 = vpack.c.b16 %v1928_v21, %v1927_v52  ;;  %v765_v42 = vadd.f32 %v6544_v41, %v6752_v35  ;;  %v6964_v27 = vpack.c.b16 %v1642_v34, %v1641_v36  ;;  %v5029_v19 = vld [vmem:[#allocation12] sm:$0xff]  }
 0x23e   : > { %v1358_v11 = vsub.f32 1.5, %v1357_v2  ;;  %8546 = vst [vmem:[#allocation31_spill] sm:$0xff] %v6962_v37  ;;  %v780_v41 = vadd.f32 %v779_v32, %v6752_v35  ;;  %v6999_v59 = vunpack.c.l.bf16 %v5029_v19  ;;  %v7007_v17 = vunpack.c.h.bf16 %v5061_v49 }
 0x23f   : > { %v5290_v39 = vpop.eup %5289  ;;  %v1647_v15 = vunpack.c.l.b16 %v1403_v38  ;;  %8543 = vst [vmem:[#allocation30_spill] sm:$0xff] %v6936_v40  ;;  %v1411_v58 = vpack.c.bf16 %v765_v42, %v765_v42  ;;  %v1181_v38 = vmul.f32 %v1165_v43, %v6171_v1 }
 0x240   : > { %1997 = vmatpush.bf16.msra.mxu3 %v6898_v5  ;;  %v1359_v51 = vmul.f32 %v6883_v26, %v1358_v11  ;;  %v1365_v29 = vmul.f32 %v5290_v39, %v6896_v44  ;;  %vm1371_vm3 = vweird.f32 %v5290_v39  ;;  %v763_v44 = vadd.f32 %v6499_v14, %v6752_v35  ;;  %8547 = vst [vmem:[#allocation32_spill] sm:$0xff] %v6964_v27 }
 0x241   : > { %v6928_v20 = vpack.c.b16 %v1647_v15, %v1646_v9  ;;  %vm1372_vm5 = vmor %vm1370_vm4, %vm1371_vm3  ;;  %v1417_v45 = vpack.c.bf16 %v780_v41, %v780_v41 }
 0x242   : > { %v1366_v8 = vmul.f32 %v5290_v39, %v1365_v29  ;;  %v1363_v48 = vsel %vm6924_vm15, %v6883_v26, %v1359_v51  ;;  %v6952_v23 = vpop.f32.mrf.mxu2  ;;  %v1136_v26 = vsel %vm6940_vm2, %v6820_v50, %v1132_v0  ;;  %v1410_v50 = vpack.c.bf16 %v763_v44, %v763_v44 }
 0x243   : > { %v1653_v46 = vsel %vm1468_vm0, %v6928_v20, 0  ;;  %v1388_v33 = vmul.f32 %v1363_v48, %v6298_v60  ;;  %v1164_v2 = vmul.f32 %v6888_v54, %v1136_v26  ;;  %v778_v60 = vadd.f32 %v6866_v47, %v6752_v35 }
 0x244   : > { %v1367_v28 = vmul.f32 0.5, %v1366_v8  ;;  %1662 = vmatpush.bf16.xpose.msrb.mxu1 %v1653_v46  ;;  %v1955_v11 = vunpack.c.l.b16 %v1410_v50  ;;  %v1197_v51 = vpack.c.bf16 %v1181_v38, %v1181_v38  ;;  %v2040_v55 = vunpack.c.l.b16 %v1417_v45 }
 0x245   : > { %v1404_v52 = vpack.c.bf16 %v1388_v33, %v1388_v33  ;;  %v1180_v54 = vmul.f32 %v1164_v2, %v6160_v57  ;;  %v6997_v46 = vunpack.c.l.bf16 %v5061_v49  ;;  %v5076_v33 = vld [vmem:[#allocation12 + $0x8] sm:$0xff]  }
 0x246   : > { %v1368_v31 = vsub.f32 1.5, %v1367_v28  ;;  %v1672_v57 = vunpack.c.l.b16 %v1197_v51  ;;  %v7017_v43 = vunpack.c.l.bf16 %v5076_v33 }
 0x247   : > { %v1676_v9 = vunpack.c.l.b16 %v1404_v52  ;;  %v1196_v47 = vpack.c.bf16 %v1180_v54, %v1180_v54  ;;  %v7025_v52 = vunpack.c.h.bf16 %v5076_v33  ;;  %v7069_v33 = vld [vmem:[#allocation12 + $0x30] sm:$0xff]  }
 0x248   : > { %v1369_v12 = vmul.f32 %v5290_v39, %v1368_v31  ;;  %v7009_v31 = vunpack.c.h.bf16 %v5029_v19 }
 0x249   : > { %v1671_v62 = vunpack.c.l.b16 %v1196_v47 }
 0x24a   : > { %v1373_v13 = vsel %vm1372_vm5, %v5290_v39, %v1369_v12  ;;  %v1956_v39 = vunpack.c.l.b16 %v1411_v58  ;;  %v6977_v16 = vpop.f32.mrf.mxu2 }
 0x24b   : > { %v1389_v14 = vmul.f32 %v1373_v13, %v6306_v7  ;;  %4867 = vmatmul.msk.bf16.vlgmr.msrb.gmra.mxu1 %vm1468_vm0, %v6964_v27  ;;  %v1416_v7 = vpack.c.bf16 %v778_v60, %v778_v60  ;;  %v6988_v10 = vpack.c.b16 %v1672_v57, %v1671_v62 }
 0x24c   : > { %1941 = vmatpush.bf16.msra.mxu1 %v6936_v40  ;;  %v6981_v32 = vpack.c.b16 %v1956_v39, %v1955_v11 }
 0x24d   : > { %v1405_v21 = vpack.c.bf16 %v1389_v14, %v1389_v14  ;;  %v2039_v63 = vunpack.c.l.b16 %v1416_v7 }
 0x24e   : > { %8548 = vst [vmem:[#allocation33_spill] sm:$0xff] %v6981_v32 }
 0x24f   : > { %v1677_v15 = vunpack.c.l.b16 %v1405_v21  ;;  %v6986_v0 = vpack.c.b16 %v2040_v55, %v2039_v63  ;;  %v5078_v21 = vld [vmem:[#allocation12 + $0x18] sm:$0xff]   ;;  %v5079_v63 = vld [vmem:[#allocation12 + $0x20] sm:$0xff]  }
 0x250   : > { %2025 = vmatpush.bf16.msrb.mxu1 %v6962_v37  ;;  %v7035_v54 = vunpack.c.l.bf16 %v5078_v21  ;;  %v7043_v7 = vunpack.c.h.bf16 %v5078_v21  ;;  %v7051_v55 = vunpack.c.l.bf16 %v5079_v63 }
 0x251   : > { %v6979_v29 = vpack.c.b16 %v1677_v15, %v1676_v9  ;;  %8549 = vst [vmem:[#allocation34_spill] sm:$0xff] %v6986_v0 }
 0x252   : > { %v6990_v8 = vpop.f32.mrf.mxu2  ;;  %8550 = vst [vmem:[#allocation35_spill] sm:$0xff] %v7051_v55 }
 0x253   : > { %v1683_v1 = vsel %vm1468_vm0, %v6979_v29, 0 }
 0x254   : > { %1692 = vmatpush.bf16.xpose.msra.mxu2 %v1683_v1 }
 0x25a   : > { %v6995_v24 = vpop.f32.mrf.mxu2 }
 0x25b   : > { %4868 = vmatmul.msk.bf16.vlgmr.msra.gmra.mxu2 %vm1468_vm0, %v6988_v10 }
 0x25c   : > { %1969 = vmatpush.bf16.msrb.mxu2 %v6981_v32 }
 0x260   : > { %2053 = vmatpush.bf16.msra.mxu2 %v6986_v0 }
 0x26e   : > { %v1484_v48 = vpop.f32.mrf.mxu2 }
 0x26f   : > { %v1485_v28 = vadd.f32 %v6997_v46, %v1484_v48  ;;  %v7059_v48 = vunpack.c.h.bf16 %v5079_v63 }
 0x271   : > { %v7003_v34 = vadd.f32 %v6999_v59, %v1485_v28  ;;  %8551 = vst [vmem:[#allocation36_spill] sm:$0xff] %v7059_v48 }
 0x273   : > { %v1732_v36 = vsel %vm1731_vm6, %v7003_v34, -inf }
 0x274   : > { %1733 = vmax.xlane.f32.xlu0 %v1732_v36 }
 0x276   : > { %v1486_v26 = vpop.f32.mrf.mxu2 }
 0x277   : > { %v1487_v44 = vadd.f32 %v7007_v17, %v1486_v26 }
 0x279   : > { %v7013_v42 = vadd.f32 %v7009_v31, %v1487_v44 }
 0x27b   : > { %v1735_v12 = vsel %vm1731_vm6, %v7013_v42, -inf }
 0x27c   : > { %1736 = vmax.xlane.f32.xlu0 %v1735_v12  ;;  %v7074_v12 = vunpack.c.l.bf16 %v7069_v33 }
 0x27e   : > { %v1514_v2 = vpop.f32.mrf.mxu2 }
 0x27f   : > { %v1515_v13 = vadd.f32 %v6997_v46, %v1514_v2 }
 0x281   : > { %v7021_v50 = vadd.f32 %v7017_v43, %v1515_v13 }
 0x283   : > { %v1738_v58 = vsel %vm1731_vm6, %v7021_v50, -inf }
 0x284   : > { %1739 = vmax.xlane.f32.xlu2 %v1738_v58 }
 0x286   : > { %v1516_v14 = vpop.f32.mrf.mxu2 }
 0x287   : > { %v1517_v60 = vadd.f32 %v7007_v17, %v1516_v14 }
 0x289   : > { %v7029_v41 = vadd.f32 %v7025_v52, %v1517_v60  ;;  %v8552_v60 = vld [vmem:[#allocation23_spill] sm:$0xff] }
 0x28b   : > { %v1741_v38 = vsel %vm1731_vm6, %v7029_v41, -inf }
 0x28c   : > { %1742 = vmax.xlane.f32.xlu2 %v1741_v38 }
 0x28e   : > { %v1544_v38 = vpop.f32.mrf.mxu3 }
 0x290   : > { %2300 = vrot.lane.b32.xlu0 %v6378_v30, %s5851_s28 }
 0x298   : > { %v1574_v11 = vpop.f32.mrf.mxu1 }
 0x299   : > { %v1575_v39 = vadd.f32 %v6997_v46, %v1574_v11 }
 0x29b   : > { %v7039_v9 = vadd.f32 %v7035_v54, %v1575_v39 }
 0x29d   : > { %v1750_v15 = vsel %vm1731_vm6, %v7039_v9, -inf }
 0x29e   : > { %1751 = vmax.xlane.f32.xlu1 %v1750_v15  ;;  %v7099_v15 = vpop.permute.xlu2 %2348 }
 0x2a0   : > { %v1576_v45 = vpop.f32.mrf.mxu1 }
 0x2a1   : > { %v1577_v51 = vadd.f32 %v7007_v17, %v1576_v45 }
 0x2a3   : > { %v7047_v47 = vadd.f32 %v7043_v7, %v1577_v51 }
 0x2a5   : > { %v1753_v1 = vsel %vm1731_vm6, %v7047_v47, -inf }
 0x2a6   : > { %1754 = vmax.xlane.f32.xlu1 %v1753_v1  ;;  %v1546_v1 = vpop.f32.mrf.mxu3 }
 0x2ae   : > { %v1604_v57 = vpop.f32.mrf.mxu2 }
 0x2af   : > { %v1605_v62 = vadd.f32 %v6997_v46, %v1604_v57  ;;  %v783_v57 = vadd.f32 %v6952_v23, %v6752_v35 }
 0x2b1   : > { %v7055_v49 = vadd.f32 %v7051_v55, %v1605_v62  ;;  %v5077_v62 = vld [vmem:[#allocation12 + $0x10] sm:$0xff]  }
 0x2b3   : > { %v1756_v19 = vsel %vm1731_vm6, %v7055_v49, -inf }
 0x2b4   : > { %1757 = vmax.xlane.f32.xlu2 %v1756_v19  ;;  %v785_v19 = vadd.f32 %v6977_v16, %v6752_v35 }
 0x2b6   : > { %v1606_v28 = vpop.f32.mrf.mxu2 }
 0x2b7   : > { %v1607_v36 = vadd.f32 %v7007_v17, %v1606_v28  ;;  %v7107_v28 = vunpack.c.h.bf16 %v5077_v62 }
 0x2b9   : > { %v7063_v26 = vadd.f32 %v7059_v48, %v1607_v36 }
 0x2bb   : > { %v1759_v44 = vsel %vm1731_vm6, %v7063_v26, -inf }
 0x2bc   : > { %1760 = vmax.xlane.f32.xlu0 %v1759_v44 }
 0x2bf   : > { %2322 = vrot.lane.b32.xlu1 %v6519_v61, %s5851_s28 }
 0x2c7   : > { %2394 = vrot.lane.b32.xlu1 %v6804_v4, %s5851_s28 }
 0x2c8   : > { %v1664_v2 = vpop.f32.mrf.mxu1 }
 0x2c9   : > { %v1665_v13 = vadd.f32 %v6997_v46, %v1664_v2  ;;  %v1418_v2 = vpack.c.bf16 %v783_v57, %v783_v57 }
 0x2cb   : > { %v7078_v58 = vadd.f32 %v7074_v12, %v1665_v13  ;;  %v1419_v13 = vpack.c.bf16 %v785_v19, %v785_v19 }
 0x2cc   : > { %2346 = vrot.lane.b32.xlu2 %v6615_v22, %s5851_s28  ;;  %v7159_v22 = vld [vmem:[#allocation12 + $0x28] sm:$0xff]  }
 0x2cd   : > { %v1768_v14 = vsel %vm1731_vm6, %v7078_v58, -inf }
 0x2ce   : > { %1769 = vmax.xlane.f32.xlu0 %v1768_v14 }
 0x2cf   : > { %2370 = vrot.lane.b32.xlu1 %v6715_v18, %s5851_s28 }
 0x2d4   : > { %2372 = vrot.lane.b32.xlu2 %v6646_v6, %s5851_s28 }
 0x2d7   : > { %2468 = vrot.lane.b32.xlu1 %v6979_v29, %s5851_s28 }
 0x2df   : > { %2444 = vrot.lane.b32.xlu1 %v6928_v20, %s5851_s28 }
 0x2e2   : > { %2324 = vrot.lane.b32.xlu0 %v8552_v60, %s5851_s28 }
 0x2e7   : > { %v1734_v21 = vpop.xlane.xlu0 %1733  ;;  %2466 = vrot.lane.b32.xlu1 %v6988_v10, %s5851_s28 }
 0x2e8   : > { %v1780_v11 = vsub.f32 %v7003_v34, %v1734_v21  ;;  %v1547_v34 = vadd.f32 %v7007_v17, %v1546_v1 }
 0x2ea   : > { %2396 = vrot.lane.b32.xlu0 %v6763_v56, %s5851_s28  ;;  %v1796_v39 = vmul.f32 1.442695, %v1780_v11  ;;  %v7113_v14 = vadd.f32 %v7107_v28, %v1547_v34  ;;  %v2067_v11 = vunpack.c.l.b16 %v1418_v2  ;;  %v788_v2 = vadd.f32 %v6990_v8, %v6752_v35 }
 0x2ec   : > { %5291 = vpow2.f32 %v1796_v39  ;;  %v2068_v39 = vunpack.c.l.b16 %v1419_v13  ;;  %v790_v13 = vadd.f32 %v6995_v24, %v6752_v35  ;;  %v1545_v35 = vadd.f32 %v6997_v46, %v1544_v38 }
 0x2ee   : > { %v7123_v19 = vpack.c.b16 %v2068_v39, %v2067_v11  ;;  %v1421_v11 = vpack.c.bf16 %v790_v13, %v790_v13 }
 0x2ef   : > { %v1737_v45 = vpop.xlane.xlu0 %1736 }
 0x2f0   : > { %v1781_v51 = vsub.f32 %v7013_v42, %v1737_v45  ;;  %8553 = vst [vmem:[#allocation23_spill] sm:$0xff] %v7123_v19 }
 0x2f2   : > { %v1798_v63 = vmul.f32 1.442695, %v1781_v51  ;;  %v7109_v36 = vpop.eup %5291  ;;  %v1747_v51 = vsel %vm1731_vm6, %v7113_v14, -inf }
 0x2f3   : > { %v1876_v23 = vpack.c.bf16 %v7109_v36, %v7109_v36 }
 0x2f4   : > { %5293 = vpow2.f32 %v1798_v63 }
 0x2f5   : > { %v1894_v1 = vunpack.c.l.b16 %v1876_v23 }
 0x2f7   : > { %v1740_v44 = vpop.xlane.xlu2 %1739 }
 0x2f8   : > { %v1782_v42 = vsub.f32 %v7021_v50, %v1740_v44 }
 0x2fa   : > { %v7117_v21 = vpop.eup %5293  ;;  %v1800_v45 = vmul.f32 1.442695, %v1782_v42  ;;  %v1666_v42 = vpop.f32.mrf.mxu1 }
 0x2fb   : > { %v1877_v16 = vpack.c.bf16 %v7117_v21, %v7117_v21  ;;  %v1667_v39 = vadd.f32 %v7007_v17, %v1666_v42  ;;  %v1634_v42 = vpop.f32.mrf.mxu3 }
 0x2fc   : > { %5295 = vpow2.f32 %v1800_v45  ;;  %v7138_v45 = vpop.permute.xlu1 %2298 }
 0x2fd   : > { %v1895_v63 = vunpack.c.l.b16 %v1877_v16  ;;  %1748 = vmax.xlane.f32.xlu2 %v1747_v51  ;;  %v1420_v16 = vpack.c.bf16 %v788_v2, %v788_v2 }
 0x2ff   : > { %v1743_v50 = vpop.xlane.xlu2 %1742  ;;  %v1896_v57 = vpack.c.b16 %v1895_v63, %v1894_v1  ;;  %v7147_v1 = vunpack.c.l.bf16 %v5077_v62  ;;  %v2095_v63 = vunpack.c.l.b16 %v1420_v16 }
 0x300   : > { %v1783_v34 = vsub.f32 %v7029_v41, %v1743_v50  ;;  %v7136_v41 = vunpack.c.h.bf16 %v7069_v33  ;;  %v2096_v50 = vunpack.c.l.b16 %v1421_v11  ;;  %v1635_v11 = vadd.f32 %v6997_v46, %v1634_v42 }
 0x301   : > { %4869 = vmatmul.msk.bf16.vlgmr.msrb.gmra.mxu3 %vm1731_vm6, %v1896_v57  ;;  %v7153_v2 = vadd.f32 %v7147_v1, %v1545_v35 }
 0x302   : > { %v1802_v44 = vmul.f32 1.442695, %v1783_v34  ;;  %2081 = vmatpush.bf16.msrb.mxu3 %v7123_v19  ;;  %v7132_v23 = vpop.eup %5295  ;;  %v7150_v57 = vadd.f32 %v7136_v41, %v1667_v39  ;;  %v7155_v13 = vpack.c.b16 %v2096_v50, %v2095_v63 }
 0x303   : > { %v1878_v51 = vpack.c.bf16 %v7132_v23, %v7132_v23  ;;  %v1744_v39 = vsel %vm1731_vm6, %v7153_v2, -inf }
 0x304   : > { %5297 = vpow2.f32 %v1802_v44  ;;  %8554 = vst [vmem:[#allocation37_spill] sm:$0xff] %v7155_v13  ;;  %v1771_v38 = vsel %vm1731_vm6, %v7150_v57, -inf }
 0x305   : > { %v1922_v33 = vunpack.c.l.b16 %v1878_v51  ;;  %v7168_v51 = vunpack.c.l.bf16 %v7159_v22 }
 0x307   : > { %8555 = vst [vmem:[#allocation38_spill] sm:$0xff] %v7168_v51 }
 0x30a   : > { %v7142_v8 = vpop.eup %5297 }
 0x30b   : > { %v1879_v24 = vpack.c.bf16 %v7142_v8, %v7142_v8 }
 0x30d   : > { %v1923_v34 = vunpack.c.l.b16 %v1879_v24  ;;  %v7173_v24 = vadd.f32 %v7168_v51, %v1635_v11 }
 0x30f   : > { %v1924_v44 = vpack.c.b16 %v1923_v34, %v1922_v33  ;;  %v1762_v50 = vsel %vm1731_vm6, %v7173_v24, -inf }
 0x311   : > { %v1752_v62 = vpop.xlane.xlu1 %1751  ;;  %4870 = vmatmul.msk.bf16.vlgmr.msra.gmra.mxu1 %vm1731_vm6, %v1924_v44  ;;  %1772 = vmax.xlane.f32.xlu1 %v1771_v38 }
 0x312   : > { %v1786_v16 = vsub.f32 %v7039_v9, %v1752_v62  ;;  %2109 = vmatpush.bf16.msra.mxu1 %v7155_v13 }
 0x314   : > { %1745 = vmax.xlane.f32.xlu0 %v1744_v39  ;;  %v1808_v35 = vmul.f32 1.442695, %v1786_v16 }
 0x315   : > { %2420 = vrot.lane.b32.xlu2 %v6858_v25, %s5851_s28 }
 0x316   : > { %5299 = vpow2.f32 %v1808_v35 }
 0x319   : > { %v1755_v63 = vpop.xlane.xlu1 %1754 }
 0x31a   : > { %v1787_v9 = vsub.f32 %v7047_v47, %v1755_v63  ;;  %v2301_v47 = vpop.permute.xlu0 %2300 }
 0x31b   : > { %v2306_v63 = vsel %vm1468_vm0, %v2301_v47, 0 }
 0x31c   : > { %v1810_v33 = vmul.f32 1.442695, %v1787_v9  ;;  %1763 = vmax.xlane.f32.xlu0 %v1762_v50  ;;  %v7180_v34 = vpop.eup %5299 }
 0x31d   : > { %2746 = vrot.lane.b32.xlu2 %v6898_v5, %s5851_s28  ;;  %v1882_v44 = vpack.c.bf16 %v7180_v34, %v7180_v34 }
 0x31e   : > { %5301 = vpow2.f32 %v1810_v33  ;;  %v1694_v33 = vpop.f32.mrf.mxu2 }
 0x31f   : > { %v1978_v62 = vunpack.c.l.b16 %v1882_v44 }
 0x324   : > { %v7184_v42 = vpop.eup %5301 }
 0x325   : > { %v1883_v38 = vpack.c.bf16 %v7184_v42, %v7184_v42 }
 0x327   : > { %v1979_v16 = vunpack.c.l.b16 %v1883_v38  ;;  %v1758_v11 = vpop.xlane.xlu2 %1757 }
 0x328   : > { %v1788_v39 = vsub.f32 %v7055_v49, %v1758_v11 }
 0x329   : > { %v1980_v35 = vpack.c.b16 %v1979_v16, %v1978_v62  ;;  %v1696_v62 = vpop.f32.mrf.mxu2 }
 0x32a   : > { %2442 = vrot.lane.b32.xlu1 %v6964_v27, %s5851_s28  ;;  %v1812_v9 = vmul.f32 1.442695, %v1788_v39  ;;  %v1697_v11 = vadd.f32 %v7007_v17, %v1696_v62 }
 0x32b   : > { %4872 = vmatmul.msk.bf16.vlgmr.msra.gmra.mxu3 %vm1731_vm6, %v1980_v35 }
 0x32c   : > { %2315 = vmatpush.bf16.xpose.msra.mxu3 %v2306_v63  ;;  %5303 = vpow2.f32 %v1812_v9 }
 0x32f   : > { %v1761_v50 = vpop.xlane.xlu0 %1760 }
 0x330   : > { %v1789_v25 = vsub.f32 %v7063_v26, %v1761_v50  ;;  %2418 = vrot.lane.b32.xlu0 %v6902_v53, %s5851_s28  ;;  %v5082_v26 = vld [vmem:[#allocation12 + $0x38] sm:$0xff]  }
 0x331   : > { %v7207_v35 = vunpack.c.h.bf16 %v5082_v26  ;;  %v7220_v62 = vunpack.c.l.bf16 %v5082_v26 }
 0x332   : > { %v1814_v44 = vmul.f32 1.442695, %v1789_v25  ;;  %v7196_v49 = vpop.eup %5303 }
 0x333   : > { %v1884_v38 = vpack.c.bf16 %v7196_v49, %v7196_v49  ;;  %8556 = vst [vmem:[#allocation39_spill] sm:$0xff] %v7207_v35  ;;  %v7213_v9 = vadd.f32 %v7207_v35, %v1697_v11 }
 0x334   : > { %5305 = vpow2.f32 %v1814_v44  ;;  %v7217_v44 = vpop.permute.xlu1 %2322  ;;  %8557 = vst [vmem:[#allocation40_spill] sm:$0xff] %v7220_v62 }
 0x335   : > { %v2006_v39 = vunpack.c.l.b16 %v1884_v38  ;;  %v1777_v50 = vsel %vm1731_vm6, %v7213_v9, -inf  ;;  %v1695_v38 = vadd.f32 %v6997_v46, %v1694_v33 }
 0x338   : > { %2696 = vrot.lane.b32.xlu0 %v6936_v40, %s5851_s28  ;;  %v7229_v40 = vunpack.c.h.bf16 %v7159_v22 }
 0x33a   : > { %v7202_v47 = vpop.eup %5305  ;;  %8558 = vst [vmem:[#allocation41_spill] sm:$0xff] %v7229_v40 }
 0x33b   : > { %v1885_v16 = vpack.c.bf16 %v7202_v47, %v7202_v47 }
 0x33d   : > { %v2007_v25 = vunpack.c.l.b16 %v1885_v16 }
 0x33f   : > { %v2008_v63 = vpack.c.b16 %v2007_v25, %v2006_v39  ;;  %v7223_v39 = vadd.f32 %v7220_v62, %v1695_v38  ;;  %v1636_v25 = vpop.f32.mrf.mxu3 }
 0x340   : > { %2771 = vrot.lane.b32.xlu0 %v6962_v37, %s5851_s28 }
 0x341   : > { %4873 = vmatmul.msk.bf16.vlgmr.msrb.gmra.mxu1 %vm1731_vm6, %v2008_v63  ;;  %v1770_v16 = vpop.xlane.xlu0 %1769  ;;  %v1637_v63 = vadd.f32 %v7007_v17, %v1636_v25  ;;  %v1774_v11 = vsel %vm1731_vm6, %v7223_v39, -inf  ;;  %v7239_v17 = vpop.permute.xlu2 %2346  ;;  %v1831_v25 = vsel %vm1731_vm6, %v7117_v21, 0.0 }
 0x343   : > { %v7235_v33 = vadd.f32 %v7229_v40, %v1637_v63 }
 0x345   : > { %v1765_v26 = vsel %vm1731_vm6, %v7235_v33, -inf }
 0x346   : > { %1778 = vmax.xlane.f32.xlu2 %v1777_v50  ;;  %v7231_v50 = vpop.permute.xlu1 %2394 }
 0x349   : > { %v7247_v22 = vpop.permute.xlu2 %2372 }
 0x34e   : > { %v7241_v38 = vpop.permute.xlu1 %2370 }
 0x354   : > { %v2325_v51 = vpop.permute.xlu0 %2324  ;;  %1775 = vmax.xlane.f32.xlu1 %v1774_v11 }
 0x355   : > { %v2330_v46 = vsel %vm1468_vm0, %v2325_v51, 0 }
 0x356   : > { %2339 = vmatpush.bf16.xpose.msrb.mxu1 %v2330_v46  ;;  %v7249_v51 = vpop.permute.xlu1 %2468  ;;  %v1837_v46 = vsel %vm1731_vm6, %v7142_v8, 0.0 }
 0x35c   : > { %1766 = vmax.xlane.f32.xlu1 %v1765_v26  ;;  %v2397_v8 = vpop.permute.xlu0 %2396 }
 0x35e   : > { %2846 = vrot.lane.b32.xlu2 %v7155_v13, %s5851_s28  ;;  %v7256_v26 = vpop.permute.xlu1 %2444 }
 0x366   : > { %3051 = vrot.lane.b32.xlu2 %v6378_v30, %s5852_s25 }
 0x36a   : > { %1832 = vadd.xlane.f32.xlu0 %v1831_v25  ;;  %v7261_v25 = vpop.permute.xlu1 %2466 }
 0x370   : > { %v1749_v63 = vpop.xlane.xlu2 %1748 }
 0x371   : > { %v1785_v11 = vsub.f32 %v7113_v14, %v1749_v63  ;;  %v1792_v63 = vsub.f32 %v7078_v58, %v1770_v16  ;;  %v1828_v16 = vsel %vm1731_vm6, %v7109_v36, 0.0  ;;  %v1834_v36 = vsel %vm1731_vm6, %v7132_v23, 0.0 }
 0x372   : > { %1838 = vadd.xlane.f32.xlu0 %v1837_v46  ;;  %v1846_v23 = vsel %vm1731_vm6, %v7180_v34, 0.0 }
 0x373   : > { %v1806_v13 = vmul.f32 1.442695, %v1785_v11 }
 0x375   : > { %5307 = vpow2.f32 %v1806_v13  ;;  %2671 = vrot.lane.b32.xlu1 %v6868_v3, %s5851_s28  ;;  %v1820_v13 = vmul.f32 1.442695, %v1792_v63 }
 0x377   : > { %5309 = vpow2.f32 %v1820_v13 }
 0x378   : > { %v2421_v30 = vpop.permute.xlu2 %2420 }
 0x379   : > { %v2426_v5 = vsel %vm1468_vm0, %v2421_v30, 0 }
 0x37a   : > { %2435 = vmatpush.bf16.xpose.msrb.mxu0 %v2426_v5 }
 0x37b   : > { %v5308_v21 = vpop.eup %5307 }
 0x37c   : > { %v1843_v14 = vsel %vm1731_vm6, %v5308_v21, 0.0  ;;  %v1881_v13 = vpack.c.bf16 %v5308_v21, %v5308_v21 }
 0x37d   : > { %1844 = vadd.xlane.f32.xlu0 %v1843_v14  ;;  %2821 = vrot.lane.b32.xlu1 %v7123_v19, %s5851_s28  ;;  %v7269_v32 = vpop.eup %5309  ;;  %v2354_v19 = vsel %vm1468_vm0, %v7099_v15, 0  ;;  %v2402_v15 = vsel %vm1468_vm0, %v2397_v8, 0 }
 0x37e   : > { %v1888_v58 = vpack.c.bf16 %v7269_v32, %v7269_v32 }
 0x380   : > { %v2747_v8 = vpop.permute.xlu2 %2746 }
 0x384   : > { %v1773_v11 = vpop.xlane.xlu1 %1772 }
 0x385   : > { %v1793_v46 = vsub.f32 %v7150_v57, %v1773_v11 }
 0x387   : > { %v1822_v53 = vmul.f32 1.442695, %v1793_v46  ;;  %v1746_v30 = vpop.xlane.xlu0 %1745 }
 0x388   : > { %v1784_v5 = vsub.f32 %v7153_v2, %v1746_v30  ;;  %v2062_v2 = vunpack.c.l.b16 %v1888_v58 }
 0x389   : > { %5311 = vpow2.f32 %v1822_v53 }
 0x38a   : > { %v1804_v0 = vmul.f32 1.442695, %v1784_v5  ;;  %v1951_v5 = vunpack.c.l.b16 %v1881_v13  ;;  %v1855_v13 = vsel %vm1731_vm6, %v7202_v47, 0.0 }
 0x38c   : > { %5313 = vpow2.f32 %v1804_v0 }
 0x38f   : > { %v5312_v14 = vpop.eup %5311  ;;  %1829 = vadd.xlane.f32.xlu2 %v1828_v16  ;;  %v1764_v21 = vpop.xlane.xlu0 %1763 }
 0x390   : > { %v1889_v63 = vpack.c.bf16 %v5312_v14, %v5312_v14  ;;  %v1867_v57 = vsel %vm1731_vm6, %v5312_v14, 0.0 }
 0x391   : > { %1868 = vadd.xlane.f32.xlu0 %v1867_v57 }
 0x392   : > { %v5314_v11 = vpop.eup %5313  ;;  %v2063_v53 = vunpack.c.l.b16 %v1889_v63  ;;  %v1790_v63 = vsub.f32 %v7173_v24, %v1764_v21  ;;  %v1849_v24 = vsel %vm1731_vm6, %v7184_v42, 0.0 }
 0x393   : > { %v1880_v46 = vpack.c.bf16 %v5314_v11, %v5314_v11  ;;  %v1840_v58 = vsel %vm1731_vm6, %v5314_v11, 0.0 }
 0x394   : > { %v2064_v30 = vpack.c.b16 %v2063_v53, %v2062_v2  ;;  %v1816_v57 = vmul.f32 1.442695, %v1790_v63 }
 0x395   : > { %v1950_v0 = vunpack.c.l.b16 %v1880_v46 }
 0x396   : > { %4875 = vmatmul.msk.bf16.vlgmr.msrb.gmra.mxu3 %vm1731_vm6, %v2064_v30  ;;  %5315 = vpow2.f32 %v1816_v57 }
 0x397   : > { %v1952_v16 = vpack.c.b16 %v1951_v5, %v1950_v0  ;;  %2363 = vmatpush.bf16.xpose.msrb.mxu3 %v2354_v19  ;;  %1835 = vadd.xlane.f32.xlu2 %v1834_v36  ;;  %v1852_v19 = vsel %vm1731_vm6, %v7196_v49, 0.0  ;;  %v2474_v49 = vsel %vm1468_vm0, %v7249_v51, 0 }
 0x399   : > { %4871 = vmatmul.msk.bf16.vlgmr.msrb.gmra.mxu2 %vm1731_vm6, %v1952_v16 }
 0x39c   : > { %v2443_v2 = vpop.permute.xlu1 %2442 }
 0x39f   : > { %1841 = vadd.xlane.f32.xlu2 %v1840_v58  ;;  %v2378_v58 = vsel %vm1468_vm0, %v7247_v22, 0  ;;  %v2450_v22 = vsel %vm1468_vm0, %v7256_v26, 0 }
 0x3a2   : > { %v2419_v14 = vpop.permute.xlu0 %2418 }
 0x3a3   : > { %4898 = vmatmul.msk.bf16.vlgmr.msrb.gmra.mxu0 %vm1468_vm0, %v2419_v14 }
 0x3a6   : > { %4893 = vmatmul.msk.bf16.vlgmr.msra.gmra.mxu3 %vm1468_vm0, %v7138_v45  ;;  %v5316_v45 = vpop.eup %5315 }
 0x3a7   : > { %2411 = vmatpush.bf16.xpose.msra.mxu3 %v2402_v15  ;;  %1853 = vadd.xlane.f32.xlu2 %v1852_v19  ;;  %v1858_v34 = vsel %vm1731_vm6, %v5316_v45, 0.0 }
 0x3a8   : > { %1847 = vadd.xlane.f32.xlu1 %v1846_v23 }
 0x3af   : > { %1856 = vadd.xlane.f32.xlu2 %v1855_v13 }
 0x3b0   : > { %1850 = vadd.xlane.f32.xlu1 %v1849_v24  ;;  %v2697_v24 = vpop.permute.xlu0 %2696 }
 0x3b6   : > { %4895 = vmatmul.msk.bf16.vlgmr.msrb.gmra.mxu3 %vm1468_vm0, %v7239_v17 }
 0x3b7   : > { %2483 = vmatpush.bf16.xpose.msrb.mxu3 %v2474_v49  ;;  %1859 = vadd.xlane.f32.xlu2 %v1858_v34  ;;  %v5019_v34 = vld [vmem:[#allocation14] sm:$0xff] }
 0x3b9   : > { %v1779_v11 = vpop.xlane.xlu2 %1778 }
 0x3ba   : > { %v1795_v47 = vsub.f32 %v7213_v9, %v1779_v11  ;;  %v1915_v11 = vpop.f32.mrf.mxu3 }
 0x3bc   : > { %v1826_v53 = vmul.f32 1.442695, %v1795_v47 }
 0x3be   : > { %5317 = vpow2.f32 %v1826_v53 }
 0x3c1   : > { %v7327_v49 = vpop.permute.xlu2 %2846 }
 0x3c2   : > { %v1917_v53 = vpop.f32.mrf.mxu3 }
 0x3c4   : > { %v7305_v30 = vpop.eup %5317 }
 0x3c5   : > { %v1891_v0 = vpack.c.bf16 %v7305_v30, %v7305_v30 }
 0x3c6   : > { %4897 = vmatmul.msk.bf16.vlgmr.msra.gmra.mxu3 %vm1468_vm0, %v7231_v50 }
 0x3c7   : > { %v1776_v42 = vpop.xlane.xlu1 %1775  ;;  %v2091_v16 = vunpack.c.l.b16 %v1891_v0 }
 0x3c8   : > { %v1794_v46 = vsub.f32 %v7223_v39, %v1776_v42 }
 0x3c9   : > { %v7331_v47 = vpop.permute.xlu2 %3051 }
 0x3ca   : > { %v1824_v51 = vmul.f32 1.442695, %v1794_v46  ;;  %v1999_v42 = vpop.f32.mrf.mxu3 }
 0x3cc   : > { %5319 = vpow2.f32 %v1824_v51 }
 0x3cf   : > { %v1767_v17 = vpop.xlane.xlu1 %1766 }
 0x3d0   : > { %v1791_v5 = vsub.f32 %v7235_v33, %v1767_v17  ;;  %v1886_v33 = vpack.c.bf16 %v5316_v45, %v5316_v45  ;;  %v5020_v45 = vld [vmem:[#allocation14 + $0x8] sm:$0xff] }
 0x3d1   : > { %2218 = vmatpush.bf16.msrb.mxu2 %v5020_v45 }
 0x3d2   : > { %v7310_v36 = vpop.eup %5319  ;;  %v1818_v9 = vmul.f32 1.442695, %v1791_v5  ;;  %v2034_v19 = vunpack.c.l.b16 %v1886_v33 }
 0x3d3   : > { %v1890_v50 = vpack.c.bf16 %v7310_v36, %v7310_v36 }
 0x3d4   : > { %5321 = vpow2.f32 %v1818_v9 }
 0x3d5   : > { %v2090_v21 = vunpack.c.l.b16 %v1890_v50  ;;  %2219 = vmatpush.bf16.msrb.mxu2 %v5019_v34  ;;  %v2001_v50 = vpop.f32.mrf.mxu3 }
 0x3d6   : > { %4900 = vmatmul.msk.bf16.vlgmr.msrb.gmra.mxu3 %vm1468_vm0, %v7261_v25  ;;  %v1864_v25 = vsel %vm1731_vm6, %v7269_v32, 0.0  ;;  %v2772_v32 = vpop.permute.xlu0 %2771 }
 0x3d7   : > { %v2092_v39 = vpack.c.b16 %v2091_v16, %v2090_v21 }
 0x3d9   : > { %4876 = vmatmul.msk.bf16.vlgmr.msra.gmra.mxu1 %vm1731_vm6, %v2092_v39 }
 0x3da   : > { %v5322_v14 = vpop.eup %5321  ;;  %2387 = vmatpush.bf16.xpose.msra.mxu1 %v2378_v58 }
 0x3db   : > { %v1887_v63 = vpack.c.bf16 %v5322_v14, %v5322_v14  ;;  %v1861_v15 = vsel %vm1731_vm6, %v5322_v14, 0.0 }
 0x3dc   : > { %1862 = vadd.xlane.f32.xlu1 %v1861_v15 }
 0x3dd   : > { %v2035_v23 = vunpack.c.l.b16 %v1887_v63 }
 0x3de   : > { %v1833_v26 = vpop.xlane.xlu0 %1832 }
 0x3df   : > { %v2036_v57 = vpack.c.b16 %v2035_v23, %v2034_v19  ;;  %5323 = vrcp.f32 %v1833_v26 }
 0x3e1   : > { %4874 = vmatmul.msk.bf16.vlgmr.msra.gmra.mxu2 %vm1731_vm6, %v2036_v57 }
 0x3e4   : > { %1865 = vadd.xlane.f32.xlu1 %v1864_v25 }
 0x3e6   : > { %v1839_v9 = vpop.xlane.xlu0 %1838 }
 0x3e7   : > { %v2672_v13 = vpop.permute.xlu1 %2671 }
 0x3e8   : > { %2684 = vmatpush.bf16.msra.mxu0 %v2672_v13  ;;  %v5065_v13 = vld [vmem:[#allocation11 + $0x8] sm:$0xff]  }
 0x3e9   : > { %4894 = vmatmul.msk.bf16.vlgmr.msrb.gmra.mxu1 %vm1468_vm0, %v7217_v44  ;;  %v7342_v45 = vunpack.c.l.bf16 %v5065_v13 }
 0x3ea   : > { %2459 = vmatpush.bf16.xpose.msrb.mxu1 %v2450_v22 }
 0x3ec   : > { %2759 = vmatpush.bf16.msrb.mxu0 %v2747_v8  ;;  %v5324_v8 = vpop.eup %5323 }
 0x3ed   : > { %v2133_v51 = vmul.f32 %v5324_v8, %v1917_v53 }
 0x3f0   : > { %v1845_v19 = vpop.xlane.xlu0 %1844 }
 0x3f9   : > { %4896 = vmatmul.msk.bf16.vlgmr.msra.gmra.mxu1 %vm1468_vm0, %v7241_v38  ;;  %v1943_v38 = vpop.f32.mrf.mxu1 }
 0x3fa   : > { %2709 = vmatpush.bf16.msra.mxu1 %v2697_v24 }
 0x401   : > { %v1945_v58 = vpop.f32.mrf.mxu1 }
 0x402   : > { %v1830_v44 = vpop.xlane.xlu2 %1829 }
 0x403   : > { %5325 = vrcp.f32 %v1830_v44 }
 0x409   : > { %v5326_v46 = vpop.eup %5325  ;;  %4899 = vmatmul.msk.bf16.vlgmr.msrb.gmra.mxu1 %vm1468_vm0, %v2443_v2  ;;  %v7337_v2 = vpop.permute.xlu1 %2821 }
 0x40a   : > { %v2132_v17 = vmul.f32 %v5326_v46, %v1915_v11  ;;  %2784 = vmatpush.bf16.msrb.mxu1 %v2772_v32  ;;  %v1836_v0 = vpop.xlane.xlu2 %1835 }
 0x40b   : > { %5327 = vrcp.f32 %v1836_v0 }
 0x40c   : > { %v2164_v5 = vpack.c.bf16 %v2133_v51, %v2132_v17  ;;  %5329 = vrcp.f32 %v1839_v9  ;;  %v7351_v17 = vunpack.c.h.bf16 %v5065_v13 }
 0x40d   : > { %5331 = vrcp.f32 %v1845_v19  ;;  %v2027_v19 = vpop.f32.mrf.mxu1 }
 0x40e   : > { %4885 = vmatmul.msk.bf16.vlgmr.msrb.gmra.mxu2 %vm1468_vm0, %v2164_v5 }
 0x411   : > { %v5328_v16 = vpop.eup %5327 }
 0x412   : > { %v5330_v21 = vpop.eup %5329  ;;  %v2134_v39 = vmul.f32 %v5328_v16, %v1943_v38  ;;  %v1842_v23 = vpop.xlane.xlu2 %1841 }
 0x413   : > { %v2135_v14 = vmul.f32 %v5330_v21, %v1945_v58  ;;  %5333 = vrcp.f32 %v1842_v23  ;;  %v5332_v24 = vpop.eup %5331 }
 0x415   : > { %v2165_v15 = vpack.c.bf16 %v2135_v14, %v2134_v39  ;;  %v2029_v13 = vpop.f32.mrf.mxu1 }
 0x419   : > { %v7335_v33 = vpop.f32.mrf.mxu3  ;;  %v5334_v11 = vpop.eup %5333 }
 0x41a   : > { %v1854_v0 = vpop.xlane.xlu2 %1853 }
 0x41b   : > { %v1848_v25 = vpop.xlane.xlu1 %1847 }
 0x41c   : > { %v1971_v63 = vpop.f32.mrf.mxu2 }
 0x41d   : > { %v2136_v26 = vmul.f32 %v5334_v11, %v1971_v63 }
 0x41e   : > { %4886 = vmatmul.msk.bf16.gmra.mxu2 %vm1468_vm0, %v2165_v15 }
 0x421   : > { %v7340_v57 = vpop.f32.mrf.mxu3 }
 0x422   : > { %v1857_v63 = vpop.xlane.xlu2 %1856 }
 0x423   : > { %v1851_v44 = vpop.xlane.xlu1 %1850 }
 0x424   : > { %v1973_v22 = vpop.f32.mrf.mxu2  ;;  %5335 = vrcp.f32 %v1851_v44 }
 0x425   : > { %v2137_v34 = vmul.f32 %v5332_v24, %v1973_v22  ;;  %5337 = vrcp.f32 %v1848_v25 }
 0x426   : > { %5339 = vrcp.f32 %v1857_v63 }
 0x427   : > { %v2166_v8 = vpack.c.bf16 %v2137_v34, %v2136_v26  ;;  %5341 = vrcp.f32 %v1854_v0 }
 0x429   : > { %v2317_v32 = vpop.f32.mrf.mxu3 }
 0x42a   : > { %v2318_v53 = vadd.f32 %v7342_v45, %v2317_v32  ;;  %v5336_v16 = vpop.eup %5335  ;;  %v1860_v26 = vpop.xlane.xlu2 %1859 }
 0x42b   : > { %v5338_v39 = vpop.eup %5337  ;;  %v2139_v58 = vmul.f32 %v5336_v16, %v2001_v50  ;;  %5343 = vrcp.f32 %v1860_v26 }
 0x42c   : > { %v7346_v46 = vadd.f32 %v6999_v59, %v2318_v53  ;;  %v2138_v14 = vmul.f32 %v5338_v39, %v1999_v42  ;;  %v5340_v23 = vpop.eup %5339 }
 0x42d   : > { %v5342_v25 = vpop.eup %5341  ;;  %v2141_v22 = vmul.f32 %v5340_v23, %v2029_v13 }
 0x42e   : > { %4887 = vmatmul.msk.bf16.gmra.mxu2 %vm1468_vm0, %v2166_v8  ;;  %v2506_v51 = vsel %vm1731_vm6, %v7346_v46, -inf  ;;  %v2167_v15 = vpack.c.bf16 %v2139_v58, %v2138_v14  ;;  %v2140_v24 = vmul.f32 %v5342_v25, %v2027_v19 }
 0x42f   : > { %2507 = vmax.xlane.f32.xlu1 %v2506_v51 }
 0x430   : > { %v2168_v34 = vpack.c.bf16 %v2141_v22, %v2140_v24  ;;  %v1869_v24 = vpop.xlane.xlu0 %1868 }
 0x431   : > { %v2319_v5 = vpop.f32.mrf.mxu3 }
 0x432   : > { %v2320_v9 = vadd.f32 %v7351_v17, %v2319_v5 }
 0x434   : > { %v7355_v38 = vadd.f32 %v7009_v31, %v2320_v9  ;;  %v5344_v9 = vpop.eup %5343 }
 0x436   : > { %v2509_v21 = vsel %vm1731_vm6, %v7355_v38, -inf }
 0x437   : > { %2510 = vmax.xlane.f32.xlu1 %v2509_v21 }
 0x439   : > { %v7361_v11 = vpop.f32.mrf.mxu3 }
 0x43e   : > { %4888 = vmatmul.msk.bf16.gmra.mxu2 %vm1468_vm0, %v2167_v15 }
 0x441   : > { %v7365_v42 = vpop.f32.mrf.mxu3 }
 0x449   : > { %v2413_v5 = vpop.f32.mrf.mxu3 }
 0x44a   : > { %v2414_v16 = vadd.f32 %v7342_v45, %v2413_v5 }
 0x44c   : > { %v7378_v13 = vadd.f32 %v7051_v55, %v2414_v16  ;;  %v1870_v16 = vsel %vm1731_vm6, %v7310_v36, 0.0 }
 0x44e   : > { %4889 = vmatmul.msk.bf16.gmra.mxu2 %vm1468_vm0, %v2168_v34  ;;  %v2530_v26 = vsel %vm1731_vm6, %v7378_v13, -inf }
 0x44f   : > { %v1863_v53 = vpop.xlane.xlu1 %1862 }
 0x450   : > { %5345 = vrcp.f32 %v1863_v53 }
 0x456   : > { %v7363_v32 = vpop.f32.mrf.mxu1  ;;  %v5346_v39 = vpop.eup %5345 }
 0x457   : > { %v1866_v19 = vpop.xlane.xlu1 %1865 }
 0x458   : > { %5347 = vrcp.f32 %v1866_v19 }
 0x459   : > { %5349 = vrcp.f32 %v1869_v24 }
 0x45e   : > { %v7367_v50 = vpop.f32.mrf.mxu1 }
 0x464   : > { %v2055_v44 = vpop.f32.mrf.mxu2 }
 0x465   : > { %v2142_v14 = vmul.f32 %v5344_v9, %v2055_v44 }
 0x466   : > { %v2341_v8 = vpop.f32.mrf.mxu1 }
 0x467   : > { %v2342_v51 = vadd.f32 %v7342_v45, %v2341_v8  ;;  %v5348_v8 = vpop.eup %5347 }
 0x468   : > { %v2144_v5 = vmul.f32 %v5348_v8, %v7335_v33 }
 0x469   : > { %v7371_v0 = vadd.f32 %v7017_v43, %v2342_v51 }
 0x46b   : > { %v2512_v21 = vsel %vm1731_vm6, %v7371_v0, -inf }
 0x46c   : > { %v2057_v58 = vpop.f32.mrf.mxu2  ;;  %2513 = vmax.xlane.f32.xlu1 %v2512_v21  ;;  %v5350_v21 = vpop.eup %5349 }
 0x46d   : > { %v2143_v63 = vmul.f32 %v5346_v39, %v2057_v58  ;;  %v2145_v39 = vmul.f32 %v5350_v21, %v7340_v57  ;;  %v2415_v58 = vpop.f32.mrf.mxu3 }
 0x46e   : > { %v2343_v15 = vpop.f32.mrf.mxu1  ;;  %v2416_v19 = vadd.f32 %v7351_v17, %v2415_v58 }
 0x46f   : > { %v2169_v23 = vpack.c.bf16 %v2143_v63, %v2142_v14  ;;  %v2344_v25 = vadd.f32 %v7351_v17, %v2343_v15  ;;  %v2170_v15 = vpack.c.bf16 %v2145_v39, %v2144_v5 }
 0x470   : > { %v7408_v57 = vadd.f32 %v7059_v48, %v2416_v19 }
 0x471   : > { %4890 = vmatmul.msk.bf16.gmra.mxu2 %vm1468_vm0, %v2169_v23  ;;  %v7382_v22 = vadd.f32 %v7025_v52, %v2344_v25 }
 0x473   : > { %v2515_v34 = vsel %vm1731_vm6, %v7382_v22, -inf }
 0x474   : > { %2516 = vmax.xlane.f32.xlu2 %v2515_v34  ;;  %2531 = vmax.xlane.f32.xlu1 %v2530_v26 }
 0x475   : > { %v2485_v24 = vpop.f32.mrf.mxu3 }
 0x476   : > { %v2389_v53 = vpop.f32.mrf.mxu1  ;;  %v2486_v26 = vadd.f32 %v7342_v45, %v2485_v24 }
 0x477   : > { %v2390_v44 = vadd.f32 %v7342_v45, %v2389_v53  ;;  %v2533_v53 = vsel %vm1731_vm6, %v7408_v57, -inf }
 0x478   : > { %v7419_v8 = vadd.f32 %v7220_v62, %v2486_v26 }
 0x479   : > { %v7390_v51 = vadd.f32 %v7035_v54, %v2390_v44 }
 0x47a   : > { %v2548_v5 = vsel %vm1731_vm6, %v7419_v8, -inf }
 0x47b   : > { %v2524_v9 = vsel %vm1731_vm6, %v7390_v51, -inf }
 0x47c   : > { %2525 = vmax.xlane.f32.xlu0 %v2524_v9  ;;  %1871 = vadd.xlane.f32.xlu2 %v1870_v16 }
 0x47e   : > { %v2391_v14 = vpop.f32.mrf.mxu1 }
 0x47f   : > { %v2392_v63 = vadd.f32 %v7351_v17, %v2391_v14 }
 0x481   : > { %4891 = vmatmul.msk.bf16.gmra.mxu2 %vm1468_vm0, %v2170_v15  ;;  %v7401_v33 = vadd.f32 %v7043_v7, %v2392_v63  ;;  %v8559_v63 = vld [vmem:[#allocation21_spill] sm:$0xff] }
 0x483   : > { %v2527_v36 = vsel %vm1731_vm6, %v7401_v33, -inf }
 0x484   : > { %2528 = vmax.xlane.f32.xlu2 %v2527_v36 }
 0x486   : > { %v2461_v23 = vpop.f32.mrf.mxu1 }
 0x487   : > { %v2462_v25 = vadd.f32 %v7342_v45, %v2461_v23 }
 0x489   : > { %v7411_v34 = vadd.f32 %v7074_v12, %v2462_v25 }
 0x48b   : > { %v2542_v44 = vsel %vm1731_vm6, %v7411_v34, -inf }
 0x48c   : > { %2534 = vmax.xlane.f32.xlu2 %v2533_v53  ;;  %2543 = vmax.xlane.f32.xlu1 %v2542_v44 }
 0x48e   : > { %v2463_v15 = vpop.f32.mrf.mxu1 }
 0x490   : > { %3075 = vrot.lane.b32.xlu0 %v8552_v60, %s5852_s25 }
 0x494   : > { %2549 = vmax.xlane.f32.xlu1 %v2548_v5  ;;  %v1873_v5 = vsel %vm1731_vm6, %v7305_v30, 0.0 }
 0x4a2   : > { %v2508_v9 = vpop.xlane.xlu1 %2507 }
 0x4a3   : > { %v2554_v16 = vsub.f32 %v7346_v46, %v2508_v9  ;;  %v2464_v46 = vadd.f32 %v7351_v17, %v2463_v15  ;;  %v7459_v9 = vpop.f32.mrf.mxu0  ;;  %v2487_v15 = vpop.f32.mrf.mxu3 }
 0x4a4   : > { %3073 = vrot.lane.b32.xlu2 %v6519_v61, %s5852_s25 }
 0x4a5   : > { %v2570_v21 = vmul.f32 1.442695, %v2554_v16  ;;  %v7445_v23 = vadd.f32 %v7136_v41, %v2464_v46  ;;  %v2366_v16 = vadd.f32 %v7342_v45, %v7361_v11 }
 0x4a7   : > { %5351 = vpow2.f32 %v2570_v21  ;;  %v2545_v53 = vsel %vm1731_vm6, %v7445_v23, -inf }
 0x4aa   : > { %v2511_v39 = vpop.xlane.xlu1 %2510 }
 0x4ab   : > { %v2555_v58 = vsub.f32 %v7355_v38, %v2511_v39  ;;  %v2439_v21 = vpop.f32.mrf.mxu0 }
 0x4ac   : > { %3195 = vrot.lane.b32.xlu2 %v6928_v20, %s5852_s25  ;;  %v2440_v39 = vadd.f32 %v7351_v17, %v2439_v21 }
 0x4ad   : > { %v2572_v14 = vmul.f32 1.442695, %v2555_v58  ;;  %3049 = vrot.lane.b32.xlu1 %v8559_v63, %s5852_s25  ;;  %v7433_v19 = vpop.eup %5351 }
 0x4ae   : > { %v2650_v36 = vpack.c.bf16 %v7433_v19, %v7433_v19  ;;  %v7475_v11 = vadd.f32 %v7229_v40, %v2440_v39 }
 0x4af   : > { %5353 = vpow2.f32 %v2572_v14 }
 0x4b0   : > { %v2668_v24 = vunpack.c.l.b16 %v2650_v36  ;;  %v2539_v36 = vsel %vm1731_vm6, %v7475_v11, -inf }
 0x4b4   : > { %3193 = vrot.lane.b32.xlu2 %v6964_v27, %s5852_s25 }
 0x4b5   : > { %v7440_v38 = vpop.eup %5353  ;;  %3123 = vrot.lane.b32.xlu1 %v6646_v6, %s5852_s25 }
 0x4b6   : > { %v2651_v25 = vpack.c.bf16 %v7440_v38, %v7440_v38 }
 0x4b8   : > { %v2669_v26 = vunpack.c.l.b16 %v2651_v25  ;;  %v2488_v25 = vadd.f32 %v7351_v17, %v2487_v15 }
 0x4ba   : > { %v2670_v44 = vpack.c.b16 %v2669_v26, %v2668_v24  ;;  %2546 = vmax.xlane.f32.xlu0 %v2545_v53 }
 0x4bc   : > { %4901 = vmatmul.msk.bf16.vlgmr.msra.gmra.mxu0 %vm1731_vm6, %v2670_v44  ;;  %v7482_v44 = vadd.f32 %v7207_v35, %v2488_v25 }
 0x4bd   : > { %2834 = vmatpush.bf16.msra.mxu0 %v7337_v2  ;;  %3147 = vrot.lane.b32.xlu1 %v6763_v56, %s5852_s25  ;;  %v7466_v2 = vadd.f32 %v7147_v1, %v2366_v16 }
 0x4bf   : > { %v2518_v30 = vsel %vm1731_vm6, %v7466_v2, -inf }
 0x4c2   : > { %1874 = vadd.xlane.f32.xlu0 %v1873_v5  ;;  %v2551_v5 = vsel %vm1731_vm6, %v7482_v44, -inf }
 0x4c5   : > { %3145 = vrot.lane.b32.xlu1 %v6804_v4, %s5852_s25 }
 0x4d6   : > { %3121 = vrot.lane.b32.xlu0 %v6715_v18, %s5852_s25 }
 0x4dd   : > { %2519 = vmax.xlane.f32.xlu2 %v2518_v30 }
 0x4de   : > { %3219 = vrot.lane.b32.xlu0 %v6979_v29, %s5852_s25 }
 0x4df   : > { %v2514_v58 = vpop.xlane.xlu1 %2513 }
 0x4e0   : > { %v2556_v14 = vsub.f32 %v7371_v0, %v2514_v58 }
 0x4e2   : > { %v2574_v46 = vmul.f32 1.442695, %v2556_v14 }
 0x4e4   : > { %5355 = vpow2.f32 %v2574_v46 }
 0x4e5   : > { %2540 = vmax.xlane.f32.xlu2 %v2539_v36 }
 0x4e7   : > { %v2517_v24 = vpop.xlane.xlu2 %2516  ;;  %v2532_v36 = vpop.xlane.xlu1 %2531 }
 0x4e8   : > { %v2557_v26 = vsub.f32 %v7382_v22, %v2517_v24 }
 0x4ea   : > { %v2576_v53 = vmul.f32 1.442695, %v2557_v26  ;;  %v7484_v0 = vpop.eup %5355  ;;  %v2562_v26 = vsub.f32 %v7378_v13, %v2532_v36 }
 0x4eb   : > { %v2652_v30 = vpack.c.bf16 %v7484_v0, %v7484_v0 }
 0x4ec   : > { %5357 = vpow2.f32 %v2576_v53 }
 0x4ed   : > { %v2693_v15 = vunpack.c.l.b16 %v2652_v30  ;;  %v2368_v30 = vadd.f32 %v7351_v17, %v7365_v42 }
 0x4ef   : > { %v2526_v16 = vpop.xlane.xlu0 %2525  ;;  %v7488_v21 = vpop.xlane.xlu2 %1871  ;;  %2552 = vmax.xlane.f32.xlu1 %v2551_v5  ;;  %v2586_v5 = vmul.f32 1.442695, %v2562_v26 }
 0x4f0   : > { %v2560_v39 = vsub.f32 %v7390_v51, %v2526_v16  ;;  %v8560_v16 = vld [vmem:[#allocation24_spill] sm:$0xff] }
 0x4f2   : > { %v7493_v22 = vpop.eup %5357  ;;  %v2582_v14 = vmul.f32 1.442695, %v2560_v39 }
 0x4f3   : > { %v2653_v58 = vpack.c.bf16 %v7493_v22, %v7493_v22 }
 0x4f4   : > { %5359 = vpow2.f32 %v2582_v14 }
 0x4f5   : > { %v2694_v46 = vunpack.c.l.b16 %v2653_v58 }
 0x4f7   : > { %v2695_v25 = vpack.c.b16 %v2694_v46, %v2693_v15  ;;  %v2529_v24 = vpop.xlane.xlu2 %2528  ;;  %v7515_v46 = vadd.f32 %v7107_v28, %v2368_v30 }
 0x4f8   : > { %v2561_v53 = vsub.f32 %v7401_v33, %v2529_v24  ;;  %v3057_v24 = vsel %vm1468_vm0, %v7331_v47, 0  ;;  %v8561_v47 = vld [vmem:[#allocation33_spill] sm:$0xff] }
 0x4f9   : > { %4902 = vmatmul.msk.bf16.vlgmr.msra.gmra.mxu1 %vm1731_vm6, %v2695_v25 }
 0x4fa   : > { %v2584_v51 = vmul.f32 1.442695, %v2561_v53  ;;  %2859 = vmatpush.bf16.msra.mxu1 %v7327_v49  ;;  %v7503_v39 = vpop.eup %5359 }
 0x4fb   : > { %v2656_v33 = vpack.c.bf16 %v7503_v39, %v7503_v39 }
 0x4fc   : > { %5361 = vpow2.f32 %v2584_v51 }
 0x4fd   : > { %3099 = vrot.lane.b32.xlu2 %v8560_v16, %s5852_s25  ;;  %5363 = vpow2.f32 %v2586_v5  ;;  %v2743_v36 = vunpack.c.l.b16 %v2656_v33 }
 0x4ff   : > { %v2535_v58 = vpop.xlane.xlu2 %2534 }
 0x500   : > { %v2563_v13 = vsub.f32 %v7408_v57, %v2535_v58  ;;  %v2521_v57 = vsel %vm1731_vm6, %v7515_v46, -inf  ;;  %v2544_v58 = vpop.xlane.xlu1 %2543 }
 0x502   : > { %v7510_v14 = vpop.eup %5361  ;;  %v2588_v49 = vmul.f32 1.442695, %v2563_v13  ;;  %v3076_v13 = vpop.permute.xlu0 %3075 }
 0x503   : > { %v2657_v15 = vpack.c.bf16 %v7510_v14, %v7510_v14  ;;  %v7519_v17 = vpop.eup %5363 }
 0x504   : > { %5365 = vpow2.f32 %v2588_v49  ;;  %v2658_v26 = vpack.c.bf16 %v7519_v17, %v7519_v17  ;;  %v3081_v49 = vsel %vm1468_vm0, %v3076_v13, 0 }
 0x505   : > { %v2744_v25 = vunpack.c.l.b16 %v2657_v15  ;;  %3422 = vrot.lane.b32.xlu2 %v6868_v3, %s5852_s25 }
 0x506   : > { %v2768_v5 = vunpack.c.l.b16 %v2658_v26 }
 0x507   : > { %v2745_v42 = vpack.c.b16 %v2744_v25, %v2743_v36  ;;  %v8562_v36 = vld [vmem:[#allocation34_spill] sm:$0xff] }
 0x508   : > { %2522 = vmax.xlane.f32.xlu0 %v2521_v57  ;;  %3217 = vrot.lane.b32.xlu1 %v6988_v10, %s5852_s25  ;;  %v7540_v15 = vpop.xlane.xlu1 %2549  ;;  %v2566_v57 = vsub.f32 %v7411_v34, %v2544_v58  ;;  %v7558_v58 = vpop.permute.xlu2 %3073 }
 0x509   : > { %4904 = vmatmul.msk.bf16.vlgmr.msrb.gmra.mxu0 %vm1731_vm6, %v2745_v42  ;;  %v8563_v42 = vld [vmem:[#allocation25_spill] sm:$0xff] }
 0x50a   : > { %v7530_v53 = vpop.eup %5365  ;;  %3066 = vmatpush.bf16.xpose.msrb.mxu0 %v3057_v24  ;;  %v2594_v26 = vmul.f32 1.442695, %v2566_v57  ;;  %v8565_v57 = vld [vmem:[#allocation28_spill] sm:$0xff] }
 0x50b   : > { %v2659_v51 = vpack.c.bf16 %v7530_v53, %v7530_v53 }
 0x50c   : > { %5367 = vpow2.f32 %v2594_v26 }
 0x50d   : > { %v2769_v30 = vunpack.c.l.b16 %v2659_v51  ;;  %3522 = vrot.lane.b32.xlu2 %v6962_v37, %s5852_s25  ;;  %v8564_v51 = vld [vmem:[#allocation29_spill] sm:$0xff]  ;;  %v2438_v37 = vadd.f32 %v7342_v45, %v7459_v9 }
 0x50f   : > { %v2770_v33 = vpack.c.b16 %v2769_v30, %v2768_v5 }
 0x510   : > { %2721 = vrot.lane.b32.xlu1 %v8561_v47, %s5851_s28  ;;  %v7579_v3 = vpop.permute.xlu2 %3195 }
 0x511   : > { %4905 = vmatmul.msk.bf16.vlgmr.msrb.gmra.mxu1 %vm1731_vm6, %v2770_v33 }
 0x512   : > { %3090 = vmatpush.bf16.xpose.msrb.mxu1 %v3081_v49  ;;  %v7555_v34 = vpop.eup %5367 }
 0x51c   : > { %2796 = vrot.lane.b32.xlu0 %v8562_v36, %s5851_s28  ;;  %s5775_s28 = scalar_lea.hbm %s5774_s17, 128 }
 0x51d   : > { %p5776_p1 = scmp.ne.s32.totalorder %s5774_s17, %s5775_s28 }
 0x51f   : > { %v3050_v25 = vpop.permute.xlu1 %3049  ;;  %p5777_p3 = pnand %p5776_p1, %p6006_p4 }
 0x521   : > { %p5778_p5 = pneg %p5777_p3 }
 0x524   : > { %3097 = vrot.lane.b32.xlu0 %v8563_v42, %s5852_s25 }
 0x527   : > { %v7547_v24 = vpop.permute.xlu1 %3123 }
 0x52c   : > { %3169 = vrot.lane.b32.xlu0 %v8564_v51, %s5852_s25 }
 0x52d   : > { %v2547_v5 = vpop.xlane.xlu0 %2546 }
 0x52e   : > { %v2567_v30 = vsub.f32 %v7445_v23, %v2547_v5  ;;  %v8566_v23 = vld [vmem:[#allocation38_spill] sm:$0xff] }
 0x52f   : > { %v3148_v13 = vpop.permute.xlu1 %3147  ;;  %v7563_v5 = vadd.f32 %v8566_v23, %v2438_v37 }
 0x530   : > { %v2596_v33 = vmul.f32 1.442695, %v2567_v30  ;;  %v3153_v49 = vsel %vm1468_vm0, %v3148_v13, 0  ;;  %v2662_v30 = vpack.c.bf16 %v7555_v34, %v7555_v34 }
 0x531   : > { %3162 = vmatpush.bf16.xpose.msra.mxu2 %v3153_v49 }
 0x532   : > { %5369 = vpow2.f32 %v2596_v33  ;;  %v7573_v33 = vpop.f32.mrf.mxu2  ;;  %v2818_v49 = vunpack.c.l.b16 %v2662_v30  ;;  %v7585_v30 = vpop.permute.xlu2 %3193 }
 0x533   : > { %5371 = vrcp.f32 %v7488_v21  ;;  %v2536_v21 = vsel %vm1731_vm6, %v7563_v5, -inf  ;;  %8567 = vst [vmem:[#allocation21_spill] sm:$0xff] %v7573_v33 }
 0x534   : > { %3497 = vrot.lane.b32.xlu0 %v8565_v57, %s5852_s25 }
 0x535   : > { %v1875_v26 = vpop.xlane.xlu0 %1874 }
 0x536   : > { %5373 = vrcp.f32 %v1875_v26  ;;  %v8568_v26 = vld [vmem:[#allocation37_spill] sm:$0xff] }
 0x538   : > { %v7567_v45 = vpop.eup %5369 }
 0x539   : > { %v2663_v9 = vpack.c.bf16 %v7567_v45, %v7567_v45  ;;  %v5372_v13 = vpop.eup %5371 }
 0x53a   : > { %2537 = vmax.xlane.f32.xlu1 %v2536_v21  ;;  %v2146_v36 = vmul.f32 %v5372_v13, %v7363_v32  ;;  %v7583_v21 = vpop.f32.mrf.mxu2 }
 0x53b   : > { %v2819_v40 = vunpack.c.l.b16 %v2663_v9  ;;  %8569 = vst [vmem:[#allocation24_spill] sm:$0xff] %v7583_v21 }
 0x53c   : > { %v5374_v37 = vpop.eup %5373  ;;  %3597 = vrot.lane.b32.xlu0 %v8568_v26, %s5852_s25  ;;  %v3146_v26 = vpop.permute.xlu1 %3145 }
 0x53d   : > { %v2820_v57 = vpack.c.b16 %v2819_v40, %v2818_v49  ;;  %v2147_v23 = vmul.f32 %v5374_v37, %v7367_v50 }
 0x53f   : > { %4907 = vmatmul.msk.bf16.vlgmr.msra.gmra.mxu0 %vm1731_vm6, %v2820_v57  ;;  %v2171_v27 = vpack.c.bf16 %v2147_v23, %v2146_v36 }
 0x541   : > { %4892 = vmatmul.msk.bf16.gmra.mxu2 %vm1468_vm0, %v2171_v27  ;;  %v8571_v27 = vld [vmem:[#allocation26_spill] sm:$0xff] }
 0x542   : > { %v7589_v33 = vpop.f32.mrf.mxu2 }
 0x543   : > { %8570 = vst [vmem:[#allocation33_spill] sm:$0xff] %v7589_v33 }
 0x548   : > { %v7587_v9 = vpop.permute.xlu0 %3121 }
 0x54a   : > { %v7598_v49 = vpop.f32.mrf.mxu2 }
 0x54b   : > { %8572 = vst [vmem:[#allocation25_spill] sm:$0xff] %v7598_v49 }
 0x54f   : > { %4925 = vmatmul.msk.bf16.vlgmr.msrb.gmra.mxu0 %vm1468_vm0, %v3050_v25  ;;  %v2568_v25 = vsub.f32 %v7419_v8, %v7540_v15  ;;  %v8574_v8 = vld [vmem:[#allocation23_spill] sm:$0xff] }
 0x550   : > { %v3220_v40 = vpop.permute.xlu0 %3219  ;;  %v2520_v32 = vpop.xlane.xlu2 %2519 }
 0x551   : > { %v3225_v50 = vsel %vm1468_vm0, %v3220_v40, 0  ;;  %4929 = vmatmul.msk.bf16.vlgmr.msra.gmra.mxu2 %vm1468_vm0, %v3146_v26  ;;  %v2558_v36 = vsub.f32 %v7466_v2, %v2520_v32  ;;  %v8573_v40 = vld [vmem:[#allocation30_spill] sm:$0xff]  ;;  %v2598_v26 = vmul.f32 1.442695, %v2568_v25 }
 0x552   : > { %3234 = vmatpush.bf16.xpose.msrb.mxu2 %v3225_v50  ;;  %v7610_v15 = vpop.f32.mrf.mxu2  ;;  %v8576_v25 = vld [vmem:[#allocation22_spill] sm:$0xff] }
 0x553   : > { %3171 = vrot.lane.b32.xlu1 %v8571_v27, %s5852_s25  ;;  %v2578_v57 = vmul.f32 1.442695, %v2558_v36  ;;  %8575 = vst [vmem:[#allocation29_spill] sm:$0xff] %v7610_v15 }
 0x555   : > { %5375 = vpow2.f32 %v2578_v57 }
 0x558   : > { %v2541_v23 = vpop.xlane.xlu2 %2540 }
 0x559   : > { %v2565_v13 = vsub.f32 %v7475_v11, %v2541_v23 }
 0x55b   : > { %v2592_v37 = vmul.f32 1.442695, %v2565_v13  ;;  %3447 = vrot.lane.b32.xlu1 %v8573_v40, %s5852_s25  ;;  %v5376_v2 = vpop.eup %5375 }
 0x55c   : > { %v2614_v13 = vsel %vm1731_vm6, %v5376_v2, 0.0 }
 0x55d   : > { %5377 = vpow2.f32 %v2592_v37  ;;  %v2608_v37 = vsel %vm1731_vm6, %v7484_v0, 0.0 }
 0x55e   : > { %5379 = vpow2.f32 %v2598_v26 }
 0x560   : > { %v3100_v50 = vpop.permute.xlu2 %3099 }
 0x561   : > { %v3105_v33 = vsel %vm1468_vm0, %v3100_v50, 0  ;;  %v2611_v50 = vsel %vm1731_vm6, %v7493_v22, 0.0 }
 0x562   : > { %3114 = vmatpush.bf16.xpose.msra.mxu0 %v3105_v33  ;;  %v2553_v32 = vpop.xlane.xlu1 %2552 }
 0x563   : > { %v7605_v36 = vpop.eup %5377  ;;  %v2569_v11 = vsub.f32 %v7482_v44, %v2553_v32  ;;  %3572 = vrot.lane.b32.xlu1 %v8574_v8, %s5852_s25  ;;  %v7627_v32 = vpop.f32.mrf.mxu2 }
 0x564   : > { %v2635_v57 = vsel %vm1731_vm6, %v7605_v36, 0.0  ;;  %v7615_v33 = vpop.eup %5379  ;;  %8577 = vst [vmem:[#allocation26_spill] sm:$0xff] %v7627_v32 }
 0x565   : > { %v2600_v23 = vmul.f32 1.442695, %v2569_v11  ;;  %2636 = vadd.xlane.f32.xlu2 %v2635_v57  ;;  %v2664_v44 = vpack.c.bf16 %v7615_v33, %v7615_v33 }
 0x566   : > { %2615 = vadd.xlane.f32.xlu0 %v2614_v13 }
 0x567   : > { %5381 = vpow2.f32 %v2600_v23  ;;  %v2843_v57 = vunpack.c.l.b16 %v2664_v44 }
 0x56b   : > { %3802 = vrot.lane.b32.xlu1 %v8576_v25, %s5853_s24  ;;  %v3129_v25 = vsel %vm1468_vm0, %v7547_v24, 0  ;;  %v7634_v0 = vpop.f32.mrf.mxu2  ;;  %v3201_v24 = vsel %vm1468_vm0, %v7579_v3, 0 }
 0x56c   : > { %8578 = vst [vmem:[#allocation30_spill] sm:$0xff] %v7634_v0 }
 0x56d   : > { %v7623_v26 = vpop.eup %5381  ;;  %2609 = vadd.xlane.f32.xlu2 %v2608_v37 }
 0x56e   : > { %v2665_v11 = vpack.c.bf16 %v7623_v26, %v7623_v26  ;;  %2612 = vadd.xlane.f32.xlu0 %v2611_v50 }
 0x570   : > { %v2844_v23 = vunpack.c.l.b16 %v2665_v11  ;;  %v2654_v11 = vpack.c.bf16 %v5376_v2, %v5376_v2 }
 0x572   : > { %v2845_v13 = vpack.c.b16 %v2844_v23, %v2843_v57 }
 0x573   : > { %v7638_v50 = vpop.f32.mrf.mxu2 }
 0x574   : > { %4908 = vmatmul.msk.bf16.vlgmr.msra.gmra.mxu1 %vm1731_vm6, %v2845_v13  ;;  %8579 = vst [vmem:[#allocation22_spill] sm:$0xff] %v7638_v50  ;;  %v7662_v13 = vpop.f32.mrf.mxu0 }
 0x575   : > { %3138 = vmatpush.bf16.xpose.msra.mxu1 %v3129_v25 }
 0x57a   : > { %v3218_v37 = vpop.permute.xlu1 %3217 }
 0x57b   : > { %v2523_v15 = vpop.xlane.xlu0 %2522  ;;  %4932 = vmatmul.msk.bf16.vlgmr.msrb.gmra.mxu2 %vm1468_vm0, %v3218_v37  ;;  %v7652_v23 = vpop.f32.mrf.mxu2 }
 0x57c   : > { %v2559_v22 = vsub.f32 %v7515_v46, %v2523_v15  ;;  %8580 = vst [vmem:[#allocation42_spill] sm:$0xff] %v7652_v23  ;;  %v7668_v37 = vpop.f32.mrf.mxu0 }
 0x57e   : > { %v2580_v32 = vmul.f32 1.442695, %v2559_v22  ;;  %v2626_v22 = vsel %vm1731_vm6, %v7519_v17, 0.0  ;;  %v2661_v17 = vpack.c.bf16 %v7605_v36, %v7605_v36 }
 0x580   : > { %5383 = vpow2.f32 %v2580_v32  ;;  %v2718_v32 = vunpack.c.l.b16 %v2654_v11 }
 0x582   : > { %3800 = vrot.lane.b32.xlu0 %v8559_v63, %s5853_s24  ;;  %v2722_v44 = vpop.permute.xlu1 %2721 }
 0x583   : > { %2734 = vmatpush.bf16.msra.mxu3 %v2722_v44  ;;  %v2620_v44 = vsel %vm1731_vm6, %v7503_v39, 0.0 }
 0x584   : > { %4926 = vmatmul.msk.bf16.vlgmr.msrb.gmra.mxu1 %vm1468_vm0, %v7558_v58  ;;  %v7657_v58 = vpop.f32.mrf.mxu2 }
 0x585   : > { %3210 = vmatpush.bf16.xpose.msrb.mxu1 %v3201_v24  ;;  %3826 = vrot.lane.b32.xlu2 %v8552_v60, %s5853_s24  ;;  %8581 = vst [vmem:[#allocation43_spill] sm:$0xff] %v7657_v58 }
 0x586   : > { %v7648_v46 = vpop.eup %5383  ;;  %v7675_v11 = vpop.f32.mrf.mxu0 }
 0x587   : > { %v2655_v15 = vpack.c.bf16 %v7648_v46, %v7648_v46 }
 0x589   : > { %v2719_v63 = vunpack.c.l.b16 %v2655_v15 }
 0x58b   : > { %v2720_v57 = vpack.c.b16 %v2719_v63, %v2718_v32 }
 0x58c   : > { %v7660_v2 = vpop.f32.mrf.mxu2 }
 0x58d   : > { %4903 = vmatmul.msk.bf16.vlgmr.msra.gmra.mxu3 %vm1731_vm6, %v2720_v57  ;;  %8582 = vst [vmem:[#allocation44_spill] sm:$0xff] %v7660_v2 }
 0x58e   : > { %v2797_v3 = vpop.permute.xlu0 %2796 }
 0x58f   : > { %2809 = vmatpush.bf16.msrb.mxu3 %v2797_v3  ;;  %v7684_v3 = vpop.f32.mrf.mxu0 }
 0x594   : > { %4928 = vmatmul.msk.bf16.vlgmr.msra.gmra.mxu1 %vm1468_vm0, %v7587_v9  ;;  %v7666_v25 = vpop.f32.mrf.mxu2 }
 0x595   : > { %8583 = vst [vmem:[#allocation45_spill] sm:$0xff] %v7666_v25 }
 0x596   : > { %v3098_v60 = vpop.permute.xlu0 %3097 }
 0x597   : > { %4927 = vmatmul.msk.bf16.vlgmr.msra.gmra.mxu0 %vm1468_vm0, %v3098_v60 }
 0x59c   : > { %v7677_v32 = vpop.f32.mrf.mxu2 }
 0x59d   : > { %8584 = vst [vmem:[#allocation46_spill] sm:$0xff] %v7677_v32 }
 0x5a4   : > { %4931 = vmatmul.msk.bf16.vlgmr.msrb.gmra.mxu1 %vm1468_vm0, %v7585_v30  ;;  %v2623_v30 = vsel %vm1731_vm6, %v7510_v14, 0.0  ;;  %v2602_v14 = vsel %vm1731_vm6, %v7433_v19, 0.0  ;;  %v7704_v19 = vpop.f32.mrf.mxu1 }
 0x5ac   : > { %2627 = vadd.xlane.f32.xlu0 %v2626_v22  ;;  %v7686_v22 = vpop.f32.mrf.mxu2 }
 0x5ad   : > { %v2538_v9 = vpop.xlane.xlu1 %2537  ;;  %8585 = vst [vmem:[#allocation47_spill] sm:$0xff] %v7686_v22 }
 0x5ae   : > { %v2564_v24 = vsub.f32 %v7563_v5, %v2538_v9  ;;  %2621 = vadd.xlane.f32.xlu2 %v2620_v44  ;;  %v2794_v5 = vunpack.c.l.b16 %v2661_v17  ;;  %v2629_v44 = vsel %vm1731_vm6, %v7530_v53, 0.0  ;;  %v2605_v53 = vsel %vm1731_vm6, %v7440_v38, 0.0 }
 0x5b0   : > { %v2590_v15 = vmul.f32 1.442695, %v2564_v24  ;;  %v3423_v24 = vpop.permute.xlu2 %3422 }
 0x5b2   : > { %5385 = vpow2.f32 %v2590_v15  ;;  %v3170_v15 = vpop.permute.xlu0 %3169 }
 0x5b6   : > { %2624 = vadd.xlane.f32.xlu2 %v2623_v30 }
 0x5b8   : > { %v5386_v63 = vpop.eup %5385 }
 0x5b9   : > { %v2660_v57 = vpack.c.bf16 %v5386_v63, %v5386_v63  ;;  %v2632_v39 = vsel %vm1731_vm6, %v5386_v63, 0.0 }
 0x5ba   : > { %2633 = vadd.xlane.f32.xlu1 %v2632_v39 }
 0x5bb   : > { %v2793_v60 = vunpack.c.l.b16 %v2660_v57 }
 0x5bc   : > { %v7693_v36 = vpop.f32.mrf.mxu0 }
 0x5bd   : > { %v2795_v9 = vpack.c.b16 %v2794_v5, %v2793_v60  ;;  %v3523_v60 = vpop.permute.xlu2 %3522 }
 0x5be   : > { %2630 = vadd.xlane.f32.xlu2 %v2629_v44  ;;  %v5069_v44 = vld [vmem:[#allocation11 + $0x10] sm:$0xff]  }
 0x5bf   : > { %4906 = vmatmul.msk.bf16.vlgmr.msrb.gmra.mxu3 %vm1731_vm6, %v2795_v9  ;;  %v3498_v9 = vpop.permute.xlu0 %3497  ;;  %v7709_v38 = vunpack.c.l.bf16 %v5069_v44 }
 0x5c2   : > { %2603 = vadd.xlane.f32.xlu1 %v2602_v14  ;;  %v2617_v14 = vsel %vm1731_vm6, %v7648_v46, 0.0 }
 0x5c4   : > { %v7695_v30 = vpop.f32.mrf.mxu2  ;;  %v7700_v57 = vpop.f32.mrf.mxu0 }
 0x5c5   : > { %8586 = vst [vmem:[#allocation48_spill] sm:$0xff] %v7695_v30  ;;  %v3172_v17 = vpop.permute.xlu1 %3171 }
 0x5c6   : > { %v3177_v63 = vsel %vm1468_vm0, %v3172_v17, 0 }
 0x5c7   : > { %3186 = vmatpush.bf16.xpose.msrb.mxu0 %v3177_v63 }
 0x5ca   : > { %2606 = vadd.xlane.f32.xlu1 %v2605_v53  ;;  %v7712_v53 = vpop.f32.mrf.mxu1 }
 0x5cc   : > { %v7702_v39 = vpop.f32.mrf.mxu2  ;;  %v3068_v63 = vpop.f32.mrf.mxu0 }
 0x5cd   : > { %8587 = vst [vmem:[#allocation49_spill] sm:$0xff] %v7702_v39  ;;  %v3448_v5 = vpop.permute.xlu1 %3447 }
 0x5ce   : > { %4930 = vmatmul.msk.bf16.vlgmr.msrb.gmra.mxu0 %vm1468_vm0, %v3170_v15  ;;  %3460 = vmatpush.bf16.msra.mxu1 %v3448_v5  ;;  %v3069_v15 = vadd.f32 %v7709_v38, %v3068_v63 }
 0x5cf   : > { %3435 = vmatpush.bf16.msra.mxu0 %v3423_v24 }
 0x5d2   : > { %3535 = vmatpush.bf16.msrb.mxu1 %v3523_v60  ;;  %2618 = vadd.xlane.f32.xlu1 %v2617_v14  ;;  %v7720_v60 = vunpack.c.h.bf16 %v5069_v44  ;;  %v7724_v14 = vadd.f32 %v6999_v59, %v3069_v15 }
 0x5d3   : > { %3510 = vmatpush.bf16.msrb.mxu0 %v3498_v9 }
 0x5d4   : > { %v3164_v24 = vpop.f32.mrf.mxu2  ;;  %v3257_v63 = vsel %vm1731_vm6, %v7724_v14, -inf  ;;  %v3070_v2 = vpop.f32.mrf.mxu0 }
 0x5d5   : > { %v3165_v17 = vadd.f32 %v7709_v38, %v3164_v24  ;;  %v7726_v24 = vpop.f32.mrf.mxu1  ;;  %v3071_v58 = vadd.f32 %v7720_v60, %v3070_v2 }
 0x5d7   : > { %v7715_v39 = vadd.f32 %v7051_v55, %v3165_v17 }
 0x5d9   : > { %v3281_v5 = vsel %vm1731_vm6, %v7715_v39, -inf }
 0x5da   : > { %3282 = vmax.xlane.f32.xlu1 %v3281_v5 }
 0x5dc   : > { %v3166_v46 = vpop.f32.mrf.mxu2 }
 0x5dd   : > { %v3167_v9 = vadd.f32 %v7720_v60, %v3166_v46  ;;  %v7735_v44 = vpop.f32.mrf.mxu1 }
 0x5df   : > { %v7729_v30 = vadd.f32 %v7059_v48, %v3167_v9 }
 0x5e1   : > { %v3284_v17 = vsel %vm1731_vm6, %v7729_v30, -inf }
 0x5e2   : > { %3285 = vmax.xlane.f32.xlu0 %v3284_v17  ;;  %3258 = vmax.xlane.f32.xlu1 %v3257_v63 }
 0x5f1   : > { %v7737_v5 = vpop.f32.mrf.mxu1 }
 0x5f9   : > { %v7739_v46 = vpop.f32.mrf.mxu1 }
 0x5fe   : > { %v3236_v15 = vpop.f32.mrf.mxu2 }
 0x5ff   : > { %v3237_v22 = vadd.f32 %v7709_v38, %v3236_v15 }
 0x601   : > { %v3092_v32 = vpop.f32.mrf.mxu1  ;;  %v7743_v9 = vadd.f32 %v7220_v62, %v3237_v22  ;;  %v7780_v62 = vpop.permute.xlu1 %3572 }
 0x602   : > { %v3093_v25 = vadd.f32 %v7709_v38, %v3092_v32 }
 0x603   : > { %v3299_v17 = vsel %vm1731_vm6, %v7743_v9, -inf }
 0x604   : > { %3300 = vmax.xlane.f32.xlu0 %v3299_v17  ;;  %v7749_v63 = vadd.f32 %v7017_v43, %v3093_v25  ;;  %v7760_v17 = vadd.f32 %v7009_v31, %v3071_v58  ;;  %v2638_v58 = vsel %vm1731_vm6, %v7555_v34, 0.0 }
 0x606   : > { %v3238_v23 = vpop.f32.mrf.mxu2  ;;  %v3263_v15 = vsel %vm1731_vm6, %v7749_v63, -inf }
 0x607   : > { %v3239_v50 = vadd.f32 %v7720_v60, %v3238_v23  ;;  %3264 = vmax.xlane.f32.xlu2 %v3263_v15  ;;  %v3260_v23 = vsel %vm1731_vm6, %v7760_v17, -inf }
 0x609   : > { %v3094_v22 = vpop.f32.mrf.mxu1  ;;  %v7756_v32 = vadd.f32 %v7207_v35, %v3239_v50 }
 0x60a   : > { %v3095_v0 = vadd.f32 %v7720_v60, %v3094_v22 }
 0x60b   : > { %v3302_v25 = vsel %vm1731_vm6, %v7756_v32, -inf }
 0x60c   : > { %3303 = vmax.xlane.f32.xlu0 %v3302_v25  ;;  %v7765_v2 = vadd.f32 %v7025_v52, %v3095_v0 }
 0x60e   : > { %v3266_v15 = vsel %vm1731_vm6, %v7765_v2, -inf }
 0x60f   : > { %3261 = vmax.xlane.f32.xlu2 %v3260_v23  ;;  %3267 = vmax.xlane.f32.xlu1 %v3266_v15  ;;  %v2647_v23 = vsel %vm1731_vm6, %v7623_v26, 0.0  ;;  %v5021_v26 = vld [vmem:[#allocation14 + $0x10] sm:$0xff] }
 0x611   : > { %v3140_v50 = vpop.f32.mrf.mxu1 }
 0x612   : > { %v3141_v22 = vadd.f32 %v7709_v38, %v3140_v50  ;;  %v7789_v50 = vpop.permute.xlu1 %3802 }
 0x614   : > { %2639 = vadd.xlane.f32.xlu0 %v2638_v58  ;;  %v7775_v25 = vadd.f32 %v7035_v54, %v3141_v22  ;;  %v2641_v22 = vsel %vm1731_vm6, %v7567_v45, 0.0 }
 0x616   : > { %v3275_v0 = vsel %vm1731_vm6, %v7775_v25, -inf }
 0x617   : > { %3276 = vmax.xlane.f32.xlu1 %v3275_v0  ;;  %v7797_v0 = vpop.permute.xlu0 %3597 }
 0x619   : > { %v3142_v49 = vpop.f32.mrf.mxu1 }
 0x61a   : > { %v3143_v21 = vadd.f32 %v7720_v60, %v3142_v49  ;;  %v5022_v49 = vld [vmem:[#allocation14 + $0x18] sm:$0xff] }
 0x61b   : > { %2969 = vmatpush.bf16.msra.mxu3 %v5022_v49 }
 0x61c   : > { %2648 = vadd.xlane.f32.xlu0 %v2647_v23  ;;  %v7785_v15 = vadd.f32 %v7043_v7, %v3143_v21  ;;  %v2736_v21 = vpop.f32.mrf.mxu3 }
 0x61e   : > { %v3278_v34 = vsel %vm1731_vm6, %v7785_v15, -inf }
 0x61f   : > { %3279 = vmax.xlane.f32.xlu1 %v3278_v34  ;;  %2970 = vmatpush.bf16.msra.mxu3 %v5021_v26  ;;  %v2637_v34 = vpop.xlane.xlu2 %2636 }
 0x624   : > { %v2738_v45 = vpop.f32.mrf.mxu3 }
 0x627   : > { %3824 = vrot.lane.b32.xlu2 %v6519_v61, %s5853_s24  ;;  %2642 = vadd.xlane.f32.xlu1 %v2641_v22  ;;  %v2616_v61 = vpop.xlane.xlu0 %2615 }
 0x62d   : > { %v2634_v58 = vpop.xlane.xlu1 %2633 }
 0x62f   : > { %v2613_v55 = vpop.xlane.xlu0 %2612 }
 0x630   : > { %3874 = vrot.lane.b32.xlu0 %v6646_v6, %s5853_s24  ;;  %v3212_v6 = vpop.f32.mrf.mxu1 }
 0x635   : > { %v2604_v23 = vpop.xlane.xlu1 %2603 }
 0x636   : > { %5387 = vrcp.f32 %v2604_v23  ;;  %v2610_v23 = vpop.xlane.xlu2 %2609 }
 0x638   : > { %3922 = vrot.lane.b32.xlu0 %v8571_v27, %s5853_s24 }
 0x63c   : > { %v5388_v49 = vpop.eup %5387 }
 0x63d   : > { %v2607_v22 = vpop.xlane.xlu1 %2606  ;;  %v2882_v27 = vmul.f32 %v5388_v49, %v7662_v13 }
 0x63e   : > { %5389 = vrcp.f32 %v2607_v22  ;;  %v3213_v22 = vadd.f32 %v7709_v38, %v3212_v6 }
 0x63f   : > { %5391 = vrcp.f32 %v2637_v34 }
 0x640   : > { %3946 = vrot.lane.b32.xlu0 %v6928_v20, %s5853_s24  ;;  %3850 = vrot.lane.b32.xlu1 %v8560_v16, %s5853_s24  ;;  %5393 = vrcp.f32 %v2634_v58 }
 0x641   : > { %5395 = vrcp.f32 %v2610_v23 }
 0x642   : > { %v2811_v26 = vpop.f32.mrf.mxu3  ;;  %5397 = vrcp.f32 %v2613_v55 }
 0x644   : > { %v5390_v8 = vpop.eup %5389 }
 0x645   : > { %v2883_v35 = vmul.f32 %v5390_v8, %v7668_v37  ;;  %v5392_v20 = vpop.eup %5391  ;;  %v7818_v37 = vadd.f32 %v7074_v12, %v3213_v22  ;;  %v2619_v23 = vpop.xlane.xlu1 %2618 }
 0x646   : > { %v5394_v16 = vpop.eup %5393  ;;  %5399 = vrcp.f32 %v2619_v23 }
 0x647   : > { %v2914_v48 = vpack.c.bf16 %v2883_v35, %v2882_v27  ;;  %v7813_v58 = vmul.f32 %v5394_v16, %v2811_v26  ;;  %v3214_v35 = vpop.f32.mrf.mxu1  ;;  %v5396_v34 = vpop.eup %5395  ;;  %5401 = vrcp.f32 %v2616_v61 }
 0x648   : > { %3968 = vrot.lane.b32.xlu0 %v6988_v10, %s5853_s24  ;;  %3872 = vrot.lane.b32.xlu1 %v6715_v18, %s5853_s24  ;;  %v3215_v18 = vadd.f32 %v7720_v60, %v3214_v35  ;;  %v5398_v49 = vpop.eup %5397  ;;  %v2884_v55 = vmul.f32 %v5396_v34, %v7704_v19  ;;  %v7832_v27 = vpop.permute.xlu2 %3826 }
 0x649   : > { %4917 = vmatmul.msk.bf16.vlgmr.msra.gmra.mxu3 %vm1468_vm0, %v2914_v48  ;;  %v3293_v48 = vsel %vm1731_vm6, %v7818_v37, -inf  ;;  %v2885_v6 = vmul.f32 %v5398_v49, %v7712_v53  ;;  %v3116_v35 = vpop.f32.mrf.mxu0  ;;  %v7845_v61 = vpop.permute.xlu0 %3800 }
 0x64a   : > { %v2813_v13 = vpop.f32.mrf.mxu3  ;;  %v7830_v26 = vadd.f32 %v7136_v41, %v3215_v18 }
 0x64b   : > { %v7815_v8 = vmul.f32 %v5392_v20, %v2813_v13  ;;  %v2915_v20 = vpack.c.bf16 %v2885_v6, %v2884_v55 }
 0x64c   : > { %v3296_v22 = vsel %vm1731_vm6, %v7830_v26, -inf  ;;  %v5400_v19 = vpop.eup %5399 }
 0x64d   : > { %v2919_v10 = vpack.c.bf16 %v7815_v8, %v7813_v58  ;;  %v2887_v53 = vmul.f32 %v5400_v19, %v2738_v45  ;;  %v5402_v16 = vpop.eup %5401 }
 0x64e   : > { %v2886_v13 = vmul.f32 %v5402_v16, %v2736_v21 }
 0x650   : > { %3294 = vmax.xlane.f32.xlu2 %v3293_v48  ;;  %3898 = vrot.lane.b32.xlu1 %v6763_v56, %s5853_s24  ;;  %v2622_v56 = vpop.xlane.xlu2 %2621  ;;  %v2916_v18 = vpack.c.bf16 %v2887_v53, %v2886_v13 }
 0x651   : > { %v2628_v6 = vpop.xlane.xlu0 %2627 }
 0x658   : > { %3297 = vmax.xlane.f32.xlu2 %v3296_v22  ;;  %3896 = vrot.lane.b32.xlu1 %v6804_v4, %s5853_s24  ;;  %v2625_v34 = vpop.xlane.xlu2 %2624  ;;  %v3117_v4 = vadd.f32 %v7709_v38, %v3116_v35 }
 0x659   : > { %4918 = vmatmul.msk.bf16.gmra.mxu3 %vm1468_vm0, %v2915_v20  ;;  %5403 = vrcp.f32 %v2625_v34  ;;  %v3286_v53 = vpop.xlane.xlu0 %3285 }
 0x65a   : > { %5405 = vrcp.f32 %v2622_v56  ;;  %v7848_v48 = vadd.f32 %v7147_v1, %v3117_v4 }
 0x65c   : > { %v3269_v21 = vsel %vm1731_vm6, %v7848_v48, -inf }
 0x65f   : > { %v5404_v45 = vpop.eup %5403 }
 0x660   : > { %3920 = vrot.lane.b32.xlu1 %v8564_v51, %s5853_s24  ;;  %v3283_v51 = vpop.xlane.xlu1 %3282  ;;  %v2631_v49 = vpop.xlane.xlu2 %2630  ;;  %v2889_v55 = vmul.f32 %v5404_v45, %v7684_v3 }
 0x661   : > { %5407 = vrcp.f32 %v2631_v49  ;;  %v3118_v49 = vpop.f32.mrf.mxu0 }
 0x662   : > { %5409 = vrcp.f32 %v2628_v6 }
 0x668   : > { %3970 = vrot.lane.b32.xlu1 %v6979_v29, %s5853_s24  ;;  %v5406_v29 = vpop.eup %5405  ;;  %v3259_v20 = vpop.xlane.xlu1 %3258 }
 0x669   : > { %4919 = vmatmul.msk.bf16.gmra.mxu3 %vm1468_vm0, %v2916_v18  ;;  %v2888_v23 = vmul.f32 %v5406_v29, %v7675_v11  ;;  %v3305_v19 = vsub.f32 %v7724_v14, %v3259_v20  ;;  %v5408_v13 = vpop.eup %5407 }
 0x66a   : > { %v5410_v34 = vpop.eup %5409  ;;  %v2891_v11 = vmul.f32 %v5408_v13, %v7735_v44 }
 0x66b   : > { %v2917_v22 = vpack.c.bf16 %v2889_v55, %v2888_v23  ;;  %v3321_v16 = vmul.f32 1.442695, %v3305_v19  ;;  %v2890_v14 = vmul.f32 %v5410_v34, %v7726_v24  ;;  %v3314_v24 = vsub.f32 %v7729_v30, %v3286_v53 }
 0x66d   : > { %5411 = vpow2.f32 %v3321_v16  ;;  %v2918_v55 = vpack.c.bf16 %v2891_v11, %v2890_v14  ;;  %v3339_v16 = vmul.f32 1.442695, %v3314_v24 }
 0x670   : > { %3848 = vrot.lane.b32.xlu2 %v8563_v42, %s5853_s24 }
 0x672   : > { %3270 = vmax.xlane.f32.xlu0 %v3269_v21 }
 0x673   : > { %v7867_v44 = vpop.eup %5411 }
 0x677   : > { %v7863_v21 = vpop.xlane.xlu0 %3300 }
 0x679   : > { %4920 = vmatmul.msk.bf16.gmra.mxu3 %vm1468_vm0, %v2917_v22  ;;  %v3313_v22 = vsub.f32 %v7715_v39, %v3283_v51 }
 0x67a   : > { %v3265_v56 = vpop.xlane.xlu2 %3264 }
 0x67b   : > { %v3307_v42 = vsub.f32 %v7749_v63, %v3265_v56  ;;  %v3337_v53 = vmul.f32 1.442695, %v3313_v22 }
 0x67d   : > { %v3325_v35 = vmul.f32 1.442695, %v3307_v42 }
 0x67f   : > { %5413 = vpow2.f32 %v3325_v35 }
 0x682   : > { %v3262_v3 = vpop.xlane.xlu2 %3261  ;;  %v3268_v18 = vpop.xlane.xlu1 %3267 }
 0x683   : > { %v3306_v4 = vsub.f32 %v7760_v17, %v3262_v3  ;;  %v3308_v45 = vsub.f32 %v7765_v2, %v3268_v18  ;;  %v3119_v17 = vadd.f32 %v7720_v60, %v3118_v49  ;;  %v2644_v49 = vsel %vm1731_vm6, %v7615_v33, 0.0 }
 0x684   : > { %v3319_v33 = vsub.f32 %v7743_v9, %v7863_v21 }
 0x685   : > { %v3323_v63 = vmul.f32 1.442695, %v3306_v4  ;;  %v3327_v29 = vmul.f32 1.442695, %v3308_v45  ;;  %v7871_v2 = vpop.eup %5413  ;;  %v7881_v56 = vadd.f32 %v7107_v28, %v3119_v17 }
 0x686   : > { %4198 = vrot.lane.b32.xlu0 %v8573_v40, %s5853_s24  ;;  %v3401_v40 = vpack.c.bf16 %v7867_v44, %v7867_v44  ;;  %v3403_v19 = vpack.c.bf16 %v7871_v2, %v7871_v2  ;;  %v3349_v22 = vmul.f32 1.442695, %v3319_v33 }
 0x687   : > { %5415 = vpow2.f32 %v3323_v63  ;;  %v3272_v18 = vsel %vm1731_vm6, %v7881_v56, -inf }
 0x688   : > { %5417 = vpow2.f32 %v3327_v29  ;;  %v3419_v13 = vunpack.c.l.b16 %v3401_v40  ;;  %v3444_v34 = vunpack.c.l.b16 %v3403_v19 }
 0x689   : > { %4921 = vmatmul.msk.bf16.gmra.mxu3 %vm1468_vm0, %v2918_v55  ;;  %5419 = vpow2.f32 %v3339_v16 }
 0x68a   : > { %v3277_v6 = vpop.xlane.xlu1 %3276 }
 0x68b   : > { %v3311_v23 = vsub.f32 %v7775_v25, %v3277_v6  ;;  %v3304_v25 = vpop.xlane.xlu0 %3303 }
 0x68d   : > { %v7878_v20 = vpop.eup %5415  ;;  %v3333_v51 = vmul.f32 1.442695, %v3311_v23 }
 0x68e   : > { %v7885_v42 = vpop.eup %5417  ;;  %v3402_v30 = vpack.c.bf16 %v7878_v20, %v7878_v20 }
 0x68f   : > { %v3404_v39 = vpack.c.bf16 %v7885_v42, %v7885_v42  ;;  %5421 = vpow2.f32 %v3333_v51  ;;  %v7898_v29 = vpop.eup %5419  ;;  %v3808_v51 = vsel %vm1468_vm0, %v7789_v50, 0 }
 0x690   : > { %v3420_v35 = vunpack.c.l.b16 %v3402_v30  ;;  %5423 = vpow2.f32 %v3337_v53  ;;  %v3410_v24 = vpack.c.bf16 %v7898_v29, %v7898_v29  ;;  %v3832_v53 = vsel %vm1468_vm0, %v7832_v27, 0 }
 0x691   : > { %v3445_v3 = vunpack.c.l.b16 %v3404_v39 }
 0x692   : > { %v3421_v11 = vpack.c.b16 %v3420_v35, %v3419_v13  ;;  %3273 = vmax.xlane.f32.xlu1 %v3272_v18  ;;  %v3280_v4 = vpop.xlane.xlu1 %3279 }
 0x693   : > { %v3446_v45 = vpack.c.b16 %v3445_v3, %v3444_v34  ;;  %v3312_v14 = vsub.f32 %v7785_v15, %v3280_v4  ;;  %v2640_v17 = vpop.xlane.xlu0 %2639  ;;  %v8588_v4 = vld [vmem:[#allocation32_spill] sm:$0xff] }
 0x694   : > { %4933 = vmatmul.msk.bf16.vlgmr.msra.gmra.mxu0 %vm1731_vm6, %v3421_v11 }
 0x695   : > { %v3335_v63 = vmul.f32 1.442695, %v3312_v14  ;;  %4934 = vmatmul.msk.bf16.vlgmr.msra.gmra.mxu1 %vm1731_vm6, %v3446_v45  ;;  %3585 = vmatpush.bf16.msra.mxu0 %v7780_v62  ;;  %v7902_v55 = vpop.eup %5421  ;;  %v3320_v62 = vsub.f32 %v7756_v32, %v3304_v25 }
 0x696   : > { %3610 = vmatpush.bf16.msra.mxu1 %v7797_v0  ;;  %v7908_v15 = vpop.eup %5423  ;;  %v3407_v6 = vpack.c.bf16 %v7902_v55, %v7902_v55 }
 0x697   : > { %5425 = vpow2.f32 %v3335_v63  ;;  %v3409_v58 = vpack.c.bf16 %v7908_v15, %v7908_v15  ;;  %v3351_v8 = vmul.f32 1.442695, %v3320_v62 }
 0x698   : > { %v3494_v40 = vunpack.c.l.b16 %v3407_v6 }
 0x699   : > { %2645 = vadd.xlane.f32.xlu2 %v2644_v49  ;;  %4922 = vmatmul.msk.bf16.gmra.mxu3 %vm1468_vm0, %v2919_v10  ;;  %v3520_v10 = vunpack.c.l.b16 %v3410_v24  ;;  %v3519_v30 = vunpack.c.l.b16 %v3409_v58 }
 0x69a   : > { %v2643_v0 = vpop.xlane.xlu1 %2642 }
 0x69b   : > { %5427 = vrcp.f32 %v2643_v0  ;;  %v3521_v25 = vpack.c.b16 %v3520_v10, %v3519_v30  ;;  %v7931_v35 = vpop.xlane.xlu0 %2648  ;;  %v3825_v0 = vpop.permute.xlu2 %3824 }
 0x69c   : > { %5429 = vrcp.f32 %v2640_v17  ;;  %v8589_v17 = vld [vmem:[#allocation27_spill] sm:$0xff] }
 0x69d   : > { %v7917_v23 = vpop.eup %5425  ;;  %5431 = vpow2.f32 %v3351_v8 }
 0x69e   : > { %v3408_v32 = vpack.c.bf16 %v7917_v23, %v7917_v23  ;;  %5433 = vpow2.f32 %v3349_v22 }
 0x6a0   : > { %v3495_v19 = vunpack.c.l.b16 %v3408_v32 }
 0x6a1   : > { %v5428_v16 = vpop.eup %5427 }
 0x6a2   : > { %v5430_v9 = vpop.eup %5429  ;;  %v3496_v21 = vpack.c.b16 %v3495_v19, %v3494_v40  ;;  %v2895_v39 = vmul.f32 %v5428_v16, %v7700_v57 }
 0x6a3   : > { %v2894_v13 = vmul.f32 %v5430_v9, %v7693_v36  ;;  %v7933_v3 = vpop.eup %5431  ;;  %v3875_v27 = vpop.permute.xlu0 %3874 }
 0x6a4   : > { %4936 = vmatmul.msk.bf16.vlgmr.msrb.gmra.mxu0 %vm1731_vm6, %v3496_v21  ;;  %v7936_v57 = vpop.eup %5433  ;;  %v3416_v50 = vpack.c.bf16 %v7933_v3, %v7933_v3  ;;  %v3880_v63 = vsel %vm1468_vm0, %v3875_v27, 0 }
 0x6a5   : > { %4937 = vmatmul.msk.bf16.vlgmr.msrb.gmra.mxu1 %vm1731_vm6, %v3521_v25  ;;  %3817 = vmatpush.bf16.xpose.msrb.mxu0 %v3808_v51  ;;  %v2920_v34 = vpack.c.bf16 %v2895_v39, %v2894_v13  ;;  %v3415_v36 = vpack.c.bf16 %v7936_v57, %v7936_v57 }
 0x6a6   : > { %3841 = vmatpush.bf16.xpose.msrb.mxu1 %v3832_v53  ;;  %v3595_v18 = vunpack.c.l.b16 %v3416_v50 }
 0x6a7   : > { %v3594_v11 = vunpack.c.l.b16 %v3415_v36 }
 0x6a9   : > { %4923 = vmatmul.msk.bf16.gmra.mxu3 %vm1468_vm0, %v2920_v34  ;;  %v3596_v14 = vpack.c.b16 %v3595_v18, %v3594_v11 }
 0x6ab   : > { %4223 = vrot.lane.b32.xlu1 %v8561_v47, %s5853_s24  ;;  %v3923_v49 = vpop.permute.xlu0 %3922 }
 0x6ac   : > { %v3928_v50 = vsel %vm1468_vm0, %v3923_v49, 0 }
 0x6b1   : > { %3944 = vrot.lane.b32.xlu2 %v8588_v4, %s5853_s24 }
 0x6b2   : > { %v3851_v45 = vpop.permute.xlu1 %3850 }
 0x6b3   : > { %v3947_v24 = vpop.permute.xlu0 %3946  ;;  %v3856_v13 = vsel %vm1468_vm0, %v3851_v45, 0 }
 0x6b4   : > { %v3952_v32 = vsel %vm1468_vm0, %v3947_v24, 0 }
 0x6b5   : > { %4940 = vmatmul.msk.bf16.vlgmr.msra.gmra.mxu1 %vm1731_vm6, %v3596_v14 }
 0x6b6   : > { %3889 = vmatpush.bf16.xpose.msra.mxu1 %v3880_v63 }
 0x6b9   : > { %4173 = vrot.lane.b32.xlu2 %v8589_v17, %s5853_s24 }
 0x6ba   : > { %v3873_v62 = vpop.permute.xlu1 %3872 }
 0x6bb   : > { %v3969_v34 = vpop.permute.xlu0 %3968 }
 0x6c1   : > { %3472 = vrot.lane.b32.xlu2 %v8561_v47, %s5852_s25 }
 0x6c2   : > { %v3899_v33 = vpop.permute.xlu1 %3898 }
 0x6c3   : > { %v3904_v6 = vsel %vm1468_vm0, %v3899_v33, 0  ;;  %v3295_v58 = vpop.xlane.xlu2 %3294 }
 0x6c4   : > { %v3317_v8 = vsub.f32 %v7818_v37, %v3295_v58  ;;  %3913 = vmatpush.bf16.xpose.msrb.mxu3 %v3904_v6 }
 0x6c5   : > { %4958 = vmatmul.msk.bf16.vlgmr.msrb.gmra.mxu1 %vm1468_vm0, %v3825_v0 }
 0x6c6   : > { %3961 = vmatpush.bf16.xpose.msrb.mxu1 %v3952_v32  ;;  %v3345_v10 = vmul.f32 1.442695, %v3317_v8 }
 0x6c8   : > { %5435 = vpow2.f32 %v3345_v10  ;;  %v3188_v10 = vpop.f32.mrf.mxu0 }
 0x6ca   : > { %v7956_v22 = vpop.permute.xlu1 %3896 }
 0x6cb   : > { %v3298_v40 = vpop.xlane.xlu2 %3297 }
 0x6cc   : > { %v3318_v47 = vsub.f32 %v7830_v26, %v3298_v40 }
 0x6ce   : > { %v3347_v19 = vmul.f32 1.442695, %v3318_v47  ;;  %v7959_v16 = vpop.eup %5435 }
 0x6cf   : > { %v3413_v37 = vpack.c.bf16 %v7959_v16, %v7959_v16 }
 0x6d0   : > { %5437 = vpow2.f32 %v3347_v19 }
 0x6d1   : > { %v3569_v25 = vunpack.c.l.b16 %v3413_v37  ;;  %5439 = vrcp.f32 %v7931_v35 }
 0x6d2   : > { %v3921_v30 = vpop.permute.xlu1 %3920 }
 0x6d3   : > { %v3849_v18 = vpop.permute.xlu2 %3848 }
 0x6d5   : > { %4960 = vmatmul.msk.bf16.vlgmr.msra.gmra.mxu1 %vm1468_vm0, %v3873_v62 }
 0x6d6   : > { %v7964_v9 = vpop.eup %5437 }
 0x6d7   : > { %v3414_v21 = vpack.c.bf16 %v7964_v9, %v7964_v9  ;;  %v5440_v63 = vpop.eup %5439 }
 0x6d8   : > { %v2897_v24 = vmul.f32 %v5440_v63, %v7739_v46  ;;  %v3189_v63 = vadd.f32 %v7709_v38, %v3188_v10 }
 0x6d9   : > { %v3570_v39 = vunpack.c.l.b16 %v3414_v21 }
 0x6da   : > { %v3971_v51 = vpop.permute.xlu1 %3970 }
 0x6db   : > { %v3571_v53 = vpack.c.b16 %v3570_v39, %v3569_v25  ;;  %v3976_v26 = vsel %vm1468_vm0, %v3971_v51, 0  ;;  %v8008_v51 = vpop.f32.mrf.mxu0 }
 0x6dc   : > { %3985 = vmatpush.bf16.xpose.msra.mxu3 %v3976_v26 }
 0x6dd   : > { %4939 = vmatmul.msk.bf16.vlgmr.msra.gmra.mxu0 %vm1731_vm6, %v3571_v53 }
 0x6de   : > { %3865 = vmatpush.bf16.xpose.msra.mxu0 %v3856_v13 }
 0x6e5   : > { %v3271_v36 = vpop.xlane.xlu0 %3270 }
 0x6e6   : > { %v3309_v14 = vsub.f32 %v7848_v48, %v3271_v36 }
 0x6e8   : > { %v3329_v0 = vmul.f32 1.442695, %v3309_v14 }
 0x6ed   : > { %4957 = vmatmul.msk.bf16.vlgmr.msrb.gmra.mxu0 %vm1468_vm0, %v7845_v61  ;;  %v7979_v61 = vpop.f32.mrf.mxu3 }
 0x6ee   : > { %3937 = vmatpush.bf16.xpose.msrb.mxu0 %v3928_v50 }
 0x6f5   : > { %v7991_v58 = vpop.f32.mrf.mxu3 }
 0x6f6   : > { %8590 = vst [vmem:[#allocation32_spill] sm:$0xff] %v7991_v58 }
 0x6f8   : > { %v4199_v27 = vpop.permute.xlu0 %4198 }
 0x6f9   : > { %4211 = vmatpush.bf16.msra.mxu1 %v4199_v27  ;;  %v5073_v27 = vld [vmem:[#allocation11 + $0x18] sm:$0xff]  }
 0x6fd   : > { %4959 = vmatmul.msk.bf16.vlgmr.msra.gmra.mxu0 %vm1468_vm0, %v3849_v18  ;;  %v8001_v37 = vpop.f32.mrf.mxu3 }
 0x6fe   : > { %8591 = vst [vmem:[#allocation27_spill] sm:$0xff] %v8001_v37 }
 0x705   : > { %v3274_v11 = vpop.xlane.xlu1 %3273  ;;  %v8010_v53 = vpop.f32.mrf.mxu3 }
 0x706   : > { %v3310_v45 = vsub.f32 %v7881_v56, %v3274_v11  ;;  %8592 = vst [vmem:[#allocation50_spill] sm:$0xff] %v8010_v53 }
 0x708   : > { %v3331_v49 = vmul.f32 1.442695, %v3310_v45 }
 0x70c   : > { %v2646_v4 = vpop.xlane.xlu2 %2645 }
 0x70d   : > { %5441 = vrcp.f32 %v2646_v4  ;;  %4962 = vmatmul.msk.bf16.vlgmr.msrb.gmra.mxu0 %vm1468_vm0, %v3921_v30  ;;  %v8017_v50 = vpop.f32.mrf.mxu3 }
 0x70e   : > { %5443 = vpow2.f32 %v3331_v49  ;;  %8593 = vst [vmem:[#allocation51_spill] sm:$0xff] %v8017_v50 }
 0x70f   : > { %5445 = vpow2.f32 %v3329_v0  ;;  %v8595_v0 = vld [vmem:[#allocation38_spill] sm:$0xff] }
 0x711   : > { %v8014_v13 = vpop.f32.mrf.mxu0 }
 0x712   : > { %v7981_v17 = vpop.f32.mrf.mxu1 }
 0x713   : > { %v5442_v62 = vpop.eup %5441 }
 0x714   : > { %v2896_v35 = vmul.f32 %v5442_v62, %v7737_v5  ;;  %v3945_v33 = vpop.permute.xlu2 %3944  ;;  %v7989_v6 = vpop.eup %5443 }
 0x715   : > { %4963 = vmatmul.msk.bf16.vlgmr.msrb.gmra.mxu1 %vm1468_vm0, %v3945_v33  ;;  %v7993_v32 = vpop.eup %5445  ;;  %v3406_v5 = vpack.c.bf16 %v7989_v6, %v7989_v6  ;;  %v8025_v4 = vpop.f32.mrf.mxu3 }
 0x716   : > { %v2921_v56 = vpack.c.bf16 %v2897_v24, %v2896_v35  ;;  %v3405_v46 = vpack.c.bf16 %v7993_v32, %v7993_v32  ;;  %8594 = vst [vmem:[#allocation52_spill] sm:$0xff] %v8025_v4  ;;  %v8037_v24 = vadd.f32 %v8595_v0, %v3189_v63 }
 0x717   : > { %v3470_v40 = vunpack.c.l.b16 %v3406_v5 }
 0x718   : > { %4924 = vmatmul.msk.bf16.gmra.mxu3 %vm1468_vm0, %v2921_v56  ;;  %v3469_v19 = vunpack.c.l.b16 %v3405_v46  ;;  %v3287_v33 = vsel %vm1731_vm6, %v8037_v24, -inf }
 0x719   : > { %v8021_v18 = vpop.f32.mrf.mxu0 }
 0x71a   : > { %v7987_v48 = vpop.f32.mrf.mxu1  ;;  %v3471_v21 = vpack.c.b16 %v3470_v40, %v3469_v19 }
 0x71c   : > { %v4174_v8 = vpop.permute.xlu2 %4173 }
 0x71d   : > { %4186 = vmatpush.bf16.msra.mxu0 %v4174_v8  ;;  %v4224_v25 = vpop.permute.xlu1 %4223  ;;  %v8039_v35 = vpop.f32.mrf.mxu3  ;;  %v8047_v8 = vunpack.c.h.bf16 %v5073_v27 }
 0x71e   : > { %8596 = vst [vmem:[#allocation38_spill] sm:$0xff] %v8039_v35 }
 0x721   : > { %v8034_v49 = vpop.f32.mrf.mxu0 }
 0x722   : > { %v7999_v47 = vpop.f32.mrf.mxu1 }
 0x724   : > { %v3473_v30 = vpop.permute.xlu2 %3472 }
 0x725   : > { %3485 = vmatpush.bf16.msra.mxu2 %v3473_v30  ;;  %v8045_v38 = vpop.f32.mrf.mxu3 }
 0x726   : > { %8597 = vst [vmem:[#allocation53_spill] sm:$0xff] %v8045_v38 }
 0x728   : > { %4935 = vmatmul.msk.bf16.vlgmr.msra.gmra.mxu2 %vm1731_vm6, %v3471_v21  ;;  %4961 = vmatmul.msk.bf16.vlgmr.msrb.gmra.mxu3 %vm1468_vm0, %v7956_v22  ;;  %v8023_v22 = vunpack.c.l.bf16 %v5073_v27 }
 0x729   : > { %4236 = vmatpush.bf16.msrb.mxu3 %v4224_v25 }
 0x72a   : > { %v8006_v39 = vpop.f32.mrf.mxu1 }
 0x72d   : > { %v8057_v30 = vpop.f32.mrf.mxu3 }
 0x72e   : > { %8598 = vst [vmem:[#allocation54_spill] sm:$0xff] %v8057_v30 }
 0x732   : > { %v8012_v26 = vpop.f32.mrf.mxu1 }
 0x738   : > { %4964 = vmatmul.msk.bf16.vlgmr.msra.gmra.mxu3 %vm1468_vm0, %v3969_v34 }
 0x73a   : > { %v8019_v36 = vpop.f32.mrf.mxu1 }
 0x742   : > { %v3843_v11 = vpop.f32.mrf.mxu1 }
 0x743   : > { %v3844_v45 = vadd.f32 %v8023_v22, %v3843_v11  ;;  %v8061_v11 = vpop.f32.mrf.mxu3 }
 0x744   : > { %8599 = vst [vmem:[#allocation55_spill] sm:$0xff] %v8061_v11 }
 0x745   : > { %v8029_v14 = vadd.f32 %v7017_v43, %v3844_v45  ;;  %v8043_v43 = vpop.f32.mrf.mxu0 }
 0x747   : > { %v4014_v34 = vsel %vm1731_vm6, %v8029_v14, -inf }
 0x748   : > { %4015 = vmax.xlane.f32.xlu2 %v4014_v34 }
 0x74a   : > { %v3845_v62 = vpop.f32.mrf.mxu1 }
 0x74b   : > { %v3846_v63 = vadd.f32 %v8047_v8, %v3845_v62 }
 0x750   : > { %3288 = vmax.xlane.f32.xlu2 %v3287_v33  ;;  %v8071_v33 = vadd.f32 %v7025_v52, %v3846_v63 }
 0x752   : > { %v3891_v56 = vpop.f32.mrf.mxu1  ;;  %v4017_v62 = vsel %vm1731_vm6, %v8071_v33, -inf }
 0x75a   : > { %v3893_v5 = vpop.f32.mrf.mxu1  ;;  %v8049_v46 = vpop.f32.mrf.mxu0 }
 0x75b   : > { %v3894_v10 = vadd.f32 %v8047_v8, %v3893_v5 }
 0x75d   : > { %v8053_v40 = vadd.f32 %v7043_v7, %v3894_v10  ;;  %v8074_v10 = vpop.f32.mrf.mxu3 }
 0x75e   : > { %8600 = vst [vmem:[#allocation56_spill] sm:$0xff] %v8074_v10 }
 0x75f   : > { %v4029_v19 = vsel %vm1731_vm6, %v8053_v40, -inf }
 0x760   : > { %4030 = vmax.xlane.f32.xlu2 %v4029_v19 }
 0x762   : > { %v8059_v21 = vpop.f32.mrf.mxu0 }
 0x765   : > { %v8087_v63 = vpop.f32.mrf.mxu3 }
 0x766   : > { %8601 = vst [vmem:[#allocation57_spill] sm:$0xff] %v8087_v63 }
 0x76a   : > { %v3819_v25 = vpop.f32.mrf.mxu0 }
 0x76b   : > { %v3820_v27 = vadd.f32 %v8023_v22, %v3819_v25 }
 0x76d   : > { %v8065_v45 = vadd.f32 %v6999_v59, %v3820_v27 }
 0x76f   : > { %v4008_v7 = vsel %vm1731_vm6, %v8065_v45, -inf }
 0x770   : > { %4009 = vmax.xlane.f32.xlu1 %v4008_v7  ;;  %v3892_v7 = vadd.f32 %v8023_v22, %v3891_v56  ;;  %v8103_v56 = vpop.f32.mrf.mxu3 }
 0x771   : > { %8602 = vst [vmem:[#allocation58_spill] sm:$0xff] %v8103_v56 }
 0x772   : > { %v3821_v34 = vpop.f32.mrf.mxu0 }
 0x773   : > { %v3822_v5 = vadd.f32 %v8047_v8, %v3821_v34 }
 0x775   : > { %v8077_v19 = vadd.f32 %v7009_v31, %v3822_v5 }
 0x777   : > { %v4011_v59 = vsel %vm1731_vm6, %v8077_v19, -inf }
 0x778   : > { %4012 = vmax.xlane.f32.xlu0 %v4011_v59  ;;  %4018 = vmax.xlane.f32.xlu1 %v4017_v62  ;;  %v8094_v59 = vadd.f32 %v7035_v54, %v3892_v7 }
 0x77a   : > { %v3867_v25 = vpop.f32.mrf.mxu0 }
 0x77b   : > { %v3868_v27 = vadd.f32 %v8023_v22, %v3867_v25  ;;  %v4026_v25 = vsel %vm1731_vm6, %v8094_v59, -inf }
 0x77d   : > { %v8085_v52 = vadd.f32 %v7147_v1, %v3868_v27 }
 0x77f   : > { %v4020_v31 = vsel %vm1731_vm6, %v8085_v52, -inf }
 0x780   : > { %4021 = vmax.xlane.f32.xlu0 %v4020_v31 }
 0x782   : > { %v3869_v34 = vpop.f32.mrf.mxu0 }
 0x783   : > { %v3870_v5 = vadd.f32 %v8047_v8, %v3869_v34 }
 0x785   : > { %v8097_v62 = vadd.f32 %v7107_v28, %v3870_v5  ;;  %v8111_v28 = vpop.f32.mrf.mxu3  ;;  %v8605_v5 = vld [vmem:[#allocation28_spill] sm:$0xff] }
 0x786   : > { %8603 = vst [vmem:[#allocation59_spill] sm:$0xff] %v8111_v28 }
 0x787   : > { %v4023_v1 = vsel %vm1731_vm6, %v8097_v62, -inf }
 0x788   : > { %4024 = vmax.xlane.f32.xlu1 %v4023_v1  ;;  %4027 = vmax.xlane.f32.xlu0 %v4026_v25  ;;  %v8607_v25 = vld [vmem:[#allocation34_spill] sm:$0xff] }
 0x78a   : > { %v3939_v27 = vpop.f32.mrf.mxu0 }
 0x78b   : > { %v3940_v31 = vadd.f32 %v8023_v22, %v3939_v27 }
 0x78d   : > { %v8107_v34 = vadd.f32 %v8595_v0, %v3940_v31  ;;  %v8608_v31 = vld [vmem:[#allocation36_spill] sm:$0xff] }
 0x78f   : > { %v4038_v54 = vsel %vm1731_vm6, %v8107_v34, -inf }
 0x790   : > { %4039 = vmax.xlane.f32.xlu2 %v4038_v54  ;;  %v3191_v54 = vadd.f32 %v7720_v60, %v8008_v51 }
 0x792   : > { %v3963_v51 = vpop.f32.mrf.mxu1 }
 0x79b   : > { %v8113_v7 = vpop.f32.mrf.mxu3 }
 0x79c   : > { %8604 = vst [vmem:[#allocation60_spill] sm:$0xff] %v8113_v7 }
 0x7a1   : > { %4248 = vrot.lane.b32.xlu1 %v8605_v5, %s5853_s24  ;;  %v8609_v5 = vld [vmem:[#allocation41_spill] sm:$0xff] }
 0x7a2   : > { %v8130_v28 = vadd.f32 %v8609_v5, %v3191_v54  ;;  %v3964_v54 = vadd.f32 %v8023_v22, %v3963_v51 }
 0x7a3   : > { %v8117_v1 = vpop.f32.mrf.mxu3 }
 0x7a4   : > { %8606 = vst [vmem:[#allocation28_spill] sm:$0xff] %v8117_v1  ;;  %v3941_v1 = vpop.f32.mrf.mxu0  ;;  %v3290_v11 = vsel %vm1731_vm6, %v8130_v28, -inf }
 0x7a5   : > { %v3942_v10 = vadd.f32 %v8047_v8, %v3941_v1 }
 0x7a7   : > { %v8139_v60 = vadd.f32 %v8609_v5, %v3942_v10 }
 0x7a8   : > { %3547 = vrot.lane.b32.xlu2 %v8607_v25, %s5852_s25  ;;  %s5779_s25 = scalar_lea.hbm %s8436_s9, 256 }
 0x7a9   : > { %v4041_v1 = vsel %vm1731_vm6, %v8139_v60, -inf  ;;  %p5781_p7 = scmp.lt.s32.totalorder %s5779_s25, %s5775_s28 }
 0x7ab   : > { %v3915_v27 = vpop.f32.mrf.mxu3  ;;  %p5782_p8 = por %p5781_p7, %p5780_p12 }
 0x7ad   : > { %p5783_p9 = pnand %p5782_p8, %p5778_p5 }
 0x7b3   : > { %v3917_v56 = vpop.f32.mrf.mxu3 }
 0x7b4   : > { %v3918_v0 = vadd.f32 %v8047_v8, %v3917_v56  ;;  %v3916_v56 = vadd.f32 %v8023_v22, %v3915_v27  ;;  %v8150_v27 = vadd.f32 %v7074_v12, %v3964_v54  ;;  %v3353_v12 = vsel %vm1731_vm6, %v7867_v44, 0.0  ;;  %v8613_v44 = vld [vmem:[#allocation23_spill] sm:$0xff] }
 0x7b6   : > { %v8123_v63 = vadd.f32 %v8608_v31, %v3918_v0  ;;  %v8610_v31 = vld [vmem:[#allocation35_spill] sm:$0xff]  ;;  %v4044_v5 = vsel %vm1731_vm6, %v8150_v27, -inf }
 0x7b8   : > { %v4035_v7 = vsel %vm1731_vm6, %v8123_v63, -inf }
 0x7b9   : > { %4036 = vmax.xlane.f32.xlu0 %v4035_v7  ;;  %v8142_v7 = vadd.f32 %v8610_v31, %v3916_v56  ;;  %v8611_v56 = vld [vmem:[#allocation39_spill] sm:$0xff] }
 0x7bb   : > { %v8136_v0 = vpop.f32.mrf.mxu3  ;;  %v4016_v54 = vpop.xlane.xlu2 %4015 }
 0x7c1   : > { %3291 = vmax.xlane.f32.xlu0 %v3290_v11  ;;  %v4032_v11 = vsel %vm1731_vm6, %v8142_v7, -inf }
 0x7c3   : > { %v3989_v30 = vpop.f32.mrf.mxu3 }
 0x7c4   : > { %v3990_v10 = vadd.f32 %v8047_v8, %v3989_v30 }
 0x7c6   : > { %v8156_v51 = vadd.f32 %v8611_v56, %v3990_v10  ;;  %v4058_v10 = vsub.f32 %v8029_v14, %v4016_v54  ;;  %v8173_v14 = vpop.xlane.xlu2 %3288 }
 0x7c8   : > { %v4053_v31 = vsel %vm1731_vm6, %v8156_v51, -inf  ;;  %v4076_v56 = vmul.f32 1.442695, %v4058_v10 }
 0x7c9   : > { %4042 = vmax.xlane.f32.xlu0 %v4041_v1 }
 0x7cb   : > { %4033 = vmax.xlane.f32.xlu1 %v4032_v11  ;;  %v8612_v11 = vld [vmem:[#allocation31_spill] sm:$0xff] }
 0x7d1   : > { %4045 = vmax.xlane.f32.xlu2 %v4044_v5 }
 0x7d9   : > { %4054 = vmax.xlane.f32.xlu2 %v4053_v31 }
 0x7dd   : > { %4298 = vrot.lane.b32.xlu0 %v8607_v25, %s5853_s24 }
 0x7e1   : > { %3354 = vadd.xlane.f32.xlu2 %v3353_v12 }
 0x7e3   : > { %v4010_v30 = vpop.xlane.xlu1 %4009 }
 0x7e4   : > { %v4056_v1 = vsub.f32 %v8065_v45, %v4010_v30  ;;  %4273 = vrot.lane.b32.xlu1 %v8612_v11, %s5853_s24 }
 0x7e6   : > { %v4072_v5 = vmul.f32 1.442695, %v4056_v1 }
 0x7e8   : > { %5447 = vpow2.f32 %v4072_v5 }
 0x7e9   : > { %5449 = vpow2.f32 %v4076_v56  ;;  %v3362_v56 = vsel %vm1731_vm6, %v7885_v42, 0.0 }
 0x7eb   : > { %v4013_v31 = vpop.xlane.xlu0 %4012  ;;  %v4019_v38 = vpop.xlane.xlu1 %4018 }
 0x7ec   : > { %v4057_v25 = vsub.f32 %v8077_v19, %v4013_v31  ;;  %v4059_v35 = vsub.f32 %v8071_v33, %v4019_v38  ;;  %4323 = vrot.lane.b32.xlu1 %v8613_v44, %s5853_s24 }
 0x7ee   : > { %v5448_v12 = vpop.eup %5447  ;;  %v4074_v45 = vmul.f32 1.442695, %v4057_v25  ;;  %v4078_v30 = vmul.f32 1.442695, %v4059_v35 }
 0x7ef   : > { %v4104_v11 = vsel %vm1731_vm6, %v5448_v12, 0.0  ;;  %v8175_v54 = vpop.eup %5449  ;;  %v4152_v19 = vpack.c.bf16 %v5448_v12, %v5448_v12  ;;  %v3965_v12 = vpop.f32.mrf.mxu1 }
 0x7f0   : > { %5451 = vpow2.f32 %v4074_v45  ;;  %4105 = vadd.xlane.f32.xlu2 %v4104_v11  ;;  %v4154_v10 = vpack.c.bf16 %v8175_v54, %v8175_v54  ;;  %v3966_v42 = vadd.f32 %v8047_v8, %v3965_v12 }
 0x7f1   : > { %5453 = vpow2.f32 %v4078_v30  ;;  %v4170_v25 = vunpack.c.l.b16 %v4152_v19 }
 0x7f2   : > { %v4195_v30 = vunpack.c.l.b16 %v4154_v10 }
 0x7f3   : > { %v4022_v1 = vpop.xlane.xlu0 %4021 }
 0x7f4   : > { %v4060_v38 = vsub.f32 %v8085_v52, %v4022_v1  ;;  %v4031_v52 = vpop.xlane.xlu2 %4030 }
 0x7f5   : > { %v4063_v19 = vsub.f32 %v8053_v40, %v4031_v52  ;;  %v8614_v52 = vld [vmem:[#allocation40_spill] sm:$0xff] }
 0x7f6   : > { %v8178_v33 = vpop.eup %5451  ;;  %v4080_v45 = vmul.f32 1.442695, %v4060_v38 }
 0x7f7   : > { %v5454_v5 = vpop.eup %5453  ;;  %v4153_v35 = vpack.c.bf16 %v8178_v33, %v8178_v33 }
 0x7f8   : > { %v4155_v31 = vpack.c.bf16 %v5454_v5, %v5454_v5  ;;  %3363 = vadd.xlane.f32.xlu2 %v3362_v56  ;;  %5455 = vpow2.f32 %v4080_v45  ;;  %v4113_v10 = vsel %vm1731_vm6, %v5454_v5, 0.0  ;;  %v8194_v56 = vadd.f32 %v7136_v41, %v3966_v42 }
 0x7f9   : > { %v4171_v44 = vunpack.c.l.b16 %v4153_v35  ;;  %v3988_v45 = vadd.f32 %v8023_v22, %v8136_v0  ;;  %v3374_v0 = vsel %vm1731_vm6, %v7917_v23, 0.0  ;;  %v3315_v23 = vsub.f32 %v8037_v24, %v8173_v14 }
 0x7fa   : > { %v4196_v11 = vunpack.c.l.b16 %v4155_v31 }
 0x7fb   : > { %v4172_v1 = vpack.c.b16 %v4171_v44, %v4170_v25  ;;  %v4028_v4 = vpop.xlane.xlu0 %4027  ;;  %v4025_v50 = vpop.xlane.xlu1 %4024 }
 0x7fc   : > { %v4197_v53 = vpack.c.b16 %v4196_v11, %v4195_v30  ;;  %v4062_v37 = vsub.f32 %v8094_v59, %v4028_v4  ;;  %v4061_v58 = vsub.f32 %v8097_v62, %v4025_v50  ;;  %v4086_v4 = vmul.f32 1.442695, %v4063_v19 }
 0x7fd   : > { %4965 = vmatmul.msk.bf16.vlgmr.msra.gmra.mxu0 %vm1731_vm6, %v4172_v1  ;;  %v8217_v11 = vadd.f32 %v8614_v52, %v3988_v45 }
 0x7fe   : > { %v4082_v38 = vmul.f32 1.442695, %v4061_v58  ;;  %4966 = vmatmul.msk.bf16.vlgmr.msra.gmra.mxu1 %vm1731_vm6, %v4197_v53  ;;  %v4084_v35 = vmul.f32 1.442695, %v4062_v37  ;;  %v8196_v50 = vpop.eup %5455  ;;  %v4047_v58 = vsel %vm1731_vm6, %v8194_v56, -inf  ;;  %v3368_v37 = vsel %vm1731_vm6, %v7989_v6, 0.0 }
 0x7ff   : > { %v4156_v8 = vpack.c.bf16 %v8196_v50, %v8196_v50  ;;  %v4050_v22 = vsel %vm1731_vm6, %v8217_v11, -inf }
 0x800   : > { %4114 = vadd.xlane.f32.xlu2 %v4113_v10  ;;  %5457 = vpow2.f32 %v4082_v38  ;;  %v8615_v10 = vld [vmem:[#allocation37_spill] sm:$0xff] }
 0x801   : > { %5459 = vpow2.f32 %v4084_v35  ;;  %v4220_v62 = vunpack.c.l.b16 %v4156_v8  ;;  %v3356_v35 = vsel %vm1731_vm6, %v7878_v20, 0.0  ;;  %v4107_v8 = vsel %vm1731_vm6, %v8178_v33, 0.0 }
 0x802   : > { %5461 = vpow2.f32 %v4086_v4  ;;  %v3377_v4 = vsel %vm1731_vm6, %v7908_v15, 0.0 }
 0x803   : > { %v4040_v59 = vpop.xlane.xlu2 %4039 }
 0x804   : > { %v4066_v20 = vsub.f32 %v8107_v34, %v4040_v59 }
 0x806   : > { %v5458_v53 = vpop.eup %5457  ;;  %v4092_v15 = vmul.f32 1.442695, %v4066_v20 }
 0x807   : > { %4048 = vmax.xlane.f32.xlu0 %v4047_v58  ;;  %v4157_v40 = vpack.c.bf16 %v5458_v53, %v5458_v53  ;;  %v8204_v41 = vpop.eup %5459  ;;  %v4119_v30 = vsel %vm1731_vm6, %v5458_v53, 0.0 }
 0x808   : > { %3369 = vadd.xlane.f32.xlu2 %v3368_v37  ;;  %v8206_v25 = vpop.eup %5461  ;;  %v4158_v12 = vpack.c.bf16 %v8204_v41, %v8204_v41  ;;  %v4110_v37 = vsel %vm1731_vm6, %v8175_v54, 0.0 }
 0x809   : > { %v4221_v5 = vunpack.c.l.b16 %v4157_v40  ;;  %v4159_v6 = vpack.c.bf16 %v8206_v25, %v8206_v25 }
 0x80a   : > { %v4245_v1 = vunpack.c.l.b16 %v4158_v12 }
 0x80b   : > { %v3548_v31 = vpop.permute.xlu2 %3547  ;;  %v4222_v44 = vpack.c.b16 %v4221_v5, %v4220_v62  ;;  %v4246_v42 = vunpack.c.l.b16 %v4159_v6  ;;  %v3341_v62 = vmul.f32 1.442695, %v3315_v23 }
 0x80c   : > { %3560 = vmatpush.bf16.msrb.mxu2 %v3548_v31  ;;  %v3365_v31 = vsel %vm1731_vm6, %v7993_v32, 0.0 }
 0x80d   : > { %4967 = vmatmul.msk.bf16.vlgmr.msrb.gmra.mxu3 %vm1731_vm6, %v4222_v44  ;;  %v4247_v38 = vpack.c.b16 %v4246_v42, %v4245_v1 }
 0x810   : > { %4120 = vadd.xlane.f32.xlu2 %v4119_v30 }
 0x813   : > { %v4249_v19 = vpop.permute.xlu1 %4248 }
 0x814   : > { %4261 = vmatpush.bf16.msrb.mxu0 %v4249_v19 }
 0x816   : > { %4051 = vmax.xlane.f32.xlu1 %v4050_v22 }
 0x817   : > { %4968 = vmatmul.msk.bf16.vlgmr.msrb.gmra.mxu0 %vm1731_vm6, %v4247_v38 }
 0x818   : > { %3375 = vadd.xlane.f32.xlu2 %v3374_v0  ;;  %v3371_v0 = vsel %vm1731_vm6, %v7902_v55, 0.0  ;;  %v4122_v55 = vsel %vm1731_vm6, %v8204_v41, 0.0  ;;  %v3380_v41 = vsel %vm1731_vm6, %v7898_v29, 0.0 }
 0x81b   : > { %4348 = vrot.lane.b32.xlu0 %v8615_v10, %s5853_s24  ;;  %v3392_v10 = vsel %vm1731_vm6, %v7964_v9, 0.0 }
 0x81e   : > { %3357 = vadd.xlane.f32.xlu1 %v3356_v35 }
 0x820   : > { %3378 = vadd.xlane.f32.xlu2 %v3377_v4 }
 0x826   : > { %4108 = vadd.xlane.f32.xlu1 %v4107_v8 }
 0x82c   : > { %v4037_v58 = vpop.xlane.xlu0 %4036 }
 0x82d   : > { %v4065_v53 = vsub.f32 %v8123_v63, %v4037_v58  ;;  %v4125_v58 = vsel %vm1731_vm6, %v8206_v25, 0.0 }
 0x82e   : > { %4111 = vadd.xlane.f32.xlu1 %v4110_v37 }
 0x82f   : > { %v4090_v40 = vmul.f32 1.442695, %v4065_v53 }
 0x831   : > { %5463 = vpow2.f32 %v4090_v40 }
 0x832   : > { %5465 = vpow2.f32 %v3341_v62  ;;  %v3395_v62 = vsel %vm1731_vm6, %v7936_v57, 0.0 }
 0x833   : > { %5467 = vpow2.f32 %v4092_v15 }
 0x834   : > { %v3292_v5 = vpop.xlane.xlu0 %3291 }
 0x835   : > { %v3316_v33 = vsub.f32 %v8130_v28, %v3292_v5  ;;  %v4116_v28 = vsel %vm1731_vm6, %v8196_v50, 0.0  ;;  %v3359_v50 = vsel %vm1731_vm6, %v7871_v2, 0.0 }
 0x836   : > { %3366 = vadd.xlane.f32.xlu1 %v3365_v31 }
 0x837   : > { %v5464_v24 = vpop.eup %5463  ;;  %v3343_v63 = vmul.f32 1.442695, %v3316_v33 }
 0x838   : > { %v4131_v14 = vsel %vm1731_vm6, %v5464_v24, 0.0  ;;  %v8242_v34 = vpop.eup %5465  ;;  %v4161_v25 = vpack.c.bf16 %v5464_v24, %v5464_v24 }
 0x839   : > { %5469 = vpow2.f32 %v3343_v63  ;;  %4132 = vadd.xlane.f32.xlu2 %v4131_v14  ;;  %v5468_v59 = vpop.eup %5467  ;;  %v3411_v32 = vpack.c.bf16 %v8242_v34, %v8242_v34  ;;  %v3383_v29 = vsel %vm1731_vm6, %v8242_v34, 0.0 }
 0x83a   : > { %v4134_v1 = vsel %vm1731_vm6, %v5468_v59, 0.0  ;;  %v4162_v4 = vpack.c.bf16 %v5468_v59, %v5468_v59  ;;  %v4271_v33 = vunpack.c.l.b16 %v4161_v25 }
 0x83b   : > { %v3544_v42 = vunpack.c.l.b16 %v3411_v32 }
 0x83c   : > { %v4043_v54 = vpop.xlane.xlu0 %4042  ;;  %v4295_v37 = vunpack.c.l.b16 %v4162_v4 }
 0x83d   : > { %v4067_v44 = vsub.f32 %v8139_v60, %v4043_v54 }
 0x83e   : > { %4117 = vadd.xlane.f32.xlu1 %v4116_v28  ;;  %v4034_v45 = vpop.xlane.xlu1 %4033  ;;  %v3389_v28 = vsel %vm1731_vm6, %v7959_v16, 0.0  ;;  %v5023_v16 = vld [vmem:[#allocation14 + $0x20] sm:$0xff] }
 0x83f   : > { %v5470_v12 = vpop.eup %5469  ;;  %v4094_v6 = vmul.f32 1.442695, %v4067_v44  ;;  %v4064_v30 = vsub.f32 %v8142_v7, %v4034_v45 }
 0x840   : > { %v3412_v52 = vpack.c.bf16 %v5470_v12, %v5470_v12  ;;  %v3386_v54 = vsel %vm1731_vm6, %v5470_v12, 0.0  ;;  %v3398_v12 = vsel %vm1731_vm6, %v7933_v3, 0.0 }
 0x841   : > { %5471 = vpow2.f32 %v4094_v6  ;;  %4135 = vadd.xlane.f32.xlu2 %v4134_v1  ;;  %v4088_v60 = vmul.f32 1.442695, %v4064_v30  ;;  %v5024_v30 = vld [vmem:[#allocation14 + $0x28] sm:$0xff]  ;;  %v5026_v1 = vld [vmem:[#allocation14 + $0x38] sm:$0xff] }
 0x842   : > { %v3545_v19 = vunpack.c.l.b16 %v3412_v52  ;;  %3720 = vmatpush.bf16.msra.mxu2 %v5024_v30 }
 0x843   : > { %5473 = vpow2.f32 %v4088_v60 }
 0x844   : > { %v3546_v38 = vpack.c.b16 %v3545_v19, %v3544_v42  ;;  %v4046_v22 = vpop.xlane.xlu2 %4045 }
 0x845   : > { %3360 = vadd.xlane.f32.xlu0 %v3359_v50  ;;  %v4068_v24 = vsub.f32 %v8150_v27, %v4046_v22 }
 0x846   : > { %3372 = vadd.xlane.f32.xlu1 %v3371_v0  ;;  %4938 = vmatmul.msk.bf16.vlgmr.msrb.gmra.mxu2 %vm1731_vm6, %v3546_v38  ;;  %v5025_v0 = vld [vmem:[#allocation14 + $0x30] sm:$0xff] }
 0x847   : > { %v5472_v7 = vpop.eup %5471  ;;  %v4096_v44 = vmul.f32 1.442695, %v4068_v24  ;;  %3721 = vmatpush.bf16.msra.mxu2 %v5023_v16 }
 0x848   : > { %v4163_v35 = vpack.c.bf16 %v5472_v7, %v5472_v7  ;;  %v4137_v32 = vsel %vm1731_vm6, %v5472_v7, 0.0 }
 0x849   : > { %3393 = vadd.xlane.f32.xlu2 %v3392_v10  ;;  %v5474_v2 = vpop.eup %5473 }
 0x84a   : > { %v4296_v23 = vunpack.c.l.b16 %v4163_v35  ;;  %v4160_v9 = vpack.c.bf16 %v5474_v2, %v5474_v2  ;;  %v4128_v5 = vsel %vm1731_vm6, %v5474_v2, 0.0 }
 0x84c   : > { %v4055_v8 = vpop.xlane.xlu2 %4054  ;;  %v4297_v15 = vpack.c.b16 %v4296_v23, %v4295_v37 }
 0x84d   : > { %v4071_v53 = vsub.f32 %v8156_v51, %v4055_v8  ;;  %4126 = vadd.xlane.f32.xlu0 %v4125_v58  ;;  %v4270_v51 = vunpack.c.l.b16 %v4160_v9 }
 0x84e   : > { %4123 = vadd.xlane.f32.xlu1 %v4122_v55 }
 0x84f   : > { %v4102_v20 = vmul.f32 1.442695, %v4071_v53  ;;  %v4299_v40 = vpop.permute.xlu0 %4298  ;;  %v4272_v57 = vpack.c.b16 %v4271_v33, %v4270_v51 }
 0x850   : > { %4311 = vmatpush.bf16.msra.mxu3 %v4299_v40 }
 0x851   : > { %5475 = vpow2.f32 %v4102_v20  ;;  %3396 = vadd.xlane.f32.xlu2 %v3395_v62 }
 0x852   : > { %5477 = vpow2.f32 %v4096_v44 }
 0x853   : > { %4970 = vmatmul.msk.bf16.vlgmr.msra.gmra.mxu3 %vm1731_vm6, %v4297_v15 }
 0x854   : > { %4471 = vmatpush.bf16.msrb.mxu3 %v5026_v1  ;;  %v3355_v22 = vpop.xlane.xlu2 %3354 }
 0x855   : > { %4129 = vadd.xlane.f32.xlu0 %v4128_v5 }
 0x856   : > { %3381 = vadd.xlane.f32.xlu1 %v3380_v41  ;;  %v4274_v31 = vpop.permute.xlu1 %4273 }
 0x857   : > { %v8269_v63 = vpop.eup %5475  ;;  %4286 = vmatpush.bf16.msrb.mxu1 %v4274_v31 }
 0x858   : > { %v4149_v14 = vsel %vm1731_vm6, %v8269_v63, 0.0  ;;  %v5478_v45 = vpop.eup %5477  ;;  %4472 = vmatpush.bf16.msrb.mxu3 %v5025_v0  ;;  %v4167_v2 = vpack.c.bf16 %v8269_v63, %v8269_v63 }
 0x859   : > { %4150 = vadd.xlane.f32.xlu2 %v4149_v14  ;;  %v4140_v27 = vsel %vm1731_vm6, %v5478_v45, 0.0  ;;  %v4164_v42 = vpack.c.bf16 %v5478_v45, %v5478_v45 }
 0x85a   : > { %4969 = vmatmul.msk.bf16.vlgmr.msrb.gmra.mxu1 %vm1731_vm6, %v4272_v57  ;;  %v4346_v20 = vunpack.c.l.b16 %v4167_v2 }
 0x85b   : > { %v4320_v3 = vunpack.c.l.b16 %v4164_v42 }
 0x85d   : > { %3387 = vadd.xlane.f32.xlu0 %v3386_v54 }
 0x85e   : > { %3384 = vadd.xlane.f32.xlu1 %v3383_v29  ;;  %v4324_v59 = vpop.permute.xlu1 %4323 }
 0x85f   : > { %4336 = vmatpush.bf16.msra.mxu0 %v4324_v59 }
 0x863   : > { %v4106_v8 = vpop.xlane.xlu2 %4105 }
 0x865   : > { %3390 = vadd.xlane.f32.xlu0 %v3389_v28 }
 0x866   : > { %4138 = vadd.xlane.f32.xlu1 %v4137_v32 }
 0x86b   : > { %v3364_v15 = vpop.xlane.xlu2 %3363 }
 0x86e   : > { %4141 = vadd.xlane.f32.xlu1 %v4140_v27 }
 0x873   : > { %v4115_v54 = vpop.xlane.xlu2 %4114 }
 0x876   : > { %3399 = vadd.xlane.f32.xlu1 %v3398_v12 }
 0x87a   : > { %v4049_v34 = vpop.xlane.xlu0 %4048 }
 0x87b   : > { %v4069_v6 = vsub.f32 %v8194_v56, %v4049_v34  ;;  %v4213_v29 = vpop.f32.mrf.mxu1  ;;  %v3370_v44 = vpop.xlane.xlu2 %3369 }
 0x87d   : > { %v4098_v52 = vmul.f32 1.442695, %v4069_v6 }
 0x87f   : > { %5479 = vpow2.f32 %v4098_v52 }
 0x883   : > { %v4215_v28 = vpop.f32.mrf.mxu1  ;;  %v4121_v30 = vpop.xlane.xlu2 %4120 }
 0x885   : > { %v5480_v19 = vpop.eup %5479 }
 0x886   : > { %v4165_v60 = vpack.c.bf16 %v5480_v19, %v5480_v19  ;;  %v4143_v38 = vsel %vm1731_vm6, %v5480_v19, 0.0 }
 0x887   : > { %4144 = vadd.xlane.f32.xlu0 %v4143_v38 }
 0x888   : > { %v4321_v50 = vunpack.c.l.b16 %v4165_v60 }
 0x889   : > { %v4052_v7 = vpop.xlane.xlu1 %4051 }
 0x88a   : > { %v4322_v56 = vpack.c.b16 %v4321_v50, %v4320_v3  ;;  %v4070_v10 = vsub.f32 %v8217_v11, %v4052_v7  ;;  %v4188_v11 = vpop.f32.mrf.mxu0 }
 0x88c   : > { %v4100_v35 = vmul.f32 1.442695, %v4070_v10  ;;  %4971 = vmatmul.msk.bf16.vlgmr.msra.gmra.mxu0 %vm1731_vm6, %v4322_v56  ;;  %v3376_v10 = vpop.xlane.xlu2 %3375 }
 0x88d   : > { %v4349_v4 = vpop.permute.xlu0 %4348 }
 0x88e   : > { %5481 = vpow2.f32 %v4100_v35  ;;  %4361 = vmatpush.bf16.msra.mxu1 %v4349_v4 }
 0x88f   : > { %5483 = vrcp.f32 %v3355_v22 }
 0x890   : > { %v4238_v6 = vpop.f32.mrf.mxu3 }
 0x891   : > { %v3358_v58 = vpop.xlane.xlu1 %3357 }
 0x892   : > { %5485 = vrcp.f32 %v3358_v58  ;;  %v4190_v63 = vpop.f32.mrf.mxu0  ;;  %v3487_v58 = vpop.f32.mrf.mxu2 }
 0x893   : > { %5487 = vrcp.f32 %v4106_v8 }
 0x894   : > { %v5482_v23 = vpop.eup %5481 }
 0x895   : > { %v4166_v53 = vpack.c.bf16 %v5482_v23, %v5482_v23  ;;  %v4146_v55 = vsel %vm1731_vm6, %v5482_v23, 0.0  ;;  %v5484_v37 = vpop.eup %5483 }
 0x896   : > { %4147 = vadd.xlane.f32.xlu0 %v4146_v55  ;;  %v3633_v62 = vmul.f32 %v5484_v37, %v8014_v13 }
 0x897   : > { %v4345_v40 = vunpack.c.l.b16 %v4166_v53  ;;  %v3379_v53 = vpop.xlane.xlu2 %3378 }
 0x898   : > { %v5486_v9 = vpop.eup %5485  ;;  %v4240_v19 = vpop.f32.mrf.mxu3 }
 0x899   : > { %v4347_v25 = vpack.c.b16 %v4346_v20, %v4345_v40  ;;  %v3634_v51 = vmul.f32 %v5486_v9, %v8021_v18  ;;  %v4109_v5 = vpop.xlane.xlu1 %4108  ;;  %v5488_v33 = vpop.eup %5487 }
 0x89a   : > { %5489 = vrcp.f32 %v4109_v5  ;;  %v4384_v57 = vmul.f32 %v5488_v33, %v4188_v11  ;;  %v4263_v8 = vpop.f32.mrf.mxu0  ;;  %v3489_v11 = vpop.f32.mrf.mxu2 }
 0x89b   : > { %v3665_v41 = vpack.c.bf16 %v3634_v51, %v3633_v62  ;;  %4972 = vmatmul.msk.bf16.vlgmr.msra.gmra.mxu1 %vm1731_vm6, %v4347_v25 }
 0x89d   : > { %4949 = vmatmul.msk.bf16.vlgmr.msra.gmra.mxu2 %vm1468_vm0, %v3665_v41 }
 0x8a0   : > { %v5490_v31 = vpop.eup %5489 }
 0x8a1   : > { %v4385_v14 = vmul.f32 %v5490_v31, %v4190_v63  ;;  %v4112_v24 = vpop.xlane.xlu1 %4111 }
 0x8a2   : > { %5491 = vrcp.f32 %v4112_v24  ;;  %v4265_v55 = vpop.f32.mrf.mxu0 }
 0x8a3   : > { %v4416_v13 = vpack.c.bf16 %v4385_v14, %v4384_v57  ;;  %5493 = vrcp.f32 %v4115_v54 }
 0x8a5   : > { %4981 = vmatmul.msk.bf16.vlgmr.msrb.gmra.mxu3 %vm1468_vm0, %v4416_v13 }
 0x8a8   : > { %v5492_v59 = vpop.eup %5491 }
 0x8a9   : > { %v3367_v18 = vpop.xlane.xlu1 %3366  ;;  %v4386_v32 = vmul.f32 %v5492_v59, %v4213_v29  ;;  %v5494_v45 = vpop.eup %5493 }
 0x8aa   : > { %v4387_v27 = vmul.f32 %v5494_v45, %v4215_v28 }
 0x8ac   : > { %v4417_v34 = vpack.c.bf16 %v4387_v27, %v4386_v32  ;;  %v4133_v51 = vpop.xlane.xlu2 %4132 }
 0x8b1   : > { %v4118_v12 = vpop.xlane.xlu1 %4117 }
 0x8b2   : > { %5495 = vrcp.f32 %v4118_v12 }
 0x8b3   : > { %5497 = vrcp.f32 %v3364_v15 }
 0x8b4   : > { %v4136_v45 = vpop.xlane.xlu2 %4135 }
 0x8b5   : > { %4982 = vmatmul.msk.bf16.gmra.mxu3 %vm1468_vm0, %v4417_v34 }
 0x8b8   : > { %v3361_v52 = vpop.xlane.xlu0 %3360  ;;  %v5496_v1 = vpop.eup %5495 }
 0x8b9   : > { %5499 = vrcp.f32 %v3361_v52  ;;  %v3373_v16 = vpop.xlane.xlu1 %3372  ;;  %v5498_v42 = vpop.eup %5497  ;;  %v4388_v38 = vmul.f32 %v5496_v1, %v4238_v6 }
 0x8ba   : > { %5501 = vrcp.f32 %v4121_v30  ;;  %v3636_v3 = vmul.f32 %v5498_v42, %v7987_v48 }
 0x8bb   : > { %5503 = vrcp.f32 %v3367_v18 }
 0x8bf   : > { %v5500_v60 = vpop.eup %5499 }
 0x8c0   : > { %v5502_v22 = vpop.eup %5501  ;;  %v3635_v50 = vmul.f32 %v5500_v60, %v7981_v17  ;;  %v4127_v7 = vpop.xlane.xlu0 %4126 }
 0x8c1   : > { %v4389_v0 = vmul.f32 %v5502_v22, %v4240_v19  ;;  %v4124_v35 = vpop.xlane.xlu1 %4123  ;;  %5505 = vrcp.f32 %v4127_v7  ;;  %v5504_v2 = vpop.eup %5503 }
 0x8c2   : > { %v3666_v56 = vpack.c.bf16 %v3636_v3, %v3635_v50  ;;  %5507 = vrcp.f32 %v4124_v35  ;;  %v3637_v37 = vmul.f32 %v5504_v2, %v3487_v58  ;;  %v3394_v7 = vpop.xlane.xlu2 %3393 }
 0x8c3   : > { %v4418_v4 = vpack.c.bf16 %v4389_v0, %v4388_v38  ;;  %5509 = vrcp.f32 %v3370_v44 }
 0x8c4   : > { %4950 = vmatmul.msk.bf16.gmra.mxu2 %vm1468_vm0, %v3666_v56  ;;  %5511 = vrcp.f32 %v3373_v16 }
 0x8c5   : > { %4983 = vmatmul.msk.bf16.gmra.mxu3 %vm1468_vm0, %v4418_v4  ;;  %5513 = vrcp.f32 %v3376_v10 }
 0x8c6   : > { %5515 = vrcp.f32 %v4133_v51 }
 0x8c7   : > { %v5506_v48 = vpop.eup %5505 }
 0x8c8   : > { %v5508_v23 = vpop.eup %5507  ;;  %v4391_v20 = vmul.f32 %v5506_v48, %v4265_v55  ;;  %v4130_v5 = vpop.xlane.xlu0 %4129 }
 0x8c9   : > { %v5510_v17 = vpop.eup %5509  ;;  %v4390_v40 = vmul.f32 %v5508_v23, %v4263_v8  ;;  %v3382_v9 = vpop.xlane.xlu1 %3381  ;;  %5517 = vrcp.f32 %v4130_v5 }
 0x8ca   : > { %v3638_v62 = vmul.f32 %v5510_v17, %v3489_v11  ;;  %v5512_v31 = vpop.eup %5511  ;;  %5519 = vrcp.f32 %v3382_v9  ;;  %v3562_v19 = vpop.f32.mrf.mxu2 }
 0x8cb   : > { %v4419_v25 = vpack.c.bf16 %v4391_v20, %v4390_v40  ;;  %v5514_v63 = vpop.eup %5513  ;;  %v3639_v14 = vmul.f32 %v5512_v31, %v8034_v49  ;;  %v3397_v8 = vpop.xlane.xlu2 %3396 }
 0x8cc   : > { %v3667_v15 = vpack.c.bf16 %v3638_v62, %v3637_v37  ;;  %v5516_v57 = vpop.eup %5515  ;;  %v3640_v13 = vmul.f32 %v5514_v63, %v8043_v43 }
 0x8ce   : > { %v3668_v44 = vpack.c.bf16 %v3640_v13, %v3639_v14 }
 0x8cf   : > { %v5518_v24 = vpop.eup %5517 }
 0x8d0   : > { %v5520_v49 = vpop.eup %5519  ;;  %v3388_v16 = vpop.xlane.xlu0 %3387 }
 0x8d1   : > { %v3385_v33 = vpop.xlane.xlu1 %3384  ;;  %v3642_v43 = vmul.f32 %v5520_v49, %v8006_v39 }
 0x8d2   : > { %v3564_v3 = vpop.f32.mrf.mxu2 }
 0x8d3   : > { %v4151_v9 = vpop.xlane.xlu2 %4150 }
 0x8d4   : > { %4951 = vmatmul.msk.bf16.gmra.mxu2 %vm1468_vm0, %v3667_v15 }
 0x8d5   : > { %4984 = vmatmul.msk.bf16.gmra.mxu3 %vm1468_vm0, %v4419_v25 }
 0x8d6   : > { %v4313_v32 = vpop.f32.mrf.mxu3 }
 0x8d7   : > { %v4288_v41 = vpop.f32.mrf.mxu1 }
 0x8d8   : > { %v4392_v29 = vmul.f32 %v5518_v24, %v4288_v41  ;;  %v3391_v0 = vpop.xlane.xlu0 %3390 }
 0x8d9   : > { %v4139_v28 = vpop.xlane.xlu1 %4138 }
 0x8da   : > { %5521 = vrcp.f32 %v4139_v28  ;;  %v8617_v28 = vld [vmem:[#allocation24_spill] sm:$0xff] }
 0x8db   : > { %5523 = vrcp.f32 %v3379_v53 }
 0x8dc   : > { %5525 = vrcp.f32 %v4136_v45 }
 0x8dd   : > { %5527 = vrcp.f32 %v3388_v16 }
 0x8de   : > { %v4315_v34 = vpop.f32.mrf.mxu3  ;;  %5529 = vrcp.f32 %v3385_v33 }
 0x8df   : > { %v4290_v54 = vpop.f32.mrf.mxu1  ;;  %5531 = vrcp.f32 %v3391_v0 }
 0x8e0   : > { %v4393_v18 = vmul.f32 %v5516_v57, %v4290_v54  ;;  %v5522_v27 = vpop.eup %5521  ;;  %5533 = vrcp.f32 %v3394_v7  ;;  %v8616_v54 = vld [vmem:[#allocation21_spill] sm:$0xff] }
 0x8e1   : > { %v5524_v12 = vpop.eup %5523  ;;  %v4395_v6 = vmul.f32 %v5522_v27, %v4315_v34  ;;  %v3012_v13 = vadd.f32 %v7979_v61, %v8616_v54  ;;  %v8631_v54 = vld [vmem:[#allocation42_spill] sm:$0xff] }
 0x8e2   : > { %v4420_v59 = vpack.c.bf16 %v4393_v18, %v4392_v29  ;;  %v5526_v30 = vpop.eup %5525  ;;  %v3641_v52 = vmul.f32 %v5524_v12, %v7999_v47  ;;  %v4142_v47 = vpop.xlane.xlu1 %4141 }
 0x8e3   : > { %v4394_v1 = vmul.f32 %v5526_v30, %v4313_v32  ;;  %v5528_v38 = vpop.eup %5527  ;;  %5535 = vrcp.f32 %v4142_v47  ;;  %v8618_v32 = vld [vmem:[#allocation32_spill] sm:$0xff]  ;;  %v8620_v30 = vld [vmem:[#allocation27_spill] sm:$0xff]  ;;  %v8623_v47 = vld [vmem:[#allocation29_spill] sm:$0xff] }
 0x8e4   : > { %4952 = vmatmul.msk.bf16.gmra.mxu2 %vm1468_vm0, %v3668_v44  ;;  %v3669_v42 = vpack.c.bf16 %v3642_v43, %v3641_v52  ;;  %v5530_v22 = vpop.eup %5529  ;;  %v3644_v39 = vmul.f32 %v5528_v38, %v3564_v3  ;;  %v3013_v45 = vadd.f32 %v8618_v32, %v8617_v28  ;;  %v8621_v38 = vld [vmem:[#allocation25_spill] sm:$0xff]  ;;  %v8633_v32 = vld [vmem:[#allocation43_spill] sm:$0xff] }
 0x8e5   : > { %4985 = vmatmul.msk.bf16.gmra.mxu3 %vm1468_vm0, %v4420_v59  ;;  %v4421_v60 = vpack.c.bf16 %v4395_v6, %v4394_v1  ;;  %v3643_v50 = vmul.f32 %v5530_v22, %v3562_v19  ;;  %v5532_v4 = vpop.eup %5531  ;;  %v8619_v6 = vld [vmem:[#allocation33_spill] sm:$0xff]  ;;  %v8622_v22 = vld [vmem:[#allocation50_spill] sm:$0xff] }
 0x8e6   : > { %v5534_v58 = vpop.eup %5533  ;;  %v3645_v2 = vmul.f32 %v5532_v4, %v8049_v46  ;;  %v3014_v52 = vadd.f32 %v8620_v30, %v8619_v6  ;;  %v3015_v3 = vadd.f32 %v8622_v22, %v8621_v38  ;;  %v8636_v6 = vld [vmem:[#allocation56_spill] sm:$0xff]  ;;  %v8638_v38 = vld [vmem:[#allocation57_spill] sm:$0xff] }
 0x8e7   : > { %v3670_v56 = vpack.c.bf16 %v3644_v39, %v3643_v50  ;;  %v3646_v23 = vmul.f32 %v5534_v58, %v8059_v21 }
 0x8e9   : > { %v5536_v48 = vpop.eup %5535  ;;  %v3671_v20 = vpack.c.bf16 %v3646_v23, %v3645_v2  ;;  %v8626_v23 = vld [vmem:[#allocation52_spill] sm:$0xff] }
 0x8ea   : > { %v3400_v55 = vpop.xlane.xlu1 %3399 }
 0x8f4   : > { %4953 = vmatmul.msk.bf16.gmra.mxu2 %vm1468_vm0, %v3669_v42 }
 0x8f5   : > { %4986 = vmatmul.msk.bf16.gmra.mxu3 %vm1468_vm0, %v4421_v60 }
 0x8fa   : > { %v4145_v10 = vpop.xlane.xlu0 %4144 }
 0x8fb   : > { %5537 = vrcp.f32 %v4145_v10  ;;  %v8624_v10 = vld [vmem:[#allocation51_spill] sm:$0xff] }
 0x8fc   : > { %5539 = vrcp.f32 %v3400_v55 }
 0x8fd   : > { %5541 = vrcp.f32 %v3397_v8 }
 0x8fe   : > { %5543 = vrcp.f32 %v4151_v9  ;;  %v8628_v9 = vld [vmem:[#allocation38_spill] sm:$0xff] }
 0x901   : > { %v5538_v17 = vpop.eup %5537 }
 0x902   : > { %v5540_v46 = vpop.eup %5539 }
 0x903   : > { %v5542_v21 = vpop.eup %5541  ;;  %v3648_v25 = vmul.f32 %v5540_v46, %v8019_v36  ;;  %v8325_v36 = vld [vmem:[%s8435_s8] ss:$0 sm:$0xff] }
 0x904   : > { %4954 = vmatmul.msk.bf16.gmra.mxu2 %vm1468_vm0, %v3670_v56  ;;  %v5544_v51 = vpop.eup %5543  ;;  %v3647_v41 = vmul.f32 %v5542_v21, %v8012_v26 }
 0x906   : > { %v3672_v14 = vpack.c.bf16 %v3648_v25, %v3647_v41  ;;  %v8630_v41 = vld [vmem:[#allocation53_spill] sm:$0xff] }
 0x909   : > { %v4338_v35 = vpop.f32.mrf.mxu0  ;;  %v4148_v62 = vpop.xlane.xlu0 %4147 }
 0x90a   : > { %v4396_v37 = vmul.f32 %v5536_v48, %v4338_v35  ;;  %5545 = vrcp.f32 %v4148_v62  ;;  %v3016_v35 = vadd.f32 %v8624_v10, %v8623_v47  ;;  %v8625_v48 = vld [vmem:[#allocation26_spill] sm:$0xff] }
 0x90b   : > { %v8640_v47 = vld [vmem:[#allocation58_spill] sm:$0xff] }
 0x910   : > { %v5546_v5 = vpop.eup %5545 }
 0x911   : > { %v4340_v53 = vpop.f32.mrf.mxu0 }
 0x912   : > { %v4397_v11 = vmul.f32 %v5538_v17, %v4340_v53  ;;  %v3017_v17 = vadd.f32 %v8626_v23, %v8625_v48  ;;  %v8641_v48 = vld [vmem:[#allocation47_spill] sm:$0xff] }
 0x913   : > { %v8642_v23 = vld [vmem:[#allocation59_spill] sm:$0xff] }
 0x914   : > { %v4422_v40 = vpack.c.bf16 %v4397_v11, %v4396_v37  ;;  %4955 = vmatmul.msk.bf16.gmra.mxu2 %vm1468_vm0, %v3671_v20 }
 0x916   : > { %4987 = vmatmul.msk.bf16.gmra.mxu3 %vm1468_vm0, %v4422_v40  ;;  %v8627_v40 = vld [vmem:[#allocation30_spill] sm:$0xff] }
 0x917   : > { %v3018_v62 = vadd.f32 %v8628_v9, %v8627_v40  ;;  %v8643_v40 = vld [vmem:[#allocation48_spill] sm:$0xff] }
 0x918   : > { %v4363_v15 = vpop.f32.mrf.mxu1  ;;  %v8644_v9 = vld [vmem:[#allocation60_spill] sm:$0xff] }
 0x919   : > { %v4398_v31 = vmul.f32 %v5546_v5, %v4363_v15  ;;  %v8629_v5 = vld [vmem:[#allocation22_spill] sm:$0xff] }
 0x920   : > { %v4365_v33 = vpop.f32.mrf.mxu1  ;;  %v3723_v57 = vpop.f32.mrf.mxu2 }
 0x921   : > { %v4399_v63 = vmul.f32 %v5544_v51, %v4365_v33  ;;  %v3763_v29 = vadd.f32 %v3723_v57, %v3012_v13  ;;  %v3019_v33 = vadd.f32 %v8630_v41, %v8629_v5  ;;  %v8632_v13 = vld [vmem:[#allocation54_spill] sm:$0xff]  ;;  %v8645_v5 = vld [vmem:[#allocation49_spill] sm:$0xff]  ;;  %v8646_v41 = vld [vmem:[#allocation28_spill] sm:$0xff] }
 0x923   : > { %v4423_v24 = vpack.c.bf16 %v4399_v63, %v4398_v31 }
 0x924   : > { %4956 = vmatmul.msk.bf16.gmra.mxu2 %vm1468_vm0, %v3672_v14 }
 0x926   : > { %4988 = vmatmul.msk.bf16.gmra.mxu3 %vm1468_vm0, %v4423_v24 }
 0x928   : > { %v4474_v26 = vpop.f32.mrf.mxu3  ;;  %v3725_v44 = vpop.f32.mrf.mxu2 }
 0x929   : > { %v4514_v18 = vadd.f32 %v4474_v26, %v3763_v29  ;;  %v3764_v61 = vadd.f32 %v3725_v44, %v3013_v45  ;;  %v3020_v29 = vadd.f32 %v8632_v13, %v8631_v54  ;;  %v8634_v45 = vld [vmem:[#allocation55_spill] sm:$0xff] }
 0x92b   : > { %v4566_v59 = vadd.f32 %v8325_v36, %v4514_v18 }
 0x92d   : > { %4582 = vst [vmem:[%s8332_s20] sm:$0xff] %v4566_v59 }
 0x930   : > { %v4476_v49 = vpop.f32.mrf.mxu3 }
 0x931   : > { %v4515_v27 = vadd.f32 %v4476_v49, %v3764_v61  ;;  %v3021_v61 = vadd.f32 %v8634_v45, %v8633_v32 }
 0x933   : > { %v4567_v12 = vadd.f32 %v8325_v36, %v4515_v27 }
 0x935   : > { %4583 = vst [vmem:[%s8332_s20 + $0x8] sm:$0xff] %v4567_v12 }
 0x938   : > { %v4479_v43 = vpop.f32.mrf.mxu3 }
 0x940   : > { %v4481_v34 = vpop.f32.mrf.mxu3 }
 0x947   : > { %v3728_v16 = vpop.f32.mrf.mxu2 }
 0x948   : > { %v3765_v1 = vadd.f32 %v3728_v16, %v3014_v52  ;;  %v4484_v19 = vpop.f32.mrf.mxu3 }
 0x94a   : > { %v4516_v42 = vadd.f32 %v4479_v43, %v3765_v1 }
 0x94c   : > { %v4568_v60 = vadd.f32 %v8325_v36, %v4516_v42 }
 0x94e   : > { %4584 = vst [vmem:[%s8332_s20 + $0x10] sm:$0xff] %v4568_v60  ;;  %v8637_v60 = vld [vmem:[#allocation45_spill] sm:$0xff] }
 0x94f   : > { %v3730_v39 = vpop.f32.mrf.mxu2  ;;  %v3023_v22 = vadd.f32 %v8638_v38, %v8637_v60 }
 0x950   : > { %v3766_v50 = vadd.f32 %v3730_v39, %v3015_v3  ;;  %v4486_v56 = vpop.f32.mrf.mxu3 }
 0x952   : > { %v4517_v0 = vadd.f32 %v4481_v34, %v3766_v50  ;;  %v8635_v34 = vld [vmem:[#allocation44_spill] sm:$0xff] }
 0x953   : > { %v3022_v30 = vadd.f32 %v8636_v6, %v8635_v34 }
 0x954   : > { %v4569_v7 = vadd.f32 %v8325_v36, %v4517_v0 }
 0x956   : > { %4585 = vst [vmem:[%s8332_s20 + $0x18] sm:$0xff] %v4569_v7 }
 0x957   : > { %v3733_v4 = vpop.f32.mrf.mxu2 }
 0x958   : > { %v3767_v8 = vadd.f32 %v3733_v4, %v3016_v35  ;;  %v4489_v53 = vpop.f32.mrf.mxu3 }
 0x95a   : > { %v4518_v58 = vadd.f32 %v4484_v19, %v3767_v8 }
 0x95c   : > { %v4570_v2 = vadd.f32 %v8325_v36, %v4518_v58 }
 0x95e   : > { %4586 = vst [vmem:[%s8332_s20 + $0x20] sm:$0xff] %v4570_v2 }
 0x95f   : > { %v3735_v55 = vpop.f32.mrf.mxu2 }
 0x960   : > { %v3768_v37 = vadd.f32 %v3735_v55, %v3017_v17  ;;  %v4491_v21 = vpop.f32.mrf.mxu3  ;;  %v3025_v17 = vadd.f32 %v8642_v23, %v8641_v48 }
 0x962   : > { %v4519_v11 = vadd.f32 %v4486_v56, %v3768_v37  ;;  %v8639_v56 = vld [vmem:[#allocation46_spill] sm:$0xff] }
 0x963   : > { %v3024_v10 = vadd.f32 %v8640_v47, %v8639_v56 }
 0x964   : > { %v4571_v20 = vadd.f32 %v8325_v36, %v4519_v11 }
 0x966   : > { %4587 = vst [vmem:[%s8332_s20 + $0x28] sm:$0xff] %v4571_v20 }
 0x967   : > { %v3738_v15 = vpop.f32.mrf.mxu2 }
 0x968   : > { %v3769_v46 = vadd.f32 %v3738_v15, %v3018_v62  ;;  %v4494_v14 = vpop.f32.mrf.mxu3  ;;  %v3026_v62 = vadd.f32 %v8644_v9, %v8643_v40 }
 0x96a   : > { %v4520_v25 = vadd.f32 %v4489_v53, %v3769_v46 }
 0x96c   : > { %v4572_v51 = vadd.f32 %v8325_v36, %v4520_v25 }
 0x96e   : > { %4588 = vst [vmem:[%s8332_s20 + $0x30] sm:$0xff] %v4572_v51 }
 0x96f   : > { %v3740_v31 = vpop.f32.mrf.mxu2 }
 0x970   : > { %v3770_v63 = vadd.f32 %v3740_v31, %v3019_v33  ;;  %v4496_v28 = vpop.f32.mrf.mxu3  ;;  %v3027_v33 = vadd.f32 %v8646_v41, %v8645_v5 }
 0x972   : > { %v4521_v57 = vadd.f32 %v4491_v21, %v3770_v63 }
 0x974   : > { %v4573_v24 = vadd.f32 %v8325_v36, %v4521_v57 }
 0x976   : > { %4589 = vst [vmem:[%s8332_s20 + $0x38] sm:$0xff] %v4573_v24 }
 0x977   : > { %v3743_v26 = vpop.f32.mrf.mxu2 }
 0x978   : > { %v3771_v18 = vadd.f32 %v3743_v26, %v3020_v29  ;;  %v4499_v52 = vpop.f32.mrf.mxu3 }
 0x97a   : > { %v4522_v59 = vadd.f32 %v4494_v14, %v3771_v18 }
 0x97c   : > { %v4574_v44 = vadd.f32 %v8325_v36, %v4522_v59 }
 0x97e   : > { %4590 = vst [vmem:[%s8332_s20 + $0x40] sm:$0xff] %v4574_v44 }
 0x97f   : > { %v3745_v49 = vpop.f32.mrf.mxu2 }
 0x980   : > { %v3772_v27 = vadd.f32 %v3745_v49, %v3021_v61  ;;  %v4501_v50 = vpop.f32.mrf.mxu3 }
 0x982   : > { %v4523_v12 = vadd.f32 %v4496_v28, %v3772_v27 }
 0x984   : > { %v4575_v43 = vadd.f32 %v8325_v36, %v4523_v12 }
 0x986   : > { %4591 = vst [vmem:[%s8332_s20 + $0x48] sm:$0xff] %v4575_v43 }
 0x987   : > { %v3748_v16 = vpop.f32.mrf.mxu2 }
 0x988   : > { %v3773_v1 = vadd.f32 %v3748_v16, %v3022_v30 }
 0x98a   : > { %v4524_v42 = vadd.f32 %v4499_v52, %v3773_v1 }
 0x98c   : > { %v4576_v19 = vadd.f32 %v8325_v36, %v4524_v42 }
 0x98e   : > { %4592 = vst [vmem:[%s8332_s20 + $0x50] sm:$0xff] %v4576_v19 }
 0x98f   : > { %v3750_v3 = vpop.f32.mrf.mxu2 }
 0x990   : > { %v3774_v39 = vadd.f32 %v3750_v3, %v3023_v22 }
 0x992   : > { %v4525_v0 = vadd.f32 %v4501_v50, %v3774_v39 }
 0x994   : > { %v4577_v7 = vadd.f32 %v8325_v36, %v4525_v0 }
 0x996   : > { %4593 = vst [vmem:[%s8332_s20 + $0x58] sm:$0xff] %v4577_v7 }
 0x997   : > { %v3753_v35 = vpop.f32.mrf.mxu2 }
 0x998   : > { %v3775_v4 = vadd.f32 %v3753_v35, %v3024_v10 }
 0x999   : > { %v4504_v8 = vpop.f32.mrf.mxu3 }
 0x99a   : > { %v4526_v58 = vadd.f32 %v4504_v8, %v3775_v4 }
 0x99c   : > { %v4578_v2 = vadd.f32 %v8325_v36, %v4526_v58 }
 0x99e   : > { %4594 = vst [vmem:[%s8332_s20 + $0x60] sm:$0xff] %v4578_v2 }
 0x99f   : > { %v3755_v53 = vpop.f32.mrf.mxu2 }
 0x9a0   : > { %v3776_v55 = vadd.f32 %v3755_v53, %v3025_v17 }
 0x9a1   : > { %v4506_v37 = vpop.f32.mrf.mxu3 }
 0x9a2   : > { %v4527_v11 = vadd.f32 %v4506_v37, %v3776_v55 }
 0x9a4   : > { %v4579_v20 = vadd.f32 %v8325_v36, %v4527_v11 }
 0x9a6   : > { %4595 = vst [vmem:[%s8332_s20 + $0x68] sm:$0xff] %v4579_v20 }
 0x9a7   : > { %v3758_v15 = vpop.f32.mrf.mxu2 }
 0x9a8   : > { %v3777_v46 = vadd.f32 %v3758_v15, %v3026_v62 }
 0x9a9   : > { %v4509_v21 = vpop.f32.mrf.mxu3 }
 0x9aa   : > { %v4528_v25 = vadd.f32 %v4509_v21, %v3777_v46 }
 0x9ac   : > { %v4580_v51 = vadd.f32 %v8325_v36, %v4528_v25 }
 0x9ae   : > { %4596 = vst [vmem:[%s8332_s20 + $0x70] sm:$0xff] %v4580_v51 }
 0x9af   : > { %v3760_v31 = vpop.f32.mrf.mxu2 }
 0x9b0   : > { %v3778_v63 = vadd.f32 %v3760_v31, %v3027_v33 }
 0x9b1   : > { %v4511_v57 = vpop.f32.mrf.mxu3 }
 0x9b2   : > { %v4529_v14 = vadd.f32 %v4511_v57, %v3778_v63 }
 0x9b4   : > { %v4581_v24 = vadd.f32 %v8325_v36, %v4529_v14 }
 0x9b6   : > { %4597 = vst [vmem:[%s8332_s20 + $0x78] sm:$0xff] %v4581_v24 }
 0x9b7   : > { %5786 = shalt.err (!%p5783_p9)
}
 0x9b8   : > { %s5854_s1 = smov 128   ;;  %s5855_s15 = smov 8  }
 0x9b9   : > { %5133 = dma.vmem_to_hbm [thread:$0]  (%p6006_p4), %s4612_s21, 2048, %s4614_s2, %s4599_s16, %s5854_s1, %s5854_s1, %s5855_s15  }
 0x9ba PF: > { %s4628_s20 = sand.u32 1, %s5825_s30   ;;  %p8647_p10 = scmp.ge.s32.totalorder %s5837_s12, 2 }
 0x9bb   : > { %s4629_s19 = scalar_lea.sflag [#allocation5], %s4628_s20 }
 0x9bc   : > { %p5159_p13 = pnand %p8647_p10, %p6010_p6 }
 0x9be   : > { %p5160_p11 = pneg %p5159_p13 }
 0x9c0   : > { %5820 = dma.done.wait (%p5160_p11), %s4629_s19, 2048  }
 0x9c1   : > { %5822 = vsyncadd (%p5160_p11), %s4629_s19, 4294965248  ;;  %p25_p0 = scmp.ge.s32.totalorder %s5980_s27, 4   ;;  %s8648_s30 = smov %s5829_s10 }
 0x9c2   : > { %s8649_s10 = smov %s5833_s11  ;;  %s8650_s11 = smov %s5991_s14 }
 0x9c3   : > { %s8651_s12 = smov %s5980_s27  ;;  %27 = sbr.rel (!%p25_p0) target bundleno = 13 (0xd), region = 131 }
 0x9c8   :  { %4635 = vsyncpa [#allocation4], 1 }
 0x9c9   :  { %4637 = vsyncpa [#allocation4 + $0x1], 1 }
 0x9ca   :  { %4638 = vsyncpa [#allocation7], 1 }
 0x9cb   :  { %4639 = vsyncpa [#allocation10], 1 }
 0x9cc   :  { %4640 = vsyncpa [#allocation13], 1 }
 0x9cd   :  { %4641 = vsyncpa [#allocation5], 1 }
 0x9ce   :  { %4643 = vsyncpa [#allocation5 + $0x1], 1 }

// kernel: tpu_custom_call.1
= control target key start
LH: loop header
LB: loop body
LE: loop exit
PB: predicated region body
PF: predicated region fallthrough
CT: control target
= control target key end

     0   :  { %s8427_s0 = inlined_call_operand.hbm [shape: f32[256,128], index: 0, kind: input, shape index: {}]   ;;  %s8428_s1 = inlined_call_operand.hbm [shape: bf16[128,384], index: 1, kind: input, shape index: {}]   ;;  %s8429_s2 = inlined_call_operand.hbm [shape: f32[1,384], index: 2, kind: input, shape index: {}]   ;;  %s8430_s3 = inlined_call_operand.hbm [shape: f32[128,128], index: 3, kind: input, shape index: {}]   ;;  %s8431_s4 = inlined_call_operand.vmem [shape: f32[1,128], index: 4, kind: input, shape index: {}]   ;;  %s8432_s5 = inlined_call_operand.hbm [shape: bf16[4,16,16], index: 5, kind: input, shape index: {}]   ;;  %s8433_s6 = inlined_call_operand.hbm [shape: bf16[8,16,16], index: 6, kind: input, shape index: {}]   ;;  %s8434_s7 = inlined_call_operand.hbm [shape: bf16[4,32,128], index: 7, kind: input, shape index: {}]   ;;  %s8435_s8 = inlined_call_operand.vmem [shape: f32[1,128], index: 8, kind: input, shape index: {}]   ;;  %s8436_s9 = inlined_call_operand.hbm [shape: f32[256,128], index: 9, kind: output, shape index: {}]  }
   0x1   :  { %8475 = sst [smem:[#allocation61_spill]] %s8428_s1 }
   0x2   :  { %8476 = sst [smem:[#allocation62_spill]] %s8429_s2 }
   0x3   :  { %8477 = sst [smem:[#allocation63_spill]] %s8430_s3 }
   0x4   :  { %8478 = sst [smem:[#allocation64_spill]] %s8432_s5 }
   0x5   :  { %14 = vsyncpa [#allocation4], 0 }
   0x6   :  { %16 = vsyncpa [#allocation4 + $0x1], 0 }
   0x7   :  { %17 = vsyncpa [#allocation7], 0 }
   0x8   :  { %18 = vsyncpa [#allocation10], 0 }
   0x9   :  { %19 = vsyncpa [#allocation13], 0 }
   0xa   :  { %20 = vsyncpa [#allocation5], 0 }
   0xb   :  { %22 = vsyncpa [#allocation5 + $0x1], 0  ;;  %s5906_s30 = smov 0   ;;  %s5908_s10 = smov 0  }
   0xc   :  { %s5910_s11 = smov 0   ;;  %s5912_s12 = smov 0  }
   0xd LB: > { %s8479_s1 = sld [smem:[#allocation61_spill]]  ;;  %s5930_s16 = sadd.s32 4294967295, %s5837_s12   ;;  %s5837_s12 = sphi %s5912_s12, %s8651_s12   ;;  %s5833_s11 = sphi %s5910_s11, %s8650_s11   ;;  %s5829_s10 = sphi %s5908_s10, %s8649_s10   ;;  %s5825_s30 = sphi %s5906_s30, %s8648_s30  }
   0xe   : > { %p4745_p0 = scmp.ge.s32.totalorder %s5837_s12, 1  ;;  %p49_p1 = scmp.eq.s32.totalorder %s5930_s16, 0 }
   0xf   : > { %p253_p2 = scmp.lt.s32.totalorder %s5837_s12, 3  ;;  %s5839_s18 = smov [#allocation6]  }
  0x10   : > { %s266_s19 = sshll.u32 %s5839_s18, 4  ;;  %s8481_s3 = sld [smem:[#allocation63_spill]]  ;;  %s267_s19 = int_to_ptr.vmem [resolvable:$true] %s266_s19 }
  0x11   : > { %p5935_p3 = pnand %p4745_p0, %p253_p2  ;;  %s5840_s24 = smov [#allocation9]  }
  0x12   : > { %s292_s25 = sshll.u32 %s5840_s24, 4  ;;  %s5841_s26 = smov 192   ;;  %s293_s25 = int_to_ptr.vmem [resolvable:$true] %s292_s25 }
  0x13   : > { %s264_s15 = sshll.u32 %s8479_s1, 4  ;;  %p5135_p4 = pneg %p5935_p3  ;;  %s265_s15 = int_to_ptr.hbm [resolvable:$true] %s264_s15 }
  0x14   : > { %s5842_s27 = smov 12   ;;  %s8437_s28 = smov 128  }
  0x15   : > { %p5947_p6 = pnand %p5135_p4, %p49_p1  ;;  %s8438_s29 = smov 8  }
  0x16   : > { %s290_s22 = sshll.u32 %s8481_s3, 4  ;;  %s321_s18 = sshll.u32 %s8433_s6, 4  ;;  %s291_s22 = int_to_ptr.hbm [resolvable:$true] %s290_s22  ;;  %s322_s18 = int_to_ptr.hbm [resolvable:$true] %s321_s18 }
  0x17   : > { %5138 = dma.hbm_to_vmem [thread:$0]  (!%p5947_p6), %s265_s15, 3072, %s267_s19, [#allocation7], %s5841_s26, %s5841_s26, %s5842_s27  }
  0x18   : > { %5144 = dma.hbm_to_vmem [thread:$0]  (!%p5947_p6), %s291_s22, 2048, %s293_s25, [#allocation10], %s8437_s28, %s8437_s28, %s8438_s29  }
  0x19   : > { %s5845_s20 = smov [#allocation12]   ;;  %s8483_s2 = sld [smem:[#allocation62_spill]] }
  0x1a   : > { %s323_s21 = sshll.u32 %s5845_s20, 4  ;;  %s5846_s19 = smov 64   ;;  %s324_s21 = int_to_ptr.vmem [resolvable:$true] %s323_s21 }
  0x1b   : > { %s5847_s26 = smov 4   ;;  %s5848_s22 = smov [#allocation8]  }
  0x1c   : > { %5150 = dma.hbm_to_vmem [thread:$0]  (!%p5947_p6), %s322_s18, 1024, %s324_s21, [#allocation13], %s5846_s19, %s5846_s19, %s5847_s26  }
  0x1d   : > { %s281_s25 = sshll.u32 %s5848_s22, 4  ;;  %s8484_s5 = sld [smem:[#allocation64_spill]]  ;;  %s282_s25 = int_to_ptr.vmem [resolvable:$true] %s281_s25 }
  0x1e   : > { %s335_s18 = sshll.u32 %s8434_s7, 4  ;;  %s5849_s21 = smov [#allocation11]   ;;  %s336_s18 = int_to_ptr.hbm [resolvable:$true] %s335_s18 }
  0x1f   : > { %s279_s15 = sshll.u32 %s8483_s2, 4  ;;  %s309_s24 = sshll.u32 %s5849_s21, 4  ;;  %s280_s15 = int_to_ptr.hbm [resolvable:$true] %s279_s15  ;;  %s310_s24 = int_to_ptr.vmem [resolvable:$true] %s309_s24 }
  0x20   : > { %5141 = dma.hbm_to_vmem [thread:$0]  (!%p5947_p6), %s280_s15, 48, %s282_s25, [#allocation7]  }
  0x21   : > { %s5850_s22 = smov [#allocation14]   ;;  %s4744_s25 = sadd.s32 4294967294, %s5837_s12  }
  0x22   : > { %s337_s15 = sshll.u32 %s5850_s22, 4  ;;  %s5980_s27 = sadd.s32 1, %s5837_s12   ;;  %s338_s15 = int_to_ptr.vmem [resolvable:$true] %s337_s15 }
  0x23   : > { %s307_s14 = sshll.u32 %s8484_s5, 4  ;;  %s32_s13 = ssub.s32 %s5837_s12, %s5980_s27  ;;  %s308_s14 = int_to_ptr.hbm [resolvable:$true] %s307_s14 }
  0x24   : > { %5147 = dma.hbm_to_vmem [thread:$0]  (!%p5947_p6), %s308_s14, 512, %s310_s24, [#allocation10], %s5846_s19, %s5846_s19, %s5847_s26  }
  0x25   : > { %5153 = dma.hbm_to_vmem [thread:$0]  (!%p5947_p6), %s336_s18, 1024, %s338_s15, [#allocation13], %s5846_s19, %s5846_s19, %s5847_s26  }
  0x26   : > { %s35_s1 = sadd.s32 1, %s5833_s11  ;;  %p33_p7 = scmp.eq.s32.totalorder %s32_s13, 0 }
  0x27   : > { %p42_p8 = scmp.ne.s32.totalorder %s5833_s11, %s5829_s10  ;;  %p43_p9 = scmp.eq.s32.totalorder %s5837_s12, 0 }
  0x28   : > { %p48_p10 = scmp.ne.s32.totalorder %s5829_s10, %s5825_s30  ;;  %p240_p13 = scmp.eq.s32.totalorder %s5930_s16, 1 }
  0x29   : > { %s5991_s14 = scalar_select %p33_p7, %s5833_s11, %s35_s1  }
  0x2a   : > { %p5993_p11 = por %p43_p9, %p42_p8  ;;  %p5999_p12 = por %p49_p1, %p48_p10 }
  0x2b   : > { %p246_p0 = scmp.eq.s32.totalorder %s4744_s25, 1  ;;  %p5168_p2 = scmp.lt.s32.totalorder %s5837_s12, 2 }
  0x2c   : > { %s354_s19 = sand.u32 1, %s5833_s11   ;;  %p6006_p4 = por %p240_p13, %p42_p8 }
  0x2d   : > { %p6010_p6 = por %p246_p0, %p48_p10  ;;  %s4753_s21 = sshll.u32 %s354_s19, 7 }
  0x2e   : > { %s4994_s24 = sshll.u32 %s5837_s12, 7  ;;  %s358_s1 = scalar_lea.vmem [#allocation3], %s4753_s21 }
  0x2f   : > { %s363_s13 = scalar_lea.hbm %s8427_s0, %s4994_s24  ;;  %s366_s28 = sshll.u32 %s358_s1, 4  ;;  %s367_s28 = int_to_ptr.vmem [resolvable:$true] %s366_s28 }
  0x30   : > { %s364_s29 = sshll.u32 %s363_s13, 4  ;;  %p6020_p7 = pnand %p5168_p2, %p5993_p11  ;;  %s365_s29 = int_to_ptr.hbm [resolvable:$true] %s364_s29 }
  0x31   : > { %s355_s2 = scalar_lea.sflag [#allocation4], %s354_s19  ;;  %s5729_s3 = sshra.s32 %s365_s29, 4  ;;  %s5730_s3 = int_to_ptr.hbm [resolvable:$true] %s5729_s3 }
  0x32   : > { %s5731_s5 = scalar_lea.hbm %s5730_s3, 128  ;;  %p5733_p9 = pneg %p6020_p7 }
  0x33   : > { %p5732_p8 = scmp.ne.s32.totalorder %s5730_s3, %s5731_s5  ;;  %s5736_s22 = scalar_lea.hbm %s8427_s0, 256 }
  0x34   : > { %p5737_p11 = scmp.lt.s32.totalorder %s5730_s3, %s8427_s0  ;;  %p5738_p0 = scmp.lt.s32.totalorder %s5736_s22, %s5731_s5 }
  0x35   : > { %p5734_p10 = pnand %p5733_p9, %p5732_p8 }
  0x36   : > { %p5739_p2 = por %p5738_p0, %p5737_p11 }
  0x37   : > { %p5735_p13 = pneg %p5734_p10 }
  0x39   : > { %p5740_p5 = pnand %p5739_p2, %p5735_p13 }
  0x3b   : > { %5743 = shalt.err (!%p5740_p5)
}
  0x3c   : > { %s8490_s19 = smov 8   ;;  %s8491_s13 = smov 128  }
  0x3d   : > { %5157 = dma.hbm_to_vmem [thread:$0]  (!%p6020_p7), %s365_s29, 2048, %s367_s28, %s355_s2, %s8491_s13, %s8491_s13, %s8490_s19  }
  0x3e   : > { %378 = sbr.rel (%p5935_p3) target bundleno = 2490 (0x9ba), region = 56 }
  0x43   : > { %s6040_s1 = sand.u32 1, %s5829_s10  }
  0x44   : > { %s4757_s3 = sshll.u32 %s6040_s1, 7  ;;  %s381_s5 = scalar_lea.sflag [#allocation4], %s6040_s1 }
  0x45   : > { %s6046_s21 = scalar_lea.vmem [#allocation3], %s4757_s3 }
  0x46   : > { %5804 = dma.done.wait (%p5999_p12), %s381_s5, 2048  }
  0x47   : > { %5806 = vsyncadd (%p5999_p12), %s381_s5, 4294965248 }
  0x48   : > { %5808 = dma.done.wait (%p49_p1), [#allocation7], 3120  }
  0x49   : > { %5810 = vsyncadd (%p49_p1), [#allocation7], 4294964176 }
  0x4a   : > { %5812 = dma.done.wait (%p49_p1), [#allocation10], 2560  }
  0x4b   : > { %5814 = vsyncadd (%p49_p1), [#allocation10], 4294964736 }
  0x4c   : > { %5816 = dma.done.wait (%p49_p1), [#allocation13], 2048  }
  0x4d   : > { %5818 = vsyncadd (%p49_p1), [#allocation13], 4294965248  ;;  %v4851_v0 = vld [vmem:[#allocation6 + $0xa8] sm:$0xf]  ;;  %v5017_v1 = vld [vmem:[#allocation6 + $0xb0] sm:$0xf0] }
  0x4e   : > { %v4839_v2 = vld [vmem:[#allocation6 + $0x90] sm:$0xf]  ;;  %v4852_v3 = vor.u32 %v5017_v1, %v4851_v0  ;;  %v5014_v4 = vld [vmem:[#allocation6 + $0x98] sm:$0xf0]  ;;  %v4827_v6 = vld [vmem:[#allocation6 + $0x78] sm:$0xf] }
  0x4f   : > { %v4840_v5 = vor.u32 %v5014_v4, %v4839_v2  ;;  %v5011_v7 = vld [vmem:[#allocation6 + $0x80] sm:$0xf0]  ;;  %v4815_v9 = vld [vmem:[#allocation6 + $0x60] sm:$0xf]  ;;  %v5008_v10 = vld [vmem:[#allocation6 + $0x68] sm:$0xf0] }
  0x50   : > { %645 = vmatpush.bf16.msra.mxu0 %v4852_v3  ;;  %5083 = vmatpush.bf16.msra.mxu1 %v4852_v3  ;;  %v4828_v8 = vor.u32 %v5011_v7, %v4827_v6  ;;  %v4816_v11 = vor.u32 %v5008_v10, %v4815_v9  ;;  %v4803_v12 = vld [vmem:[#allocation6 + $0x48] sm:$0xf]  ;;  %v5005_v13 = vld [vmem:[#allocation6 + $0x50] sm:$0xf0]  ;;  %v4791_v15 = vld [vmem:[#allocation6 + $0x30] sm:$0xf] }
  0x51   : > { %v4804_v14 = vor.u32 %v5005_v13, %v4803_v12  ;;  %v5002_v16 = vld [vmem:[#allocation6 + $0x38] sm:$0xf0]  ;;  %v4779_v18 = vld [vmem:[#allocation6 + $0x18] sm:$0xf]  ;;  %v4999_v19 = vld [vmem:[#allocation6 + $0x20] sm:$0xf0] }
  0x52   : > { %v4792_v17 = vor.u32 %v5002_v16, %v4791_v15  ;;  %v4780_v20 = vor.u32 %v4999_v19, %v4779_v18  ;;  %v4767_v21 = vld [vmem:[#allocation6] sm:$0xf]  ;;  %v4996_v22 = vld [vmem:[#allocation6 + $0x8] sm:$0xf0]  ;;  %v463_v26 = vld [vmem:[%s6046_s21 + $0x50] sm:$0xff]  ;;  %s5851_s28 = smov 96  }
  0x53   : > { %v453_v23 = vld [vmem:[%s6046_s21] sm:$0xff]  ;;  %v4768_v24 = vor.u32 %v4996_v22, %v4767_v21  ;;  %v454_v25 = vld [vmem:[%s6046_s21 + $0x8] sm:$0xff]  ;;  %v464_v27 = vld [vmem:[%s6046_s21 + $0x58] sm:$0xff]  ;;  %s5852_s25 = smov 64   ;;  %s5853_s24 = smov 32  }
  0x54   : > { %646 = vmatpush.bf16.msra.mxu0 %v4840_v5  ;;  %5084 = vmatpush.bf16.msra.mxu1 %v4840_v5  ;;  %v6068_v28 = vpack.c.bf16 %v454_v25, %v453_v23  ;;  %v6070_v29 = vpack.c.bf16 %v464_v27, %v463_v26  ;;  %v5016_v30 = vld [vmem:[#allocation6 + $0xac] sm:$0xf]  ;;  %v4853_v31 = vld [vmem:[#allocation6 + $0xb4] sm:$0xf0]  ;;  %v5013_v32 = vld [vmem:[#allocation6 + $0x94] sm:$0xf] }
  0x55   : > { %v4856_v33 = vor.u32 %v5016_v30, %v4853_v31  ;;  %v4841_v34 = vld [vmem:[#allocation6 + $0x9c] sm:$0xf0]  ;;  %v455_v36 = vld [vmem:[%s6046_s21 + $0x10] sm:$0xff]  ;;  %v456_v37 = vld [vmem:[%s6046_s21 + $0x18] sm:$0xff]  ;;  %s8332_s20 = scalar_lea.vmem [#allocation15], %s4757_s3  ;;  %s5027_s19 = sshll.u32 %s5930_s16, 7 }
  0x56   : > { %v4844_v35 = vor.u32 %v5013_v32, %v4841_v34  ;;  %v465_v38 = vld [vmem:[%s6046_s21 + $0x60] sm:$0xff]  ;;  %v466_v39 = vld [vmem:[%s6046_s21 + $0x68] sm:$0xff]  ;;  %v6078_v40 = vpack.c.bf16 %v456_v37, %v455_v36  ;;  %v5010_v42 = vld [vmem:[#allocation6 + $0x7c] sm:$0xf]  ;;  %s4610_s5 = scalar_lea.hbm %s8436_s9, %s5027_s19  ;;  %s4599_s16 = scalar_lea.sflag [#allocation5], %s6040_s1 }
  0x57   : > { %v6080_v41 = vpack.c.bf16 %v466_v39, %v465_v38  ;;  %v4829_v43 = vld [vmem:[#allocation6 + $0x84] sm:$0xf0]  ;;  %v5007_v45 = vld [vmem:[#allocation6 + $0x64] sm:$0xf]  ;;  %v4817_v46 = vld [vmem:[#allocation6 + $0x6c] sm:$0xf0] }
  0x58   : > { %647 = vmatpush.bf16.msra.mxu0 %v4828_v8  ;;  %5085 = vmatpush.bf16.msra.mxu1 %v4828_v8  ;;  %v4832_v44 = vor.u32 %v5010_v42, %v4829_v43  ;;  %v4820_v47 = vor.u32 %v5007_v45, %v4817_v46  ;;  %v5004_v48 = vld [vmem:[#allocation6 + $0x4c] sm:$0xf]  ;;  %v4805_v49 = vld [vmem:[#allocation6 + $0x54] sm:$0xf0]  ;;  %v5001_v51 = vld [vmem:[#allocation6 + $0x34] sm:$0xf] }
  0x59   : > { %v4808_v50 = vor.u32 %v5004_v48, %v4805_v49  ;;  %v4793_v52 = vld [vmem:[#allocation6 + $0x3c] sm:$0xf0]  ;;  %v458_v54 = vld [vmem:[%s6046_s21 + $0x28] sm:$0xff]  ;;  %v467_v55 = vld [vmem:[%s6046_s21 + $0x70] sm:$0xff]  ;;  %s4613_s2 = sshll.u32 %s4610_s5, 4  ;;  %s4614_s2 = int_to_ptr.hbm [resolvable:$true] %s4613_s2 }
  0x5a   : > { %v457_v53 = vld [vmem:[%s6046_s21 + $0x20] sm:$0xff]  ;;  %v468_v56 = vld [vmem:[%s6046_s21 + $0x78] sm:$0xff]  ;;  %v4796_v57 = vor.u32 %v5001_v51, %v4793_v52  ;;  %v4781_v61 = vld [vmem:[#allocation6 + $0x24] sm:$0xf0]  ;;  %s5773_s17 = sshra.s32 %s4614_s2, 4  ;;  %s5774_s17 = int_to_ptr.hbm [resolvable:$true] %s5773_s17 }
  0x5b   : > { %v6088_v58 = vpack.c.bf16 %v458_v54, %v457_v53  ;;  %v6090_v59 = vpack.c.bf16 %v468_v56, %v467_v55  ;;  %v4998_v60 = vld [vmem:[#allocation6 + $0x1c] sm:$0xf]  ;;  %v4995_v63 = vld [vmem:[#allocation6 + $0x4] sm:$0xf]  ;;  %v4769_v0 = vld [vmem:[#allocation6 + $0xc] sm:$0xf0]  ;;  %p5780_p12 = scmp.lt.s32.totalorder %s5774_s17, %s8436_s9 }
  0x5c   : > { %648 = vmatpush.bf16.msra.mxu0 %v4816_v11  ;;  %5086 = vmatpush.bf16.msra.mxu1 %v4816_v11  ;;  %v4784_v62 = vor.u32 %v4998_v60, %v4781_v61  ;;  %v823_v1 = vld [vmem:[#allocation9 + $0x78] sm:$0xff]  ;;  %v4772_v2 = vor.u32 %v4995_v63, %v4769_v0  ;;  %v822_v3 = vld [vmem:[#allocation9 + $0x70] sm:$0xff]  ;;  %v821_v4 = vld [vmem:[#allocation9 + $0x68] sm:$0xff] }
  0x5d   : > { %5091 = vmatpush.msra.mxu3 %v823_v1  ;;  %v459_v5 = vld [vmem:[%s6046_s21 + $0x30] sm:$0xff]  ;;  %v460_v6 = vld [vmem:[%s6046_s21 + $0x38] sm:$0xff]  ;;  %v820_v8 = vld [vmem:[#allocation9 + $0x60] sm:$0xff] }
  0x5e   : > { %v6096_v7 = vpack.c.bf16 %v460_v6, %v459_v5  ;;  %v819_v9 = vld [vmem:[#allocation9 + $0x58] sm:$0xff]  ;;  %v818_v10 = vld [vmem:[#allocation9 + $0x50] sm:$0xff]  ;;  %v817_v11 = vld [vmem:[#allocation9 + $0x48] sm:$0xff] }
  0x5f   : > { %5092 = vmatpush.msra.mxu3 %v822_v3  ;;  %v816_v12 = vld [vmem:[#allocation9 + $0x40] sm:$0xff]  ;;  %v815_v13 = vld [vmem:[#allocation9 + $0x38] sm:$0xff]  ;;  %v814_v16 = vld [vmem:[#allocation9 + $0x30] sm:$0xff] }
  0x60   : > { %649 = vmatpush.bf16.msra.mxu0 %v4804_v14  ;;  %5087 = vmatpush.bf16.msra.mxu1 %v4804_v14  ;;  %v461_v14 = vld [vmem:[%s6046_s21 + $0x40] sm:$0xff]  ;;  %v462_v15 = vld [vmem:[%s6046_s21 + $0x48] sm:$0xff]  ;;  %v810_v21 = vld [vmem:[#allocation9 + $0x10] sm:$0xff]  ;;  %s4611_s21 = sshll.u32 %s8332_s20, 4  ;;  %s4612_s21 = int_to_ptr.vmem [resolvable:$true] %s4611_s21 }
  0x61   : > { %5093 = vmatpush.msra.mxu3 %v821_v4  ;;  %v813_v18 = vld [vmem:[#allocation9 + $0x28] sm:$0xff]  ;;  %v812_v19 = vld [vmem:[#allocation9 + $0x20] sm:$0xff] }
  0x62   : > { %v809_v22 = vld [vmem:[#allocation9 + $0x8] sm:$0xff]  ;;  %v808_v23 = vld [vmem:[#allocation9] sm:$0xff] }
  0x63   : > { %5094 = vmatpush.msra.mxu3 %v820_v8 }
  0x64   : > { %650 = vmatpush.bf16.msra.mxu0 %v4792_v17  ;;  %5088 = vmatpush.bf16.msra.mxu1 %v4792_v17  ;;  %v6102_v17 = vpack.c.bf16 %v462_v15, %v461_v14  ;;  %v5018_v14 = vld [vmem:[#allocation6 + $0xb8] sm:$0xf0]  ;;  %v4847_v15 = vld [vmem:[#allocation6 + $0x98] sm:$0xf] }
  0x65   : > { %5095 = vmatpush.msra.mxu3 %v819_v9 }
  0x67   : > { %5096 = vmatpush.msra.mxu3 %v818_v10 }
  0x68   : > { %651 = vmatpush.bf16.msra.mxu0 %v4780_v20  ;;  %5089 = vmatpush.bf16.msra.mxu1 %v4780_v20  ;;  %v811_v20 = vld [vmem:[#allocation9 + $0x18] sm:$0xff] }
  0x69   : > { %5097 = vmatpush.msra.mxu3 %v817_v11 }
  0x6b   : > { %5098 = vmatpush.msra.mxu3 %v816_v12 }
  0x6c   : > { %652 = vmatpush.bf16.msra.mxu0 %v4768_v24  ;;  %5090 = vmatpush.bf16.msra.mxu1 %v4768_v24  ;;  %v6109_v24 = vld [vmem:[#allocation8] sm:$0x7] }
  0x6d   : > { %5099 = vmatpush.msra.mxu3 %v815_v13  ;;  %v6112_v25 = vperm.slane %v6109_v24, 0 }
  0x6f   : > { %653 = vmatmul.bf16.vlgmr.msra.gmra.mxu0 %v6068_v28  ;;  %678 = vmatmul.bf16.vlgmr.msra.gmra.mxu1 %v6070_v29 }
  0x70   : > { %694 = vmatpush.bf16.msrb.mxu1 %v4856_v33  ;;  %824 = vmatpush.msrb.mxu0 %v823_v1 }
  0x71   : > { %5100 = vmatpush.msra.mxu3 %v814_v16 }
  0x72   : > { %825 = vmatpush.msrb.mxu0 %v822_v3 }
  0x73   : > { %5101 = vmatpush.msra.mxu3 %v813_v18 }
  0x74   : > { %695 = vmatpush.bf16.msrb.mxu1 %v4844_v35  ;;  %826 = vmatpush.msrb.mxu0 %v821_v4 }
  0x75   : > { %5102 = vmatpush.msra.mxu3 %v812_v19 }
  0x76   : > { %827 = vmatpush.msrb.mxu0 %v820_v8 }
  0x77   : > { %5103 = vmatpush.msra.mxu3 %v811_v20 }
  0x78   : > { %696 = vmatpush.bf16.msrb.mxu1 %v4832_v44  ;;  %828 = vmatpush.msrb.mxu0 %v819_v9 }
  0x79   : > { %5104 = vmatpush.msra.mxu3 %v810_v21 }
  0x7a   : > { %829 = vmatpush.msrb.mxu0 %v818_v10 }
  0x7b   : > { %5105 = vmatpush.msra.mxu3 %v809_v22 }
  0x7c   : > { %697 = vmatpush.bf16.msrb.mxu1 %v4820_v47  ;;  %830 = vmatpush.msrb.mxu0 %v817_v11 }
  0x7d   : > { %5106 = vmatpush.msra.mxu3 %v808_v23 }
  0x7e   : > { %831 = vmatpush.msrb.mxu0 %v816_v12 }
  0x7f   : > { %658 = vmatmul.bf16.gmra.mxu0 %v6078_v40  ;;  %683 = vmatmul.bf16.gmra.mxu1 %v6080_v41 }
  0x80   : > { %698 = vmatpush.bf16.msrb.mxu1 %v4808_v50  ;;  %832 = vmatpush.msrb.mxu0 %v815_v13 }
  0x82   : > { %833 = vmatpush.msrb.mxu0 %v814_v16 }
  0x84   : > { %699 = vmatpush.bf16.msrb.mxu1 %v4796_v57  ;;  %834 = vmatpush.msrb.mxu0 %v813_v18 }
  0x86   : > { %835 = vmatpush.msrb.mxu0 %v812_v19 }
  0x88   : > { %700 = vmatpush.bf16.msrb.mxu1 %v4784_v62  ;;  %836 = vmatpush.msrb.mxu0 %v811_v20 }
  0x8a   : > { %837 = vmatpush.msrb.mxu0 %v810_v21 }
  0x8c   : > { %701 = vmatpush.bf16.msrb.mxu1 %v4772_v2  ;;  %838 = vmatpush.msrb.mxu0 %v809_v22 }
  0x8e   : > { %839 = vmatpush.msrb.mxu0 %v808_v23 }
  0x8f   : > { %663 = vmatmul.bf16.gmra.mxu0 %v6088_v58  ;;  %688 = vmatmul.bf16.gmra.mxu1 %v6090_v59 }
  0x90   : > { %905 = vmatpush.msra.mxu0 %v823_v1 }
  0x92   : > { %906 = vmatpush.msra.mxu0 %v822_v3 }
  0x94   : > { %907 = vmatpush.msra.mxu0 %v821_v4 }
  0x96   : > { %908 = vmatpush.msra.mxu0 %v820_v8 }
  0x98   : > { %909 = vmatpush.msra.mxu0 %v819_v9 }
  0x9a   : > { %910 = vmatpush.msra.mxu0 %v818_v10 }
  0x9c   : > { %911 = vmatpush.msra.mxu0 %v817_v11 }
  0x9e   : > { %912 = vmatpush.msra.mxu0 %v816_v12 }
  0x9f   : > { %668 = vmatmul.bf16.gmra.mxu0 %v6096_v7  ;;  %702 = vmatmul.bf16.vlgmr.msrb.gmra.mxu1 %v6068_v28 }
  0xa0   : > { %913 = vmatpush.msra.mxu0 %v815_v13  ;;  %v4859_v13 = vld [vmem:[#allocation6 + $0xb0] sm:$0xf] }
  0xa2   : > { %914 = vmatpush.msra.mxu0 %v814_v16  ;;  %v4860_v16 = vor.u32 %v5018_v14, %v4859_v13 }
  0xa4   : > { %915 = vmatpush.msra.mxu0 %v813_v18  ;;  %v5015_v18 = vld [vmem:[#allocation6 + $0xa0] sm:$0xf0]  ;;  %743 = vmatpush.bf16.msra.mxu2 %v4860_v16 }
  0xa6   : > { %916 = vmatpush.msra.mxu0 %v812_v19 }
  0xa8   : > { %917 = vmatpush.msra.mxu0 %v811_v20  ;;  %v4848_v20 = vor.u32 %v5015_v18, %v4847_v15 }
  0xaa   : > { %918 = vmatpush.msra.mxu0 %v810_v21  ;;  %744 = vmatpush.bf16.msra.mxu2 %v4848_v20 }
  0xac   : > { %919 = vmatpush.msra.mxu0 %v809_v22 }
  0xae   : > { %920 = vmatpush.msra.mxu0 %v808_v23 }
  0xaf   : > { %673 = vmatmul.bf16.gmra.mxu0 %v6102_v17  ;;  %707 = vmatmul.bf16.gmra.mxu1 %v6078_v40 }
  0xbf   : > { %712 = vmatmul.bf16.gmra.mxu1 %v6088_v58 }
  0xcf   : > { %717 = vmatmul.bf16.gmra.mxu1 %v6096_v7 }
  0xdf   : > { %722 = vmatmul.bf16.gmra.mxu1 %v6102_v17 }
  0xec   : > { %v654_v26 = vpop.f32.mrf.mxu0  ;;  %v679_v27 = vpop.f32.mrf.mxu1 }
  0xed   : > { %v6115_v30 = vadd.f32 %v654_v26, %v6112_v25  ;;  %v6118_v31 = vadd.f32 %v679_v27, %v6112_v25  ;;  %v4835_v26 = vld [vmem:[#allocation6 + $0x80] sm:$0xf]  ;;  %v5012_v27 = vld [vmem:[#allocation6 + $0x88] sm:$0xf0] }
  0xef   : > { %v792_v32 = vmul.f32 %v6115_v30, %v6115_v30  ;;  %v802_v33 = vmul.f32 %v6118_v31, %v6118_v31  ;;  %727 = vmatmul.bf16.gmra.mxu1 %v6070_v29 }
  0xf1   : > { %840 = vmatmul.f32.vlgmr.msrb.gmra.mxu0 %v792_v32  ;;  %870 = vmatmul.f32.vlgmr.msra.gmra.mxu3 %v802_v33  ;;  %v4823_v32 = vld [vmem:[#allocation6 + $0x68] sm:$0xf]  ;;  %v4836_v33 = vor.u32 %v5012_v27, %v4835_v26 }
  0xf3   : > { %745 = vmatpush.bf16.msra.mxu2 %v4836_v33 }
  0xf4   : > { %v656_v34 = vpop.f32.mrf.mxu0  ;;  %v681_v35 = vpop.f32.mrf.mxu1 }
  0xf5   : > { %v6126_v36 = vadd.f32 %v656_v34, %v6112_v25  ;;  %v6129_v37 = vadd.f32 %v681_v35, %v6112_v25  ;;  %v5009_v34 = vld [vmem:[#allocation6 + $0x70] sm:$0xf0] }
  0xf7   : > { %v793_v38 = vmul.f32 %v6126_v36, %v6126_v36  ;;  %v803_v39 = vmul.f32 %v6129_v37, %v6129_v37 }
  0xf9   : > { %843 = vmatmul.f32.gmra.mxu0 %v793_v38  ;;  %873 = vmatmul.f32.gmra.mxu3 %v803_v39  ;;  %v4824_v38 = vor.u32 %v5009_v34, %v4823_v32 }
  0xfb   : > { %746 = vmatpush.bf16.msra.mxu2 %v4824_v38 }
  0xfc   : > { %v659_v42 = vpop.f32.mrf.mxu0  ;;  %v684_v43 = vpop.f32.mrf.mxu1 }
  0xfd   : > { %v6136_v44 = vadd.f32 %v659_v42, %v6112_v25  ;;  %v6139_v45 = vadd.f32 %v684_v43, %v6112_v25  ;;  %v6196_v42 = vperm.slane %v6109_v24, 1 }
  0xff   : > { %v794_v46 = vmul.f32 %v6136_v44, %v6136_v44  ;;  %v804_v47 = vmul.f32 %v6139_v45, %v6139_v45  ;;  %732 = vmatmul.bf16.gmra.mxu1 %v6080_v41 }
 0x101   : > { %846 = vmatmul.f32.gmra.mxu0 %v794_v46  ;;  %876 = vmatmul.f32.gmra.mxu3 %v804_v47 }
 0x104   : > { %v661_v48 = vpop.f32.mrf.mxu0  ;;  %v686_v49 = vpop.f32.mrf.mxu1 }
 0x105   : > { %v6147_v50 = vadd.f32 %v661_v48, %v6112_v25  ;;  %v6150_v51 = vadd.f32 %v686_v49, %v6112_v25  ;;  %v4811_v48 = vld [vmem:[#allocation6 + $0x50] sm:$0xf]  ;;  %v5006_v49 = vld [vmem:[#allocation6 + $0x58] sm:$0xf0] }
 0x107   : > { %v795_v52 = vmul.f32 %v6147_v50, %v6147_v50  ;;  %v805_v53 = vmul.f32 %v6150_v51, %v6150_v51 }
 0x109   : > { %849 = vmatmul.f32.gmra.mxu0 %v795_v52  ;;  %879 = vmatmul.f32.gmra.mxu3 %v805_v53  ;;  %v4799_v52 = vld [vmem:[#allocation6 + $0x38] sm:$0xf]  ;;  %v4812_v53 = vor.u32 %v5006_v49, %v4811_v48 }
 0x10b   : > { %747 = vmatpush.bf16.msra.mxu2 %v4812_v53 }
 0x10c   : > { %v664_v54 = vpop.f32.mrf.mxu0  ;;  %v689_v55 = vpop.f32.mrf.mxu1 }
 0x10d   : > { %v6157_v56 = vadd.f32 %v664_v54, %v6112_v25  ;;  %v6160_v57 = vadd.f32 %v689_v55, %v6112_v25  ;;  %v5003_v54 = vld [vmem:[#allocation6 + $0x40] sm:$0xf0]  ;;  %v4787_v55 = vld [vmem:[#allocation6 + $0x20] sm:$0xf] }
 0x10f   : > { %v796_v60 = vmul.f32 %v6157_v56, %v6157_v56  ;;  %v806_v61 = vmul.f32 %v6160_v57, %v6160_v57  ;;  %737 = vmatmul.bf16.gmra.mxu1 %v6090_v59 }
 0x111   : > { %852 = vmatmul.f32.gmra.mxu0 %v796_v60  ;;  %882 = vmatmul.f32.gmra.mxu3 %v806_v61  ;;  %v5000_v60 = vld [vmem:[#allocation6 + $0x28] sm:$0xf0]  ;;  %v4775_v61 = vld [vmem:[#allocation6 + $0x8] sm:$0xf] }
 0x114   : > { %v666_v62 = vpop.f32.mrf.mxu0  ;;  %v691_v63 = vpop.f32.mrf.mxu1 }
 0x115   : > { %v6168_v0 = vadd.f32 %v666_v62, %v6112_v25  ;;  %v6171_v1 = vadd.f32 %v691_v63, %v6112_v25  ;;  %v4788_v63 = vor.u32 %v5000_v60, %v4787_v55 }
 0x117   : > { %v797_v2 = vmul.f32 %v6168_v0, %v6168_v0  ;;  %v807_v3 = vmul.f32 %v6171_v1, %v6171_v1 }
 0x119   : > { %855 = vmatmul.f32.gmra.mxu0 %v797_v2  ;;  %885 = vmatmul.f32.gmra.mxu3 %v807_v3  ;;  %v4997_v2 = vld [vmem:[#allocation6 + $0x10] sm:$0xf0] }
 0x11c   : > { %v669_v4 = vpop.f32.mrf.mxu0  ;;  %v703_v5 = vpop.f32.mrf.mxu1 }
 0x11d   : > { %v6178_v6 = vadd.f32 %v669_v4, %v6112_v25  ;;  %v6201_v47 = vadd.f32 %v703_v5, %v6196_v42  ;;  %v4776_v4 = vor.u32 %v4997_v2, %v4775_v61 }
 0x11f   : > { %v798_v8 = vmul.f32 %v6178_v6, %v6178_v6  ;;  %v889_v24 = vmul.f32 %v6201_v47, %v6201_v47 }
 0x121   : > { %858 = vmatmul.f32.gmra.mxu0 %v798_v8 }
 0x124   : > { %v671_v9 = vpop.f32.mrf.mxu0  ;;  %v705_v10 = vpop.f32.mrf.mxu1 }
 0x125   : > { %v6183_v11 = vadd.f32 %v671_v9, %v6112_v25  ;;  %v6206_v3 = vadd.f32 %v705_v10, %v6196_v42 }
 0x127   : > { %v799_v12 = vmul.f32 %v6183_v11, %v6183_v11  ;;  %v890_v5 = vmul.f32 %v6206_v3, %v6206_v3 }
 0x129   : > { %861 = vmatmul.f32.gmra.mxu0 %v799_v12 }
 0x12c   : > { %v674_v19 = vpop.f32.mrf.mxu0  ;;  %v708_v22 = vpop.f32.mrf.mxu1 }
 0x12d   : > { %v6188_v21 = vadd.f32 %v674_v19, %v6112_v25  ;;  %v6211_v8 = vadd.f32 %v708_v22, %v6196_v42 }
 0x12f   : > { %v800_v23 = vmul.f32 %v6188_v21, %v6188_v21  ;;  %v891_v12 = vmul.f32 %v6211_v8, %v6211_v8 }
 0x131   : > { %864 = vmatmul.f32.gmra.mxu0 %v800_v23 }
 0x134   : > { %v676_v35 = vpop.f32.mrf.mxu0  ;;  %v710_v46 = vpop.f32.mrf.mxu1 }
 0x135   : > { %v6193_v39 = vadd.f32 %v676_v35, %v6112_v25  ;;  %v4800_v25 = vor.u32 %v5003_v54, %v4799_v52  ;;  %v6217_v10 = vadd.f32 %v710_v46, %v6196_v42 }
 0x137   : > { %v801_v43 = vmul.f32 %v6193_v39, %v6193_v39  ;;  %748 = vmatpush.bf16.msra.mxu2 %v4800_v25  ;;  %v892_v14 = vmul.f32 %v6217_v10, %v6217_v10 }
 0x139   : > { %867 = vmatmul.f32.gmra.mxu0 %v801_v43 }
 0x13b   : > { %749 = vmatpush.bf16.msra.mxu2 %v4788_v63 }
 0x13c   : > { %v713_v62 = vpop.f32.mrf.mxu1 }
 0x13d   : > { %v6222_v15 = vadd.f32 %v713_v62, %v6196_v42 }
 0x13f   : > { %750 = vmatpush.bf16.msra.mxu2 %v4776_v4 }
 0x141   : > { %921 = vmatmul.f32.vlgmr.msra.gmra.mxu0 %v889_v24 }
 0x142   : > { %751 = vmatmul.bf16.vlgmr.msra.gmra.mxu2 %v6068_v28  ;;  %v893_v28 = vmul.f32 %v6222_v15, %v6222_v15 }
 0x144   : > { %v715_v9 = vpop.f32.mrf.mxu1 }
 0x145   : > { %v6228_v18 = vadd.f32 %v715_v9, %v6196_v42 }
 0x147   : > { %v894_v19 = vmul.f32 %v6228_v18, %v6228_v18 }
 0x149   : > { %924 = vmatmul.f32.gmra.mxu0 %v890_v5  ;;  %v6259_v5 = vld [vmem:[%s8431_s4] ss:$0 sm:$0xff] }
 0x14c   : > { %v718_v13 = vpop.f32.mrf.mxu1 }
 0x14d   : > { %v6233_v22 = vadd.f32 %v718_v13, %v6196_v42 }
 0x151   : > { %927 = vmatmul.f32.gmra.mxu0 %v891_v12 }
 0x152   : > { %756 = vmatmul.bf16.gmra.mxu2 %v6078_v40  ;;  %v895_v40 = vmul.f32 %v6233_v22, %v6233_v22 }
 0x154   : > { %v720_v16 = vpop.f32.mrf.mxu1 }
 0x155   : > { %v6239_v32 = vadd.f32 %v720_v16, %v6196_v42 }
 0x157   : > { %v896_v35 = vmul.f32 %v6239_v32, %v6239_v32 }
 0x159   : > { %930 = vmatmul.f32.gmra.mxu0 %v892_v14 }
 0x15c   : > { %v723_v20 = vpop.f32.mrf.mxu1 }
 0x161   : > { %933 = vmatmul.f32.gmra.mxu0 %v893_v28 }
 0x162   : > { %761 = vmatmul.bf16.gmra.mxu2 %v6088_v58  ;;  %v6244_v58 = vadd.f32 %v723_v20, %v6196_v42 }
 0x164   : > { %v725_v27 = vpop.f32.mrf.mxu1  ;;  %v897_v52 = vmul.f32 %v6244_v58, %v6244_v58 }
 0x165   : > { %v6252_v55 = vadd.f32 %v725_v27, %v6196_v42 }
 0x169   : > { %936 = vmatmul.f32.gmra.mxu0 %v894_v19 }
 0x16c   : > { %v728_v49 = vpop.f32.mrf.mxu1 }
 0x16d   : > { %v6262_v13 = vadd.f32 %v728_v49, %v6196_v42 }
 0x16e   : > { %v841_v23 = vpop.f32.mrf.mxu0 }
 0x16f   : > { %v971_v26 = vmax.f32 %v841_v23, 1e-24  ;;  %v899_v19 = vmul.f32 %v6262_v13, %v6262_v13 }
 0x171   : > { %5227 = vrsqrt.f32 %v971_v26  ;;  %939 = vmatmul.f32.gmra.mxu0 %v895_v40  ;;  %vm993_vm1 = vweird.f32 %v971_v26 }
 0x172   : > { %766 = vmatmul.bf16.gmra.mxu2 %v6096_v7  ;;  %v898_v7 = vmul.f32 %v6252_v55, %v6252_v55 }
 0x174   : > { %v730_v4 = vpop.f32.mrf.mxu1 }
 0x175   : > { %v6274_v27 = vadd.f32 %v730_v4, %v6196_v42 }
 0x176   : > { %v844_v33 = vpop.f32.mrf.mxu0 }
 0x177   : > { %v5228_v34 = vpop.eup %5227  ;;  %v972_v38 = vmax.f32 %v844_v33, 1e-24 }
 0x178   : > { %v988_v43 = vmul.f32 %v5228_v34, %v971_v26  ;;  %vm994_vm0 = vweird.f32 %v5228_v34 }
 0x179   : > { %5229 = vrsqrt.f32 %v972_v38  ;;  %942 = vmatmul.f32.gmra.mxu0 %v896_v35  ;;  %vm995_vm3 = vmor %vm993_vm1, %vm994_vm0  ;;  %vm1003_vm4 = vweird.f32 %v972_v38  ;;  %v900_v35 = vmul.f32 %v6274_v27, %v6274_v27  ;;  %vm1468_vm0 = vcmask 261120  }
 0x17a   : > { %v989_v46 = vmul.f32 %v5228_v34, %v988_v43 }
 0x17c   : > { %v990_v48 = vmul.f32 0.5, %v989_v46  ;;  %v733_v26 = vpop.f32.mrf.mxu1 }
 0x17e   : > { %v6249_v53 = vpop.f32.mrf.mxu0  ;;  %v991_v25 = vsub.f32 1.5, %v990_v48 }
 0x17f   : > { %v5230_v54 = vpop.eup %5229 }
 0x180   : > { %v998_v24 = vmul.f32 %v5230_v54, %v972_v38  ;;  %v992_v61 = vmul.f32 %v5228_v34, %v991_v25  ;;  %vm1004_vm2 = vweird.f32 %v5230_v54 }
 0x181   : > { %945 = vmatmul.f32.gmra.mxu0 %v897_v52  ;;  %vm1005_vm5 = vmor %vm1003_vm4, %vm1004_vm2 }
 0x182   : > { %v999_v60 = vmul.f32 %v5230_v54, %v998_v24  ;;  %v996_v9 = vsel %vm995_vm3, %v5228_v34, %v992_v61  ;;  %771 = vmatmul.bf16.gmra.mxu2 %v6102_v17 }
 0x183   : > { %v1150_v28 = vmul.f32 %v6259_v5, %v996_v9 }
 0x184   : > { %v1000_v62 = vmul.f32 0.5, %v999_v60 }
 0x185   : > { %v1166_v23 = vmul.f32 %v1150_v28, %v6115_v30  ;;  %v735_v30 = vpop.f32.mrf.mxu1 }
 0x186   : > { %v1001_v63 = vsub.f32 1.5, %v1000_v62  ;;  %v850_v2 = vpop.f32.mrf.mxu0  ;;  %v6291_v52 = vadd.f32 %v735_v30, %v6196_v42 }
 0x187   : > { %v1182_v34 = vpack.c.bf16 %v1166_v23, %v1166_v23 }
 0x188   : > { %v1002_v12 = vmul.f32 %v5230_v54, %v1001_v63  ;;  %v902_v25 = vmul.f32 %v6291_v52, %v6291_v52 }
 0x189   : > { %948 = vmatmul.f32.gmra.mxu0 %v898_v7  ;;  %v1460_v43 = vunpack.c.l.b16 %v1182_v34 }
 0x18a   : > { %v1006_v14 = vsel %vm1005_vm5, %v5230_v54, %v1002_v12  ;;  %v6314_v12 = vmax.f32 %v6249_v53, 1e-24 }
 0x18b   : > { %v1151_v16 = vmul.f32 %v6259_v5, %v1006_v14  ;;  %v6316_v14 = vmax.f32 %v850_v2, 1e-24 }
 0x18c   : > { %vm1013_vm12 = vweird.f32 %v6314_v12 }
 0x18d   : > { %v1167_v40 = vmul.f32 %v1151_v16, %v6126_v36  ;;  %v6281_v36 = vadd.f32 %v733_v26, %v6196_v42  ;;  %v738_v54 = vpop.f32.mrf.mxu1  ;;  %vm1023_vm2 = vweird.f32 %v6316_v14 }
 0x18e   : > { %v6269_v20 = vpop.f32.mrf.mxu0  ;;  %v6298_v60 = vadd.f32 %v738_v54, %v6196_v42 }
 0x18f   : > { %v1183_v33 = vpack.c.bf16 %v1167_v40, %v1167_v40  ;;  %v901_v48 = vmul.f32 %v6281_v36, %v6281_v36 }
 0x191   : > { %951 = vmatmul.f32.gmra.mxu0 %v899_v19  ;;  %v1461_v17 = vunpack.c.l.b16 %v1183_v33 }
 0x192   : > { %776 = vmatmul.bf16.gmra.mxu2 %v6070_v29  ;;  %v903_v29 = vmul.f32 %v6298_v60, %v6298_v60 }
 0x193   : > { %v6278_v46 = vpack.c.b16 %v1461_v17, %v1460_v43 }
 0x195   : > { %8492 = vst [vmem:[#allocation21_spill] sm:$0xff] %v6278_v46  ;;  %2298 = vrot.lane.b32.xlu1 %v6278_v46, %s5851_s28  ;;  %v740_v62 = vpop.f32.mrf.mxu1 }
 0x196   : > { %v856_v38 = vpop.f32.mrf.mxu0  ;;  %v6306_v7 = vadd.f32 %v740_v62, %v6196_v42 }
 0x197   : > { %v6336_v62 = vmax.f32 %v856_v38, 1e-24 }
 0x198   : > { %v904_v63 = vmul.f32 %v6306_v7, %v6306_v7 }
 0x199   : > { %954 = vmatmul.f32.gmra.mxu0 %v900_v35 }
 0x19e   : > { %v6288_v49 = vpop.f32.mrf.mxu0 }
 0x1a1   : > { %957 = vmatmul.f32.gmra.mxu0 %v901_v48 }
 0x1a2   : > { %781 = vmatmul.bf16.gmra.mxu2 %v6080_v41 }
 0x1a6   : > { %v6295_v24 = vpop.f32.mrf.mxu0 }
 0x1a9   : > { %960 = vmatmul.f32.gmra.mxu0 %v902_v25 }
 0x1ae   : > { %v6303_v61 = vpop.f32.mrf.mxu0 }
 0x1b1   : > { %963 = vmatmul.f32.gmra.mxu0 %v903_v29  ;;  %v6334_v29 = vmax.f32 %v6269_v20, 1e-24 }
 0x1b2   : > { %786 = vmatmul.bf16.gmra.mxu2 %v6090_v59 }
 0x1b6   : > { %v6310_v4 = vpop.f32.mrf.mxu0 }
 0x1b9   : > { %966 = vmatmul.f32.gmra.mxu0 %v904_v63 }
 0x1be   : > { %v922_v9 = vpop.f32.mrf.mxu0 }
 0x1bf   : > { %v1198_v41 = vmax.f32 %v922_v9, 1e-24 }
 0x1c1   : > { %5231 = vrsqrt.f32 %v1198_v41  ;;  %vm1220_vm7 = vweird.f32 %v1198_v41 }
 0x1c2   : > { %5233 = vrsqrt.f32 %v6314_v12 }
 0x1c3   : > { %5235 = vrsqrt.f32 %v6316_v14 }
 0x1c6   : > { %v925_v42 = vpop.f32.mrf.mxu0 }
 0x1c7   : > { %v5232_v28 = vpop.eup %5231  ;;  %v1199_v16 = vmax.f32 %v925_v42, 1e-24  ;;  %v6338_v42 = vpop.f32.mrf.mxu2 }
 0x1c8   : > { %v1215_v19 = vmul.f32 %v5232_v28, %v1198_v41  ;;  %v6320_v23 = vpop.eup %5233  ;;  %vm1221_vm6 = vweird.f32 %v5232_v28 }
 0x1c9   : > { %5237 = vrsqrt.f32 %v1199_v16  ;;  %v6322_v59 = vpop.eup %5235  ;;  %v1008_v53 = vmul.f32 %v6320_v23, %v6314_v12  ;;  %vm1222_vm8 = vmor %vm1220_vm7, %vm1221_vm6  ;;  %vm1230_vm10 = vweird.f32 %v1199_v16  ;;  %vm1014_vm13 = vweird.f32 %v6320_v23 }
 0x1ca   : > { %v1216_v40 = vmul.f32 %v5232_v28, %v1215_v19  ;;  %v1018_v35 = vmul.f32 %v6322_v59, %v6316_v14  ;;  %vm1024_vm14 = vweird.f32 %v6322_v59  ;;  %vm6370_vm1 = vmor %vm1013_vm12, %vm1014_vm13  ;;  %vm1033_vm13 = vweird.f32 %v6334_v29 }
 0x1cb   : > { %v1009_v48 = vmul.f32 %v6320_v23, %v1008_v53  ;;  %vm6385_vm3 = vmor %vm1023_vm2, %vm1024_vm14 }
 0x1cc   : > { %v1217_v26 = vmul.f32 0.5, %v1216_v40  ;;  %v1019_v25 = vmul.f32 %v6322_v59, %v1018_v35 }
 0x1cd   : > { %v1010_v19 = vmul.f32 0.5, %v1009_v48 }
 0x1ce   : > { %v1218_v2 = vsub.f32 1.5, %v1217_v26  ;;  %v928_v33 = vpop.f32.mrf.mxu0  ;;  %v1020_v41 = vmul.f32 0.5, %v1019_v25 }
 0x1cf   : > { %v5238_v34 = vpop.eup %5237  ;;  %v6328_v17 = vmax.f32 %v928_v33, 1e-24  ;;  %v1011_v33 = vsub.f32 1.5, %v1010_v19  ;;  %v6352_v25 = vpop.f32.mrf.mxu2 }
 0x1d0   : > { %v1219_v43 = vmul.f32 %v5232_v28, %v1218_v2  ;;  %v1225_v30 = vmul.f32 %v5238_v34, %v1199_v16  ;;  %vm1231_vm9 = vweird.f32 %v5238_v34 }
 0x1d1   : > { %5239 = vrsqrt.f32 %v6328_v17  ;;  %vm1232_vm11 = vmor %vm1230_vm10, %vm1231_vm9  ;;  %vm1240_vm4 = vweird.f32 %v6328_v17 }
 0x1d2   : > { %v1226_v54 = vmul.f32 %v5238_v34, %v1225_v30  ;;  %v1223_v63 = vsel %vm1222_vm8, %v5232_v28, %v1219_v43  ;;  %5241 = vrsqrt.f32 %v6334_v29  ;;  %v1021_v30 = vsub.f32 1.5, %v1020_v41 }
 0x1d3   : > { %v1374_v53 = vmul.f32 %v1223_v63, %v6201_v47  ;;  %5243 = vrsqrt.f32 %v6336_v62 }
 0x1d4   : > { %v1227_v9 = vmul.f32 0.5, %v1226_v54 }
 0x1d5   : > { %v1390_v48 = vpack.c.bf16 %v1374_v53, %v1374_v53 }
 0x1d6   : > { %v1228_v40 = vsub.f32 1.5, %v1227_v9  ;;  %v931_v26 = vpop.f32.mrf.mxu0 }
 0x1d7   : > { %v6340_v2 = vpop.eup %5239  ;;  %v6344_v20 = vmax.f32 %v931_v26, 1e-24  ;;  %v1465_v41 = vunpack.c.l.b16 %v1390_v48 }
 0x1d8   : > { %v1229_v38 = vmul.f32 %v5238_v34, %v1228_v40  ;;  %v1235_v28 = vmul.f32 %v6340_v2, %v6328_v17  ;;  %v6354_v63 = vpop.eup %5241  ;;  %v1012_v40 = vmul.f32 %v6320_v23, %v1011_v33  ;;  %vm1241_vm15 = vweird.f32 %v6340_v2 }
 0x1d9   : > { %5245 = vrsqrt.f32 %v6344_v20  ;;  %v6357_v9 = vpop.eup %5243  ;;  %vm6392_vm5 = vmor %vm1240_vm4, %vm1241_vm15  ;;  %v6413_v33 = vmax.f32 %v6288_v49, 1e-24  ;;  %vm1250_vm7 = vweird.f32 %v6344_v20  ;;  %vm1034_vm9 = vweird.f32 %v6354_v63 }
 0x1da   : > { %v1233_v35 = vsel %vm1232_vm11, %v5238_v34, %v1229_v38  ;;  %v1236_v43 = vmul.f32 %v6340_v2, %v1235_v28  ;;  %v1016_v48 = vsel %vm6370_vm1, %v6320_v23, %v1012_v40  ;;  %v1038_v14 = vmul.f32 %v6357_v9, %v6336_v62  ;;  %vm6472_vm15 = vmor %vm1033_vm13, %vm1034_vm9 }
 0x1db   : > { %v1375_v47 = vmul.f32 %v1233_v35, %v6206_v3  ;;  %v1022_v3 = vmul.f32 %v6322_v59, %v1021_v30  ;;  %v6402_v40 = vmax.f32 %v6295_v24, 1e-24  ;;  %vm1044_vm11 = vweird.f32 %v6357_v9 }
 0x1dc   : > { %v1237_v54 = vmul.f32 0.5, %v1236_v43  ;;  %v1028_v43 = vmul.f32 %v6354_v63, %v6334_v29  ;;  %vm1043_vm1 = vweird.f32 %v6336_v62  ;;  %v6478_v29 = vmax.f32 %v6310_v4, 1e-24 }
 0x1dd   : > { %v1391_v16 = vpack.c.bf16 %v1375_v47, %v1375_v47  ;;  %v1026_v23 = vsel %vm6385_vm3, %v6322_v59, %v1022_v3  ;;  %vm6490_vm2 = vmor %vm1043_vm1, %vm1044_vm11  ;;  %vm1063_vm11 = vweird.f32 %v6402_v40 }
 0x1de   : > { %v1238_v34 = vsub.f32 1.5, %v1237_v54  ;;  %v934_v19 = vpop.f32.mrf.mxu0 }
 0x1df   : > { %v5246_v26 = vpop.eup %5245  ;;  %v6363_v53 = vmax.f32 %v934_v19, 1e-24  ;;  %v1466_v38 = vunpack.c.l.b16 %v1391_v16  ;;  %v6407_v19 = vpop.f32.mrf.mxu2 }
 0x1e0   : > { %v1239_v28 = vmul.f32 %v6340_v2, %v1238_v34  ;;  %v1245_v35 = vmul.f32 %v5246_v26, %v6344_v20  ;;  %vm1251_vm6 = vweird.f32 %v5246_v26 }
 0x1e1   : > { %5247 = vrsqrt.f32 %v6363_v53  ;;  %v6378_v30 = vpack.c.b16 %v1466_v38, %v1465_v41  ;;  %v1152_v41 = vmul.f32 %v6259_v5, %v1016_v48  ;;  %v1029_v38 = vmul.f32 %v6354_v63, %v1028_v43  ;;  %vm1252_vm8 = vmor %vm1250_vm7, %vm1251_vm6 }
 0x1e2   : > { %v1246_v47 = vmul.f32 %v5246_v26, %v1245_v35  ;;  %v1243_v34 = vsel %vm6392_vm5, %v6340_v2, %v1239_v28  ;;  %v1039_v35 = vmul.f32 %v6357_v9, %v1038_v14  ;;  %v1153_v2 = vmul.f32 %v6259_v5, %v1026_v23 }
 0x1e3   : > { %8495 = vst [vmem:[#allocation22_spill] sm:$0xff] %v6378_v30  ;;  %v1473_v16 = vsel %vm1468_vm0, %v6378_v30, 0  ;;  %v1376_v28 = vmul.f32 %v1243_v34, %v6211_v8  ;;  %5249 = vrsqrt.f32 %v6402_v40  ;;  %v1168_v48 = vmul.f32 %v1152_v41, %v6136_v44 }
 0x1e4   : > { %v1247_v17 = vmul.f32 0.5, %v1246_v47  ;;  %1482 = vmatpush.bf16.xpose.msrb.mxu2 %v1473_v16  ;;  %v871_v47 = vpop.f32.mrf.mxu3  ;;  %v1030_v14 = vmul.f32 0.5, %v1029_v38  ;;  %v1040_v54 = vmul.f32 0.5, %v1039_v35  ;;  %v1169_v20 = vmul.f32 %v1153_v2, %v6147_v50 }
 0x1e5   : > { %v1392_v23 = vpack.c.bf16 %v1376_v28, %v1376_v28  ;;  %v6437_v35 = vmax.f32 %v871_v47, 1e-24  ;;  %vm1260_vm12 = vweird.f32 %v6363_v53 }
 0x1e6   : > { %v1248_v59 = vsub.f32 1.5, %v1247_v17  ;;  %v937_v24 = vpop.f32.mrf.mxu0  ;;  %v1031_v41 = vsub.f32 1.5, %v1030_v14  ;;  %v1185_v14 = vpack.c.bf16 %v1169_v20, %v1169_v20 }
 0x1e7   : > { %v6415_v3 = vpop.eup %5247  ;;  %v6419_v12 = vmax.f32 %v937_v24, 1e-24  ;;  %v6433_v44 = vpop.f32.mrf.mxu2  ;;  %v1041_v24 = vsub.f32 1.5, %v1040_v54 }
 0x1e8   : > { %v1249_v43 = vmul.f32 %v5246_v26, %v1248_v59  ;;  %v1255_v49 = vmul.f32 %v6415_v3, %v6363_v53  ;;  %vm1261_vm10 = vweird.f32 %v6415_v3 }
 0x1e9   : > { %5251 = vrsqrt.f32 %v6419_v12  ;;  %v6435_v59 = vpop.eup %5249  ;;  %vm6464_vm14 = vmor %vm1260_vm12, %vm1261_vm10  ;;  %vm1270_vm4 = vweird.f32 %v6419_v12  ;;  %vm1053_vm12 = vweird.f32 %v6413_v33 }
 0x1ea   : > { %5253 = vrsqrt.f32 %v6413_v33  ;;  %v1253_v8 = vsel %vm1252_vm8, %v5246_v26, %v1249_v43  ;;  %v1256_v16 = vmul.f32 %v6415_v3, %v1255_v49  ;;  %v1184_v26 = vpack.c.bf16 %v1168_v48, %v1168_v48 }
 0x1eb   : > { %v1377_v34 = vmul.f32 %v1253_v8, %v6217_v10  ;;  %4861 = vmatmul.msk.bf16.vlgmr.msrb.gmra.mxu2 %vm1468_vm0, %v6278_v46  ;;  %v1496_v10 = vunpack.c.l.b16 %v1392_v23  ;;  %v1032_v48 = vmul.f32 %v6354_v63, %v1031_v41  ;;  %v1058_v20 = vmul.f32 %v6435_v59, %v6402_v40 }
 0x1ec   : > { %v1257_v17 = vmul.f32 0.5, %v1256_v16  ;;  %v874_v23 = vpop.f32.mrf.mxu3  ;;  %vm1064_vm7 = vweird.f32 %v6435_v59 }
 0x1ed   : > { %v1393_v38 = vpack.c.bf16 %v1377_v34, %v1377_v34  ;;  %v1042_v34 = vmul.f32 %v6357_v9, %v1041_v24  ;;  %v1036_v46 = vsel %vm6472_vm15, %v6354_v63, %v1032_v48  ;;  %v6505_v48 = vmax.f32 %v6303_v61, 1e-24  ;;  %vm6584_vm13 = vmor %vm1063_vm11, %vm1064_vm7 }
 0x1ee   : > { %v1258_v43 = vsub.f32 1.5, %v1257_v17  ;;  %v940_v28 = vpop.f32.mrf.mxu0 }
 0x1ef   : > { %v6439_v49 = vpop.eup %5251  ;;  %v1497_v8 = vunpack.c.l.b16 %v1393_v38  ;;  %v6442_v50 = vmax.f32 %v940_v28, 1e-24  ;;  %v1046_v4 = vsel %vm6490_vm2, %v6357_v9, %v1042_v34 }
 0x1f0   : > { %v6444_v2 = vpop.eup %5253  ;;  %v1259_v16 = vmul.f32 %v6415_v3, %v1258_v43  ;;  %v1265_v47 = vmul.f32 %v6439_v49, %v6419_v12  ;;  %vm1271_vm3 = vweird.f32 %v6439_v49 }
 0x1f1   : > { %5255 = vrsqrt.f32 %v6442_v50  ;;  %v6453_v54 = vpack.c.b16 %v1497_v8, %v1496_v10  ;;  %v1048_v41 = vmul.f32 %v6444_v2, %v6413_v33  ;;  %v6483_v10 = vmax.f32 %v874_v23, 1e-24  ;;  %vm1272_vm5 = vmor %vm1270_vm4, %vm1271_vm3 }
 0x1f2   : > { %v1266_v17 = vmul.f32 %v6439_v49, %v1265_v47  ;;  %5257 = vrsqrt.f32 %v6437_v35  ;;  %v1263_v43 = vsel %vm6464_vm14, %v6415_v3, %v1259_v16  ;;  %v1491_v8 = vunpack.c.l.b16 %v1184_v26 }
 0x1f3   : > { %8500 = vst [vmem:[#allocation23_spill] sm:$0xff] %v6453_v54  ;;  %v1503_v24 = vsel %vm1468_vm0, %v6453_v54, 0  ;;  %v1492_v47 = vunpack.c.l.b16 %v1185_v14  ;;  %v1059_v3 = vmul.f32 %v6435_v59, %v1058_v20  ;;  %v6499_v14 = vpop.f32.mrf.mxu2  ;;  %v1049_v63 = vmul.f32 %v6444_v2, %v1048_v41 }
 0x1f4   : > { %v1267_v28 = vmul.f32 0.5, %v1266_v17  ;;  %1512 = vmatpush.bf16.xpose.msra.mxu2 %v1503_v24  ;;  %v1378_v17 = vmul.f32 %v1263_v43, %v6222_v15  ;;  %5259 = vrsqrt.f32 %v6478_v29  ;;  %v1155_v41 = vmul.f32 %v6259_v5, %v1046_v4 }
 0x1f5   : > { %v6519_v61 = vpack.c.b16 %v1492_v47, %v1491_v8  ;;  %v1154_v15 = vmul.f32 %v6259_v5, %v1036_v46  ;;  %v1060_v24 = vmul.f32 0.5, %v1059_v3  ;;  %v1050_v12 = vmul.f32 0.5, %v1049_v63 }
 0x1f6   : > { %v1268_v16 = vsub.f32 1.5, %v1267_v28  ;;  %v943_v26 = vpop.f32.mrf.mxu0  ;;  %v1394_v28 = vpack.c.bf16 %v1378_v17, %v1378_v17  ;;  %vm1280_vm8 = vweird.f32 %v6442_v50  ;;  %vm1054_vm9 = vweird.f32 %v6444_v2 }
 0x1f7   : > { %v6501_v23 = vpop.eup %5255  ;;  %v6508_v38 = vmax.f32 %v943_v26, 1e-24  ;;  %v1061_v3 = vsub.f32 1.5, %v1060_v24  ;;  %v1170_v63 = vmul.f32 %v1154_v15, %v6157_v56  ;;  %vm6590_vm14 = vmor %vm1053_vm12, %vm1054_vm9  ;;  %vm1093_vm3 = vweird.f32 %v6437_v35 }
 0x1f8   : > { %v1269_v9 = vmul.f32 %v6439_v49, %v1268_v16  ;;  %v1275_v34 = vmul.f32 %v6501_v23, %v6442_v50  ;;  %v6515_v20 = vpop.eup %5257  ;;  %vm1281_vm6 = vweird.f32 %v6501_v23  ;;  %vm1103_vm11 = vweird.f32 %v6483_v10 }
 0x1f9   : > { %5261 = vrsqrt.f32 %v6508_v38  ;;  %v1088_v8 = vmul.f32 %v6515_v20, %v6437_v35  ;;  %vm6563_vm10 = vmor %vm1280_vm8, %vm1281_vm6  ;;  %vm1290_vm1 = vweird.f32 %v6508_v38  ;;  %vm1094_vm7 = vweird.f32 %v6515_v20 }
 0x1fa   : > { %v1273_v53 = vsel %vm1272_vm5, %v6439_v49, %v1269_v9  ;;  %v1276_v43 = vmul.f32 %v6501_v23, %v1275_v34  ;;  %5263 = vrsqrt.f32 %v6505_v48  ;;  %v1171_v49 = vmul.f32 %v1155_v41, %v6168_v0  ;;  %v6532_v4 = vpop.eup %5259  ;;  %v877_v9 = vpop.f32.mrf.mxu3 }
 0x1fb   : > { %4862 = vmatmul.msk.bf16.vlgmr.msra.gmra.mxu2 %vm1468_vm0, %v6519_v61  ;;  %v1379_v62 = vmul.f32 %v1273_v53, %v6228_v18  ;;  %5265 = vrsqrt.f32 %v6483_v10  ;;  %v1051_v18 = vsub.f32 1.5, %v1050_v12  ;;  %v1526_v53 = vunpack.c.l.b16 %v1394_v28  ;;  %v6544_v41 = vpop.f32.mrf.mxu2 }
 0x1fc   : > { %v1277_v46 = vmul.f32 0.5, %v1276_v43  ;;  %v1089_v43 = vmul.f32 %v6515_v20, %v1088_v8  ;;  %v1187_v24 = vpack.c.bf16 %v1171_v49, %v1171_v49  ;;  %v1062_v28 = vmul.f32 %v6435_v59, %v1061_v3 }
 0x1fd   : > { %v1395_v47 = vpack.c.bf16 %v1379_v62, %v1379_v62  ;;  %v1078_v8 = vmul.f32 %v6532_v4, %v6478_v29  ;;  %v1186_v3 = vpack.c.bf16 %v1170_v63, %v1170_v63  ;;  %vm1084_vm8 = vweird.f32 %v6532_v4 }
 0x1fe   : > { %v1278_v16 = vsub.f32 1.5, %v1277_v46  ;;  %v946_v26 = vpop.f32.mrf.mxu0  ;;  %v1522_v63 = vunpack.c.l.b16 %v1187_v24  ;;  %vm1073_vm12 = vweird.f32 %v6505_v48 }
 0x1ff   : > { %v6535_v17 = vpop.eup %5261  ;;  %v6537_v34 = vmax.f32 %v946_v26, 1e-24  ;;  %v1527_v54 = vunpack.c.l.b16 %v1395_v47  ;;  %v1052_v47 = vmul.f32 %v6444_v2, %v1051_v18 }
 0x200   : > { %v1279_v62 = vmul.f32 %v6501_v23, %v1278_v16  ;;  %v1285_v0 = vmul.f32 %v6535_v17, %v6508_v38  ;;  %v6546_v56 = vpop.eup %5263  ;;  %vm1291_vm15 = vweird.f32 %v6535_v17 }
 0x201   : > { %5267 = vrsqrt.f32 %v6537_v34  ;;  %v6550_v15 = vpack.c.b16 %v1527_v54, %v1526_v53  ;;  %v6552_v12 = vpop.eup %5265  ;;  %v1068_v50 = vmul.f32 %v6546_v56, %v6505_v48  ;;  %v6579_v53 = vmax.f32 %v877_v9, 1e-24  ;;  %vm1292_vm2 = vmor %vm1290_vm1, %vm1291_vm15 }
 0x202   : > { %v1286_v46 = vmul.f32 %v6535_v17, %v1285_v0  ;;  %v1283_v16 = vsel %vm6563_vm10, %v6501_v23, %v1279_v62  ;;  %v1098_v18 = vmul.f32 %v6552_v12, %v6483_v10  ;;  %v1066_v9 = vsel %vm6584_vm13, %v6435_v59, %v1062_v28 }
 0x203   : > { %8507 = vst [vmem:[#allocation24_spill] sm:$0xff] %v6550_v15  ;;  %2348 = vrot.lane.b32.xlu2 %v6550_v15, %s5851_s28  ;;  %v1533_v49 = vsel %vm1468_vm0, %v6550_v15, 0  ;;  %v1079_v62 = vmul.f32 %v6532_v4, %v1078_v8  ;;  %v1056_v24 = vsel %vm6590_vm14, %v6444_v2, %v1052_v47  ;;  %v1380_v54 = vmul.f32 %v1283_v16, %v6233_v22 }
 0x204   : > { %v1287_v26 = vmul.f32 0.5, %v1286_v46  ;;  %1542 = vmatpush.bf16.xpose.msrb.mxu3 %v1533_v49  ;;  %v1521_v15 = vunpack.c.l.b16 %v1186_v3  ;;  %v1069_v40 = vmul.f32 %v6546_v56, %v1068_v50  ;;  %v1099_v8 = vmul.f32 %v6552_v12, %v1098_v18  ;;  %v6619_v50 = vpop.f32.mrf.mxu2 }
 0x205   : > { %v1157_v23 = vmul.f32 %v6259_v5, %v1066_v9  ;;  %v1080_v2 = vmul.f32 0.5, %v1079_v62  ;;  %v1156_v38 = vmul.f32 %v6259_v5, %v1056_v24  ;;  %v1396_v16 = vpack.c.bf16 %v1380_v54, %v1380_v54 }
 0x206   : > { %v1288_v33 = vsub.f32 1.5, %v1287_v26  ;;  %v949_v0 = vpop.f32.mrf.mxu0  ;;  %v880_v26 = vpop.f32.mrf.mxu3  ;;  %v6615_v22 = vpack.c.b16 %v1522_v63, %v1521_v15  ;;  %v1090_v9 = vmul.f32 0.5, %v1089_v43  ;;  %v1070_v15 = vmul.f32 0.5, %v1069_v40 }
 0x207   : > { %v6599_v46 = vpop.eup %5267  ;;  %v6605_v49 = vmax.f32 %v949_v0, 1e-24  ;;  %v1173_v62 = vmul.f32 %v1157_v23, %v6183_v11  ;;  %v1081_v24 = vsub.f32 1.5, %v1080_v2  ;;  %vm1300_vm4 = vweird.f32 %v6537_v34 }
 0x208   : > { %v1289_v59 = vmul.f32 %v6535_v17, %v1288_v33  ;;  %v1295_v28 = vmul.f32 %v6599_v46, %v6537_v34  ;;  %8514 = vst [vmem:[#allocation25_spill] sm:$0xff] %v6615_v22  ;;  %v6625_v33 = vmax.f32 %v880_v26, 1e-24  ;;  %vm1301_vm5 = vweird.f32 %v6599_v46 }
 0x209   : > { %5269 = vrsqrt.f32 %v6605_v49  ;;  %v1172_v40 = vmul.f32 %v1156_v38, %v6178_v6  ;;  %v1091_v34 = vsub.f32 1.5, %v1090_v9  ;;  %v1189_v2 = vpack.c.bf16 %v1173_v62, %v1173_v62  ;;  %vm6641_vm6 = vmor %vm1300_vm4, %vm1301_vm5 }
 0x20a   : > { %v1293_v47 = vsel %vm1292_vm2, %v6535_v17, %v1289_v59  ;;  %v1296_v3 = vmul.f32 %v6599_v46, %v1295_v28  ;;  %v1100_v17 = vmul.f32 0.5, %v1099_v8  ;;  %5271 = vrsqrt.f32 %v6579_v53  ;;  %vm6696_vm4 = vmor %vm1093_vm3, %vm1094_vm7 }
 0x20b   : > { %v1381_v18 = vmul.f32 %v1293_v47, %v6239_v32  ;;  %4863 = vmatmul.msk.bf16.vlgmr.msrb.gmra.mxu3 %vm1468_vm0, %v6615_v22  ;;  %v1556_v59 = vunpack.c.l.b16 %v1396_v16  ;;  %5273 = vrsqrt.f32 %v6625_v33  ;;  %v1071_v8 = vsub.f32 1.5, %v1070_v15 }
 0x20c   : > { %v1297_v63 = vmul.f32 0.5, %v1296_v3  ;;  %v1082_v3 = vmul.f32 %v6532_v4, %v1081_v24  ;;  %v1188_v9 = vpack.c.bf16 %v1172_v40, %v1172_v40  ;;  %vm1074_vm9 = vweird.f32 %v6546_v56  ;;  %v6662_v24 = vpop.f32.mrf.mxu2 }
 0x20d   : > { %v1397_v0 = vpack.c.bf16 %v1381_v18, %v1381_v18  ;;  %v1101_v18 = vsub.f32 1.5, %v1100_v17  ;;  %vm1083_vm10 = vweird.f32 %v6478_v29  ;;  %v1092_v17 = vmul.f32 %v6515_v20, %v1091_v34  ;;  %vm6685_vm2 = vmor %vm1073_vm12, %vm1074_vm9 }
 0x20e   : > { %v1298_v54 = vsub.f32 1.5, %v1297_v63  ;;  %v952_v32 = vpop.f32.mrf.mxu0  ;;  %v1072_v63 = vmul.f32 %v6546_v56, %v1071_v8  ;;  %vm6669_vm13 = vmor %vm1083_vm10, %vm1084_vm8  ;;  %vm1310_vm14 = vweird.f32 %v6605_v49  ;;  %vm1104_vm1 = vweird.f32 %v6552_v12 }
 0x20f   : > { %v6632_v43 = vpop.eup %5269  ;;  %v1557_v28 = vunpack.c.l.b16 %v1397_v0  ;;  %v6635_v26 = vmax.f32 %v952_v32, 1e-24  ;;  %v1086_v40 = vsel %vm6669_vm13, %v6532_v4, %v1082_v3  ;;  %v1551_v8 = vunpack.c.l.b16 %v1188_v9  ;;  %vm6721_vm5 = vmor %vm1103_vm11, %vm1104_vm1 }
 0x210   : > { %v1299_v11 = vmul.f32 %v6599_v46, %v1298_v54  ;;  %v1305_v23 = vmul.f32 %v6632_v43, %v6605_v49  ;;  %v6652_v16 = vpop.eup %5271  ;;  %v1552_v54 = vunpack.c.l.b16 %v1189_v2  ;;  %vm1311_vm15 = vweird.f32 %v6632_v43 }
 0x211   : > { %5275 = vrsqrt.f32 %v6635_v26  ;;  %v6646_v6 = vpack.c.b16 %v1557_v28, %v1556_v59  ;;  %v6673_v29 = vpop.eup %5273  ;;  %v1102_v2 = vmul.f32 %v6552_v12, %v1101_v18  ;;  %v1076_v47 = vsel %vm6685_vm2, %v6546_v56, %v1072_v63  ;;  %vm1312_vm3 = vmor %vm1310_vm14, %vm1311_vm15 }
 0x212   : > { %v1306_v38 = vmul.f32 %v6632_v43, %v1305_v23  ;;  %v1303_v62 = vsel %vm6641_vm6, %v6599_v46, %v1299_v11  ;;  %v883_v46 = vpop.f32.mrf.mxu3  ;;  %v1159_v35 = vmul.f32 %v6259_v5, %v1086_v40  ;;  %v6715_v18 = vpack.c.b16 %v1552_v54, %v1551_v8 }
 0x213   : > { %v1563_v15 = vsel %vm1468_vm0, %v6646_v6, 0  ;;  %v1382_v23 = vmul.f32 %v1303_v62, %v6244_v58  ;;  %v1118_v9 = vmul.f32 %v6673_v29, %v6625_v33  ;;  %v1158_v63 = vmul.f32 %v6259_v5, %v1076_v47 }
 0x214   : > { %v1307_v0 = vmul.f32 0.5, %v1306_v38  ;;  %1572 = vmatpush.bf16.xpose.msra.mxu1 %v1563_v15  ;;  %v1108_v38 = vmul.f32 %v6652_v16, %v6579_v53  ;;  %v1096_v10 = vsel %vm6696_vm4, %v6515_v20, %v1092_v17  ;;  %v1106_v32 = vsel %vm6721_vm5, %v6552_v12, %v1102_v2  ;;  %v6744_v11 = vpop.f32.mrf.mxu2 }
 0x215   : > { %v1398_v62 = vpack.c.bf16 %v1382_v23, %v1382_v23  ;;  %v1175_v40 = vmul.f32 %v1159_v35, %v6193_v39  ;;  %vm1320_vm6 = vweird.f32 %v6635_v26  ;;  %v1174_v17 = vmul.f32 %v1158_v63, %v6188_v21 }
 0x216   : > { %v1308_v59 = vsub.f32 1.5, %v1307_v0  ;;  %v955_v28 = vpop.f32.mrf.mxu0  ;;  %v1160_v39 = vmul.f32 %v6259_v5, %v1096_v10  ;;  %vm1113_vm11 = vweird.f32 %v6579_v53  ;;  %vm1114_vm13 = vweird.f32 %v6652_v16 }
 0x217   : > { %v6680_v48 = vpop.eup %5275  ;;  %v6690_v4 = vmax.f32 %v955_v28, 1e-24  ;;  %v1119_v28 = vmul.f32 %v6673_v29, %v1118_v9  ;;  %v1586_v23 = vunpack.c.l.b16 %v1398_v62  ;;  %v1161_v9 = vmul.f32 %v6259_v5, %v1106_v32  ;;  %vm6829_vm1 = vmor %vm1113_vm11, %vm1114_vm13 }
 0x218   : > { %v1309_v3 = vmul.f32 %v6632_v43, %v1308_v59  ;;  %v1315_v58 = vmul.f32 %v6680_v48, %v6635_v26  ;;  %vm1321_vm7 = vweird.f32 %v6680_v48  ;;  %v1190_v10 = vpack.c.bf16 %v1174_v17, %v1174_v17 }
 0x219   : > { %5277 = vrsqrt.f32 %v6690_v4  ;;  %vm6758_vm8 = vmor %vm1320_vm6, %vm1321_vm7  ;;  %v1120_v62 = vmul.f32 0.5, %v1119_v28  ;;  %vm1330_vm9 = vweird.f32 %v6690_v4  ;;  %vm1123_vm14 = vweird.f32 %v6625_v33 }
 0x21a   : > { %v1313_v15 = vsel %vm1312_vm3, %v6632_v43, %v1309_v3  ;;  %v1316_v49 = vmul.f32 %v6680_v48, %v1315_v58  ;;  %v1109_v43 = vmul.f32 %v6652_v16, %v1108_v38  ;;  %v886_v2 = vpop.f32.mrf.mxu3  ;;  %v1191_v58 = vpack.c.bf16 %v1175_v40, %v1175_v40  ;;  %v5547_v38 = vld [vmem:[#allocation8] sm:$0x7] }
 0x21b   : > { %v1383_v0 = vmul.f32 %v1313_v15, %v6252_v55  ;;  %4864 = vmatmul.msk.bf16.vlgmr.msra.gmra.mxu1 %vm1468_vm0, %v6715_v18  ;;  %v6752_v35 = vperm.slane %v5547_v38, 2  ;;  %v1581_v17 = vunpack.c.l.b16 %v1190_v10  ;;  %vm1124_vm15 = vweird.f32 %v6673_v29 }
 0x21c   : > { %v1317_v54 = vmul.f32 0.5, %v1316_v49  ;;  %v1110_v15 = vmul.f32 0.5, %v1109_v43  ;;  %v6766_v49 = vmax.f32 %v883_v46, 1e-24  ;;  %v1582_v5 = vunpack.c.l.b16 %v1191_v58  ;;  %vm6839_vm3 = vmor %vm1123_vm14, %vm1124_vm15 }
 0x21d   : > { %v1399_v59 = vpack.c.bf16 %v1383_v0, %v1383_v0  ;;  %v6768_v0 = vmax.f32 %v886_v2, 1e-24  ;;  %v753_v46 = vadd.f32 %v6338_v42, %v6752_v35  ;;  %v755_v32 = vadd.f32 %v6352_v25, %v6752_v35 }
 0x21e   : > { %v1318_v55 = vsub.f32 1.5, %v1317_v54  ;;  %v958_v8 = vpop.f32.mrf.mxu0  ;;  %v6782_v43 = vmul.f32 %v1160_v39, %v6118_v31  ;;  %v6801_v39 = vpop.f32.mrf.mxu2  ;;  %vm1133_vm13 = vweird.f32 %v6766_v49 }
 0x21f   : > { %v5278_v20 = vpop.eup %5277  ;;  %v1587_v12 = vunpack.c.l.b16 %v1399_v59  ;;  %v6747_v34 = vmax.f32 %v958_v8, 1e-24  ;;  %v1177_v59 = vmul.f32 %v1161_v9, %v6129_v37  ;;  %v1121_v37 = vsub.f32 1.5, %v1120_v62 }
 0x220   : > { %v1319_v47 = vmul.f32 %v6680_v48, %v1318_v55  ;;  %v1325_v3 = vmul.f32 %v5278_v20, %v6690_v4  ;;  %vm1331_vm10 = vweird.f32 %v5278_v20  ;;  %v1406_v2 = vpack.c.bf16 %v753_v46, %v753_v46 }
 0x221   : > { %5279 = vrsqrt.f32 %v6747_v34  ;;  %v6763_v56 = vpack.c.b16 %v1587_v12, %v1586_v23  ;;  %vm6792_vm12 = vmor %vm1330_vm9, %vm1331_vm10  ;;  %v6804_v4 = vpack.c.b16 %v1582_v5, %v1581_v17  ;;  %v770_v9 = vadd.f32 %v6662_v24, %v6752_v35 }
 0x222   : > { %v1326_v63 = vmul.f32 %v5278_v20, %v1325_v3  ;;  %v1323_v54 = vsel %vm6758_vm8, %v6680_v48, %v1319_v47  ;;  %v1111_v48 = vsub.f32 1.5, %v1110_v15  ;;  %5281 = vrsqrt.f32 %v6766_v49 }
 0x223   : > { %v1593_v26 = vsel %vm1468_vm0, %v6763_v56, 0  ;;  %v1384_v23 = vmul.f32 %v1323_v54, %v6262_v13  ;;  %5283 = vrsqrt.f32 %v6768_v0  ;;  %v1407_v13 = vpack.c.bf16 %v755_v32, %v755_v32 }
 0x224   : > { %v1327_v40 = vmul.f32 0.5, %v1326_v63  ;;  %1602 = vmatpush.bf16.xpose.msrb.mxu2 %v1593_v26  ;;  %v768_v3 = vadd.f32 %v6619_v50, %v6752_v35  ;;  %v1193_v15 = vpack.c.bf16 %v1177_v59, %v1177_v59  ;;  %v1112_v63 = vmul.f32 %v6652_v16, %v1111_v48 }
 0x225   : > { %v1400_v38 = vpack.c.bf16 %v1384_v23, %v1384_v23  ;;  %v1122_v62 = vmul.f32 %v6673_v29, %v1121_v37  ;;  %v1899_v10 = vunpack.c.l.b16 %v1406_v2  ;;  %v1900_v26 = vunpack.c.l.b16 %v1407_v13 }
 0x226   : > { %v1328_v28 = vsub.f32 1.5, %v1327_v40  ;;  %v961_v55 = vpop.f32.mrf.mxu0  ;;  %v1412_v40 = vpack.c.bf16 %v768_v3, %v768_v3  ;;  %vm1340_vm2 = vweird.f32 %v6747_v34  ;;  %v775_v37 = vadd.f32 %v6801_v39, %v6752_v35 }
 0x227   : > { %v6785_v8 = vpop.eup %5279  ;;  %v6796_v31 = vmax.f32 %v961_v55, 1e-24  ;;  %v1616_v53 = vunpack.c.l.b16 %v1400_v38  ;;  %v1126_v2 = vsel %vm6839_vm3, %v6673_v29, %v1122_v62  ;;  %v6868_v3 = vpack.c.b16 %v1900_v26, %v1899_v10 }
 0x228   : > { %v1329_v25 = vmul.f32 %v5278_v20, %v1328_v28  ;;  %v1335_v12 = vmul.f32 %v6785_v8, %v6747_v34  ;;  %v6820_v50 = vpop.eup %5281  ;;  %vm1341_vm4 = vweird.f32 %v6785_v8  ;;  %v1413_v28 = vpack.c.bf16 %v770_v9, %v770_v9 }
 0x229   : > { %5285 = vrsqrt.f32 %v6796_v31  ;;  %v1192_v34 = vpack.c.bf16 %v6782_v43, %v6782_v43  ;;  %v1128_v42 = vmul.f32 %v6820_v50, %v6766_v49  ;;  %vm6853_vm5 = vmor %vm1340_vm2, %vm1341_vm4  ;;  %v1116_v43 = vsel %vm6829_vm1, %v6652_v16, %v1112_v63  ;;  %8536 = vst [vmem:[#allocation27_spill] sm:$0xff] %v6868_v3 }
 0x22a   : > { %v1333_v47 = vsel %vm6792_vm12, %v5278_v20, %v1329_v25  ;;  %v1336_v58 = vmul.f32 %v6785_v8, %v1335_v12  ;;  %v1612_v12 = vunpack.c.l.b16 %v1193_v15  ;;  %v1984_v38 = vunpack.c.l.b16 %v1413_v28 }
 0x22b   : > { %v1385_v21 = vmul.f32 %v1333_v47, %v6274_v27  ;;  %4865 = vmatmul.msk.bf16.vlgmr.msrb.gmra.mxu2 %vm1468_vm0, %v6804_v4  ;;  %v6823_v27 = vpop.eup %5283  ;;  %v6866_v47 = vpop.f32.mrf.mxu2  ;;  %vm1350_vm6 = vweird.f32 %v6796_v31  ;;  %v1129_v16 = vmul.f32 %v6820_v50, %v1128_v42  ;;  %v758_v63 = vadd.f32 %v6407_v19, %v6752_v35 }
 0x22c   : > { %v1337_v20 = vmul.f32 0.5, %v1336_v58  ;;  %v1138_v33 = vmul.f32 %v6823_v27, %v6768_v0  ;;  %v1983_v58 = vunpack.c.l.b16 %v1412_v40  ;;  %v760_v62 = vadd.f32 %v6433_v44, %v6752_v35 }
 0x22d   : > { %v1401_v54 = vpack.c.bf16 %v1385_v21, %v1385_v21  ;;  %vm1143_vm11 = vweird.f32 %v6768_v0  ;;  %vm1144_vm12 = vweird.f32 %v6823_v27  ;;  %vm1134_vm14 = vweird.f32 %v6820_v50 }
 0x22e   : > { %v1338_v5 = vsub.f32 1.5, %v1337_v20  ;;  %v964_v46 = vpop.f32.mrf.mxu0  ;;  %v1139_v29 = vmul.f32 %v6823_v27, %v1138_v33  ;;  %v1611_v20 = vunpack.c.l.b16 %v1192_v34  ;;  %v1408_v34 = vpack.c.bf16 %v758_v63, %v758_v63  ;;  %vm6932_vm1 = vmor %vm1143_vm11, %vm1144_vm12 }
 0x22f   : > { %v5286_v32 = vpop.eup %5285  ;;  %v1617_v48 = vunpack.c.l.b16 %v1401_v54  ;;  %v6843_v55 = vmax.f32 %v964_v46, 1e-24  ;;  %v6888_v54 = vld [vmem:[%s8431_s4] ss:$0 sm:$0xff]  ;;  %v773_v33 = vadd.f32 %v6744_v11, %v6752_v35  ;;  %vm6940_vm2 = vmor %vm1133_vm13, %vm1134_vm14 }
 0x230   : > { %v1339_v17 = vmul.f32 %v6785_v8, %v1338_v5  ;;  %v1345_v23 = vmul.f32 %v5286_v32, %v6796_v31  ;;  %vm1351_vm7 = vweird.f32 %v5286_v32  ;;  %v1162_v24 = vmul.f32 %v6888_v54, %v1116_v43 }
 0x231   : > { %5287 = vrsqrt.f32 %v6843_v55  ;;  %v6858_v25 = vpack.c.b16 %v1617_v48, %v1616_v53  ;;  %v1163_v40 = vmul.f32 %v6888_v54, %v1126_v2  ;;  %vm1352_vm8 = vmor %vm1350_vm6, %vm1351_vm7  ;;  %v6898_v5 = vpack.c.b16 %v1984_v38, %v1983_v58 }
 0x232   : > { %v1346_v13 = vmul.f32 %v5286_v32, %v1345_v23  ;;  %v1343_v9 = vsel %vm6853_vm5, %v6785_v8, %v1339_v17  ;;  %v6902_v53 = vpack.c.b16 %v1612_v12, %v1611_v20  ;;  %v1130_v48 = vmul.f32 0.5, %v1129_v16 }
 0x233   : > { %8535 = vst [vmem:[#allocation26_spill] sm:$0xff] %v6858_v25  ;;  %v1623_v21 = vsel %vm1468_vm0, %v6858_v25, 0  ;;  %v1386_v19 = vmul.f32 %v1343_v9, %v6281_v36  ;;  %v1140_v28 = vmul.f32 0.5, %v1139_v29  ;;  %v1409_v36 = vpack.c.bf16 %v760_v62, %v760_v62 }
 0x234   : > { %v1347_v15 = vmul.f32 0.5, %v1346_v13  ;;  %1632 = vmatpush.bf16.xpose.msra.mxu3 %v1623_v21  ;;  %8537 = vst [vmem:[#allocation28_spill] sm:$0xff] %v6898_v5  ;;  %v1178_v12 = vmul.f32 %v1162_v24, %v6139_v45  ;;  %v1179_v43 = vmul.f32 %v1163_v40, %v6150_v51  ;;  %v1131_v13 = vsub.f32 1.5, %v1130_v48 }
 0x235   : > { %8538 = vst [vmem:[#allocation29_spill] sm:$0xff] %v6902_v53  ;;  %v1402_v23 = vpack.c.bf16 %v1386_v19, %v1386_v19  ;;  %v1141_v58 = vsub.f32 1.5, %v1140_v28  ;;  %v1928_v21 = vunpack.c.l.b16 %v1409_v36  ;;  %vm1360_vm9 = vweird.f32 %v6843_v55 }
 0x236   : > { %v1348_v10 = vsub.f32 1.5, %v1347_v15  ;;  %v967_v8 = vpop.f32.mrf.mxu0  ;;  %v1414_v45 = vpack.c.bf16 %v773_v33, %v773_v33  ;;  %v1415_v16 = vpack.c.bf16 %v775_v37, %v775_v37  ;;  %v1195_v63 = vpack.c.bf16 %v1179_v43, %v1179_v43 }
 0x237   : > { %v6883_v26 = vpop.eup %5287  ;;  %v6896_v44 = vmax.f32 %v967_v8, 1e-24  ;;  %v1646_v9 = vunpack.c.l.b16 %v1402_v23  ;;  %v1194_v62 = vpack.c.bf16 %v1178_v12, %v1178_v12  ;;  %v1132_v0 = vmul.f32 %v6820_v50, %v1131_v13 }
 0x238   : > { %v1349_v46 = vmul.f32 %v5286_v32, %v1348_v10  ;;  %v1355_v59 = vmul.f32 %v6883_v26, %v6843_v55  ;;  %vm1361_vm10 = vweird.f32 %v6883_v26  ;;  %v1142_v10 = vmul.f32 %v6823_v27, %v1141_v58 }
 0x239   : > { %5289 = vrsqrt.f32 %v6896_v44  ;;  %vm6924_vm15 = vmor %vm1360_vm9, %vm1361_vm10  ;;  %v2011_v49 = vunpack.c.l.b16 %v1414_v45  ;;  %v2012_v19 = vunpack.c.l.b16 %v1415_v16  ;;  %vm1370_vm4 = vweird.f32 %v6896_v44 }
 0x23a   : > { %v1353_v17 = vsel %vm1352_vm8, %v5286_v32, %v1349_v46  ;;  %v1356_v31 = vmul.f32 %v6883_v26, %v1355_v59  ;;  %v779_v32 = vpop.f32.mrf.mxu2  ;;  %v1641_v36 = vunpack.c.l.b16 %v1194_v62  ;;  %vm1731_vm6 = vcmask 130048  }
 0x23b   : > { %v1387_v42 = vmul.f32 %v1353_v17, %v6291_v52  ;;  %4866 = vmatmul.msk.bf16.vlgmr.msra.gmra.mxu3 %vm1468_vm0, %v6902_v53  ;;  %v1927_v52 = vunpack.c.l.b16 %v1408_v34  ;;  %v1642_v34 = vunpack.c.l.b16 %v1195_v63  ;;  %v1146_v17 = vsel %vm6932_vm1, %v6823_v27, %v1142_v10 }
 0x23c   : > { %1913 = vmatpush.bf16.msrb.mxu3 %v6868_v3  ;;  %v1357_v2 = vmul.f32 0.5, %v1356_v31  ;;  %v6962_v37 = vpack.c.b16 %v2012_v19, %v2011_v49  ;;  %v1165_v43 = vmul.f32 %v6888_v54, %v1146_v17  ;;  %v5061_v49 = vld [vmem:[#allocation11] sm:$0xff]  }
 0x23d   : > { %v1403_v38 = vpack.c.bf16 %v1387_v42, %v1387_v42  ;;  %v6936_v40 = vpack.c.b16 %v1928_v21, %v1927_v52  ;;  %v765_v42 = vadd.f32 %v6544_v41, %v6752_v35  ;;  %v6964_v27 = vpack.c.b16 %v1642_v34, %v1641_v36  ;;  %v5029_v19 = vld [vmem:[#allocation12] sm:$0xff]  }
 0x23e   : > { %v1358_v11 = vsub.f32 1.5, %v1357_v2  ;;  %8546 = vst [vmem:[#allocation31_spill] sm:$0xff] %v6962_v37  ;;  %v780_v41 = vadd.f32 %v779_v32, %v6752_v35  ;;  %v6999_v59 = vunpack.c.l.bf16 %v5029_v19  ;;  %v7007_v17 = vunpack.c.h.bf16 %v5061_v49 }
 0x23f   : > { %v5290_v39 = vpop.eup %5289  ;;  %v1647_v15 = vunpack.c.l.b16 %v1403_v38  ;;  %8543 = vst [vmem:[#allocation30_spill] sm:$0xff] %v6936_v40  ;;  %v1411_v58 = vpack.c.bf16 %v765_v42, %v765_v42  ;;  %v1181_v38 = vmul.f32 %v1165_v43, %v6171_v1 }
 0x240   : > { %1997 = vmatpush.bf16.msra.mxu3 %v6898_v5  ;;  %v1359_v51 = vmul.f32 %v6883_v26, %v1358_v11  ;;  %v1365_v29 = vmul.f32 %v5290_v39, %v6896_v44  ;;  %vm1371_vm3 = vweird.f32 %v5290_v39  ;;  %v763_v44 = vadd.f32 %v6499_v14, %v6752_v35  ;;  %8547 = vst [vmem:[#allocation32_spill] sm:$0xff] %v6964_v27 }
 0x241   : > { %v6928_v20 = vpack.c.b16 %v1647_v15, %v1646_v9  ;;  %vm1372_vm5 = vmor %vm1370_vm4, %vm1371_vm3  ;;  %v1417_v45 = vpack.c.bf16 %v780_v41, %v780_v41 }
 0x242   : > { %v1366_v8 = vmul.f32 %v5290_v39, %v1365_v29  ;;  %v1363_v48 = vsel %vm6924_vm15, %v6883_v26, %v1359_v51  ;;  %v6952_v23 = vpop.f32.mrf.mxu2  ;;  %v1136_v26 = vsel %vm6940_vm2, %v6820_v50, %v1132_v0  ;;  %v1410_v50 = vpack.c.bf16 %v763_v44, %v763_v44 }
 0x243   : > { %v1653_v46 = vsel %vm1468_vm0, %v6928_v20, 0  ;;  %v1388_v33 = vmul.f32 %v1363_v48, %v6298_v60  ;;  %v1164_v2 = vmul.f32 %v6888_v54, %v1136_v26  ;;  %v778_v60 = vadd.f32 %v6866_v47, %v6752_v35 }
 0x244   : > { %v1367_v28 = vmul.f32 0.5, %v1366_v8  ;;  %1662 = vmatpush.bf16.xpose.msrb.mxu1 %v1653_v46  ;;  %v1955_v11 = vunpack.c.l.b16 %v1410_v50  ;;  %v1197_v51 = vpack.c.bf16 %v1181_v38, %v1181_v38  ;;  %v2040_v55 = vunpack.c.l.b16 %v1417_v45 }
 0x245   : > { %v1404_v52 = vpack.c.bf16 %v1388_v33, %v1388_v33  ;;  %v1180_v54 = vmul.f32 %v1164_v2, %v6160_v57  ;;  %v6997_v46 = vunpack.c.l.bf16 %v5061_v49  ;;  %v5076_v33 = vld [vmem:[#allocation12 + $0x8] sm:$0xff]  }
 0x246   : > { %v1368_v31 = vsub.f32 1.5, %v1367_v28  ;;  %v1672_v57 = vunpack.c.l.b16 %v1197_v51  ;;  %v7017_v43 = vunpack.c.l.bf16 %v5076_v33 }
 0x247   : > { %v1676_v9 = vunpack.c.l.b16 %v1404_v52  ;;  %v1196_v47 = vpack.c.bf16 %v1180_v54, %v1180_v54  ;;  %v7025_v52 = vunpack.c.h.bf16 %v5076_v33  ;;  %v7069_v33 = vld [vmem:[#allocation12 + $0x30] sm:$0xff]  }
 0x248   : > { %v1369_v12 = vmul.f32 %v5290_v39, %v1368_v31  ;;  %v7009_v31 = vunpack.c.h.bf16 %v5029_v19 }
 0x249   : > { %v1671_v62 = vunpack.c.l.b16 %v1196_v47 }
 0x24a   : > { %v1373_v13 = vsel %vm1372_vm5, %v5290_v39, %v1369_v12  ;;  %v1956_v39 = vunpack.c.l.b16 %v1411_v58  ;;  %v6977_v16 = vpop.f32.mrf.mxu2 }
 0x24b   : > { %v1389_v14 = vmul.f32 %v1373_v13, %v6306_v7  ;;  %4867 = vmatmul.msk.bf16.vlgmr.msrb.gmra.mxu1 %vm1468_vm0, %v6964_v27  ;;  %v1416_v7 = vpack.c.bf16 %v778_v60, %v778_v60  ;;  %v6988_v10 = vpack.c.b16 %v1672_v57, %v1671_v62 }
 0x24c   : > { %1941 = vmatpush.bf16.msra.mxu1 %v6936_v40  ;;  %v6981_v32 = vpack.c.b16 %v1956_v39, %v1955_v11 }
 0x24d   : > { %v1405_v21 = vpack.c.bf16 %v1389_v14, %v1389_v14  ;;  %v2039_v63 = vunpack.c.l.b16 %v1416_v7 }
 0x24e   : > { %8548 = vst [vmem:[#allocation33_spill] sm:$0xff] %v6981_v32 }
 0x24f   : > { %v1677_v15 = vunpack.c.l.b16 %v1405_v21  ;;  %v6986_v0 = vpack.c.b16 %v2040_v55, %v2039_v63  ;;  %v5078_v21 = vld [vmem:[#allocation12 + $0x18] sm:$0xff]   ;;  %v5079_v63 = vld [vmem:[#allocation12 + $0x20] sm:$0xff]  }
 0x250   : > { %2025 = vmatpush.bf16.msrb.mxu1 %v6962_v37  ;;  %v7035_v54 = vunpack.c.l.bf16 %v5078_v21  ;;  %v7043_v7 = vunpack.c.h.bf16 %v5078_v21  ;;  %v7051_v55 = vunpack.c.l.bf16 %v5079_v63 }
 0x251   : > { %v6979_v29 = vpack.c.b16 %v1677_v15, %v1676_v9  ;;  %8549 = vst [vmem:[#allocation34_spill] sm:$0xff] %v6986_v0 }
 0x252   : > { %v6990_v8 = vpop.f32.mrf.mxu2  ;;  %8550 = vst [vmem:[#allocation35_spill] sm:$0xff] %v7051_v55 }
 0x253   : > { %v1683_v1 = vsel %vm1468_vm0, %v6979_v29, 0 }
 0x254   : > { %1692 = vmatpush.bf16.xpose.msra.mxu2 %v1683_v1 }
 0x25a   : > { %v6995_v24 = vpop.f32.mrf.mxu2 }
 0x25b   : > { %4868 = vmatmul.msk.bf16.vlgmr.msra.gmra.mxu2 %vm1468_vm0, %v6988_v10 }
 0x25c   : > { %1969 = vmatpush.bf16.msrb.mxu2 %v6981_v32 }
 0x260   : > { %2053 = vmatpush.bf16.msra.mxu2 %v6986_v0 }
 0x26e   : > { %v1484_v48 = vpop.f32.mrf.mxu2 }
 0x26f   : > { %v1485_v28 = vadd.f32 %v6997_v46, %v1484_v48  ;;  %v7059_v48 = vunpack.c.h.bf16 %v5079_v63 }
 0x271   : > { %v7003_v34 = vadd.f32 %v6999_v59, %v1485_v28  ;;  %8551 = vst [vmem:[#allocation36_spill] sm:$0xff] %v7059_v48 }
 0x273   : > { %v1732_v36 = vsel %vm1731_vm6, %v7003_v34, -inf }
 0x274   : > { %1733 = vmax.xlane.f32.xlu0 %v1732_v36 }
 0x276   : > { %v1486_v26 = vpop.f32.mrf.mxu2 }
 0x277   : > { %v1487_v44 = vadd.f32 %v7007_v17, %v1486_v26 }
 0x279   : > { %v7013_v42 = vadd.f32 %v7009_v31, %v1487_v44 }
 0x27b   : > { %v1735_v12 = vsel %vm1731_vm6, %v7013_v42, -inf }
 0x27c   : > { %1736 = vmax.xlane.f32.xlu0 %v1735_v12  ;;  %v7074_v12 = vunpack.c.l.bf16 %v7069_v33 }
 0x27e   : > { %v1514_v2 = vpop.f32.mrf.mxu2 }
 0x27f   : > { %v1515_v13 = vadd.f32 %v6997_v46, %v1514_v2 }
 0x281   : > { %v7021_v50 = vadd.f32 %v7017_v43, %v1515_v13 }
 0x283   : > { %v1738_v58 = vsel %vm1731_vm6, %v7021_v50, -inf }
 0x284   : > { %1739 = vmax.xlane.f32.xlu2 %v1738_v58 }
 0x286   : > { %v1516_v14 = vpop.f32.mrf.mxu2 }
 0x287   : > { %v1517_v60 = vadd.f32 %v7007_v17, %v1516_v14 }
 0x289   : > { %v7029_v41 = vadd.f32 %v7025_v52, %v1517_v60  ;;  %v8552_v60 = vld [vmem:[#allocation23_spill] sm:$0xff] }
 0x28b   : > { %v1741_v38 = vsel %vm1731_vm6, %v7029_v41, -inf }
 0x28c   : > { %1742 = vmax.xlane.f32.xlu2 %v1741_v38 }
 0x28e   : > { %v1544_v38 = vpop.f32.mrf.mxu3 }
 0x290   : > { %2300 = vrot.lane.b32.xlu0 %v6378_v30, %s5851_s28 }
 0x298   : > { %v1574_v11 = vpop.f32.mrf.mxu1 }
 0x299   : > { %v1575_v39 = vadd.f32 %v6997_v46, %v1574_v11 }
 0x29b   : > { %v7039_v9 = vadd.f32 %v7035_v54, %v1575_v39 }
 0x29d   : > { %v1750_v15 = vsel %vm1731_vm6, %v7039_v9, -inf }
 0x29e   : > { %1751 = vmax.xlane.f32.xlu1 %v1750_v15  ;;  %v7099_v15 = vpop.permute.xlu2 %2348 }
 0x2a0   : > { %v1576_v45 = vpop.f32.mrf.mxu1 }
 0x2a1   : > { %v1577_v51 = vadd.f32 %v7007_v17, %v1576_v45 }
 0x2a3   : > { %v7047_v47 = vadd.f32 %v7043_v7, %v1577_v51 }
 0x2a5   : > { %v1753_v1 = vsel %vm1731_vm6, %v7047_v47, -inf }
 0x2a6   : > { %1754 = vmax.xlane.f32.xlu1 %v1753_v1  ;;  %v1546_v1 = vpop.f32.mrf.mxu3 }
 0x2ae   : > { %v1604_v57 = vpop.f32.mrf.mxu2 }
 0x2af   : > { %v1605_v62 = vadd.f32 %v6997_v46, %v1604_v57  ;;  %v783_v57 = vadd.f32 %v6952_v23, %v6752_v35 }
 0x2b1   : > { %v7055_v49 = vadd.f32 %v7051_v55, %v1605_v62  ;;  %v5077_v62 = vld [vmem:[#allocation12 + $0x10] sm:$0xff]  }
 0x2b3   : > { %v1756_v19 = vsel %vm1731_vm6, %v7055_v49, -inf }
 0x2b4   : > { %1757 = vmax.xlane.f32.xlu2 %v1756_v19  ;;  %v785_v19 = vadd.f32 %v6977_v16, %v6752_v35 }
 0x2b6   : > { %v1606_v28 = vpop.f32.mrf.mxu2 }
 0x2b7   : > { %v1607_v36 = vadd.f32 %v7007_v17, %v1606_v28  ;;  %v7107_v28 = vunpack.c.h.bf16 %v5077_v62 }
 0x2b9   : > { %v7063_v26 = vadd.f32 %v7059_v48, %v1607_v36 }
 0x2bb   : > { %v1759_v44 = vsel %vm1731_vm6, %v7063_v26, -inf }
 0x2bc   : > { %1760 = vmax.xlane.f32.xlu0 %v1759_v44 }
 0x2bf   : > { %2322 = vrot.lane.b32.xlu1 %v6519_v61, %s5851_s28 }
 0x2c7   : > { %2394 = vrot.lane.b32.xlu1 %v6804_v4, %s5851_s28 }
 0x2c8   : > { %v1664_v2 = vpop.f32.mrf.mxu1 }
 0x2c9   : > { %v1665_v13 = vadd.f32 %v6997_v46, %v1664_v2  ;;  %v1418_v2 = vpack.c.bf16 %v783_v57, %v783_v57 }
 0x2cb   : > { %v7078_v58 = vadd.f32 %v7074_v12, %v1665_v13  ;;  %v1419_v13 = vpack.c.bf16 %v785_v19, %v785_v19 }
 0x2cc   : > { %2346 = vrot.lane.b32.xlu2 %v6615_v22, %s5851_s28  ;;  %v7159_v22 = vld [vmem:[#allocation12 + $0x28] sm:$0xff]  }
 0x2cd   : > { %v1768_v14 = vsel %vm1731_vm6, %v7078_v58, -inf }
 0x2ce   : > { %1769 = vmax.xlane.f32.xlu0 %v1768_v14 }
 0x2cf   : > { %2370 = vrot.lane.b32.xlu1 %v6715_v18, %s5851_s28 }
 0x2d4   : > { %2372 = vrot.lane.b32.xlu2 %v6646_v6, %s5851_s28 }
 0x2d7   : > { %2468 = vrot.lane.b32.xlu1 %v6979_v29, %s5851_s28 }
 0x2df   : > { %2444 = vrot.lane.b32.xlu1 %v6928_v20, %s5851_s28 }
 0x2e2   : > { %2324 = vrot.lane.b32.xlu0 %v8552_v60, %s5851_s28 }
 0x2e7   : > { %v1734_v21 = vpop.xlane.xlu0 %1733  ;;  %2466 = vrot.lane.b32.xlu1 %v6988_v10, %s5851_s28 }
 0x2e8   : > { %v1780_v11 = vsub.f32 %v7003_v34, %v1734_v21  ;;  %v1547_v34 = vadd.f32 %v7007_v17, %v1546_v1 }
 0x2ea   : > { %2396 = vrot.lane.b32.xlu0 %v6763_v56, %s5851_s28  ;;  %v1796_v39 = vmul.f32 1.442695, %v1780_v11  ;;  %v7113_v14 = vadd.f32 %v7107_v28, %v1547_v34  ;;  %v2067_v11 = vunpack.c.l.b16 %v1418_v2  ;;  %v788_v2 = vadd.f32 %v6990_v8, %v6752_v35 }
 0x2ec   : > { %5291 = vpow2.f32 %v1796_v39  ;;  %v2068_v39 = vunpack.c.l.b16 %v1419_v13  ;;  %v790_v13 = vadd.f32 %v6995_v24, %v6752_v35  ;;  %v1545_v35 = vadd.f32 %v6997_v46, %v1544_v38 }
 0x2ee   : > { %v7123_v19 = vpack.c.b16 %v2068_v39, %v2067_v11  ;;  %v1421_v11 = vpack.c.bf16 %v790_v13, %v790_v13 }
 0x2ef   : > { %v1737_v45 = vpop.xlane.xlu0 %1736 }
 0x2f0   : > { %v1781_v51 = vsub.f32 %v7013_v42, %v1737_v45  ;;  %8553 = vst [vmem:[#allocation23_spill] sm:$0xff] %v7123_v19 }
 0x2f2   : > { %v1798_v63 = vmul.f32 1.442695, %v1781_v51  ;;  %v7109_v36 = vpop.eup %5291  ;;  %v1747_v51 = vsel %vm1731_vm6, %v7113_v14, -inf }
 0x2f3   : > { %v1876_v23 = vpack.c.bf16 %v7109_v36, %v7109_v36 }
 0x2f4   : > { %5293 = vpow2.f32 %v1798_v63 }
 0x2f5   : > { %v1894_v1 = vunpack.c.l.b16 %v1876_v23 }
 0x2f7   : > { %v1740_v44 = vpop.xlane.xlu2 %1739 }
 0x2f8   : > { %v1782_v42 = vsub.f32 %v7021_v50, %v1740_v44 }
 0x2fa   : > { %v7117_v21 = vpop.eup %5293  ;;  %v1800_v45 = vmul.f32 1.442695, %v1782_v42  ;;  %v1666_v42 = vpop.f32.mrf.mxu1 }
 0x2fb   : > { %v1877_v16 = vpack.c.bf16 %v7117_v21, %v7117_v21  ;;  %v1667_v39 = vadd.f32 %v7007_v17, %v1666_v42  ;;  %v1634_v42 = vpop.f32.mrf.mxu3 }
 0x2fc   : > { %5295 = vpow2.f32 %v1800_v45  ;;  %v7138_v45 = vpop.permute.xlu1 %2298 }
 0x2fd   : > { %v1895_v63 = vunpack.c.l.b16 %v1877_v16  ;;  %1748 = vmax.xlane.f32.xlu2 %v1747_v51  ;;  %v1420_v16 = vpack.c.bf16 %v788_v2, %v788_v2 }
 0x2ff   : > { %v1743_v50 = vpop.xlane.xlu2 %1742  ;;  %v1896_v57 = vpack.c.b16 %v1895_v63, %v1894_v1  ;;  %v7147_v1 = vunpack.c.l.bf16 %v5077_v62  ;;  %v2095_v63 = vunpack.c.l.b16 %v1420_v16 }
 0x300   : > { %v1783_v34 = vsub.f32 %v7029_v41, %v1743_v50  ;;  %v7136_v41 = vunpack.c.h.bf16 %v7069_v33  ;;  %v2096_v50 = vunpack.c.l.b16 %v1421_v11  ;;  %v1635_v11 = vadd.f32 %v6997_v46, %v1634_v42 }
 0x301   : > { %4869 = vmatmul.msk.bf16.vlgmr.msrb.gmra.mxu3 %vm1731_vm6, %v1896_v57  ;;  %v7153_v2 = vadd.f32 %v7147_v1, %v1545_v35 }
 0x302   : > { %v1802_v44 = vmul.f32 1.442695, %v1783_v34  ;;  %2081 = vmatpush.bf16.msrb.mxu3 %v7123_v19  ;;  %v7132_v23 = vpop.eup %5295  ;;  %v7150_v57 = vadd.f32 %v7136_v41, %v1667_v39  ;;  %v7155_v13 = vpack.c.b16 %v2096_v50, %v2095_v63 }
 0x303   : > { %v1878_v51 = vpack.c.bf16 %v7132_v23, %v7132_v23  ;;  %v1744_v39 = vsel %vm1731_vm6, %v7153_v2, -inf }
 0x304   : > { %5297 = vpow2.f32 %v1802_v44  ;;  %8554 = vst [vmem:[#allocation37_spill] sm:$0xff] %v7155_v13  ;;  %v1771_v38 = vsel %vm1731_vm6, %v7150_v57, -inf }
 0x305   : > { %v1922_v33 = vunpack.c.l.b16 %v1878_v51  ;;  %v7168_v51 = vunpack.c.l.bf16 %v7159_v22 }
 0x307   : > { %8555 = vst [vmem:[#allocation38_spill] sm:$0xff] %v7168_v51 }
 0x30a   : > { %v7142_v8 = vpop.eup %5297 }
 0x30b   : > { %v1879_v24 = vpack.c.bf16 %v7142_v8, %v7142_v8 }
 0x30d   : > { %v1923_v34 = vunpack.c.l.b16 %v1879_v24  ;;  %v7173_v24 = vadd.f32 %v7168_v51, %v1635_v11 }
 0x30f   : > { %v1924_v44 = vpack.c.b16 %v1923_v34, %v1922_v33  ;;  %v1762_v50 = vsel %vm1731_vm6, %v7173_v24, -inf }
 0x311   : > { %v1752_v62 = vpop.xlane.xlu1 %1751  ;;  %4870 = vmatmul.msk.bf16.vlgmr.msra.gmra.mxu1 %vm1731_vm6, %v1924_v44  ;;  %1772 = vmax.xlane.f32.xlu1 %v1771_v38 }
 0x312   : > { %v1786_v16 = vsub.f32 %v7039_v9, %v1752_v62  ;;  %2109 = vmatpush.bf16.msra.mxu1 %v7155_v13 }
 0x314   : > { %1745 = vmax.xlane.f32.xlu0 %v1744_v39  ;;  %v1808_v35 = vmul.f32 1.442695, %v1786_v16 }
 0x315   : > { %2420 = vrot.lane.b32.xlu2 %v6858_v25, %s5851_s28 }
 0x316   : > { %5299 = vpow2.f32 %v1808_v35 }
 0x319   : > { %v1755_v63 = vpop.xlane.xlu1 %1754 }
 0x31a   : > { %v1787_v9 = vsub.f32 %v7047_v47, %v1755_v63  ;;  %v2301_v47 = vpop.permute.xlu0 %2300 }
 0x31b   : > { %v2306_v63 = vsel %vm1468_vm0, %v2301_v47, 0 }
 0x31c   : > { %v1810_v33 = vmul.f32 1.442695, %v1787_v9  ;;  %1763 = vmax.xlane.f32.xlu0 %v1762_v50  ;;  %v7180_v34 = vpop.eup %5299 }
 0x31d   : > { %2746 = vrot.lane.b32.xlu2 %v6898_v5, %s5851_s28  ;;  %v1882_v44 = vpack.c.bf16 %v7180_v34, %v7180_v34 }
 0x31e   : > { %5301 = vpow2.f32 %v1810_v33  ;;  %v1694_v33 = vpop.f32.mrf.mxu2 }
 0x31f   : > { %v1978_v62 = vunpack.c.l.b16 %v1882_v44 }
 0x324   : > { %v7184_v42 = vpop.eup %5301 }
 0x325   : > { %v1883_v38 = vpack.c.bf16 %v7184_v42, %v7184_v42 }
 0x327   : > { %v1979_v16 = vunpack.c.l.b16 %v1883_v38  ;;  %v1758_v11 = vpop.xlane.xlu2 %1757 }
 0x328   : > { %v1788_v39 = vsub.f32 %v7055_v49, %v1758_v11 }
 0x329   : > { %v1980_v35 = vpack.c.b16 %v1979_v16, %v1978_v62  ;;  %v1696_v62 = vpop.f32.mrf.mxu2 }
 0x32a   : > { %2442 = vrot.lane.b32.xlu1 %v6964_v27, %s5851_s28  ;;  %v1812_v9 = vmul.f32 1.442695, %v1788_v39  ;;  %v1697_v11 = vadd.f32 %v7007_v17, %v1696_v62 }
 0x32b   : > { %4872 = vmatmul.msk.bf16.vlgmr.msra.gmra.mxu3 %vm1731_vm6, %v1980_v35 }
 0x32c   : > { %2315 = vmatpush.bf16.xpose.msra.mxu3 %v2306_v63  ;;  %5303 = vpow2.f32 %v1812_v9 }
 0x32f   : > { %v1761_v50 = vpop.xlane.xlu0 %1760 }
 0x330   : > { %v1789_v25 = vsub.f32 %v7063_v26, %v1761_v50  ;;  %2418 = vrot.lane.b32.xlu0 %v6902_v53, %s5851_s28  ;;  %v5082_v26 = vld [vmem:[#allocation12 + $0x38] sm:$0xff]  }
 0x331   : > { %v7207_v35 = vunpack.c.h.bf16 %v5082_v26  ;;  %v7220_v62 = vunpack.c.l.bf16 %v5082_v26 }
 0x332   : > { %v1814_v44 = vmul.f32 1.442695, %v1789_v25  ;;  %v7196_v49 = vpop.eup %5303 }
 0x333   : > { %v1884_v38 = vpack.c.bf16 %v7196_v49, %v7196_v49  ;;  %8556 = vst [vmem:[#allocation39_spill] sm:$0xff] %v7207_v35  ;;  %v7213_v9 = vadd.f32 %v7207_v35, %v1697_v11 }
 0x334   : > { %5305 = vpow2.f32 %v1814_v44  ;;  %v7217_v44 = vpop.permute.xlu1 %2322  ;;  %8557 = vst [vmem:[#allocation40_spill] sm:$0xff] %v7220_v62 }
 0x335   : > { %v2006_v39 = vunpack.c.l.b16 %v1884_v38  ;;  %v1777_v50 = vsel %vm1731_vm6, %v7213_v9, -inf  ;;  %v1695_v38 = vadd.f32 %v6997_v46, %v1694_v33 }
 0x338   : > { %2696 = vrot.lane.b32.xlu0 %v6936_v40, %s5851_s28  ;;  %v7229_v40 = vunpack.c.h.bf16 %v7159_v22 }
 0x33a   : > { %v7202_v47 = vpop.eup %5305  ;;  %8558 = vst [vmem:[#allocation41_spill] sm:$0xff] %v7229_v40 }
 0x33b   : > { %v1885_v16 = vpack.c.bf16 %v7202_v47, %v7202_v47 }
 0x33d   : > { %v2007_v25 = vunpack.c.l.b16 %v1885_v16 }
 0x33f   : > { %v2008_v63 = vpack.c.b16 %v2007_v25, %v2006_v39  ;;  %v7223_v39 = vadd.f32 %v7220_v62, %v1695_v38  ;;  %v1636_v25 = vpop.f32.mrf.mxu3 }
 0x340   : > { %2771 = vrot.lane.b32.xlu0 %v6962_v37, %s5851_s28 }
 0x341   : > { %4873 = vmatmul.msk.bf16.vlgmr.msrb.gmra.mxu1 %vm1731_vm6, %v2008_v63  ;;  %v1770_v16 = vpop.xlane.xlu0 %1769  ;;  %v1637_v63 = vadd.f32 %v7007_v17, %v1636_v25  ;;  %v1774_v11 = vsel %vm1731_vm6, %v7223_v39, -inf  ;;  %v7239_v17 = vpop.permute.xlu2 %2346  ;;  %v1831_v25 = vsel %vm1731_vm6, %v7117_v21, 0.0 }
 0x343   : > { %v7235_v33 = vadd.f32 %v7229_v40, %v1637_v63 }
 0x345   : > { %v1765_v26 = vsel %vm1731_vm6, %v7235_v33, -inf }
 0x346   : > { %1778 = vmax.xlane.f32.xlu2 %v1777_v50  ;;  %v7231_v50 = vpop.permute.xlu1 %2394 }
 0x349   : > { %v7247_v22 = vpop.permute.xlu2 %2372 }
 0x34e   : > { %v7241_v38 = vpop.permute.xlu1 %2370 }
 0x354   : > { %v2325_v51 = vpop.permute.xlu0 %2324  ;;  %1775 = vmax.xlane.f32.xlu1 %v1774_v11 }
 0x355   : > { %v2330_v46 = vsel %vm1468_vm0, %v2325_v51, 0 }
 0x356   : > { %2339 = vmatpush.bf16.xpose.msrb.mxu1 %v2330_v46  ;;  %v7249_v51 = vpop.permute.xlu1 %2468  ;;  %v1837_v46 = vsel %vm1731_vm6, %v7142_v8, 0.0 }
 0x35c   : > { %1766 = vmax.xlane.f32.xlu1 %v1765_v26  ;;  %v2397_v8 = vpop.permute.xlu0 %2396 }
 0x35e   : > { %2846 = vrot.lane.b32.xlu2 %v7155_v13, %s5851_s28  ;;  %v7256_v26 = vpop.permute.xlu1 %2444 }
 0x366   : > { %3051 = vrot.lane.b32.xlu2 %v6378_v30, %s5852_s25 }
 0x36a   : > { %1832 = vadd.xlane.f32.xlu0 %v1831_v25  ;;  %v7261_v25 = vpop.permute.xlu1 %2466 }
 0x370   : > { %v1749_v63 = vpop.xlane.xlu2 %1748 }
 0x371   : > { %v1785_v11 = vsub.f32 %v7113_v14, %v1749_v63  ;;  %v1792_v63 = vsub.f32 %v7078_v58, %v1770_v16  ;;  %v1828_v16 = vsel %vm1731_vm6, %v7109_v36, 0.0  ;;  %v1834_v36 = vsel %vm1731_vm6, %v7132_v23, 0.0 }
 0x372   : > { %1838 = vadd.xlane.f32.xlu0 %v1837_v46  ;;  %v1846_v23 = vsel %vm1731_vm6, %v7180_v34, 0.0 }
 0x373   : > { %v1806_v13 = vmul.f32 1.442695, %v1785_v11 }
 0x375   : > { %5307 = vpow2.f32 %v1806_v13  ;;  %2671 = vrot.lane.b32.xlu1 %v6868_v3, %s5851_s28  ;;  %v1820_v13 = vmul.f32 1.442695, %v1792_v63 }
 0x377   : > { %5309 = vpow2.f32 %v1820_v13 }
 0x378   : > { %v2421_v30 = vpop.permute.xlu2 %2420 }
 0x379   : > { %v2426_v5 = vsel %vm1468_vm0, %v2421_v30, 0 }
 0x37a   : > { %2435 = vmatpush.bf16.xpose.msrb.mxu0 %v2426_v5 }
 0x37b   : > { %v5308_v21 = vpop.eup %5307 }
 0x37c   : > { %v1843_v14 = vsel %vm1731_vm6, %v5308_v21, 0.0  ;;  %v1881_v13 = vpack.c.bf16 %v5308_v21, %v5308_v21 }
 0x37d   : > { %1844 = vadd.xlane.f32.xlu0 %v1843_v14  ;;  %2821 = vrot.lane.b32.xlu1 %v7123_v19, %s5851_s28  ;;  %v7269_v32 = vpop.eup %5309  ;;  %v2354_v19 = vsel %vm1468_vm0, %v7099_v15, 0  ;;  %v2402_v15 = vsel %vm1468_vm0, %v2397_v8, 0 }
 0x37e   : > { %v1888_v58 = vpack.c.bf16 %v7269_v32, %v7269_v32 }
 0x380   : > { %v2747_v8 = vpop.permute.xlu2 %2746 }
 0x384   : > { %v1773_v11 = vpop.xlane.xlu1 %1772 }
 0x385   : > { %v1793_v46 = vsub.f32 %v7150_v57, %v1773_v11 }
 0x387   : > { %v1822_v53 = vmul.f32 1.442695, %v1793_v46  ;;  %v1746_v30 = vpop.xlane.xlu0 %1745 }
 0x388   : > { %v1784_v5 = vsub.f32 %v7153_v2, %v1746_v30  ;;  %v2062_v2 = vunpack.c.l.b16 %v1888_v58 }
 0x389   : > { %5311 = vpow2.f32 %v1822_v53 }
 0x38a   : > { %v1804_v0 = vmul.f32 1.442695, %v1784_v5  ;;  %v1951_v5 = vunpack.c.l.b16 %v1881_v13  ;;  %v1855_v13 = vsel %vm1731_vm6, %v7202_v47, 0.0 }
 0x38c   : > { %5313 = vpow2.f32 %v1804_v0 }
 0x38f   : > { %v5312_v14 = vpop.eup %5311  ;;  %1829 = vadd.xlane.f32.xlu2 %v1828_v16  ;;  %v1764_v21 = vpop.xlane.xlu0 %1763 }
 0x390   : > { %v1889_v63 = vpack.c.bf16 %v5312_v14, %v5312_v14  ;;  %v1867_v57 = vsel %vm1731_vm6, %v5312_v14, 0.0 }
 0x391   : > { %1868 = vadd.xlane.f32.xlu0 %v1867_v57 }
 0x392   : > { %v5314_v11 = vpop.eup %5313  ;;  %v2063_v53 = vunpack.c.l.b16 %v1889_v63  ;;  %v1790_v63 = vsub.f32 %v7173_v24, %v1764_v21  ;;  %v1849_v24 = vsel %vm1731_vm6, %v7184_v42, 0.0 }
 0x393   : > { %v1880_v46 = vpack.c.bf16 %v5314_v11, %v5314_v11  ;;  %v1840_v58 = vsel %vm1731_vm6, %v5314_v11, 0.0 }
 0x394   : > { %v2064_v30 = vpack.c.b16 %v2063_v53, %v2062_v2  ;;  %v1816_v57 = vmul.f32 1.442695, %v1790_v63 }
 0x395   : > { %v1950_v0 = vunpack.c.l.b16 %v1880_v46 }
 0x396   : > { %4875 = vmatmul.msk.bf16.vlgmr.msrb.gmra.mxu3 %vm1731_vm6, %v2064_v30  ;;  %5315 = vpow2.f32 %v1816_v57 }
 0x397   : > { %v1952_v16 = vpack.c.b16 %v1951_v5, %v1950_v0  ;;  %2363 = vmatpush.bf16.xpose.msrb.mxu3 %v2354_v19  ;;  %1835 = vadd.xlane.f32.xlu2 %v1834_v36  ;;  %v1852_v19 = vsel %vm1731_vm6, %v7196_v49, 0.0  ;;  %v2474_v49 = vsel %vm1468_vm0, %v7249_v51, 0 }
 0x399   : > { %4871 = vmatmul.msk.bf16.vlgmr.msrb.gmra.mxu2 %vm1731_vm6, %v1952_v16 }
 0x39c   : > { %v2443_v2 = vpop.permute.xlu1 %2442 }
 0x39f   : > { %1841 = vadd.xlane.f32.xlu2 %v1840_v58  ;;  %v2378_v58 = vsel %vm1468_vm0, %v7247_v22, 0  ;;  %v2450_v22 = vsel %vm1468_vm0, %v7256_v26, 0 }
 0x3a2   : > { %v2419_v14 = vpop.permute.xlu0 %2418 }
 0x3a3   : > { %4898 = vmatmul.msk.bf16.vlgmr.msrb.gmra.mxu0 %vm1468_vm0, %v2419_v14 }
 0x3a6   : > { %4893 = vmatmul.msk.bf16.vlgmr.msra.gmra.mxu3 %vm1468_vm0, %v7138_v45  ;;  %v5316_v45 = vpop.eup %5315 }
 0x3a7   : > { %2411 = vmatpush.bf16.xpose.msra.mxu3 %v2402_v15  ;;  %1853 = vadd.xlane.f32.xlu2 %v1852_v19  ;;  %v1858_v34 = vsel %vm1731_vm6, %v5316_v45, 0.0 }
 0x3a8   : > { %1847 = vadd.xlane.f32.xlu1 %v1846_v23 }
 0x3af   : > { %1856 = vadd.xlane.f32.xlu2 %v1855_v13 }
 0x3b0   : > { %1850 = vadd.xlane.f32.xlu1 %v1849_v24  ;;  %v2697_v24 = vpop.permute.xlu0 %2696 }
 0x3b6   : > { %4895 = vmatmul.msk.bf16.vlgmr.msrb.gmra.mxu3 %vm1468_vm0, %v7239_v17 }
 0x3b7   : > { %2483 = vmatpush.bf16.xpose.msrb.mxu3 %v2474_v49  ;;  %1859 = vadd.xlane.f32.xlu2 %v1858_v34  ;;  %v5019_v34 = vld [vmem:[#allocation14] sm:$0xff] }
 0x3b9   : > { %v1779_v11 = vpop.xlane.xlu2 %1778 }
 0x3ba   : > { %v1795_v47 = vsub.f32 %v7213_v9, %v1779_v11  ;;  %v1915_v11 = vpop.f32.mrf.mxu3 }
 0x3bc   : > { %v1826_v53 = vmul.f32 1.442695, %v1795_v47 }
 0x3be   : > { %5317 = vpow2.f32 %v1826_v53 }
 0x3c1   : > { %v7327_v49 = vpop.permute.xlu2 %2846 }
 0x3c2   : > { %v1917_v53 = vpop.f32.mrf.mxu3 }
 0x3c4   : > { %v7305_v30 = vpop.eup %5317 }
 0x3c5   : > { %v1891_v0 = vpack.c.bf16 %v7305_v30, %v7305_v30 }
 0x3c6   : > { %4897 = vmatmul.msk.bf16.vlgmr.msra.gmra.mxu3 %vm1468_vm0, %v7231_v50 }
 0x3c7   : > { %v1776_v42 = vpop.xlane.xlu1 %1775  ;;  %v2091_v16 = vunpack.c.l.b16 %v1891_v0 }
 0x3c8   : > { %v1794_v46 = vsub.f32 %v7223_v39, %v1776_v42 }
 0x3c9   : > { %v7331_v47 = vpop.permute.xlu2 %3051 }
 0x3ca   : > { %v1824_v51 = vmul.f32 1.442695, %v1794_v46  ;;  %v1999_v42 = vpop.f32.mrf.mxu3 }
 0x3cc   : > { %5319 = vpow2.f32 %v1824_v51 }
 0x3cf   : > { %v1767_v17 = vpop.xlane.xlu1 %1766 }
 0x3d0   : > { %v1791_v5 = vsub.f32 %v7235_v33, %v1767_v17  ;;  %v1886_v33 = vpack.c.bf16 %v5316_v45, %v5316_v45  ;;  %v5020_v45 = vld [vmem:[#allocation14 + $0x8] sm:$0xff] }
 0x3d1   : > { %2218 = vmatpush.bf16.msrb.mxu2 %v5020_v45 }
 0x3d2   : > { %v7310_v36 = vpop.eup %5319  ;;  %v1818_v9 = vmul.f32 1.442695, %v1791_v5  ;;  %v2034_v19 = vunpack.c.l.b16 %v1886_v33 }
 0x3d3   : > { %v1890_v50 = vpack.c.bf16 %v7310_v36, %v7310_v36 }
 0x3d4   : > { %5321 = vpow2.f32 %v1818_v9 }
 0x3d5   : > { %v2090_v21 = vunpack.c.l.b16 %v1890_v50  ;;  %2219 = vmatpush.bf16.msrb.mxu2 %v5019_v34  ;;  %v2001_v50 = vpop.f32.mrf.mxu3 }
 0x3d6   : > { %4900 = vmatmul.msk.bf16.vlgmr.msrb.gmra.mxu3 %vm1468_vm0, %v7261_v25  ;;  %v1864_v25 = vsel %vm1731_vm6, %v7269_v32, 0.0  ;;  %v2772_v32 = vpop.permute.xlu0 %2771 }
 0x3d7   : > { %v2092_v39 = vpack.c.b16 %v2091_v16, %v2090_v21 }
 0x3d9   : > { %4876 = vmatmul.msk.bf16.vlgmr.msra.gmra.mxu1 %vm1731_vm6, %v2092_v39 }
 0x3da   : > { %v5322_v14 = vpop.eup %5321  ;;  %2387 = vmatpush.bf16.xpose.msra.mxu1 %v2378_v58 }
 0x3db   : > { %v1887_v63 = vpack.c.bf16 %v5322_v14, %v5322_v14  ;;  %v1861_v15 = vsel %vm1731_vm6, %v5322_v14, 0.0 }
 0x3dc   : > { %1862 = vadd.xlane.f32.xlu1 %v1861_v15 }
 0x3dd   : > { %v2035_v23 = vunpack.c.l.b16 %v1887_v63 }
 0x3de   : > { %v1833_v26 = vpop.xlane.xlu0 %1832 }
 0x3df   : > { %v2036_v57 = vpack.c.b16 %v2035_v23, %v2034_v19  ;;  %5323 = vrcp.f32 %v1833_v26 }
 0x3e1   : > { %4874 = vmatmul.msk.bf16.vlgmr.msra.gmra.mxu2 %vm1731_vm6, %v2036_v57 }
 0x3e4   : > { %1865 = vadd.xlane.f32.xlu1 %v1864_v25 }
 0x3e6   : > { %v1839_v9 = vpop.xlane.xlu0 %1838 }
 0x3e7   : > { %v2672_v13 = vpop.permute.xlu1 %2671 }
 0x3e8   : > { %2684 = vmatpush.bf16.msra.mxu0 %v2672_v13  ;;  %v5065_v13 = vld [vmem:[#allocation11 + $0x8] sm:$0xff]  }
 0x3e9   : > { %4894 = vmatmul.msk.bf16.vlgmr.msrb.gmra.mxu1 %vm1468_vm0, %v7217_v44  ;;  %v7342_v45 = vunpack.c.l.bf16 %v5065_v13 }
 0x3ea   : > { %2459 = vmatpush.bf16.xpose.msrb.mxu1 %v2450_v22 }
 0x3ec   : > { %2759 = vmatpush.bf16.msrb.mxu0 %v2747_v8  ;;  %v5324_v8 = vpop.eup %5323 }
 0x3ed   : > { %v2133_v51 = vmul.f32 %v5324_v8, %v1917_v53 }
 0x3f0   : > { %v1845_v19 = vpop.xlane.xlu0 %1844 }
 0x3f9   : > { %4896 = vmatmul.msk.bf16.vlgmr.msra.gmra.mxu1 %vm1468_vm0, %v7241_v38  ;;  %v1943_v38 = vpop.f32.mrf.mxu1 }
 0x3fa   : > { %2709 = vmatpush.bf16.msra.mxu1 %v2697_v24 }
 0x401   : > { %v1945_v58 = vpop.f32.mrf.mxu1 }
 0x402   : > { %v1830_v44 = vpop.xlane.xlu2 %1829 }
 0x403   : > { %5325 = vrcp.f32 %v1830_v44 }
 0x409   : > { %v5326_v46 = vpop.eup %5325  ;;  %4899 = vmatmul.msk.bf16.vlgmr.msrb.gmra.mxu1 %vm1468_vm0, %v2443_v2  ;;  %v7337_v2 = vpop.permute.xlu1 %2821 }
 0x40a   : > { %v2132_v17 = vmul.f32 %v5326_v46, %v1915_v11  ;;  %2784 = vmatpush.bf16.msrb.mxu1 %v2772_v32  ;;  %v1836_v0 = vpop.xlane.xlu2 %1835 }
 0x40b   : > { %5327 = vrcp.f32 %v1836_v0 }
 0x40c   : > { %v2164_v5 = vpack.c.bf16 %v2133_v51, %v2132_v17  ;;  %5329 = vrcp.f32 %v1839_v9  ;;  %v7351_v17 = vunpack.c.h.bf16 %v5065_v13 }
 0x40d   : > { %5331 = vrcp.f32 %v1845_v19  ;;  %v2027_v19 = vpop.f32.mrf.mxu1 }
 0x40e   : > { %4885 = vmatmul.msk.bf16.vlgmr.msrb.gmra.mxu2 %vm1468_vm0, %v2164_v5 }
 0x411   : > { %v5328_v16 = vpop.eup %5327 }
 0x412   : > { %v5330_v21 = vpop.eup %5329  ;;  %v2134_v39 = vmul.f32 %v5328_v16, %v1943_v38  ;;  %v1842_v23 = vpop.xlane.xlu2 %1841 }
 0x413   : > { %v2135_v14 = vmul.f32 %v5330_v21, %v1945_v58  ;;  %5333 = vrcp.f32 %v1842_v23  ;;  %v5332_v24 = vpop.eup %5331 }
 0x415   : > { %v2165_v15 = vpack.c.bf16 %v2135_v14, %v2134_v39  ;;  %v2029_v13 = vpop.f32.mrf.mxu1 }
 0x419   : > { %v7335_v33 = vpop.f32.mrf.mxu3  ;;  %v5334_v11 = vpop.eup %5333 }
 0x41a   : > { %v1854_v0 = vpop.xlane.xlu2 %1853 }
 0x41b   : > { %v1848_v25 = vpop.xlane.xlu1 %1847 }
 0x41c   : > { %v1971_v63 = vpop.f32.mrf.mxu2 }
 0x41d   : > { %v2136_v26 = vmul.f32 %v5334_v11, %v1971_v63 }
 0x41e   : > { %4886 = vmatmul.msk.bf16.gmra.mxu2 %vm1468_vm0, %v2165_v15 }
 0x421   : > { %v7340_v57 = vpop.f32.mrf.mxu3 }
 0x422   : > { %v1857_v63 = vpop.xlane.xlu2 %1856 }
 0x423   : > { %v1851_v44 = vpop.xlane.xlu1 %1850 }
 0x424   : > { %v1973_v22 = vpop.f32.mrf.mxu2  ;;  %5335 = vrcp.f32 %v1851_v44 }
 0x425   : > { %v2137_v34 = vmul.f32 %v5332_v24, %v1973_v22  ;;  %5337 = vrcp.f32 %v1848_v25 }
 0x426   : > { %5339 = vrcp.f32 %v1857_v63 }
 0x427   : > { %v2166_v8 = vpack.c.bf16 %v2137_v34, %v2136_v26  ;;  %5341 = vrcp.f32 %v1854_v0 }
 0x429   : > { %v2317_v32 = vpop.f32.mrf.mxu3 }
 0x42a   : > { %v2318_v53 = vadd.f32 %v7342_v45, %v2317_v32  ;;  %v5336_v16 = vpop.eup %5335  ;;  %v1860_v26 = vpop.xlane.xlu2 %1859 }
 0x42b   : > { %v5338_v39 = vpop.eup %5337  ;;  %v2139_v58 = vmul.f32 %v5336_v16, %v2001_v50  ;;  %5343 = vrcp.f32 %v1860_v26 }
 0x42c   : > { %v7346_v46 = vadd.f32 %v6999_v59, %v2318_v53  ;;  %v2138_v14 = vmul.f32 %v5338_v39, %v1999_v42  ;;  %v5340_v23 = vpop.eup %5339 }
 0x42d   : > { %v5342_v25 = vpop.eup %5341  ;;  %v2141_v22 = vmul.f32 %v5340_v23, %v2029_v13 }
 0x42e   : > { %4887 = vmatmul.msk.bf16.gmra.mxu2 %vm1468_vm0, %v2166_v8  ;;  %v2506_v51 = vsel %vm1731_vm6, %v7346_v46, -inf  ;;  %v2167_v15 = vpack.c.bf16 %v2139_v58, %v2138_v14  ;;  %v2140_v24 = vmul.f32 %v5342_v25, %v2027_v19 }
 0x42f   : > { %2507 = vmax.xlane.f32.xlu1 %v2506_v51 }
 0x430   : > { %v2168_v34 = vpack.c.bf16 %v2141_v22, %v2140_v24  ;;  %v1869_v24 = vpop.xlane.xlu0 %1868 }
 0x431   : > { %v2319_v5 = vpop.f32.mrf.mxu3 }
 0x432   : > { %v2320_v9 = vadd.f32 %v7351_v17, %v2319_v5 }
 0x434   : > { %v7355_v38 = vadd.f32 %v7009_v31, %v2320_v9  ;;  %v5344_v9 = vpop.eup %5343 }
 0x436   : > { %v2509_v21 = vsel %vm1731_vm6, %v7355_v38, -inf }
 0x437   : > { %2510 = vmax.xlane.f32.xlu1 %v2509_v21 }
 0x439   : > { %v7361_v11 = vpop.f32.mrf.mxu3 }
 0x43e   : > { %4888 = vmatmul.msk.bf16.gmra.mxu2 %vm1468_vm0, %v2167_v15 }
 0x441   : > { %v7365_v42 = vpop.f32.mrf.mxu3 }
 0x449   : > { %v2413_v5 = vpop.f32.mrf.mxu3 }
 0x44a   : > { %v2414_v16 = vadd.f32 %v7342_v45, %v2413_v5 }
 0x44c   : > { %v7378_v13 = vadd.f32 %v7051_v55, %v2414_v16  ;;  %v1870_v16 = vsel %vm1731_vm6, %v7310_v36, 0.0 }
 0x44e   : > { %4889 = vmatmul.msk.bf16.gmra.mxu2 %vm1468_vm0, %v2168_v34  ;;  %v2530_v26 = vsel %vm1731_vm6, %v7378_v13, -inf }
 0x44f   : > { %v1863_v53 = vpop.xlane.xlu1 %1862 }
 0x450   : > { %5345 = vrcp.f32 %v1863_v53 }
 0x456   : > { %v7363_v32 = vpop.f32.mrf.mxu1  ;;  %v5346_v39 = vpop.eup %5345 }
 0x457   : > { %v1866_v19 = vpop.xlane.xlu1 %1865 }
 0x458   : > { %5347 = vrcp.f32 %v1866_v19 }
 0x459   : > { %5349 = vrcp.f32 %v1869_v24 }
 0x45e   : > { %v7367_v50 = vpop.f32.mrf.mxu1 }
 0x464   : > { %v2055_v44 = vpop.f32.mrf.mxu2 }
 0x465   : > { %v2142_v14 = vmul.f32 %v5344_v9, %v2055_v44 }
 0x466   : > { %v2341_v8 = vpop.f32.mrf.mxu1 }
 0x467   : > { %v2342_v51 = vadd.f32 %v7342_v45, %v2341_v8  ;;  %v5348_v8 = vpop.eup %5347 }
 0x468   : > { %v2144_v5 = vmul.f32 %v5348_v8, %v7335_v33 }
 0x469   : > { %v7371_v0 = vadd.f32 %v7017_v43, %v2342_v51 }
 0x46b   : > { %v2512_v21 = vsel %vm1731_vm6, %v7371_v0, -inf }
 0x46c   : > { %v2057_v58 = vpop.f32.mrf.mxu2  ;;  %2513 = vmax.xlane.f32.xlu1 %v2512_v21  ;;  %v5350_v21 = vpop.eup %5349 }
 0x46d   : > { %v2143_v63 = vmul.f32 %v5346_v39, %v2057_v58  ;;  %v2145_v39 = vmul.f32 %v5350_v21, %v7340_v57  ;;  %v2415_v58 = vpop.f32.mrf.mxu3 }
 0x46e   : > { %v2343_v15 = vpop.f32.mrf.mxu1  ;;  %v2416_v19 = vadd.f32 %v7351_v17, %v2415_v58 }
 0x46f   : > { %v2169_v23 = vpack.c.bf16 %v2143_v63, %v2142_v14  ;;  %v2344_v25 = vadd.f32 %v7351_v17, %v2343_v15  ;;  %v2170_v15 = vpack.c.bf16 %v2145_v39, %v2144_v5 }
 0x470   : > { %v7408_v57 = vadd.f32 %v7059_v48, %v2416_v19 }
 0x471   : > { %4890 = vmatmul.msk.bf16.gmra.mxu2 %vm1468_vm0, %v2169_v23  ;;  %v7382_v22 = vadd.f32 %v7025_v52, %v2344_v25 }
 0x473   : > { %v2515_v34 = vsel %vm1731_vm6, %v7382_v22, -inf }
 0x474   : > { %2516 = vmax.xlane.f32.xlu2 %v2515_v34  ;;  %2531 = vmax.xlane.f32.xlu1 %v2530_v26 }
 0x475   : > { %v2485_v24 = vpop.f32.mrf.mxu3 }
 0x476   : > { %v2389_v53 = vpop.f32.mrf.mxu1  ;;  %v2486_v26 = vadd.f32 %v7342_v45, %v2485_v24 }
 0x477   : > { %v2390_v44 = vadd.f32 %v7342_v45, %v2389_v53  ;;  %v2533_v53 = vsel %vm1731_vm6, %v7408_v57, -inf }
 0x478   : > { %v7419_v8 = vadd.f32 %v7220_v62, %v2486_v26 }
 0x479   : > { %v7390_v51 = vadd.f32 %v7035_v54, %v2390_v44 }
 0x47a   : > { %v2548_v5 = vsel %vm1731_vm6, %v7419_v8, -inf }
 0x47b   : > { %v2524_v9 = vsel %vm1731_vm6, %v7390_v51, -inf }
 0x47c   : > { %2525 = vmax.xlane.f32.xlu0 %v2524_v9  ;;  %1871 = vadd.xlane.f32.xlu2 %v1870_v16 }
 0x47e   : > { %v2391_v14 = vpop.f32.mrf.mxu1 }
 0x47f   : > { %v2392_v63 = vadd.f32 %v7351_v17, %v2391_v14 }
 0x481   : > { %4891 = vmatmul.msk.bf16.gmra.mxu2 %vm1468_vm0, %v2170_v15  ;;  %v7401_v33 = vadd.f32 %v7043_v7, %v2392_v63  ;;  %v8559_v63 = vld [vmem:[#allocation21_spill] sm:$0xff] }
 0x483   : > { %v2527_v36 = vsel %vm1731_vm6, %v7401_v33, -inf }
 0x484   : > { %2528 = vmax.xlane.f32.xlu2 %v2527_v36 }
 0x486   : > { %v2461_v23 = vpop.f32.mrf.mxu1 }
 0x487   : > { %v2462_v25 = vadd.f32 %v7342_v45, %v2461_v23 }
 0x489   : > { %v7411_v34 = vadd.f32 %v7074_v12, %v2462_v25 }
 0x48b   : > { %v2542_v44 = vsel %vm1731_vm6, %v7411_v34, -inf }
 0x48c   : > { %2534 = vmax.xlane.f32.xlu2 %v2533_v53  ;;  %2543 = vmax.xlane.f32.xlu1 %v2542_v44 }
 0x48e   : > { %v2463_v15 = vpop.f32.mrf.mxu1 }
 0x490   : > { %3075 = vrot.lane.b32.xlu0 %v8552_v60, %s5852_s25 }
 0x494   : > { %2549 = vmax.xlane.f32.xlu1 %v2548_v5  ;;  %v1873_v5 = vsel %vm1731_vm6, %v7305_v30, 0.0 }
 0x4a2   : > { %v2508_v9 = vpop.xlane.xlu1 %2507 }
 0x4a3   : > { %v2554_v16 = vsub.f32 %v7346_v46, %v2508_v9  ;;  %v2464_v46 = vadd.f32 %v7351_v17, %v2463_v15  ;;  %v7459_v9 = vpop.f32.mrf.mxu0  ;;  %v2487_v15 = vpop.f32.mrf.mxu3 }
 0x4a4   : > { %3073 = vrot.lane.b32.xlu2 %v6519_v61, %s5852_s25 }
 0x4a5   : > { %v2570_v21 = vmul.f32 1.442695, %v2554_v16  ;;  %v7445_v23 = vadd.f32 %v7136_v41, %v2464_v46  ;;  %v2366_v16 = vadd.f32 %v7342_v45, %v7361_v11 }
 0x4a7   : > { %5351 = vpow2.f32 %v2570_v21  ;;  %v2545_v53 = vsel %vm1731_vm6, %v7445_v23, -inf }
 0x4aa   : > { %v2511_v39 = vpop.xlane.xlu1 %2510 }
 0x4ab   : > { %v2555_v58 = vsub.f32 %v7355_v38, %v2511_v39  ;;  %v2439_v21 = vpop.f32.mrf.mxu0 }
 0x4ac   : > { %3195 = vrot.lane.b32.xlu2 %v6928_v20, %s5852_s25  ;;  %v2440_v39 = vadd.f32 %v7351_v17, %v2439_v21 }
 0x4ad   : > { %v2572_v14 = vmul.f32 1.442695, %v2555_v58  ;;  %3049 = vrot.lane.b32.xlu1 %v8559_v63, %s5852_s25  ;;  %v7433_v19 = vpop.eup %5351 }
 0x4ae   : > { %v2650_v36 = vpack.c.bf16 %v7433_v19, %v7433_v19  ;;  %v7475_v11 = vadd.f32 %v7229_v40, %v2440_v39 }
 0x4af   : > { %5353 = vpow2.f32 %v2572_v14 }
 0x4b0   : > { %v2668_v24 = vunpack.c.l.b16 %v2650_v36  ;;  %v2539_v36 = vsel %vm1731_vm6, %v7475_v11, -inf }
 0x4b4   : > { %3193 = vrot.lane.b32.xlu2 %v6964_v27, %s5852_s25 }
 0x4b5   : > { %v7440_v38 = vpop.eup %5353  ;;  %3123 = vrot.lane.b32.xlu1 %v6646_v6, %s5852_s25 }
 0x4b6   : > { %v2651_v25 = vpack.c.bf16 %v7440_v38, %v7440_v38 }
 0x4b8   : > { %v2669_v26 = vunpack.c.l.b16 %v2651_v25  ;;  %v2488_v25 = vadd.f32 %v7351_v17, %v2487_v15 }
 0x4ba   : > { %v2670_v44 = vpack.c.b16 %v2669_v26, %v2668_v24  ;;  %2546 = vmax.xlane.f32.xlu0 %v2545_v53 }
 0x4bc   : > { %4901 = vmatmul.msk.bf16.vlgmr.msra.gmra.mxu0 %vm1731_vm6, %v2670_v44  ;;  %v7482_v44 = vadd.f32 %v7207_v35, %v2488_v25 }
 0x4bd   : > { %2834 = vmatpush.bf16.msra.mxu0 %v7337_v2  ;;  %3147 = vrot.lane.b32.xlu1 %v6763_v56, %s5852_s25  ;;  %v7466_v2 = vadd.f32 %v7147_v1, %v2366_v16 }
 0x4bf   : > { %v2518_v30 = vsel %vm1731_vm6, %v7466_v2, -inf }
 0x4c2   : > { %1874 = vadd.xlane.f32.xlu0 %v1873_v5  ;;  %v2551_v5 = vsel %vm1731_vm6, %v7482_v44, -inf }
 0x4c5   : > { %3145 = vrot.lane.b32.xlu1 %v6804_v4, %s5852_s25 }
 0x4d6   : > { %3121 = vrot.lane.b32.xlu0 %v6715_v18, %s5852_s25 }
 0x4dd   : > { %2519 = vmax.xlane.f32.xlu2 %v2518_v30 }
 0x4de   : > { %3219 = vrot.lane.b32.xlu0 %v6979_v29, %s5852_s25 }
 0x4df   : > { %v2514_v58 = vpop.xlane.xlu1 %2513 }
 0x4e0   : > { %v2556_v14 = vsub.f32 %v7371_v0, %v2514_v58 }
 0x4e2   : > { %v2574_v46 = vmul.f32 1.442695, %v2556_v14 }
 0x4e4   : > { %5355 = vpow2.f32 %v2574_v46 }
 0x4e5   : > { %2540 = vmax.xlane.f32.xlu2 %v2539_v36 }
 0x4e7   : > { %v2517_v24 = vpop.xlane.xlu2 %2516  ;;  %v2532_v36 = vpop.xlane.xlu1 %2531 }
 0x4e8   : > { %v2557_v26 = vsub.f32 %v7382_v22, %v2517_v24 }
 0x4ea   : > { %v2576_v53 = vmul.f32 1.442695, %v2557_v26  ;;  %v7484_v0 = vpop.eup %5355  ;;  %v2562_v26 = vsub.f32 %v7378_v13, %v2532_v36 }
 0x4eb   : > { %v2652_v30 = vpack.c.bf16 %v7484_v0, %v7484_v0 }
 0x4ec   : > { %5357 = vpow2.f32 %v2576_v53 }
 0x4ed   : > { %v2693_v15 = vunpack.c.l.b16 %v2652_v30  ;;  %v2368_v30 = vadd.f32 %v7351_v17, %v7365_v42 }
 0x4ef   : > { %v2526_v16 = vpop.xlane.xlu0 %2525  ;;  %v7488_v21 = vpop.xlane.xlu2 %1871  ;;  %2552 = vmax.xlane.f32.xlu1 %v2551_v5  ;;  %v2586_v5 = vmul.f32 1.442695, %v2562_v26 }
 0x4f0   : > { %v2560_v39 = vsub.f32 %v7390_v51, %v2526_v16  ;;  %v8560_v16 = vld [vmem:[#allocation24_spill] sm:$0xff] }
 0x4f2   : > { %v7493_v22 = vpop.eup %5357  ;;  %v2582_v14 = vmul.f32 1.442695, %v2560_v39 }
 0x4f3   : > { %v2653_v58 = vpack.c.bf16 %v7493_v22, %v7493_v22 }
 0x4f4   : > { %5359 = vpow2.f32 %v2582_v14 }
 0x4f5   : > { %v2694_v46 = vunpack.c.l.b16 %v2653_v58 }
 0x4f7   : > { %v2695_v25 = vpack.c.b16 %v2694_v46, %v2693_v15  ;;  %v2529_v24 = vpop.xlane.xlu2 %2528  ;;  %v7515_v46 = vadd.f32 %v7107_v28, %v2368_v30 }
 0x4f8   : > { %v2561_v53 = vsub.f32 %v7401_v33, %v2529_v24  ;;  %v3057_v24 = vsel %vm1468_vm0, %v7331_v47, 0  ;;  %v8561_v47 = vld [vmem:[#allocation33_spill] sm:$0xff] }
 0x4f9   : > { %4902 = vmatmul.msk.bf16.vlgmr.msra.gmra.mxu1 %vm1731_vm6, %v2695_v25 }
 0x4fa   : > { %v2584_v51 = vmul.f32 1.442695, %v2561_v53  ;;  %2859 = vmatpush.bf16.msra.mxu1 %v7327_v49  ;;  %v7503_v39 = vpop.eup %5359 }
 0x4fb   : > { %v2656_v33 = vpack.c.bf16 %v7503_v39, %v7503_v39 }
 0x4fc   : > { %5361 = vpow2.f32 %v2584_v51 }
 0x4fd   : > { %3099 = vrot.lane.b32.xlu2 %v8560_v16, %s5852_s25  ;;  %5363 = vpow2.f32 %v2586_v5  ;;  %v2743_v36 = vunpack.c.l.b16 %v2656_v33 }
 0x4ff   : > { %v2535_v58 = vpop.xlane.xlu2 %2534 }
 0x500   : > { %v2563_v13 = vsub.f32 %v7408_v57, %v2535_v58  ;;  %v2521_v57 = vsel %vm1731_vm6, %v7515_v46, -inf  ;;  %v2544_v58 = vpop.xlane.xlu1 %2543 }
 0x502   : > { %v7510_v14 = vpop.eup %5361  ;;  %v2588_v49 = vmul.f32 1.442695, %v2563_v13  ;;  %v3076_v13 = vpop.permute.xlu0 %3075 }
 0x503   : > { %v2657_v15 = vpack.c.bf16 %v7510_v14, %v7510_v14  ;;  %v7519_v17 = vpop.eup %5363 }
 0x504   : > { %5365 = vpow2.f32 %v2588_v49  ;;  %v2658_v26 = vpack.c.bf16 %v7519_v17, %v7519_v17  ;;  %v3081_v49 = vsel %vm1468_vm0, %v3076_v13, 0 }
 0x505   : > { %v2744_v25 = vunpack.c.l.b16 %v2657_v15  ;;  %3422 = vrot.lane.b32.xlu2 %v6868_v3, %s5852_s25 }
 0x506   : > { %v2768_v5 = vunpack.c.l.b16 %v2658_v26 }
 0x507   : > { %v2745_v42 = vpack.c.b16 %v2744_v25, %v2743_v36  ;;  %v8562_v36 = vld [vmem:[#allocation34_spill] sm:$0xff] }
 0x508   : > { %2522 = vmax.xlane.f32.xlu0 %v2521_v57  ;;  %3217 = vrot.lane.b32.xlu1 %v6988_v10, %s5852_s25  ;;  %v7540_v15 = vpop.xlane.xlu1 %2549  ;;  %v2566_v57 = vsub.f32 %v7411_v34, %v2544_v58  ;;  %v7558_v58 = vpop.permute.xlu2 %3073 }
 0x509   : > { %4904 = vmatmul.msk.bf16.vlgmr.msrb.gmra.mxu0 %vm1731_vm6, %v2745_v42  ;;  %v8563_v42 = vld [vmem:[#allocation25_spill] sm:$0xff] }
 0x50a   : > { %v7530_v53 = vpop.eup %5365  ;;  %3066 = vmatpush.bf16.xpose.msrb.mxu0 %v3057_v24  ;;  %v2594_v26 = vmul.f32 1.442695, %v2566_v57  ;;  %v8565_v57 = vld [vmem:[#allocation28_spill] sm:$0xff] }
 0x50b   : > { %v2659_v51 = vpack.c.bf16 %v7530_v53, %v7530_v53 }
 0x50c   : > { %5367 = vpow2.f32 %v2594_v26 }
 0x50d   : > { %v2769_v30 = vunpack.c.l.b16 %v2659_v51  ;;  %3522 = vrot.lane.b32.xlu2 %v6962_v37, %s5852_s25  ;;  %v8564_v51 = vld [vmem:[#allocation29_spill] sm:$0xff]  ;;  %v2438_v37 = vadd.f32 %v7342_v45, %v7459_v9 }
 0x50f   : > { %v2770_v33 = vpack.c.b16 %v2769_v30, %v2768_v5 }
 0x510   : > { %2721 = vrot.lane.b32.xlu1 %v8561_v47, %s5851_s28  ;;  %v7579_v3 = vpop.permute.xlu2 %3195 }
 0x511   : > { %4905 = vmatmul.msk.bf16.vlgmr.msrb.gmra.mxu1 %vm1731_vm6, %v2770_v33 }
 0x512   : > { %3090 = vmatpush.bf16.xpose.msrb.mxu1 %v3081_v49  ;;  %v7555_v34 = vpop.eup %5367 }
 0x51c   : > { %2796 = vrot.lane.b32.xlu0 %v8562_v36, %s5851_s28  ;;  %s5775_s28 = scalar_lea.hbm %s5774_s17, 128 }
 0x51d   : > { %p5776_p1 = scmp.ne.s32.totalorder %s5774_s17, %s5775_s28 }
 0x51f   : > { %v3050_v25 = vpop.permute.xlu1 %3049  ;;  %p5777_p3 = pnand %p5776_p1, %p6006_p4 }
 0x521   : > { %p5778_p5 = pneg %p5777_p3 }
 0x524   : > { %3097 = vrot.lane.b32.xlu0 %v8563_v42, %s5852_s25 }
 0x527   : > { %v7547_v24 = vpop.permute.xlu1 %3123 }
 0x52c   : > { %3169 = vrot.lane.b32.xlu0 %v8564_v51, %s5852_s25 }
 0x52d   : > { %v2547_v5 = vpop.xlane.xlu0 %2546 }
 0x52e   : > { %v2567_v30 = vsub.f32 %v7445_v23, %v2547_v5  ;;  %v8566_v23 = vld [vmem:[#allocation38_spill] sm:$0xff] }
 0x52f   : > { %v3148_v13 = vpop.permute.xlu1 %3147  ;;  %v7563_v5 = vadd.f32 %v8566_v23, %v2438_v37 }
 0x530   : > { %v2596_v33 = vmul.f32 1.442695, %v2567_v30  ;;  %v3153_v49 = vsel %vm1468_vm0, %v3148_v13, 0  ;;  %v2662_v30 = vpack.c.bf16 %v7555_v34, %v7555_v34 }
 0x531   : > { %3162 = vmatpush.bf16.xpose.msra.mxu2 %v3153_v49 }
 0x532   : > { %5369 = vpow2.f32 %v2596_v33  ;;  %v7573_v33 = vpop.f32.mrf.mxu2  ;;  %v2818_v49 = vunpack.c.l.b16 %v2662_v30  ;;  %v7585_v30 = vpop.permute.xlu2 %3193 }
 0x533   : > { %5371 = vrcp.f32 %v7488_v21  ;;  %v2536_v21 = vsel %vm1731_vm6, %v7563_v5, -inf  ;;  %8567 = vst [vmem:[#allocation21_spill] sm:$0xff] %v7573_v33 }
 0x534   : > { %3497 = vrot.lane.b32.xlu0 %v8565_v57, %s5852_s25 }
 0x535   : > { %v1875_v26 = vpop.xlane.xlu0 %1874 }
 0x536   : > { %5373 = vrcp.f32 %v1875_v26  ;;  %v8568_v26 = vld [vmem:[#allocation37_spill] sm:$0xff] }
 0x538   : > { %v7567_v45 = vpop.eup %5369 }
 0x539   : > { %v2663_v9 = vpack.c.bf16 %v7567_v45, %v7567_v45  ;;  %v5372_v13 = vpop.eup %5371 }
 0x53a   : > { %2537 = vmax.xlane.f32.xlu1 %v2536_v21  ;;  %v2146_v36 = vmul.f32 %v5372_v13, %v7363_v32  ;;  %v7583_v21 = vpop.f32.mrf.mxu2 }
 0x53b   : > { %v2819_v40 = vunpack.c.l.b16 %v2663_v9  ;;  %8569 = vst [vmem:[#allocation24_spill] sm:$0xff] %v7583_v21 }
 0x53c   : > { %v5374_v37 = vpop.eup %5373  ;;  %3597 = vrot.lane.b32.xlu0 %v8568_v26, %s5852_s25  ;;  %v3146_v26 = vpop.permute.xlu1 %3145 }
 0x53d   : > { %v2820_v57 = vpack.c.b16 %v2819_v40, %v2818_v49  ;;  %v2147_v23 = vmul.f32 %v5374_v37, %v7367_v50 }
 0x53f   : > { %4907 = vmatmul.msk.bf16.vlgmr.msra.gmra.mxu0 %vm1731_vm6, %v2820_v57  ;;  %v2171_v27 = vpack.c.bf16 %v2147_v23, %v2146_v36 }
 0x541   : > { %4892 = vmatmul.msk.bf16.gmra.mxu2 %vm1468_vm0, %v2171_v27  ;;  %v8571_v27 = vld [vmem:[#allocation26_spill] sm:$0xff] }
 0x542   : > { %v7589_v33 = vpop.f32.mrf.mxu2 }
 0x543   : > { %8570 = vst [vmem:[#allocation33_spill] sm:$0xff] %v7589_v33 }
 0x548   : > { %v7587_v9 = vpop.permute.xlu0 %3121 }
 0x54a   : > { %v7598_v49 = vpop.f32.mrf.mxu2 }
 0x54b   : > { %8572 = vst [vmem:[#allocation25_spill] sm:$0xff] %v7598_v49 }
 0x54f   : > { %4925 = vmatmul.msk.bf16.vlgmr.msrb.gmra.mxu0 %vm1468_vm0, %v3050_v25  ;;  %v2568_v25 = vsub.f32 %v7419_v8, %v7540_v15  ;;  %v8574_v8 = vld [vmem:[#allocation23_spill] sm:$0xff] }
 0x550   : > { %v3220_v40 = vpop.permute.xlu0 %3219  ;;  %v2520_v32 = vpop.xlane.xlu2 %2519 }
 0x551   : > { %v3225_v50 = vsel %vm1468_vm0, %v3220_v40, 0  ;;  %4929 = vmatmul.msk.bf16.vlgmr.msra.gmra.mxu2 %vm1468_vm0, %v3146_v26  ;;  %v2558_v36 = vsub.f32 %v7466_v2, %v2520_v32  ;;  %v8573_v40 = vld [vmem:[#allocation30_spill] sm:$0xff]  ;;  %v2598_v26 = vmul.f32 1.442695, %v2568_v25 }
 0x552   : > { %3234 = vmatpush.bf16.xpose.msrb.mxu2 %v3225_v50  ;;  %v7610_v15 = vpop.f32.mrf.mxu2  ;;  %v8576_v25 = vld [vmem:[#allocation22_spill] sm:$0xff] }
 0x553   : > { %3171 = vrot.lane.b32.xlu1 %v8571_v27, %s5852_s25  ;;  %v2578_v57 = vmul.f32 1.442695, %v2558_v36  ;;  %8575 = vst [vmem:[#allocation29_spill] sm:$0xff] %v7610_v15 }
 0x555   : > { %5375 = vpow2.f32 %v2578_v57 }
 0x558   : > { %v2541_v23 = vpop.xlane.xlu2 %2540 }
 0x559   : > { %v2565_v13 = vsub.f32 %v7475_v11, %v2541_v23 }
 0x55b   : > { %v2592_v37 = vmul.f32 1.442695, %v2565_v13  ;;  %3447 = vrot.lane.b32.xlu1 %v8573_v40, %s5852_s25  ;;  %v5376_v2 = vpop.eup %5375 }
 0x55c   : > { %v2614_v13 = vsel %vm1731_vm6, %v5376_v2, 0.0 }
 0x55d   : > { %5377 = vpow2.f32 %v2592_v37  ;;  %v2608_v37 = vsel %vm1731_vm6, %v7484_v0, 0.0 }
 0x55e   : > { %5379 = vpow2.f32 %v2598_v26 }
 0x560   : > { %v3100_v50 = vpop.permute.xlu2 %3099 }
 0x561   : > { %v3105_v33 = vsel %vm1468_vm0, %v3100_v50, 0  ;;  %v2611_v50 = vsel %vm1731_vm6, %v7493_v22, 0.0 }
 0x562   : > { %3114 = vmatpush.bf16.xpose.msra.mxu0 %v3105_v33  ;;  %v2553_v32 = vpop.xlane.xlu1 %2552 }
 0x563   : > { %v7605_v36 = vpop.eup %5377  ;;  %v2569_v11 = vsub.f32 %v7482_v44, %v2553_v32  ;;  %3572 = vrot.lane.b32.xlu1 %v8574_v8, %s5852_s25  ;;  %v7627_v32 = vpop.f32.mrf.mxu2 }
 0x564   : > { %v2635_v57 = vsel %vm1731_vm6, %v7605_v36, 0.0  ;;  %v7615_v33 = vpop.eup %5379  ;;  %8577 = vst [vmem:[#allocation26_spill] sm:$0xff] %v7627_v32 }
 0x565   : > { %v2600_v23 = vmul.f32 1.442695, %v2569_v11  ;;  %2636 = vadd.xlane.f32.xlu2 %v2635_v57  ;;  %v2664_v44 = vpack.c.bf16 %v7615_v33, %v7615_v33 }
 0x566   : > { %2615 = vadd.xlane.f32.xlu0 %v2614_v13 }
 0x567   : > { %5381 = vpow2.f32 %v2600_v23  ;;  %v2843_v57 = vunpack.c.l.b16 %v2664_v44 }
 0x56b   : > { %3802 = vrot.lane.b32.xlu1 %v8576_v25, %s5853_s24  ;;  %v3129_v25 = vsel %vm1468_vm0, %v7547_v24, 0  ;;  %v7634_v0 = vpop.f32.mrf.mxu2  ;;  %v3201_v24 = vsel %vm1468_vm0, %v7579_v3, 0 }
 0x56c   : > { %8578 = vst [vmem:[#allocation30_spill] sm:$0xff] %v7634_v0 }
 0x56d   : > { %v7623_v26 = vpop.eup %5381  ;;  %2609 = vadd.xlane.f32.xlu2 %v2608_v37 }
 0x56e   : > { %v2665_v11 = vpack.c.bf16 %v7623_v26, %v7623_v26  ;;  %2612 = vadd.xlane.f32.xlu0 %v2611_v50 }
 0x570   : > { %v2844_v23 = vunpack.c.l.b16 %v2665_v11  ;;  %v2654_v11 = vpack.c.bf16 %v5376_v2, %v5376_v2 }
 0x572   : > { %v2845_v13 = vpack.c.b16 %v2844_v23, %v2843_v57 }
 0x573   : > { %v7638_v50 = vpop.f32.mrf.mxu2 }
 0x574   : > { %4908 = vmatmul.msk.bf16.vlgmr.msra.gmra.mxu1 %vm1731_vm6, %v2845_v13  ;;  %8579 = vst [vmem:[#allocation22_spill] sm:$0xff] %v7638_v50  ;;  %v7662_v13 = vpop.f32.mrf.mxu0 }
 0x575   : > { %3138 = vmatpush.bf16.xpose.msra.mxu1 %v3129_v25 }
 0x57a   : > { %v3218_v37 = vpop.permute.xlu1 %3217 }
 0x57b   : > { %v2523_v15 = vpop.xlane.xlu0 %2522  ;;  %4932 = vmatmul.msk.bf16.vlgmr.msrb.gmra.mxu2 %vm1468_vm0, %v3218_v37  ;;  %v7652_v23 = vpop.f32.mrf.mxu2 }
 0x57c   : > { %v2559_v22 = vsub.f32 %v7515_v46, %v2523_v15  ;;  %8580 = vst [vmem:[#allocation42_spill] sm:$0xff] %v7652_v23  ;;  %v7668_v37 = vpop.f32.mrf.mxu0 }
 0x57e   : > { %v2580_v32 = vmul.f32 1.442695, %v2559_v22  ;;  %v2626_v22 = vsel %vm1731_vm6, %v7519_v17, 0.0  ;;  %v2661_v17 = vpack.c.bf16 %v7605_v36, %v7605_v36 }
 0x580   : > { %5383 = vpow2.f32 %v2580_v32  ;;  %v2718_v32 = vunpack.c.l.b16 %v2654_v11 }
 0x582   : > { %3800 = vrot.lane.b32.xlu0 %v8559_v63, %s5853_s24  ;;  %v2722_v44 = vpop.permute.xlu1 %2721 }
 0x583   : > { %2734 = vmatpush.bf16.msra.mxu3 %v2722_v44  ;;  %v2620_v44 = vsel %vm1731_vm6, %v7503_v39, 0.0 }
 0x584   : > { %4926 = vmatmul.msk.bf16.vlgmr.msrb.gmra.mxu1 %vm1468_vm0, %v7558_v58  ;;  %v7657_v58 = vpop.f32.mrf.mxu2 }
 0x585   : > { %3210 = vmatpush.bf16.xpose.msrb.mxu1 %v3201_v24  ;;  %3826 = vrot.lane.b32.xlu2 %v8552_v60, %s5853_s24  ;;  %8581 = vst [vmem:[#allocation43_spill] sm:$0xff] %v7657_v58 }
 0x586   : > { %v7648_v46 = vpop.eup %5383  ;;  %v7675_v11 = vpop.f32.mrf.mxu0 }
 0x587   : > { %v2655_v15 = vpack.c.bf16 %v7648_v46, %v7648_v46 }
 0x589   : > { %v2719_v63 = vunpack.c.l.b16 %v2655_v15 }
 0x58b   : > { %v2720_v57 = vpack.c.b16 %v2719_v63, %v2718_v32 }
 0x58c   : > { %v7660_v2 = vpop.f32.mrf.mxu2 }
 0x58d   : > { %4903 = vmatmul.msk.bf16.vlgmr.msra.gmra.mxu3 %vm1731_vm6, %v2720_v57  ;;  %8582 = vst [vmem:[#allocation44_spill] sm:$0xff] %v7660_v2 }
 0x58e   : > { %v2797_v3 = vpop.permute.xlu0 %2796 }
 0x58f   : > { %2809 = vmatpush.bf16.msrb.mxu3 %v2797_v3  ;;  %v7684_v3 = vpop.f32.mrf.mxu0 }
 0x594   : > { %4928 = vmatmul.msk.bf16.vlgmr.msra.gmra.mxu1 %vm1468_vm0, %v7587_v9  ;;  %v7666_v25 = vpop.f32.mrf.mxu2 }
 0x595   : > { %8583 = vst [vmem:[#allocation45_spill] sm:$0xff] %v7666_v25 }
 0x596   : > { %v3098_v60 = vpop.permute.xlu0 %3097 }
 0x597   : > { %4927 = vmatmul.msk.bf16.vlgmr.msra.gmra.mxu0 %vm1468_vm0, %v3098_v60 }
 0x59c   : > { %v7677_v32 = vpop.f32.mrf.mxu2 }
 0x59d   : > { %8584 = vst [vmem:[#allocation46_spill] sm:$0xff] %v7677_v32 }
 0x5a4   : > { %4931 = vmatmul.msk.bf16.vlgmr.msrb.gmra.mxu1 %vm1468_vm0, %v7585_v30  ;;  %v2623_v30 = vsel %vm1731_vm6, %v7510_v14, 0.0  ;;  %v2602_v14 = vsel %vm1731_vm6, %v7433_v19, 0.0  ;;  %v7704_v19 = vpop.f32.mrf.mxu1 }
 0x5ac   : > { %2627 = vadd.xlane.f32.xlu0 %v2626_v22  ;;  %v7686_v22 = vpop.f32.mrf.mxu2 }
 0x5ad   : > { %v2538_v9 = vpop.xlane.xlu1 %2537  ;;  %8585 = vst [vmem:[#allocation47_spill] sm:$0xff] %v7686_v22 }
 0x5ae   : > { %v2564_v24 = vsub.f32 %v7563_v5, %v2538_v9  ;;  %2621 = vadd.xlane.f32.xlu2 %v2620_v44  ;;  %v2794_v5 = vunpack.c.l.b16 %v2661_v17  ;;  %v2629_v44 = vsel %vm1731_vm6, %v7530_v53, 0.0  ;;  %v2605_v53 = vsel %vm1731_vm6, %v7440_v38, 0.0 }
 0x5b0   : > { %v2590_v15 = vmul.f32 1.442695, %v2564_v24  ;;  %v3423_v24 = vpop.permute.xlu2 %3422 }
 0x5b2   : > { %5385 = vpow2.f32 %v2590_v15  ;;  %v3170_v15 = vpop.permute.xlu0 %3169 }
 0x5b6   : > { %2624 = vadd.xlane.f32.xlu2 %v2623_v30 }
 0x5b8   : > { %v5386_v63 = vpop.eup %5385 }
 0x5b9   : > { %v2660_v57 = vpack.c.bf16 %v5386_v63, %v5386_v63  ;;  %v2632_v39 = vsel %vm1731_vm6, %v5386_v63, 0.0 }
 0x5ba   : > { %2633 = vadd.xlane.f32.xlu1 %v2632_v39 }
 0x5bb   : > { %v2793_v60 = vunpack.c.l.b16 %v2660_v57 }
 0x5bc   : > { %v7693_v36 = vpop.f32.mrf.mxu0 }
 0x5bd   : > { %v2795_v9 = vpack.c.b16 %v2794_v5, %v2793_v60  ;;  %v3523_v60 = vpop.permute.xlu2 %3522 }
 0x5be   : > { %2630 = vadd.xlane.f32.xlu2 %v2629_v44  ;;  %v5069_v44 = vld [vmem:[#allocation11 + $0x10] sm:$0xff]  }
 0x5bf   : > { %4906 = vmatmul.msk.bf16.vlgmr.msrb.gmra.mxu3 %vm1731_vm6, %v2795_v9  ;;  %v3498_v9 = vpop.permute.xlu0 %3497  ;;  %v7709_v38 = vunpack.c.l.bf16 %v5069_v44 }
 0x5c2   : > { %2603 = vadd.xlane.f32.xlu1 %v2602_v14  ;;  %v2617_v14 = vsel %vm1731_vm6, %v7648_v46, 0.0 }
 0x5c4   : > { %v7695_v30 = vpop.f32.mrf.mxu2  ;;  %v7700_v57 = vpop.f32.mrf.mxu0 }
 0x5c5   : > { %8586 = vst [vmem:[#allocation48_spill] sm:$0xff] %v7695_v30  ;;  %v3172_v17 = vpop.permute.xlu1 %3171 }
 0x5c6   : > { %v3177_v63 = vsel %vm1468_vm0, %v3172_v17, 0 }
 0x5c7   : > { %3186 = vmatpush.bf16.xpose.msrb.mxu0 %v3177_v63 }
 0x5ca   : > { %2606 = vadd.xlane.f32.xlu1 %v2605_v53  ;;  %v7712_v53 = vpop.f32.mrf.mxu1 }
 0x5cc   : > { %v7702_v39 = vpop.f32.mrf.mxu2  ;;  %v3068_v63 = vpop.f32.mrf.mxu0 }
 0x5cd   : > { %8587 = vst [vmem:[#allocation49_spill] sm:$0xff] %v7702_v39  ;;  %v3448_v5 = vpop.permute.xlu1 %3447 }
 0x5ce   : > { %4930 = vmatmul.msk.bf16.vlgmr.msrb.gmra.mxu0 %vm1468_vm0, %v3170_v15  ;;  %3460 = vmatpush.bf16.msra.mxu1 %v3448_v5  ;;  %v3069_v15 = vadd.f32 %v7709_v38, %v3068_v63 }
 0x5cf   : > { %3435 = vmatpush.bf16.msra.mxu0 %v3423_v24 }
 0x5d2   : > { %3535 = vmatpush.bf16.msrb.mxu1 %v3523_v60  ;;  %2618 = vadd.xlane.f32.xlu1 %v2617_v14  ;;  %v7720_v60 = vunpack.c.h.bf16 %v5069_v44  ;;  %v7724_v14 = vadd.f32 %v6999_v59, %v3069_v15 }
 0x5d3   : > { %3510 = vmatpush.bf16.msrb.mxu0 %v3498_v9 }
 0x5d4   : > { %v3164_v24 = vpop.f32.mrf.mxu2  ;;  %v3257_v63 = vsel %vm1731_vm6, %v7724_v14, -inf  ;;  %v3070_v2 = vpop.f32.mrf.mxu0 }
 0x5d5   : > { %v3165_v17 = vadd.f32 %v7709_v38, %v3164_v24  ;;  %v7726_v24 = vpop.f32.mrf.mxu1  ;;  %v3071_v58 = vadd.f32 %v7720_v60, %v3070_v2 }
 0x5d7   : > { %v7715_v39 = vadd.f32 %v7051_v55, %v3165_v17 }
 0x5d9   : > { %v3281_v5 = vsel %vm1731_vm6, %v7715_v39, -inf }
 0x5da   : > { %3282 = vmax.xlane.f32.xlu1 %v3281_v5 }
 0x5dc   : > { %v3166_v46 = vpop.f32.mrf.mxu2 }
 0x5dd   : > { %v3167_v9 = vadd.f32 %v7720_v60, %v3166_v46  ;;  %v7735_v44 = vpop.f32.mrf.mxu1 }
 0x5df   : > { %v7729_v30 = vadd.f32 %v7059_v48, %v3167_v9 }
 0x5e1   : > { %v3284_v17 = vsel %vm1731_vm6, %v7729_v30, -inf }
 0x5e2   : > { %3285 = vmax.xlane.f32.xlu0 %v3284_v17  ;;  %3258 = vmax.xlane.f32.xlu1 %v3257_v63 }
 0x5f1   : > { %v7737_v5 = vpop.f32.mrf.mxu1 }
 0x5f9   : > { %v7739_v46 = vpop.f32.mrf.mxu1 }
 0x5fe   : > { %v3236_v15 = vpop.f32.mrf.mxu2 }
 0x5ff   : > { %v3237_v22 = vadd.f32 %v7709_v38, %v3236_v15 }
 0x601   : > { %v3092_v32 = vpop.f32.mrf.mxu1  ;;  %v7743_v9 = vadd.f32 %v7220_v62, %v3237_v22  ;;  %v7780_v62 = vpop.permute.xlu1 %3572 }
 0x602   : > { %v3093_v25 = vadd.f32 %v7709_v38, %v3092_v32 }
 0x603   : > { %v3299_v17 = vsel %vm1731_vm6, %v7743_v9, -inf }
 0x604   : > { %3300 = vmax.xlane.f32.xlu0 %v3299_v17  ;;  %v7749_v63 = vadd.f32 %v7017_v43, %v3093_v25  ;;  %v7760_v17 = vadd.f32 %v7009_v31, %v3071_v58  ;;  %v2638_v58 = vsel %vm1731_vm6, %v7555_v34, 0.0 }
 0x606   : > { %v3238_v23 = vpop.f32.mrf.mxu2  ;;  %v3263_v15 = vsel %vm1731_vm6, %v7749_v63, -inf }
 0x607   : > { %v3239_v50 = vadd.f32 %v7720_v60, %v3238_v23  ;;  %3264 = vmax.xlane.f32.xlu2 %v3263_v15  ;;  %v3260_v23 = vsel %vm1731_vm6, %v7760_v17, -inf }
 0x609   : > { %v3094_v22 = vpop.f32.mrf.mxu1  ;;  %v7756_v32 = vadd.f32 %v7207_v35, %v3239_v50 }
 0x60a   : > { %v3095_v0 = vadd.f32 %v7720_v60, %v3094_v22 }
 0x60b   : > { %v3302_v25 = vsel %vm1731_vm6, %v7756_v32, -inf }
 0x60c   : > { %3303 = vmax.xlane.f32.xlu0 %v3302_v25  ;;  %v7765_v2 = vadd.f32 %v7025_v52, %v3095_v0 }
 0x60e   : > { %v3266_v15 = vsel %vm1731_vm6, %v7765_v2, -inf }
 0x60f   : > { %3261 = vmax.xlane.f32.xlu2 %v3260_v23  ;;  %3267 = vmax.xlane.f32.xlu1 %v3266_v15  ;;  %v2647_v23 = vsel %vm1731_vm6, %v7623_v26, 0.0  ;;  %v5021_v26 = vld [vmem:[#allocation14 + $0x10] sm:$0xff] }
 0x611   : > { %v3140_v50 = vpop.f32.mrf.mxu1 }
 0x612   : > { %v3141_v22 = vadd.f32 %v7709_v38, %v3140_v50  ;;  %v7789_v50 = vpop.permute.xlu1 %3802 }
 0x614   : > { %2639 = vadd.xlane.f32.xlu0 %v2638_v58  ;;  %v7775_v25 = vadd.f32 %v7035_v54, %v3141_v22  ;;  %v2641_v22 = vsel %vm1731_vm6, %v7567_v45, 0.0 }
 0x616   : > { %v3275_v0 = vsel %vm1731_vm6, %v7775_v25, -inf }
 0x617   : > { %3276 = vmax.xlane.f32.xlu1 %v3275_v0  ;;  %v7797_v0 = vpop.permute.xlu0 %3597 }
 0x619   : > { %v3142_v49 = vpop.f32.mrf.mxu1 }
 0x61a   : > { %v3143_v21 = vadd.f32 %v7720_v60, %v3142_v49  ;;  %v5022_v49 = vld [vmem:[#allocation14 + $0x18] sm:$0xff] }
 0x61b   : > { %2969 = vmatpush.bf16.msra.mxu3 %v5022_v49 }
 0x61c   : > { %2648 = vadd.xlane.f32.xlu0 %v2647_v23  ;;  %v7785_v15 = vadd.f32 %v7043_v7, %v3143_v21  ;;  %v2736_v21 = vpop.f32.mrf.mxu3 }
 0x61e   : > { %v3278_v34 = vsel %vm1731_vm6, %v7785_v15, -inf }
 0x61f   : > { %3279 = vmax.xlane.f32.xlu1 %v3278_v34  ;;  %2970 = vmatpush.bf16.msra.mxu3 %v5021_v26  ;;  %v2637_v34 = vpop.xlane.xlu2 %2636 }
 0x624   : > { %v2738_v45 = vpop.f32.mrf.mxu3 }
 0x627   : > { %3824 = vrot.lane.b32.xlu2 %v6519_v61, %s5853_s24  ;;  %2642 = vadd.xlane.f32.xlu1 %v2641_v22  ;;  %v2616_v61 = vpop.xlane.xlu0 %2615 }
 0x62d   : > { %v2634_v58 = vpop.xlane.xlu1 %2633 }
 0x62f   : > { %v2613_v55 = vpop.xlane.xlu0 %2612 }
 0x630   : > { %3874 = vrot.lane.b32.xlu0 %v6646_v6, %s5853_s24  ;;  %v3212_v6 = vpop.f32.mrf.mxu1 }
 0x635   : > { %v2604_v23 = vpop.xlane.xlu1 %2603 }
 0x636   : > { %5387 = vrcp.f32 %v2604_v23  ;;  %v2610_v23 = vpop.xlane.xlu2 %2609 }
 0x638   : > { %3922 = vrot.lane.b32.xlu0 %v8571_v27, %s5853_s24 }
 0x63c   : > { %v5388_v49 = vpop.eup %5387 }
 0x63d   : > { %v2607_v22 = vpop.xlane.xlu1 %2606  ;;  %v2882_v27 = vmul.f32 %v5388_v49, %v7662_v13 }
 0x63e   : > { %5389 = vrcp.f32 %v2607_v22  ;;  %v3213_v22 = vadd.f32 %v7709_v38, %v3212_v6 }
 0x63f   : > { %5391 = vrcp.f32 %v2637_v34 }
 0x640   : > { %3946 = vrot.lane.b32.xlu0 %v6928_v20, %s5853_s24  ;;  %3850 = vrot.lane.b32.xlu1 %v8560_v16, %s5853_s24  ;;  %5393 = vrcp.f32 %v2634_v58 }
 0x641   : > { %5395 = vrcp.f32 %v2610_v23 }
 0x642   : > { %v2811_v26 = vpop.f32.mrf.mxu3  ;;  %5397 = vrcp.f32 %v2613_v55 }
 0x644   : > { %v5390_v8 = vpop.eup %5389 }
 0x645   : > { %v2883_v35 = vmul.f32 %v5390_v8, %v7668_v37  ;;  %v5392_v20 = vpop.eup %5391  ;;  %v7818_v37 = vadd.f32 %v7074_v12, %v3213_v22  ;;  %v2619_v23 = vpop.xlane.xlu1 %2618 }
 0x646   : > { %v5394_v16 = vpop.eup %5393  ;;  %5399 = vrcp.f32 %v2619_v23 }
 0x647   : > { %v2914_v48 = vpack.c.bf16 %v2883_v35, %v2882_v27  ;;  %v7813_v58 = vmul.f32 %v5394_v16, %v2811_v26  ;;  %v3214_v35 = vpop.f32.mrf.mxu1  ;;  %v5396_v34 = vpop.eup %5395  ;;  %5401 = vrcp.f32 %v2616_v61 }
 0x648   : > { %3968 = vrot.lane.b32.xlu0 %v6988_v10, %s5853_s24  ;;  %3872 = vrot.lane.b32.xlu1 %v6715_v18, %s5853_s24  ;;  %v3215_v18 = vadd.f32 %v7720_v60, %v3214_v35  ;;  %v5398_v49 = vpop.eup %5397  ;;  %v2884_v55 = vmul.f32 %v5396_v34, %v7704_v19  ;;  %v7832_v27 = vpop.permute.xlu2 %3826 }
 0x649   : > { %4917 = vmatmul.msk.bf16.vlgmr.msra.gmra.mxu3 %vm1468_vm0, %v2914_v48  ;;  %v3293_v48 = vsel %vm1731_vm6, %v7818_v37, -inf  ;;  %v2885_v6 = vmul.f32 %v5398_v49, %v7712_v53  ;;  %v3116_v35 = vpop.f32.mrf.mxu0  ;;  %v7845_v61 = vpop.permute.xlu0 %3800 }
 0x64a   : > { %v2813_v13 = vpop.f32.mrf.mxu3  ;;  %v7830_v26 = vadd.f32 %v7136_v41, %v3215_v18 }
 0x64b   : > { %v7815_v8 = vmul.f32 %v5392_v20, %v2813_v13  ;;  %v2915_v20 = vpack.c.bf16 %v2885_v6, %v2884_v55 }
 0x64c   : > { %v3296_v22 = vsel %vm1731_vm6, %v7830_v26, -inf  ;;  %v5400_v19 = vpop.eup %5399 }
 0x64d   : > { %v2919_v10 = vpack.c.bf16 %v7815_v8, %v7813_v58  ;;  %v2887_v53 = vmul.f32 %v5400_v19, %v2738_v45  ;;  %v5402_v16 = vpop.eup %5401 }
 0x64e   : > { %v2886_v13 = vmul.f32 %v5402_v16, %v2736_v21 }
 0x650   : > { %3294 = vmax.xlane.f32.xlu2 %v3293_v48  ;;  %3898 = vrot.lane.b32.xlu1 %v6763_v56, %s5853_s24  ;;  %v2622_v56 = vpop.xlane.xlu2 %2621  ;;  %v2916_v18 = vpack.c.bf16 %v2887_v53, %v2886_v13 }
 0x651   : > { %v2628_v6 = vpop.xlane.xlu0 %2627 }
 0x658   : > { %3297 = vmax.xlane.f32.xlu2 %v3296_v22  ;;  %3896 = vrot.lane.b32.xlu1 %v6804_v4, %s5853_s24  ;;  %v2625_v34 = vpop.xlane.xlu2 %2624  ;;  %v3117_v4 = vadd.f32 %v7709_v38, %v3116_v35 }
 0x659   : > { %4918 = vmatmul.msk.bf16.gmra.mxu3 %vm1468_vm0, %v2915_v20  ;;  %5403 = vrcp.f32 %v2625_v34  ;;  %v3286_v53 = vpop.xlane.xlu0 %3285 }
 0x65a   : > { %5405 = vrcp.f32 %v2622_v56  ;;  %v7848_v48 = vadd.f32 %v7147_v1, %v3117_v4 }
 0x65c   : > { %v3269_v21 = vsel %vm1731_vm6, %v7848_v48, -inf }
 0x65f   : > { %v5404_v45 = vpop.eup %5403 }
 0x660   : > { %3920 = vrot.lane.b32.xlu1 %v8564_v51, %s5853_s24  ;;  %v3283_v51 = vpop.xlane.xlu1 %3282  ;;  %v2631_v49 = vpop.xlane.xlu2 %2630  ;;  %v2889_v55 = vmul.f32 %v5404_v45, %v7684_v3 }
 0x661   : > { %5407 = vrcp.f32 %v2631_v49  ;;  %v3118_v49 = vpop.f32.mrf.mxu0 }
 0x662   : > { %5409 = vrcp.f32 %v2628_v6 }
 0x668   : > { %3970 = vrot.lane.b32.xlu1 %v6979_v29, %s5853_s24  ;;  %v5406_v29 = vpop.eup %5405  ;;  %v3259_v20 = vpop.xlane.xlu1 %3258 }
 0x669   : > { %4919 = vmatmul.msk.bf16.gmra.mxu3 %vm1468_vm0, %v2916_v18  ;;  %v2888_v23 = vmul.f32 %v5406_v29, %v7675_v11  ;;  %v3305_v19 = vsub.f32 %v7724_v14, %v3259_v20  ;;  %v5408_v13 = vpop.eup %5407 }
 0x66a   : > { %v5410_v34 = vpop.eup %5409  ;;  %v2891_v11 = vmul.f32 %v5408_v13, %v7735_v44 }
 0x66b   : > { %v2917_v22 = vpack.c.bf16 %v2889_v55, %v2888_v23  ;;  %v3321_v16 = vmul.f32 1.442695, %v3305_v19  ;;  %v2890_v14 = vmul.f32 %v5410_v34, %v7726_v24  ;;  %v3314_v24 = vsub.f32 %v7729_v30, %v3286_v53 }
 0x66d   : > { %5411 = vpow2.f32 %v3321_v16  ;;  %v2918_v55 = vpack.c.bf16 %v2891_v11, %v2890_v14  ;;  %v3339_v16 = vmul.f32 1.442695, %v3314_v24 }
 0x670   : > { %3848 = vrot.lane.b32.xlu2 %v8563_v42, %s5853_s24 }
 0x672   : > { %3270 = vmax.xlane.f32.xlu0 %v3269_v21 }
 0x673   : > { %v7867_v44 = vpop.eup %5411 }
 0x677   : > { %v7863_v21 = vpop.xlane.xlu0 %3300 }
 0x679   : > { %4920 = vmatmul.msk.bf16.gmra.mxu3 %vm1468_vm0, %v2917_v22  ;;  %v3313_v22 = vsub.f32 %v7715_v39, %v3283_v51 }
 0x67a   : > { %v3265_v56 = vpop.xlane.xlu2 %3264 }
 0x67b   : > { %v3307_v42 = vsub.f32 %v7749_v63, %v3265_v56  ;;  %v3337_v53 = vmul.f32 1.442695, %v3313_v22 }
 0x67d   : > { %v3325_v35 = vmul.f32 1.442695, %v3307_v42 }
 0x67f   : > { %5413 = vpow2.f32 %v3325_v35 }
 0x682   : > { %v3262_v3 = vpop.xlane.xlu2 %3261  ;;  %v3268_v18 = vpop.xlane.xlu1 %3267 }
 0x683   : > { %v3306_v4 = vsub.f32 %v7760_v17, %v3262_v3  ;;  %v3308_v45 = vsub.f32 %v7765_v2, %v3268_v18  ;;  %v3119_v17 = vadd.f32 %v7720_v60, %v3118_v49  ;;  %v2644_v49 = vsel %vm1731_vm6, %v7615_v33, 0.0 }
 0x684   : > { %v3319_v33 = vsub.f32 %v7743_v9, %v7863_v21 }
 0x685   : > { %v3323_v63 = vmul.f32 1.442695, %v3306_v4  ;;  %v3327_v29 = vmul.f32 1.442695, %v3308_v45  ;;  %v7871_v2 = vpop.eup %5413  ;;  %v7881_v56 = vadd.f32 %v7107_v28, %v3119_v17 }
 0x686   : > { %4198 = vrot.lane.b32.xlu0 %v8573_v40, %s5853_s24  ;;  %v3401_v40 = vpack.c.bf16 %v7867_v44, %v7867_v44  ;;  %v3403_v19 = vpack.c.bf16 %v7871_v2, %v7871_v2  ;;  %v3349_v22 = vmul.f32 1.442695, %v3319_v33 }
 0x687   : > { %5415 = vpow2.f32 %v3323_v63  ;;  %v3272_v18 = vsel %vm1731_vm6, %v7881_v56, -inf }
 0x688   : > { %5417 = vpow2.f32 %v3327_v29  ;;  %v3419_v13 = vunpack.c.l.b16 %v3401_v40  ;;  %v3444_v34 = vunpack.c.l.b16 %v3403_v19 }
 0x689   : > { %4921 = vmatmul.msk.bf16.gmra.mxu3 %vm1468_vm0, %v2918_v55  ;;  %5419 = vpow2.f32 %v3339_v16 }
 0x68a   : > { %v3277_v6 = vpop.xlane.xlu1 %3276 }
 0x68b   : > { %v3311_v23 = vsub.f32 %v7775_v25, %v3277_v6  ;;  %v3304_v25 = vpop.xlane.xlu0 %3303 }
 0x68d   : > { %v7878_v20 = vpop.eup %5415  ;;  %v3333_v51 = vmul.f32 1.442695, %v3311_v23 }
 0x68e   : > { %v7885_v42 = vpop.eup %5417  ;;  %v3402_v30 = vpack.c.bf16 %v7878_v20, %v7878_v20 }
 0x68f   : > { %v3404_v39 = vpack.c.bf16 %v7885_v42, %v7885_v42  ;;  %5421 = vpow2.f32 %v3333_v51  ;;  %v7898_v29 = vpop.eup %5419  ;;  %v3808_v51 = vsel %vm1468_vm0, %v7789_v50, 0 }
 0x690   : > { %v3420_v35 = vunpack.c.l.b16 %v3402_v30  ;;  %5423 = vpow2.f32 %v3337_v53  ;;  %v3410_v24 = vpack.c.bf16 %v7898_v29, %v7898_v29  ;;  %v3832_v53 = vsel %vm1468_vm0, %v7832_v27, 0 }
 0x691   : > { %v3445_v3 = vunpack.c.l.b16 %v3404_v39 }
 0x692   : > { %v3421_v11 = vpack.c.b16 %v3420_v35, %v3419_v13  ;;  %3273 = vmax.xlane.f32.xlu1 %v3272_v18  ;;  %v3280_v4 = vpop.xlane.xlu1 %3279 }
 0x693   : > { %v3446_v45 = vpack.c.b16 %v3445_v3, %v3444_v34  ;;  %v3312_v14 = vsub.f32 %v7785_v15, %v3280_v4  ;;  %v2640_v17 = vpop.xlane.xlu0 %2639  ;;  %v8588_v4 = vld [vmem:[#allocation32_spill] sm:$0xff] }
 0x694   : > { %4933 = vmatmul.msk.bf16.vlgmr.msra.gmra.mxu0 %vm1731_vm6, %v3421_v11 }
 0x695   : > { %v3335_v63 = vmul.f32 1.442695, %v3312_v14  ;;  %4934 = vmatmul.msk.bf16.vlgmr.msra.gmra.mxu1 %vm1731_vm6, %v3446_v45  ;;  %3585 = vmatpush.bf16.msra.mxu0 %v7780_v62  ;;  %v7902_v55 = vpop.eup %5421  ;;  %v3320_v62 = vsub.f32 %v7756_v32, %v3304_v25 }
 0x696   : > { %3610 = vmatpush.bf16.msra.mxu1 %v7797_v0  ;;  %v7908_v15 = vpop.eup %5423  ;;  %v3407_v6 = vpack.c.bf16 %v7902_v55, %v7902_v55 }
 0x697   : > { %5425 = vpow2.f32 %v3335_v63  ;;  %v3409_v58 = vpack.c.bf16 %v7908_v15, %v7908_v15  ;;  %v3351_v8 = vmul.f32 1.442695, %v3320_v62 }
 0x698   : > { %v3494_v40 = vunpack.c.l.b16 %v3407_v6 }
 0x699   : > { %2645 = vadd.xlane.f32.xlu2 %v2644_v49  ;;  %4922 = vmatmul.msk.bf16.gmra.mxu3 %vm1468_vm0, %v2919_v10  ;;  %v3520_v10 = vunpack.c.l.b16 %v3410_v24  ;;  %v3519_v30 = vunpack.c.l.b16 %v3409_v58 }
 0x69a   : > { %v2643_v0 = vpop.xlane.xlu1 %2642 }
 0x69b   : > { %5427 = vrcp.f32 %v2643_v0  ;;  %v3521_v25 = vpack.c.b16 %v3520_v10, %v3519_v30  ;;  %v7931_v35 = vpop.xlane.xlu0 %2648  ;;  %v3825_v0 = vpop.permute.xlu2 %3824 }
 0x69c   : > { %5429 = vrcp.f32 %v2640_v17  ;;  %v8589_v17 = vld [vmem:[#allocation27_spill] sm:$0xff] }
 0x69d   : > { %v7917_v23 = vpop.eup %5425  ;;  %5431 = vpow2.f32 %v3351_v8 }
 0x69e   : > { %v3408_v32 = vpack.c.bf16 %v7917_v23, %v7917_v23  ;;  %5433 = vpow2.f32 %v3349_v22 }
 0x6a0   : > { %v3495_v19 = vunpack.c.l.b16 %v3408_v32 }
 0x6a1   : > { %v5428_v16 = vpop.eup %5427 }
 0x6a2   : > { %v5430_v9 = vpop.eup %5429  ;;  %v3496_v21 = vpack.c.b16 %v3495_v19, %v3494_v40  ;;  %v2895_v39 = vmul.f32 %v5428_v16, %v7700_v57 }
 0x6a3   : > { %v2894_v13 = vmul.f32 %v5430_v9, %v7693_v36  ;;  %v7933_v3 = vpop.eup %5431  ;;  %v3875_v27 = vpop.permute.xlu0 %3874 }
 0x6a4   : > { %4936 = vmatmul.msk.bf16.vlgmr.msrb.gmra.mxu0 %vm1731_vm6, %v3496_v21  ;;  %v7936_v57 = vpop.eup %5433  ;;  %v3416_v50 = vpack.c.bf16 %v7933_v3, %v7933_v3  ;;  %v3880_v63 = vsel %vm1468_vm0, %v3875_v27, 0 }
 0x6a5   : > { %4937 = vmatmul.msk.bf16.vlgmr.msrb.gmra.mxu1 %vm1731_vm6, %v3521_v25  ;;  %3817 = vmatpush.bf16.xpose.msrb.mxu0 %v3808_v51  ;;  %v2920_v34 = vpack.c.bf16 %v2895_v39, %v2894_v13  ;;  %v3415_v36 = vpack.c.bf16 %v7936_v57, %v7936_v57 }
 0x6a6   : > { %3841 = vmatpush.bf16.xpose.msrb.mxu1 %v3832_v53  ;;  %v3595_v18 = vunpack.c.l.b16 %v3416_v50 }
 0x6a7   : > { %v3594_v11 = vunpack.c.l.b16 %v3415_v36 }
 0x6a9   : > { %4923 = vmatmul.msk.bf16.gmra.mxu3 %vm1468_vm0, %v2920_v34  ;;  %v3596_v14 = vpack.c.b16 %v3595_v18, %v3594_v11 }
 0x6ab   : > { %4223 = vrot.lane.b32.xlu1 %v8561_v47, %s5853_s24  ;;  %v3923_v49 = vpop.permute.xlu0 %3922 }
 0x6ac   : > { %v3928_v50 = vsel %vm1468_vm0, %v3923_v49, 0 }
 0x6b1   : > { %3944 = vrot.lane.b32.xlu2 %v8588_v4, %s5853_s24 }
 0x6b2   : > { %v3851_v45 = vpop.permute.xlu1 %3850 }
 0x6b3   : > { %v3947_v24 = vpop.permute.xlu0 %3946  ;;  %v3856_v13 = vsel %vm1468_vm0, %v3851_v45, 0 }
 0x6b4   : > { %v3952_v32 = vsel %vm1468_vm0, %v3947_v24, 0 }
 0x6b5   : > { %4940 = vmatmul.msk.bf16.vlgmr.msra.gmra.mxu1 %vm1731_vm6, %v3596_v14 }
 0x6b6   : > { %3889 = vmatpush.bf16.xpose.msra.mxu1 %v3880_v63 }
 0x6b9   : > { %4173 = vrot.lane.b32.xlu2 %v8589_v17, %s5853_s24 }
 0x6ba   : > { %v3873_v62 = vpop.permute.xlu1 %3872 }
 0x6bb   : > { %v3969_v34 = vpop.permute.xlu0 %3968 }
 0x6c1   : > { %3472 = vrot.lane.b32.xlu2 %v8561_v47, %s5852_s25 }
 0x6c2   : > { %v3899_v33 = vpop.permute.xlu1 %3898 }
 0x6c3   : > { %v3904_v6 = vsel %vm1468_vm0, %v3899_v33, 0  ;;  %v3295_v58 = vpop.xlane.xlu2 %3294 }
 0x6c4   : > { %v3317_v8 = vsub.f32 %v7818_v37, %v3295_v58  ;;  %3913 = vmatpush.bf16.xpose.msrb.mxu3 %v3904_v6 }
 0x6c5   : > { %4958 = vmatmul.msk.bf16.vlgmr.msrb.gmra.mxu1 %vm1468_vm0, %v3825_v0 }
 0x6c6   : > { %3961 = vmatpush.bf16.xpose.msrb.mxu1 %v3952_v32  ;;  %v3345_v10 = vmul.f32 1.442695, %v3317_v8 }
 0x6c8   : > { %5435 = vpow2.f32 %v3345_v10  ;;  %v3188_v10 = vpop.f32.mrf.mxu0 }
 0x6ca   : > { %v7956_v22 = vpop.permute.xlu1 %3896 }
 0x6cb   : > { %v3298_v40 = vpop.xlane.xlu2 %3297 }
 0x6cc   : > { %v3318_v47 = vsub.f32 %v7830_v26, %v3298_v40 }
 0x6ce   : > { %v3347_v19 = vmul.f32 1.442695, %v3318_v47  ;;  %v7959_v16 = vpop.eup %5435 }
 0x6cf   : > { %v3413_v37 = vpack.c.bf16 %v7959_v16, %v7959_v16 }
 0x6d0   : > { %5437 = vpow2.f32 %v3347_v19 }
 0x6d1   : > { %v3569_v25 = vunpack.c.l.b16 %v3413_v37  ;;  %5439 = vrcp.f32 %v7931_v35 }
 0x6d2   : > { %v3921_v30 = vpop.permute.xlu1 %3920 }
 0x6d3   : > { %v3849_v18 = vpop.permute.xlu2 %3848 }
 0x6d5   : > { %4960 = vmatmul.msk.bf16.vlgmr.msra.gmra.mxu1 %vm1468_vm0, %v3873_v62 }
 0x6d6   : > { %v7964_v9 = vpop.eup %5437 }
 0x6d7   : > { %v3414_v21 = vpack.c.bf16 %v7964_v9, %v7964_v9  ;;  %v5440_v63 = vpop.eup %5439 }
 0x6d8   : > { %v2897_v24 = vmul.f32 %v5440_v63, %v7739_v46  ;;  %v3189_v63 = vadd.f32 %v7709_v38, %v3188_v10 }
 0x6d9   : > { %v3570_v39 = vunpack.c.l.b16 %v3414_v21 }
 0x6da   : > { %v3971_v51 = vpop.permute.xlu1 %3970 }
 0x6db   : > { %v3571_v53 = vpack.c.b16 %v3570_v39, %v3569_v25  ;;  %v3976_v26 = vsel %vm1468_vm0, %v3971_v51, 0  ;;  %v8008_v51 = vpop.f32.mrf.mxu0 }
 0x6dc   : > { %3985 = vmatpush.bf16.xpose.msra.mxu3 %v3976_v26 }
 0x6dd   : > { %4939 = vmatmul.msk.bf16.vlgmr.msra.gmra.mxu0 %vm1731_vm6, %v3571_v53 }
 0x6de   : > { %3865 = vmatpush.bf16.xpose.msra.mxu0 %v3856_v13 }
 0x6e5   : > { %v3271_v36 = vpop.xlane.xlu0 %3270 }
 0x6e6   : > { %v3309_v14 = vsub.f32 %v7848_v48, %v3271_v36 }
 0x6e8   : > { %v3329_v0 = vmul.f32 1.442695, %v3309_v14 }
 0x6ed   : > { %4957 = vmatmul.msk.bf16.vlgmr.msrb.gmra.mxu0 %vm1468_vm0, %v7845_v61  ;;  %v7979_v61 = vpop.f32.mrf.mxu3 }
 0x6ee   : > { %3937 = vmatpush.bf16.xpose.msrb.mxu0 %v3928_v50 }
 0x6f5   : > { %v7991_v58 = vpop.f32.mrf.mxu3 }
 0x6f6   : > { %8590 = vst [vmem:[#allocation32_spill] sm:$0xff] %v7991_v58 }
 0x6f8   : > { %v4199_v27 = vpop.permute.xlu0 %4198 }
 0x6f9   : > { %4211 = vmatpush.bf16.msra.mxu1 %v4199_v27  ;;  %v5073_v27 = vld [vmem:[#allocation11 + $0x18] sm:$0xff]  }
 0x6fd   : > { %4959 = vmatmul.msk.bf16.vlgmr.msra.gmra.mxu0 %vm1468_vm0, %v3849_v18  ;;  %v8001_v37 = vpop.f32.mrf.mxu3 }
 0x6fe   : > { %8591 = vst [vmem:[#allocation27_spill] sm:$0xff] %v8001_v37 }
 0x705   : > { %v3274_v11 = vpop.xlane.xlu1 %3273  ;;  %v8010_v53 = vpop.f32.mrf.mxu3 }
 0x706   : > { %v3310_v45 = vsub.f32 %v7881_v56, %v3274_v11  ;;  %8592 = vst [vmem:[#allocation50_spill] sm:$0xff] %v8010_v53 }
 0x708   : > { %v3331_v49 = vmul.f32 1.442695, %v3310_v45 }
 0x70c   : > { %v2646_v4 = vpop.xlane.xlu2 %2645 }
 0x70d   : > { %5441 = vrcp.f32 %v2646_v4  ;;  %4962 = vmatmul.msk.bf16.vlgmr.msrb.gmra.mxu0 %vm1468_vm0, %v3921_v30  ;;  %v8017_v50 = vpop.f32.mrf.mxu3 }
 0x70e   : > { %5443 = vpow2.f32 %v3331_v49  ;;  %8593 = vst [vmem:[#allocation51_spill] sm:$0xff] %v8017_v50 }
 0x70f   : > { %5445 = vpow2.f32 %v3329_v0  ;;  %v8595_v0 = vld [vmem:[#allocation38_spill] sm:$0xff] }
 0x711   : > { %v8014_v13 = vpop.f32.mrf.mxu0 }
 0x712   : > { %v7981_v17 = vpop.f32.mrf.mxu1 }
 0x713   : > { %v5442_v62 = vpop.eup %5441 }
 0x714   : > { %v2896_v35 = vmul.f32 %v5442_v62, %v7737_v5  ;;  %v3945_v33 = vpop.permute.xlu2 %3944  ;;  %v7989_v6 = vpop.eup %5443 }
 0x715   : > { %4963 = vmatmul.msk.bf16.vlgmr.msrb.gmra.mxu1 %vm1468_vm0, %v3945_v33  ;;  %v7993_v32 = vpop.eup %5445  ;;  %v3406_v5 = vpack.c.bf16 %v7989_v6, %v7989_v6  ;;  %v8025_v4 = vpop.f32.mrf.mxu3 }
 0x716   : > { %v2921_v56 = vpack.c.bf16 %v2897_v24, %v2896_v35  ;;  %v3405_v46 = vpack.c.bf16 %v7993_v32, %v7993_v32  ;;  %8594 = vst [vmem:[#allocation52_spill] sm:$0xff] %v8025_v4  ;;  %v8037_v24 = vadd.f32 %v8595_v0, %v3189_v63 }
 0x717   : > { %v3470_v40 = vunpack.c.l.b16 %v3406_v5 }
 0x718   : > { %4924 = vmatmul.msk.bf16.gmra.mxu3 %vm1468_vm0, %v2921_v56  ;;  %v3469_v19 = vunpack.c.l.b16 %v3405_v46  ;;  %v3287_v33 = vsel %vm1731_vm6, %v8037_v24, -inf }
 0x719   : > { %v8021_v18 = vpop.f32.mrf.mxu0 }
 0x71a   : > { %v7987_v48 = vpop.f32.mrf.mxu1  ;;  %v3471_v21 = vpack.c.b16 %v3470_v40, %v3469_v19 }
 0x71c   : > { %v4174_v8 = vpop.permute.xlu2 %4173 }
 0x71d   : > { %4186 = vmatpush.bf16.msra.mxu0 %v4174_v8  ;;  %v4224_v25 = vpop.permute.xlu1 %4223  ;;  %v8039_v35 = vpop.f32.mrf.mxu3  ;;  %v8047_v8 = vunpack.c.h.bf16 %v5073_v27 }
 0x71e   : > { %8596 = vst [vmem:[#allocation38_spill] sm:$0xff] %v8039_v35 }
 0x721   : > { %v8034_v49 = vpop.f32.mrf.mxu0 }
 0x722   : > { %v7999_v47 = vpop.f32.mrf.mxu1 }
 0x724   : > { %v3473_v30 = vpop.permute.xlu2 %3472 }
 0x725   : > { %3485 = vmatpush.bf16.msra.mxu2 %v3473_v30  ;;  %v8045_v38 = vpop.f32.mrf.mxu3 }
 0x726   : > { %8597 = vst [vmem:[#allocation53_spill] sm:$0xff] %v8045_v38 }
 0x728   : > { %4935 = vmatmul.msk.bf16.vlgmr.msra.gmra.mxu2 %vm1731_vm6, %v3471_v21  ;;  %4961 = vmatmul.msk.bf16.vlgmr.msrb.gmra.mxu3 %vm1468_vm0, %v7956_v22  ;;  %v8023_v22 = vunpack.c.l.bf16 %v5073_v27 }
 0x729   : > { %4236 = vmatpush.bf16.msrb.mxu3 %v4224_v25 }
 0x72a   : > { %v8006_v39 = vpop.f32.mrf.mxu1 }
 0x72d   : > { %v8057_v30 = vpop.f32.mrf.mxu3 }
 0x72e   : > { %8598 = vst [vmem:[#allocation54_spill] sm:$0xff] %v8057_v30 }
 0x732   : > { %v8012_v26 = vpop.f32.mrf.mxu1 }
 0x738   : > { %4964 = vmatmul.msk.bf16.vlgmr.msra.gmra.mxu3 %vm1468_vm0, %v3969_v34 }
 0x73a   : > { %v8019_v36 = vpop.f32.mrf.mxu1 }
 0x742   : > { %v3843_v11 = vpop.f32.mrf.mxu1 }
 0x743   : > { %v3844_v45 = vadd.f32 %v8023_v22, %v3843_v11  ;;  %v8061_v11 = vpop.f32.mrf.mxu3 }
 0x744   : > { %8599 = vst [vmem:[#allocation55_spill] sm:$0xff] %v8061_v11 }
 0x745   : > { %v8029_v14 = vadd.f32 %v7017_v43, %v3844_v45  ;;  %v8043_v43 = vpop.f32.mrf.mxu0 }
 0x747   : > { %v4014_v34 = vsel %vm1731_vm6, %v8029_v14, -inf }
 0x748   : > { %4015 = vmax.xlane.f32.xlu2 %v4014_v34 }
 0x74a   : > { %v3845_v62 = vpop.f32.mrf.mxu1 }
 0x74b   : > { %v3846_v63 = vadd.f32 %v8047_v8, %v3845_v62 }
 0x750   : > { %3288 = vmax.xlane.f32.xlu2 %v3287_v33  ;;  %v8071_v33 = vadd.f32 %v7025_v52, %v3846_v63 }
 0x752   : > { %v3891_v56 = vpop.f32.mrf.mxu1  ;;  %v4017_v62 = vsel %vm1731_vm6, %v8071_v33, -inf }
 0x75a   : > { %v3893_v5 = vpop.f32.mrf.mxu1  ;;  %v8049_v46 = vpop.f32.mrf.mxu0 }
 0x75b   : > { %v3894_v10 = vadd.f32 %v8047_v8, %v3893_v5 }
 0x75d   : > { %v8053_v40 = vadd.f32 %v7043_v7, %v3894_v10  ;;  %v8074_v10 = vpop.f32.mrf.mxu3 }
 0x75e   : > { %8600 = vst [vmem:[#allocation56_spill] sm:$0xff] %v8074_v10 }
 0x75f   : > { %v4029_v19 = vsel %vm1731_vm6, %v8053_v40, -inf }
 0x760   : > { %4030 = vmax.xlane.f32.xlu2 %v4029_v19 }
 0x762   : > { %v8059_v21 = vpop.f32.mrf.mxu0 }
 0x765   : > { %v8087_v63 = vpop.f32.mrf.mxu3 }
 0x766   : > { %8601 = vst [vmem:[#allocation57_spill] sm:$0xff] %v8087_v63 }
 0x76a   : > { %v3819_v25 = vpop.f32.mrf.mxu0 }
 0x76b   : > { %v3820_v27 = vadd.f32 %v8023_v22, %v3819_v25 }
 0x76d   : > { %v8065_v45 = vadd.f32 %v6999_v59, %v3820_v27 }
 0x76f   : > { %v4008_v7 = vsel %vm1731_vm6, %v8065_v45, -inf }
 0x770   : > { %4009 = vmax.xlane.f32.xlu1 %v4008_v7  ;;  %v3892_v7 = vadd.f32 %v8023_v22, %v3891_v56  ;;  %v8103_v56 = vpop.f32.mrf.mxu3 }
 0x771   : > { %8602 = vst [vmem:[#allocation58_spill] sm:$0xff] %v8103_v56 }
 0x772   : > { %v3821_v34 = vpop.f32.mrf.mxu0 }
 0x773   : > { %v3822_v5 = vadd.f32 %v8047_v8, %v3821_v34 }
 0x775   : > { %v8077_v19 = vadd.f32 %v7009_v31, %v3822_v5 }
 0x777   : > { %v4011_v59 = vsel %vm1731_vm6, %v8077_v19, -inf }
 0x778   : > { %4012 = vmax.xlane.f32.xlu0 %v4011_v59  ;;  %4018 = vmax.xlane.f32.xlu1 %v4017_v62  ;;  %v8094_v59 = vadd.f32 %v7035_v54, %v3892_v7 }
 0x77a   : > { %v3867_v25 = vpop.f32.mrf.mxu0 }
 0x77b   : > { %v3868_v27 = vadd.f32 %v8023_v22, %v3867_v25  ;;  %v4026_v25 = vsel %vm1731_vm6, %v8094_v59, -inf }
 0x77d   : > { %v8085_v52 = vadd.f32 %v7147_v1, %v3868_v27 }
 0x77f   : > { %v4020_v31 = vsel %vm1731_vm6, %v8085_v52, -inf }
 0x780   : > { %4021 = vmax.xlane.f32.xlu0 %v4020_v31 }
 0x782   : > { %v3869_v34 = vpop.f32.mrf.mxu0 }
 0x783   : > { %v3870_v5 = vadd.f32 %v8047_v8, %v3869_v34 }
 0x785   : > { %v8097_v62 = vadd.f32 %v7107_v28, %v3870_v5  ;;  %v8111_v28 = vpop.f32.mrf.mxu3  ;;  %v8605_v5 = vld [vmem:[#allocation28_spill] sm:$0xff] }
 0x786   : > { %8603 = vst [vmem:[#allocation59_spill] sm:$0xff] %v8111_v28 }
 0x787   : > { %v4023_v1 = vsel %vm1731_vm6, %v8097_v62, -inf }
 0x788   : > { %4024 = vmax.xlane.f32.xlu1 %v4023_v1  ;;  %4027 = vmax.xlane.f32.xlu0 %v4026_v25  ;;  %v8607_v25 = vld [vmem:[#allocation34_spill] sm:$0xff] }
 0x78a   : > { %v3939_v27 = vpop.f32.mrf.mxu0 }
 0x78b   : > { %v3940_v31 = vadd.f32 %v8023_v22, %v3939_v27 }
 0x78d   : > { %v8107_v34 = vadd.f32 %v8595_v0, %v3940_v31  ;;  %v8608_v31 = vld [vmem:[#allocation36_spill] sm:$0xff] }
 0x78f   : > { %v4038_v54 = vsel %vm1731_vm6, %v8107_v34, -inf }
 0x790   : > { %4039 = vmax.xlane.f32.xlu2 %v4038_v54  ;;  %v3191_v54 = vadd.f32 %v7720_v60, %v8008_v51 }
 0x792   : > { %v3963_v51 = vpop.f32.mrf.mxu1 }
 0x79b   : > { %v8113_v7 = vpop.f32.mrf.mxu3 }
 0x79c   : > { %8604 = vst [vmem:[#allocation60_spill] sm:$0xff] %v8113_v7 }
 0x7a1   : > { %4248 = vrot.lane.b32.xlu1 %v8605_v5, %s5853_s24  ;;  %v8609_v5 = vld [vmem:[#allocation41_spill] sm:$0xff] }
 0x7a2   : > { %v8130_v28 = vadd.f32 %v8609_v5, %v3191_v54  ;;  %v3964_v54 = vadd.f32 %v8023_v22, %v3963_v51 }
 0x7a3   : > { %v8117_v1 = vpop.f32.mrf.mxu3 }
 0x7a4   : > { %8606 = vst [vmem:[#allocation28_spill] sm:$0xff] %v8117_v1  ;;  %v3941_v1 = vpop.f32.mrf.mxu0  ;;  %v3290_v11 = vsel %vm1731_vm6, %v8130_v28, -inf }
 0x7a5   : > { %v3942_v10 = vadd.f32 %v8047_v8, %v3941_v1 }
 0x7a7   : > { %v8139_v60 = vadd.f32 %v8609_v5, %v3942_v10 }
 0x7a8   : > { %3547 = vrot.lane.b32.xlu2 %v8607_v25, %s5852_s25  ;;  %s5779_s25 = scalar_lea.hbm %s8436_s9, 256 }
 0x7a9   : > { %v4041_v1 = vsel %vm1731_vm6, %v8139_v60, -inf  ;;  %p5781_p7 = scmp.lt.s32.totalorder %s5779_s25, %s5775_s28 }
 0x7ab   : > { %v3915_v27 = vpop.f32.mrf.mxu3  ;;  %p5782_p8 = por %p5781_p7, %p5780_p12 }
 0x7ad   : > { %p5783_p9 = pnand %p5782_p8, %p5778_p5 }
 0x7b3   : > { %v3917_v56 = vpop.f32.mrf.mxu3 }
 0x7b4   : > { %v3918_v0 = vadd.f32 %v8047_v8, %v3917_v56  ;;  %v3916_v56 = vadd.f32 %v8023_v22, %v3915_v27  ;;  %v8150_v27 = vadd.f32 %v7074_v12, %v3964_v54  ;;  %v3353_v12 = vsel %vm1731_vm6, %v7867_v44, 0.0  ;;  %v8613_v44 = vld [vmem:[#allocation23_spill] sm:$0xff] }
 0x7b6   : > { %v8123_v63 = vadd.f32 %v8608_v31, %v3918_v0  ;;  %v8610_v31 = vld [vmem:[#allocation35_spill] sm:$0xff]  ;;  %v4044_v5 = vsel %vm1731_vm6, %v8150_v27, -inf }
 0x7b8   : > { %v4035_v7 = vsel %vm1731_vm6, %v8123_v63, -inf }
 0x7b9   : > { %4036 = vmax.xlane.f32.xlu0 %v4035_v7  ;;  %v8142_v7 = vadd.f32 %v8610_v31, %v3916_v56  ;;  %v8611_v56 = vld [vmem:[#allocation39_spill] sm:$0xff] }
 0x7bb   : > { %v8136_v0 = vpop.f32.mrf.mxu3  ;;  %v4016_v54 = vpop.xlane.xlu2 %4015 }
 0x7c1   : > { %3291 = vmax.xlane.f32.xlu0 %v3290_v11  ;;  %v4032_v11 = vsel %vm1731_vm6, %v8142_v7, -inf }
 0x7c3   : > { %v3989_v30 = vpop.f32.mrf.mxu3 }
 0x7c4   : > { %v3990_v10 = vadd.f32 %v8047_v8, %v3989_v30 }
 0x7c6   : > { %v8156_v51 = vadd.f32 %v8611_v56, %v3990_v10  ;;  %v4058_v10 = vsub.f32 %v8029_v14, %v4016_v54  ;;  %v8173_v14 = vpop.xlane.xlu2 %3288 }
 0x7c8   : > { %v4053_v31 = vsel %vm1731_vm6, %v8156_v51, -inf  ;;  %v4076_v56 = vmul.f32 1.442695, %v4058_v10 }
 0x7c9   : > { %4042 = vmax.xlane.f32.xlu0 %v4041_v1 }
 0x7cb   : > { %4033 = vmax.xlane.f32.xlu1 %v4032_v11  ;;  %v8612_v11 = vld [vmem:[#allocation31_spill] sm:$0xff] }
 0x7d1   : > { %4045 = vmax.xlane.f32.xlu2 %v4044_v5 }
 0x7d9   : > { %4054 = vmax.xlane.f32.xlu2 %v4053_v31 }
 0x7dd   : > { %4298 = vrot.lane.b32.xlu0 %v8607_v25, %s5853_s24 }
 0x7e1   : > { %3354 = vadd.xlane.f32.xlu2 %v3353_v12 }
 0x7e3   : > { %v4010_v30 = vpop.xlane.xlu1 %4009 }
 0x7e4   : > { %v4056_v1 = vsub.f32 %v8065_v45, %v4010_v30  ;;  %4273 = vrot.lane.b32.xlu1 %v8612_v11, %s5853_s24 }
 0x7e6   : > { %v4072_v5 = vmul.f32 1.442695, %v4056_v1 }
 0x7e8   : > { %5447 = vpow2.f32 %v4072_v5 }
 0x7e9   : > { %5449 = vpow2.f32 %v4076_v56  ;;  %v3362_v56 = vsel %vm1731_vm6, %v7885_v42, 0.0 }
 0x7eb   : > { %v4013_v31 = vpop.xlane.xlu0 %4012  ;;  %v4019_v38 = vpop.xlane.xlu1 %4018 }
 0x7ec   : > { %v4057_v25 = vsub.f32 %v8077_v19, %v4013_v31  ;;  %v4059_v35 = vsub.f32 %v8071_v33, %v4019_v38  ;;  %4323 = vrot.lane.b32.xlu1 %v8613_v44, %s5853_s24 }
 0x7ee   : > { %v5448_v12 = vpop.eup %5447  ;;  %v4074_v45 = vmul.f32 1.442695, %v4057_v25  ;;  %v4078_v30 = vmul.f32 1.442695, %v4059_v35 }
 0x7ef   : > { %v4104_v11 = vsel %vm1731_vm6, %v5448_v12, 0.0  ;;  %v8175_v54 = vpop.eup %5449  ;;  %v4152_v19 = vpack.c.bf16 %v5448_v12, %v5448_v12  ;;  %v3965_v12 = vpop.f32.mrf.mxu1 }
 0x7f0   : > { %5451 = vpow2.f32 %v4074_v45  ;;  %4105 = vadd.xlane.f32.xlu2 %v4104_v11  ;;  %v4154_v10 = vpack.c.bf16 %v8175_v54, %v8175_v54  ;;  %v3966_v42 = vadd.f32 %v8047_v8, %v3965_v12 }
 0x7f1   : > { %5453 = vpow2.f32 %v4078_v30  ;;  %v4170_v25 = vunpack.c.l.b16 %v4152_v19 }
 0x7f2   : > { %v4195_v30 = vunpack.c.l.b16 %v4154_v10 }
 0x7f3   : > { %v4022_v1 = vpop.xlane.xlu0 %4021 }
 0x7f4   : > { %v4060_v38 = vsub.f32 %v8085_v52, %v4022_v1  ;;  %v4031_v52 = vpop.xlane.xlu2 %4030 }
 0x7f5   : > { %v4063_v19 = vsub.f32 %v8053_v40, %v4031_v52  ;;  %v8614_v52 = vld [vmem:[#allocation40_spill] sm:$0xff] }
 0x7f6   : > { %v8178_v33 = vpop.eup %5451  ;;  %v4080_v45 = vmul.f32 1.442695, %v4060_v38 }
 0x7f7   : > { %v5454_v5 = vpop.eup %5453  ;;  %v4153_v35 = vpack.c.bf16 %v8178_v33, %v8178_v33 }
 0x7f8   : > { %v4155_v31 = vpack.c.bf16 %v5454_v5, %v5454_v5  ;;  %3363 = vadd.xlane.f32.xlu2 %v3362_v56  ;;  %5455 = vpow2.f32 %v4080_v45  ;;  %v4113_v10 = vsel %vm1731_vm6, %v5454_v5, 0.0  ;;  %v8194_v56 = vadd.f32 %v7136_v41, %v3966_v42 }
 0x7f9   : > { %v4171_v44 = vunpack.c.l.b16 %v4153_v35  ;;  %v3988_v45 = vadd.f32 %v8023_v22, %v8136_v0  ;;  %v3374_v0 = vsel %vm1731_vm6, %v7917_v23, 0.0  ;;  %v3315_v23 = vsub.f32 %v8037_v24, %v8173_v14 }
 0x7fa   : > { %v4196_v11 = vunpack.c.l.b16 %v4155_v31 }
 0x7fb   : > { %v4172_v1 = vpack.c.b16 %v4171_v44, %v4170_v25  ;;  %v4028_v4 = vpop.xlane.xlu0 %4027  ;;  %v4025_v50 = vpop.xlane.xlu1 %4024 }
 0x7fc   : > { %v4197_v53 = vpack.c.b16 %v4196_v11, %v4195_v30  ;;  %v4062_v37 = vsub.f32 %v8094_v59, %v4028_v4  ;;  %v4061_v58 = vsub.f32 %v8097_v62, %v4025_v50  ;;  %v4086_v4 = vmul.f32 1.442695, %v4063_v19 }
 0x7fd   : > { %4965 = vmatmul.msk.bf16.vlgmr.msra.gmra.mxu0 %vm1731_vm6, %v4172_v1  ;;  %v8217_v11 = vadd.f32 %v8614_v52, %v3988_v45 }
 0x7fe   : > { %v4082_v38 = vmul.f32 1.442695, %v4061_v58  ;;  %4966 = vmatmul.msk.bf16.vlgmr.msra.gmra.mxu1 %vm1731_vm6, %v4197_v53  ;;  %v4084_v35 = vmul.f32 1.442695, %v4062_v37  ;;  %v8196_v50 = vpop.eup %5455  ;;  %v4047_v58 = vsel %vm1731_vm6, %v8194_v56, -inf  ;;  %v3368_v37 = vsel %vm1731_vm6, %v7989_v6, 0.0 }
 0x7ff   : > { %v4156_v8 = vpack.c.bf16 %v8196_v50, %v8196_v50  ;;  %v4050_v22 = vsel %vm1731_vm6, %v8217_v11, -inf }
 0x800   : > { %4114 = vadd.xlane.f32.xlu2 %v4113_v10  ;;  %5457 = vpow2.f32 %v4082_v38  ;;  %v8615_v10 = vld [vmem:[#allocation37_spill] sm:$0xff] }
 0x801   : > { %5459 = vpow2.f32 %v4084_v35  ;;  %v4220_v62 = vunpack.c.l.b16 %v4156_v8  ;;  %v3356_v35 = vsel %vm1731_vm6, %v7878_v20, 0.0  ;;  %v4107_v8 = vsel %vm1731_vm6, %v8178_v33, 0.0 }
 0x802   : > { %5461 = vpow2.f32 %v4086_v4  ;;  %v3377_v4 = vsel %vm1731_vm6, %v7908_v15, 0.0 }
 0x803   : > { %v4040_v59 = vpop.xlane.xlu2 %4039 }
 0x804   : > { %v4066_v20 = vsub.f32 %v8107_v34, %v4040_v59 }
 0x806   : > { %v5458_v53 = vpop.eup %5457  ;;  %v4092_v15 = vmul.f32 1.442695, %v4066_v20 }
 0x807   : > { %4048 = vmax.xlane.f32.xlu0 %v4047_v58  ;;  %v4157_v40 = vpack.c.bf16 %v5458_v53, %v5458_v53  ;;  %v8204_v41 = vpop.eup %5459  ;;  %v4119_v30 = vsel %vm1731_vm6, %v5458_v53, 0.0 }
 0x808   : > { %3369 = vadd.xlane.f32.xlu2 %v3368_v37  ;;  %v8206_v25 = vpop.eup %5461  ;;  %v4158_v12 = vpack.c.bf16 %v8204_v41, %v8204_v41  ;;  %v4110_v37 = vsel %vm1731_vm6, %v8175_v54, 0.0 }
 0x809   : > { %v4221_v5 = vunpack.c.l.b16 %v4157_v40  ;;  %v4159_v6 = vpack.c.bf16 %v8206_v25, %v8206_v25 }
 0x80a   : > { %v4245_v1 = vunpack.c.l.b16 %v4158_v12 }
 0x80b   : > { %v3548_v31 = vpop.permute.xlu2 %3547  ;;  %v4222_v44 = vpack.c.b16 %v4221_v5, %v4220_v62  ;;  %v4246_v42 = vunpack.c.l.b16 %v4159_v6  ;;  %v3341_v62 = vmul.f32 1.442695, %v3315_v23 }
 0x80c   : > { %3560 = vmatpush.bf16.msrb.mxu2 %v3548_v31  ;;  %v3365_v31 = vsel %vm1731_vm6, %v7993_v32, 0.0 }
 0x80d   : > { %4967 = vmatmul.msk.bf16.vlgmr.msrb.gmra.mxu3 %vm1731_vm6, %v4222_v44  ;;  %v4247_v38 = vpack.c.b16 %v4246_v42, %v4245_v1 }
 0x810   : > { %4120 = vadd.xlane.f32.xlu2 %v4119_v30 }
 0x813   : > { %v4249_v19 = vpop.permute.xlu1 %4248 }
 0x814   : > { %4261 = vmatpush.bf16.msrb.mxu0 %v4249_v19 }
 0x816   : > { %4051 = vmax.xlane.f32.xlu1 %v4050_v22 }
 0x817   : > { %4968 = vmatmul.msk.bf16.vlgmr.msrb.gmra.mxu0 %vm1731_vm6, %v4247_v38 }
 0x818   : > { %3375 = vadd.xlane.f32.xlu2 %v3374_v0  ;;  %v3371_v0 = vsel %vm1731_vm6, %v7902_v55, 0.0  ;;  %v4122_v55 = vsel %vm1731_vm6, %v8204_v41, 0.0  ;;  %v3380_v41 = vsel %vm1731_vm6, %v7898_v29, 0.0 }
 0x81b   : > { %4348 = vrot.lane.b32.xlu0 %v8615_v10, %s5853_s24  ;;  %v3392_v10 = vsel %vm1731_vm6, %v7964_v9, 0.0 }
 0x81e   : > { %3357 = vadd.xlane.f32.xlu1 %v3356_v35 }
 0x820   : > { %3378 = vadd.xlane.f32.xlu2 %v3377_v4 }
 0x826   : > { %4108 = vadd.xlane.f32.xlu1 %v4107_v8 }
 0x82c   : > { %v4037_v58 = vpop.xlane.xlu0 %4036 }
 0x82d   : > { %v4065_v53 = vsub.f32 %v8123_v63, %v4037_v58  ;;  %v4125_v58 = vsel %vm1731_vm6, %v8206_v25, 0.0 }
 0x82e   : > { %4111 = vadd.xlane.f32.xlu1 %v4110_v37 }
 0x82f   : > { %v4090_v40 = vmul.f32 1.442695, %v4065_v53 }
 0x831   : > { %5463 = vpow2.f32 %v4090_v40 }
 0x832   : > { %5465 = vpow2.f32 %v3341_v62  ;;  %v3395_v62 = vsel %vm1731_vm6, %v7936_v57, 0.0 }
 0x833   : > { %5467 = vpow2.f32 %v4092_v15 }
 0x834   : > { %v3292_v5 = vpop.xlane.xlu0 %3291 }
 0x835   : > { %v3316_v33 = vsub.f32 %v8130_v28, %v3292_v5  ;;  %v4116_v28 = vsel %vm1731_vm6, %v8196_v50, 0.0  ;;  %v3359_v50 = vsel %vm1731_vm6, %v7871_v2, 0.0 }
 0x836   : > { %3366 = vadd.xlane.f32.xlu1 %v3365_v31 }
 0x837   : > { %v5464_v24 = vpop.eup %5463  ;;  %v3343_v63 = vmul.f32 1.442695, %v3316_v33 }
 0x838   : > { %v4131_v14 = vsel %vm1731_vm6, %v5464_v24, 0.0  ;;  %v8242_v34 = vpop.eup %5465  ;;  %v4161_v25 = vpack.c.bf16 %v5464_v24, %v5464_v24 }
 0x839   : > { %5469 = vpow2.f32 %v3343_v63  ;;  %4132 = vadd.xlane.f32.xlu2 %v4131_v14  ;;  %v5468_v59 = vpop.eup %5467  ;;  %v3411_v32 = vpack.c.bf16 %v8242_v34, %v8242_v34  ;;  %v3383_v29 = vsel %vm1731_vm6, %v8242_v34, 0.0 }
 0x83a   : > { %v4134_v1 = vsel %vm1731_vm6, %v5468_v59, 0.0  ;;  %v4162_v4 = vpack.c.bf16 %v5468_v59, %v5468_v59  ;;  %v4271_v33 = vunpack.c.l.b16 %v4161_v25 }
 0x83b   : > { %v3544_v42 = vunpack.c.l.b16 %v3411_v32 }
 0x83c   : > { %v4043_v54 = vpop.xlane.xlu0 %4042  ;;  %v4295_v37 = vunpack.c.l.b16 %v4162_v4 }
 0x83d   : > { %v4067_v44 = vsub.f32 %v8139_v60, %v4043_v54 }
 0x83e   : > { %4117 = vadd.xlane.f32.xlu1 %v4116_v28  ;;  %v4034_v45 = vpop.xlane.xlu1 %4033  ;;  %v3389_v28 = vsel %vm1731_vm6, %v7959_v16, 0.0  ;;  %v5023_v16 = vld [vmem:[#allocation14 + $0x20] sm:$0xff] }
 0x83f   : > { %v5470_v12 = vpop.eup %5469  ;;  %v4094_v6 = vmul.f32 1.442695, %v4067_v44  ;;  %v4064_v30 = vsub.f32 %v8142_v7, %v4034_v45 }
 0x840   : > { %v3412_v52 = vpack.c.bf16 %v5470_v12, %v5470_v12  ;;  %v3386_v54 = vsel %vm1731_vm6, %v5470_v12, 0.0  ;;  %v3398_v12 = vsel %vm1731_vm6, %v7933_v3, 0.0 }
 0x841   : > { %5471 = vpow2.f32 %v4094_v6  ;;  %4135 = vadd.xlane.f32.xlu2 %v4134_v1  ;;  %v4088_v60 = vmul.f32 1.442695, %v4064_v30  ;;  %v5024_v30 = vld [vmem:[#allocation14 + $0x28] sm:$0xff]  ;;  %v5026_v1 = vld [vmem:[#allocation14 + $0x38] sm:$0xff] }
 0x842   : > { %v3545_v19 = vunpack.c.l.b16 %v3412_v52  ;;  %3720 = vmatpush.bf16.msra.mxu2 %v5024_v30 }
 0x843   : > { %5473 = vpow2.f32 %v4088_v60 }
 0x844   : > { %v3546_v38 = vpack.c.b16 %v3545_v19, %v3544_v42  ;;  %v4046_v22 = vpop.xlane.xlu2 %4045 }
 0x845   : > { %3360 = vadd.xlane.f32.xlu0 %v3359_v50  ;;  %v4068_v24 = vsub.f32 %v8150_v27, %v4046_v22 }
 0x846   : > { %3372 = vadd.xlane.f32.xlu1 %v3371_v0  ;;  %4938 = vmatmul.msk.bf16.vlgmr.msrb.gmra.mxu2 %vm1731_vm6, %v3546_v38  ;;  %v5025_v0 = vld [vmem:[#allocation14 + $0x30] sm:$0xff] }
 0x847   : > { %v5472_v7 = vpop.eup %5471  ;;  %v4096_v44 = vmul.f32 1.442695, %v4068_v24  ;;  %3721 = vmatpush.bf16.msra.mxu2 %v5023_v16 }
 0x848   : > { %v4163_v35 = vpack.c.bf16 %v5472_v7, %v5472_v7  ;;  %v4137_v32 = vsel %vm1731_vm6, %v5472_v7, 0.0 }
 0x849   : > { %3393 = vadd.xlane.f32.xlu2 %v3392_v10  ;;  %v5474_v2 = vpop.eup %5473 }
 0x84a   : > { %v4296_v23 = vunpack.c.l.b16 %v4163_v35  ;;  %v4160_v9 = vpack.c.bf16 %v5474_v2, %v5474_v2  ;;  %v4128_v5 = vsel %vm1731_vm6, %v5474_v2, 0.0 }
 0x84c   : > { %v4055_v8 = vpop.xlane.xlu2 %4054  ;;  %v4297_v15 = vpack.c.b16 %v4296_v23, %v4295_v37 }
 0x84d   : > { %v4071_v53 = vsub.f32 %v8156_v51, %v4055_v8  ;;  %4126 = vadd.xlane.f32.xlu0 %v4125_v58  ;;  %v4270_v51 = vunpack.c.l.b16 %v4160_v9 }
 0x84e   : > { %4123 = vadd.xlane.f32.xlu1 %v4122_v55 }
 0x84f   : > { %v4102_v20 = vmul.f32 1.442695, %v4071_v53  ;;  %v4299_v40 = vpop.permute.xlu0 %4298  ;;  %v4272_v57 = vpack.c.b16 %v4271_v33, %v4270_v51 }
 0x850   : > { %4311 = vmatpush.bf16.msra.mxu3 %v4299_v40 }
 0x851   : > { %5475 = vpow2.f32 %v4102_v20  ;;  %3396 = vadd.xlane.f32.xlu2 %v3395_v62 }
 0x852   : > { %5477 = vpow2.f32 %v4096_v44 }
 0x853   : > { %4970 = vmatmul.msk.bf16.vlgmr.msra.gmra.mxu3 %vm1731_vm6, %v4297_v15 }
 0x854   : > { %4471 = vmatpush.bf16.msrb.mxu3 %v5026_v1  ;;  %v3355_v22 = vpop.xlane.xlu2 %3354 }
 0x855   : > { %4129 = vadd.xlane.f32.xlu0 %v4128_v5 }
 0x856   : > { %3381 = vadd.xlane.f32.xlu1 %v3380_v41  ;;  %v4274_v31 = vpop.permute.xlu1 %4273 }
 0x857   : > { %v8269_v63 = vpop.eup %5475  ;;  %4286 = vmatpush.bf16.msrb.mxu1 %v4274_v31 }
 0x858   : > { %v4149_v14 = vsel %vm1731_vm6, %v8269_v63, 0.0  ;;  %v5478_v45 = vpop.eup %5477  ;;  %4472 = vmatpush.bf16.msrb.mxu3 %v5025_v0  ;;  %v4167_v2 = vpack.c.bf16 %v8269_v63, %v8269_v63 }
 0x859   : > { %4150 = vadd.xlane.f32.xlu2 %v4149_v14  ;;  %v4140_v27 = vsel %vm1731_vm6, %v5478_v45, 0.0  ;;  %v4164_v42 = vpack.c.bf16 %v5478_v45, %v5478_v45 }
 0x85a   : > { %4969 = vmatmul.msk.bf16.vlgmr.msrb.gmra.mxu1 %vm1731_vm6, %v4272_v57  ;;  %v4346_v20 = vunpack.c.l.b16 %v4167_v2 }
 0x85b   : > { %v4320_v3 = vunpack.c.l.b16 %v4164_v42 }
 0x85d   : > { %3387 = vadd.xlane.f32.xlu0 %v3386_v54 }
 0x85e   : > { %3384 = vadd.xlane.f32.xlu1 %v3383_v29  ;;  %v4324_v59 = vpop.permute.xlu1 %4323 }
 0x85f   : > { %4336 = vmatpush.bf16.msra.mxu0 %v4324_v59 }
 0x863   : > { %v4106_v8 = vpop.xlane.xlu2 %4105 }
 0x865   : > { %3390 = vadd.xlane.f32.xlu0 %v3389_v28 }
 0x866   : > { %4138 = vadd.xlane.f32.xlu1 %v4137_v32 }
 0x86b   : > { %v3364_v15 = vpop.xlane.xlu2 %3363 }
 0x86e   : > { %4141 = vadd.xlane.f32.xlu1 %v4140_v27 }
 0x873   : > { %v4115_v54 = vpop.xlane.xlu2 %4114 }
 0x876   : > { %3399 = vadd.xlane.f32.xlu1 %v3398_v12 }
 0x87a   : > { %v4049_v34 = vpop.xlane.xlu0 %4048 }
 0x87b   : > { %v4069_v6 = vsub.f32 %v8194_v56, %v4049_v34  ;;  %v4213_v29 = vpop.f32.mrf.mxu1  ;;  %v3370_v44 = vpop.xlane.xlu2 %3369 }
 0x87d   : > { %v4098_v52 = vmul.f32 1.442695, %v4069_v6 }
 0x87f   : > { %5479 = vpow2.f32 %v4098_v52 }
 0x883   : > { %v4215_v28 = vpop.f32.mrf.mxu1  ;;  %v4121_v30 = vpop.xlane.xlu2 %4120 }
 0x885   : > { %v5480_v19 = vpop.eup %5479 }
 0x886   : > { %v4165_v60 = vpack.c.bf16 %v5480_v19, %v5480_v19  ;;  %v4143_v38 = vsel %vm1731_vm6, %v5480_v19, 0.0 }
 0x887   : > { %4144 = vadd.xlane.f32.xlu0 %v4143_v38 }
 0x888   : > { %v4321_v50 = vunpack.c.l.b16 %v4165_v60 }
 0x889   : > { %v4052_v7 = vpop.xlane.xlu1 %4051 }
 0x88a   : > { %v4322_v56 = vpack.c.b16 %v4321_v50, %v4320_v3  ;;  %v4070_v10 = vsub.f32 %v8217_v11, %v4052_v7  ;;  %v4188_v11 = vpop.f32.mrf.mxu0 }
 0x88c   : > { %v4100_v35 = vmul.f32 1.442695, %v4070_v10  ;;  %4971 = vmatmul.msk.bf16.vlgmr.msra.gmra.mxu0 %vm1731_vm6, %v4322_v56  ;;  %v3376_v10 = vpop.xlane.xlu2 %3375 }
 0x88d   : > { %v4349_v4 = vpop.permute.xlu0 %4348 }
 0x88e   : > { %5481 = vpow2.f32 %v4100_v35  ;;  %4361 = vmatpush.bf16.msra.mxu1 %v4349_v4 }
 0x88f   : > { %5483 = vrcp.f32 %v3355_v22 }
 0x890   : > { %v4238_v6 = vpop.f32.mrf.mxu3 }
 0x891   : > { %v3358_v58 = vpop.xlane.xlu1 %3357 }
 0x892   : > { %5485 = vrcp.f32 %v3358_v58  ;;  %v4190_v63 = vpop.f32.mrf.mxu0  ;;  %v3487_v58 = vpop.f32.mrf.mxu2 }
 0x893   : > { %5487 = vrcp.f32 %v4106_v8 }
 0x894   : > { %v5482_v23 = vpop.eup %5481 }
 0x895   : > { %v4166_v53 = vpack.c.bf16 %v5482_v23, %v5482_v23  ;;  %v4146_v55 = vsel %vm1731_vm6, %v5482_v23, 0.0  ;;  %v5484_v37 = vpop.eup %5483 }
 0x896   : > { %4147 = vadd.xlane.f32.xlu0 %v4146_v55  ;;  %v3633_v62 = vmul.f32 %v5484_v37, %v8014_v13 }
 0x897   : > { %v4345_v40 = vunpack.c.l.b16 %v4166_v53  ;;  %v3379_v53 = vpop.xlane.xlu2 %3378 }
 0x898   : > { %v5486_v9 = vpop.eup %5485  ;;  %v4240_v19 = vpop.f32.mrf.mxu3 }
 0x899   : > { %v4347_v25 = vpack.c.b16 %v4346_v20, %v4345_v40  ;;  %v3634_v51 = vmul.f32 %v5486_v9, %v8021_v18  ;;  %v4109_v5 = vpop.xlane.xlu1 %4108  ;;  %v5488_v33 = vpop.eup %5487 }
 0x89a   : > { %5489 = vrcp.f32 %v4109_v5  ;;  %v4384_v57 = vmul.f32 %v5488_v33, %v4188_v11  ;;  %v4263_v8 = vpop.f32.mrf.mxu0  ;;  %v3489_v11 = vpop.f32.mrf.mxu2 }
 0x89b   : > { %v3665_v41 = vpack.c.bf16 %v3634_v51, %v3633_v62  ;;  %4972 = vmatmul.msk.bf16.vlgmr.msra.gmra.mxu1 %vm1731_vm6, %v4347_v25 }
 0x89d   : > { %4949 = vmatmul.msk.bf16.vlgmr.msra.gmra.mxu2 %vm1468_vm0, %v3665_v41 }
 0x8a0   : > { %v5490_v31 = vpop.eup %5489 }
 0x8a1   : > { %v4385_v14 = vmul.f32 %v5490_v31, %v4190_v63  ;;  %v4112_v24 = vpop.xlane.xlu1 %4111 }
 0x8a2   : > { %5491 = vrcp.f32 %v4112_v24  ;;  %v4265_v55 = vpop.f32.mrf.mxu0 }
 0x8a3   : > { %v4416_v13 = vpack.c.bf16 %v4385_v14, %v4384_v57  ;;  %5493 = vrcp.f32 %v4115_v54 }
 0x8a5   : > { %4981 = vmatmul.msk.bf16.vlgmr.msrb.gmra.mxu3 %vm1468_vm0, %v4416_v13 }
 0x8a8   : > { %v5492_v59 = vpop.eup %5491 }
 0x8a9   : > { %v3367_v18 = vpop.xlane.xlu1 %3366  ;;  %v4386_v32 = vmul.f32 %v5492_v59, %v4213_v29  ;;  %v5494_v45 = vpop.eup %5493 }
 0x8aa   : > { %v4387_v27 = vmul.f32 %v5494_v45, %v4215_v28 }
 0x8ac   : > { %v4417_v34 = vpack.c.bf16 %v4387_v27, %v4386_v32  ;;  %v4133_v51 = vpop.xlane.xlu2 %4132 }
 0x8b1   : > { %v4118_v12 = vpop.xlane.xlu1 %4117 }
 0x8b2   : > { %5495 = vrcp.f32 %v4118_v12 }
 0x8b3   : > { %5497 = vrcp.f32 %v3364_v15 }
 0x8b4   : > { %v4136_v45 = vpop.xlane.xlu2 %4135 }
 0x8b5   : > { %4982 = vmatmul.msk.bf16.gmra.mxu3 %vm1468_vm0, %v4417_v34 }
 0x8b8   : > { %v3361_v52 = vpop.xlane.xlu0 %3360  ;;  %v5496_v1 = vpop.eup %5495 }
 0x8b9   : > { %5499 = vrcp.f32 %v3361_v52  ;;  %v3373_v16 = vpop.xlane.xlu1 %3372  ;;  %v5498_v42 = vpop.eup %5497  ;;  %v4388_v38 = vmul.f32 %v5496_v1, %v4238_v6 }
 0x8ba   : > { %5501 = vrcp.f32 %v4121_v30  ;;  %v3636_v3 = vmul.f32 %v5498_v42, %v7987_v48 }
 0x8bb   : > { %5503 = vrcp.f32 %v3367_v18 }
 0x8bf   : > { %v5500_v60 = vpop.eup %5499 }
 0x8c0   : > { %v5502_v22 = vpop.eup %5501  ;;  %v3635_v50 = vmul.f32 %v5500_v60, %v7981_v17  ;;  %v4127_v7 = vpop.xlane.xlu0 %4126 }
 0x8c1   : > { %v4389_v0 = vmul.f32 %v5502_v22, %v4240_v19  ;;  %v4124_v35 = vpop.xlane.xlu1 %4123  ;;  %5505 = vrcp.f32 %v4127_v7  ;;  %v5504_v2 = vpop.eup %5503 }
 0x8c2   : > { %v3666_v56 = vpack.c.bf16 %v3636_v3, %v3635_v50  ;;  %5507 = vrcp.f32 %v4124_v35  ;;  %v3637_v37 = vmul.f32 %v5504_v2, %v3487_v58  ;;  %v3394_v7 = vpop.xlane.xlu2 %3393 }
 0x8c3   : > { %v4418_v4 = vpack.c.bf16 %v4389_v0, %v4388_v38  ;;  %5509 = vrcp.f32 %v3370_v44 }
 0x8c4   : > { %4950 = vmatmul.msk.bf16.gmra.mxu2 %vm1468_vm0, %v3666_v56  ;;  %5511 = vrcp.f32 %v3373_v16 }
 0x8c5   : > { %4983 = vmatmul.msk.bf16.gmra.mxu3 %vm1468_vm0, %v4418_v4  ;;  %5513 = vrcp.f32 %v3376_v10 }
 0x8c6   : > { %5515 = vrcp.f32 %v4133_v51 }
 0x8c7   : > { %v5506_v48 = vpop.eup %5505 }
 0x8c8   : > { %v5508_v23 = vpop.eup %5507  ;;  %v4391_v20 = vmul.f32 %v5506_v48, %v4265_v55  ;;  %v4130_v5 = vpop.xlane.xlu0 %4129 }
 0x8c9   : > { %v5510_v17 = vpop.eup %5509  ;;  %v4390_v40 = vmul.f32 %v5508_v23, %v4263_v8  ;;  %v3382_v9 = vpop.xlane.xlu1 %3381  ;;  %5517 = vrcp.f32 %v4130_v5 }
 0x8ca   : > { %v3638_v62 = vmul.f32 %v5510_v17, %v3489_v11  ;;  %v5512_v31 = vpop.eup %5511  ;;  %5519 = vrcp.f32 %v3382_v9  ;;  %v3562_v19 = vpop.f32.mrf.mxu2 }
 0x8cb   : > { %v4419_v25 = vpack.c.bf16 %v4391_v20, %v4390_v40  ;;  %v5514_v63 = vpop.eup %5513  ;;  %v3639_v14 = vmul.f32 %v5512_v31, %v8034_v49  ;;  %v3397_v8 = vpop.xlane.xlu2 %3396 }
 0x8cc   : > { %v3667_v15 = vpack.c.bf16 %v3638_v62, %v3637_v37  ;;  %v5516_v57 = vpop.eup %5515  ;;  %v3640_v13 = vmul.f32 %v5514_v63, %v8043_v43 }
 0x8ce   : > { %v3668_v44 = vpack.c.bf16 %v3640_v13, %v3639_v14 }
 0x8cf   : > { %v5518_v24 = vpop.eup %5517 }
 0x8d0   : > { %v5520_v49 = vpop.eup %5519  ;;  %v3388_v16 = vpop.xlane.xlu0 %3387 }
 0x8d1   : > { %v3385_v33 = vpop.xlane.xlu1 %3384  ;;  %v3642_v43 = vmul.f32 %v5520_v49, %v8006_v39 }
 0x8d2   : > { %v3564_v3 = vpop.f32.mrf.mxu2 }
 0x8d3   : > { %v4151_v9 = vpop.xlane.xlu2 %4150 }
 0x8d4   : > { %4951 = vmatmul.msk.bf16.gmra.mxu2 %vm1468_vm0, %v3667_v15 }
 0x8d5   : > { %4984 = vmatmul.msk.bf16.gmra.mxu3 %vm1468_vm0, %v4419_v25 }
 0x8d6   : > { %v4313_v32 = vpop.f32.mrf.mxu3 }
 0x8d7   : > { %v4288_v41 = vpop.f32.mrf.mxu1 }
 0x8d8   : > { %v4392_v29 = vmul.f32 %v5518_v24, %v4288_v41  ;;  %v3391_v0 = vpop.xlane.xlu0 %3390 }
 0x8d9   : > { %v4139_v28 = vpop.xlane.xlu1 %4138 }
 0x8da   : > { %5521 = vrcp.f32 %v4139_v28  ;;  %v8617_v28 = vld [vmem:[#allocation24_spill] sm:$0xff] }
 0x8db   : > { %5523 = vrcp.f32 %v3379_v53 }
 0x8dc   : > { %5525 = vrcp.f32 %v4136_v45 }
 0x8dd   : > { %5527 = vrcp.f32 %v3388_v16 }
 0x8de   : > { %v4315_v34 = vpop.f32.mrf.mxu3  ;;  %5529 = vrcp.f32 %v3385_v33 }
 0x8df   : > { %v4290_v54 = vpop.f32.mrf.mxu1  ;;  %5531 = vrcp.f32 %v3391_v0 }
 0x8e0   : > { %v4393_v18 = vmul.f32 %v5516_v57, %v4290_v54  ;;  %v5522_v27 = vpop.eup %5521  ;;  %5533 = vrcp.f32 %v3394_v7  ;;  %v8616_v54 = vld [vmem:[#allocation21_spill] sm:$0xff] }
 0x8e1   : > { %v5524_v12 = vpop.eup %5523  ;;  %v4395_v6 = vmul.f32 %v5522_v27, %v4315_v34  ;;  %v3012_v13 = vadd.f32 %v7979_v61, %v8616_v54  ;;  %v8631_v54 = vld [vmem:[#allocation42_spill] sm:$0xff] }
 0x8e2   : > { %v4420_v59 = vpack.c.bf16 %v4393_v18, %v4392_v29  ;;  %v5526_v30 = vpop.eup %5525  ;;  %v3641_v52 = vmul.f32 %v5524_v12, %v7999_v47  ;;  %v4142_v47 = vpop.xlane.xlu1 %4141 }
 0x8e3   : > { %v4394_v1 = vmul.f32 %v5526_v30, %v4313_v32  ;;  %v5528_v38 = vpop.eup %5527  ;;  %5535 = vrcp.f32 %v4142_v47  ;;  %v8618_v32 = vld [vmem:[#allocation32_spill] sm:$0xff]  ;;  %v8620_v30 = vld [vmem:[#allocation27_spill] sm:$0xff]  ;;  %v8623_v47 = vld [vmem:[#allocation29_spill] sm:$0xff] }
 0x8e4   : > { %4952 = vmatmul.msk.bf16.gmra.mxu2 %vm1468_vm0, %v3668_v44  ;;  %v3669_v42 = vpack.c.bf16 %v3642_v43, %v3641_v52  ;;  %v5530_v22 = vpop.eup %5529  ;;  %v3644_v39 = vmul.f32 %v5528_v38, %v3564_v3  ;;  %v3013_v45 = vadd.f32 %v8618_v32, %v8617_v28  ;;  %v8621_v38 = vld [vmem:[#allocation25_spill] sm:$0xff]  ;;  %v8633_v32 = vld [vmem:[#allocation43_spill] sm:$0xff] }
 0x8e5   : > { %4985 = vmatmul.msk.bf16.gmra.mxu3 %vm1468_vm0, %v4420_v59  ;;  %v4421_v60 = vpack.c.bf16 %v4395_v6, %v4394_v1  ;;  %v3643_v50 = vmul.f32 %v5530_v22, %v3562_v19  ;;  %v5532_v4 = vpop.eup %5531  ;;  %v8619_v6 = vld [vmem:[#allocation33_spill] sm:$0xff]  ;;  %v8622_v22 = vld [vmem:[#allocation50_spill] sm:$0xff] }
 0x8e6   : > { %v5534_v58 = vpop.eup %5533  ;;  %v3645_v2 = vmul.f32 %v5532_v4, %v8049_v46  ;;  %v3014_v52 = vadd.f32 %v8620_v30, %v8619_v6  ;;  %v3015_v3 = vadd.f32 %v8622_v22, %v8621_v38  ;;  %v8636_v6 = vld [vmem:[#allocation56_spill] sm:$0xff]  ;;  %v8638_v38 = vld [vmem:[#allocation57_spill] sm:$0xff] }
 0x8e7   : > { %v3670_v56 = vpack.c.bf16 %v3644_v39, %v3643_v50  ;;  %v3646_v23 = vmul.f32 %v5534_v58, %v8059_v21 }
 0x8e9   : > { %v5536_v48 = vpop.eup %5535  ;;  %v3671_v20 = vpack.c.bf16 %v3646_v23, %v3645_v2  ;;  %v8626_v23 = vld [vmem:[#allocation52_spill] sm:$0xff] }
 0x8ea   : > { %v3400_v55 = vpop.xlane.xlu1 %3399 }
 0x8f4   : > { %4953 = vmatmul.msk.bf16.gmra.mxu2 %vm1468_vm0, %v3669_v42 }
 0x8f5   : > { %4986 = vmatmul.msk.bf16.gmra.mxu3 %vm1468_vm0, %v4421_v60 }
 0x8fa   : > { %v4145_v10 = vpop.xlane.xlu0 %4144 }
 0x8fb   : > { %5537 = vrcp.f32 %v4145_v10  ;;  %v8624_v10 = vld [vmem:[#allocation51_spill] sm:$0xff] }
 0x8fc   : > { %5539 = vrcp.f32 %v3400_v55 }
 0x8fd   : > { %5541 = vrcp.f32 %v3397_v8 }
 0x8fe   : > { %5543 = vrcp.f32 %v4151_v9  ;;  %v8628_v9 = vld [vmem:[#allocation38_spill] sm:$0xff] }
 0x901   : > { %v5538_v17 = vpop.eup %5537 }
 0x902   : > { %v5540_v46 = vpop.eup %5539 }
 0x903   : > { %v5542_v21 = vpop.eup %5541  ;;  %v3648_v25 = vmul.f32 %v5540_v46, %v8019_v36  ;;  %v8325_v36 = vld [vmem:[%s8435_s8] ss:$0 sm:$0xff] }
 0x904   : > { %4954 = vmatmul.msk.bf16.gmra.mxu2 %vm1468_vm0, %v3670_v56  ;;  %v5544_v51 = vpop.eup %5543  ;;  %v3647_v41 = vmul.f32 %v5542_v21, %v8012_v26 }
 0x906   : > { %v3672_v14 = vpack.c.bf16 %v3648_v25, %v3647_v41  ;;  %v8630_v41 = vld [vmem:[#allocation53_spill] sm:$0xff] }
 0x909   : > { %v4338_v35 = vpop.f32.mrf.mxu0  ;;  %v4148_v62 = vpop.xlane.xlu0 %4147 }
 0x90a   : > { %v4396_v37 = vmul.f32 %v5536_v48, %v4338_v35  ;;  %5545 = vrcp.f32 %v4148_v62  ;;  %v3016_v35 = vadd.f32 %v8624_v10, %v8623_v47  ;;  %v8625_v48 = vld [vmem:[#allocation26_spill] sm:$0xff] }
 0x90b   : > { %v8640_v47 = vld [vmem:[#allocation58_spill] sm:$0xff] }
 0x910   : > { %v5546_v5 = vpop.eup %5545 }
 0x911   : > { %v4340_v53 = vpop.f32.mrf.mxu0 }
 0x912   : > { %v4397_v11 = vmul.f32 %v5538_v17, %v4340_v53  ;;  %v3017_v17 = vadd.f32 %v8626_v23, %v8625_v48  ;;  %v8641_v48 = vld [vmem:[#allocation47_spill] sm:$0xff] }
 0x913   : > { %v8642_v23 = vld [vmem:[#allocation59_spill] sm:$0xff] }
 0x914   : > { %v4422_v40 = vpack.c.bf16 %v4397_v11, %v4396_v37  ;;  %4955 = vmatmul.msk.bf16.gmra.mxu2 %vm1468_vm0, %v3671_v20 }
 0x916   : > { %4987 = vmatmul.msk.bf16.gmra.mxu3 %vm1468_vm0, %v4422_v40  ;;  %v8627_v40 = vld [vmem:[#allocation30_spill] sm:$0xff] }
 0x917   : > { %v3018_v62 = vadd.f32 %v8628_v9, %v8627_v40  ;;  %v8643_v40 = vld [vmem:[#allocation48_spill] sm:$0xff] }
 0x918   : > { %v4363_v15 = vpop.f32.mrf.mxu1  ;;  %v8644_v9 = vld [vmem:[#allocation60_spill] sm:$0xff] }
 0x919   : > { %v4398_v31 = vmul.f32 %v5546_v5, %v4363_v15  ;;  %v8629_v5 = vld [vmem:[#allocation22_spill] sm:$0xff] }
 0x920   : > { %v4365_v33 = vpop.f32.mrf.mxu1  ;;  %v3723_v57 = vpop.f32.mrf.mxu2 }
 0x921   : > { %v4399_v63 = vmul.f32 %v5544_v51, %v4365_v33  ;;  %v3763_v29 = vadd.f32 %v3723_v57, %v3012_v13  ;;  %v3019_v33 = vadd.f32 %v8630_v41, %v8629_v5  ;;  %v8632_v13 = vld [vmem:[#allocation54_spill] sm:$0xff]  ;;  %v8645_v5 = vld [vmem:[#allocation49_spill] sm:$0xff]  ;;  %v8646_v41 = vld [vmem:[#allocation28_spill] sm:$0xff] }
 0x923   : > { %v4423_v24 = vpack.c.bf16 %v4399_v63, %v4398_v31 }
 0x924   : > { %4956 = vmatmul.msk.bf16.gmra.mxu2 %vm1468_vm0, %v3672_v14 }
 0x926   : > { %4988 = vmatmul.msk.bf16.gmra.mxu3 %vm1468_vm0, %v4423_v24 }
 0x928   : > { %v4474_v26 = vpop.f32.mrf.mxu3  ;;  %v3725_v44 = vpop.f32.mrf.mxu2 }
 0x929   : > { %v4514_v18 = vadd.f32 %v4474_v26, %v3763_v29  ;;  %v3764_v61 = vadd.f32 %v3725_v44, %v3013_v45  ;;  %v3020_v29 = vadd.f32 %v8632_v13, %v8631_v54  ;;  %v8634_v45 = vld [vmem:[#allocation55_spill] sm:$0xff] }
 0x92b   : > { %v4566_v59 = vadd.f32 %v8325_v36, %v4514_v18 }
 0x92d   : > { %4582 = vst [vmem:[%s8332_s20] sm:$0xff] %v4566_v59 }
 0x930   : > { %v4476_v49 = vpop.f32.mrf.mxu3 }
 0x931   : > { %v4515_v27 = vadd.f32 %v4476_v49, %v3764_v61  ;;  %v3021_v61 = vadd.f32 %v8634_v45, %v8633_v32 }
 0x933   : > { %v4567_v12 = vadd.f32 %v8325_v36, %v4515_v27 }
 0x935   : > { %4583 = vst [vmem:[%s8332_s20 + $0x8] sm:$0xff] %v4567_v12 }
 0x938   : > { %v4479_v43 = vpop.f32.mrf.mxu3 }
 0x940   : > { %v4481_v34 = vpop.f32.mrf.mxu3 }
 0x947   : > { %v3728_v16 = vpop.f32.mrf.mxu2 }
 0x948   : > { %v3765_v1 = vadd.f32 %v3728_v16, %v3014_v52  ;;  %v4484_v19 = vpop.f32.mrf.mxu3 }
 0x94a   : > { %v4516_v42 = vadd.f32 %v4479_v43, %v3765_v1 }
 0x94c   : > { %v4568_v60 = vadd.f32 %v8325_v36, %v4516_v42 }
 0x94e   : > { %4584 = vst [vmem:[%s8332_s20 + $0x10] sm:$0xff] %v4568_v60  ;;  %v8637_v60 = vld [vmem:[#allocation45_spill] sm:$0xff] }
 0x94f   : > { %v3730_v39 = vpop.f32.mrf.mxu2  ;;  %v3023_v22 = vadd.f32 %v8638_v38, %v8637_v60 }
 0x950   : > { %v3766_v50 = vadd.f32 %v3730_v39, %v3015_v3  ;;  %v4486_v56 = vpop.f32.mrf.mxu3 }
 0x952   : > { %v4517_v0 = vadd.f32 %v4481_v34, %v3766_v50  ;;  %v8635_v34 = vld [vmem:[#allocation44_spill] sm:$0xff] }
 0x953   : > { %v3022_v30 = vadd.f32 %v8636_v6, %v8635_v34 }
 0x954   : > { %v4569_v7 = vadd.f32 %v8325_v36, %v4517_v0 }
 0x956   : > { %4585 = vst [vmem:[%s8332_s20 + $0x18] sm:$0xff] %v4569_v7 }
 0x957   : > { %v3733_v4 = vpop.f32.mrf.mxu2 }
 0x958   : > { %v3767_v8 = vadd.f32 %v3733_v4, %v3016_v35  ;;  %v4489_v53 = vpop.f32.mrf.mxu3 }
 0x95a   : > { %v4518_v58 = vadd.f32 %v4484_v19, %v3767_v8 }
 0x95c   : > { %v4570_v2 = vadd.f32 %v8325_v36, %v4518_v58 }
 0x95e   : > { %4586 = vst [vmem:[%s8332_s20 + $0x20] sm:$0xff] %v4570_v2 }
 0x95f   : > { %v3735_v55 = vpop.f32.mrf.mxu2 }
 0x960   : > { %v3768_v37 = vadd.f32 %v3735_v55, %v3017_v17  ;;  %v4491_v21 = vpop.f32.mrf.mxu3  ;;  %v3025_v17 = vadd.f32 %v8642_v23, %v8641_v48 }
 0x962   : > { %v4519_v11 = vadd.f32 %v4486_v56, %v3768_v37  ;;  %v8639_v56 = vld [vmem:[#allocation46_spill] sm:$0xff] }
 0x963   : > { %v3024_v10 = vadd.f32 %v8640_v47, %v8639_v56 }
 0x964   : > { %v4571_v20 = vadd.f32 %v8325_v36, %v4519_v11 }
 0x966   : > { %4587 = vst [vmem:[%s8332_s20 + $0x28] sm:$0xff] %v4571_v20 }
 0x967   : > { %v3738_v15 = vpop.f32.mrf.mxu2 }
 0x968   : > { %v3769_v46 = vadd.f32 %v3738_v15, %v3018_v62  ;;  %v4494_v14 = vpop.f32.mrf.mxu3  ;;  %v3026_v62 = vadd.f32 %v8644_v9, %v8643_v40 }
 0x96a   : > { %v4520_v25 = vadd.f32 %v4489_v53, %v3769_v46 }
 0x96c   : > { %v4572_v51 = vadd.f32 %v8325_v36, %v4520_v25 }
 0x96e   : > { %4588 = vst [vmem:[%s8332_s20 + $0x30] sm:$0xff] %v4572_v51 }
 0x96f   : > { %v3740_v31 = vpop.f32.mrf.mxu2 }
 0x970   : > { %v3770_v63 = vadd.f32 %v3740_v31, %v3019_v33  ;;  %v4496_v28 = vpop.f32.mrf.mxu3  ;;  %v3027_v33 = vadd.f32 %v8646_v41, %v8645_v5 }
 0x972   : > { %v4521_v57 = vadd.f32 %v4491_v21, %v3770_v63 }
 0x974   : > { %v4573_v24 = vadd.f32 %v8325_v36, %v4521_v57 }
 0x976   : > { %4589 = vst [vmem:[%s8332_s20 + $0x38] sm:$0xff] %v4573_v24 }
 0x977   : > { %v3743_v26 = vpop.f32.mrf.mxu2 }
 0x978   : > { %v3771_v18 = vadd.f32 %v3743_v26, %v3020_v29  ;;  %v4499_v52 = vpop.f32.mrf.mxu3 }
 0x97a   : > { %v4522_v59 = vadd.f32 %v4494_v14, %v3771_v18 }
 0x97c   : > { %v4574_v44 = vadd.f32 %v8325_v36, %v4522_v59 }
 0x97e   : > { %4590 = vst [vmem:[%s8332_s20 + $0x40] sm:$0xff] %v4574_v44 }
 0x97f   : > { %v3745_v49 = vpop.f32.mrf.mxu2 }
 0x980   : > { %v3772_v27 = vadd.f32 %v3745_v49, %v3021_v61  ;;  %v4501_v50 = vpop.f32.mrf.mxu3 }
 0x982   : > { %v4523_v12 = vadd.f32 %v4496_v28, %v3772_v27 }
 0x984   : > { %v4575_v43 = vadd.f32 %v8325_v36, %v4523_v12 }
 0x986   : > { %4591 = vst [vmem:[%s8332_s20 + $0x48] sm:$0xff] %v4575_v43 }
 0x987   : > { %v3748_v16 = vpop.f32.mrf.mxu2 }
 0x988   : > { %v3773_v1 = vadd.f32 %v3748_v16, %v3022_v30 }
 0x98a   : > { %v4524_v42 = vadd.f32 %v4499_v52, %v3773_v1 }
 0x98c   : > { %v4576_v19 = vadd.f32 %v8325_v36, %v4524_v42 }
 0x98e   : > { %4592 = vst [vmem:[%s8332_s20 + $0x50] sm:$0xff] %v4576_v19 }
 0x98f   : > { %v3750_v3 = vpop.f32.mrf.mxu2 }
 0x990   : > { %v3774_v39 = vadd.f32 %v3750_v3, %v3023_v22 }
 0x992   : > { %v4525_v0 = vadd.f32 %v4501_v50, %v3774_v39 }
 0x994   : > { %v4577_v7 = vadd.f32 %v8325_v36, %v4525_v0 }
 0x996   : > { %4593 = vst [vmem:[%s8332_s20 + $0x58] sm:$0xff] %v4577_v7 }
 0x997   : > { %v3753_v35 = vpop.f32.mrf.mxu2 }
 0x998   : > { %v3775_v4 = vadd.f32 %v3753_v35, %v3024_v10 }
 0x999   : > { %v4504_v8 = vpop.f32.mrf.mxu3 }
 0x99a   : > { %v4526_v58 = vadd.f32 %v4504_v8, %v3775_v4 }
 0x99c   : > { %v4578_v2 = vadd.f32 %v8325_v36, %v4526_v58 }
 0x99e   : > { %4594 = vst [vmem:[%s8332_s20 + $0x60] sm:$0xff] %v4578_v2 }
 0x99f   : > { %v3755_v53 = vpop.f32.mrf.mxu2 }
 0x9a0   : > { %v3776_v55 = vadd.f32 %v3755_v53, %v3025_v17 }
 0x9a1   : > { %v4506_v37 = vpop.f32.mrf.mxu3 }
 0x9a2   : > { %v4527_v11 = vadd.f32 %v4506_v37, %v3776_v55 }
 0x9a4   : > { %v4579_v20 = vadd.f32 %v8325_v36, %v4527_v11 }
 0x9a6   : > { %4595 = vst [vmem:[%s8332_s20 + $0x68] sm:$0xff] %v4579_v20 }
 0x9a7   : > { %v3758_v15 = vpop.f32.mrf.mxu2 }
 0x9a8   : > { %v3777_v46 = vadd.f32 %v3758_v15, %v3026_v62 }
 0x9a9   : > { %v4509_v21 = vpop.f32.mrf.mxu3 }
 0x9aa   : > { %v4528_v25 = vadd.f32 %v4509_v21, %v3777_v46 }
 0x9ac   : > { %v4580_v51 = vadd.f32 %v8325_v36, %v4528_v25 }
 0x9ae   : > { %4596 = vst [vmem:[%s8332_s20 + $0x70] sm:$0xff] %v4580_v51 }
 0x9af   : > { %v3760_v31 = vpop.f32.mrf.mxu2 }
 0x9b0   : > { %v3778_v63 = vadd.f32 %v3760_v31, %v3027_v33 }
 0x9b1   : > { %v4511_v57 = vpop.f32.mrf.mxu3 }
 0x9b2   : > { %v4529_v14 = vadd.f32 %v4511_v57, %v3778_v63 }
 0x9b4   : > { %v4581_v24 = vadd.f32 %v8325_v36, %v4529_v14 }
 0x9b6   : > { %4597 = vst [vmem:[%s8332_s20 + $0x78] sm:$0xff] %v4581_v24 }
 0x9b7   : > { %5786 = shalt.err (!%p5783_p9)
}
 0x9b8   : > { %s5854_s1 = smov 128   ;;  %s5855_s15 = smov 8  }
 0x9b9   : > { %5133 = dma.vmem_to_hbm [thread:$0]  (%p6006_p4), %s4612_s21, 2048, %s4614_s2, %s4599_s16, %s5854_s1, %s5854_s1, %s5855_s15  }
 0x9ba PF: > { %s4628_s20 = sand.u32 1, %s5825_s30   ;;  %p8647_p10 = scmp.ge.s32.totalorder %s5837_s12, 2 }
 0x9bb   : > { %s4629_s19 = scalar_lea.sflag [#allocation5], %s4628_s20 }
 0x9bc   : > { %p5159_p13 = pnand %p8647_p10, %p6010_p6 }
 0x9be   : > { %p5160_p11 = pneg %p5159_p13 }
 0x9c0   : > { %5820 = dma.done.wait (%p5160_p11), %s4629_s19, 2048  }
 0x9c1   : > { %5822 = vsyncadd (%p5160_p11), %s4629_s19, 4294965248  ;;  %p25_p0 = scmp.ge.s32.totalorder %s5980_s27, 4   ;;  %s8648_s30 = smov %s5829_s10 }
 0x9c2   : > { %s8649_s10 = smov %s5833_s11  ;;  %s8650_s11 = smov %s5991_s14 }
 0x9c3   : > { %s8651_s12 = smov %s5980_s27  ;;  %27 = sbr.rel (!%p25_p0) target bundleno = 13 (0xd), region = 131 }
 0x9c8   :  { %4635 = vsyncpa [#allocation4], 1 }
 0x9c9   :  { %4637 = vsyncpa [#allocation4 + $0x1], 1 }
 0x9ca   :  { %4638 = vsyncpa [#allocation7], 1 }
 0x9cb   :  { %4639 = vsyncpa [#allocation10], 1 }
 0x9cc   :  { %4640 = vsyncpa [#allocation13], 1 }
 0x9cd   :  { %4641 = vsyncpa [#allocation5], 1 }
 0x9ce   :  { %4643 = vsyncpa [#allocation5 + $0x1], 1 }

</bundles_post_ra>
